<compile_context>
chip_gen: v5e
topology: v5e:2x2
jax: 0.10.0
libtpu: 0.0.40
codegen_flags: <defaults>
</compile_context>

<pallas_src>
import functools

import numpy as np
import jax
import jax.numpy as jnp
from jax.experimental import pallas as pl
from jax.experimental.pallas import tpu as pltpu

KSIZE = 5          # ConvTranspose2d kernel size
C1, C2 = 16, 6     # channel counts of t_conv1 input / t_conv2 input


def _derived_sizes(input_size):
    up2 = input_size - 4        # spatial size fed to t_conv2 (2nd upsample target)
    up1 = up2 // 2 - 4          # spatial size fed to t_conv1 (1st upsample target)
    fc3 = up1 // 2              # spatial size of the fc3 feature map
    return up2, up1, fc3


# --------------------------------------------------------------------------
# fused kernel: MLP -> stage1 (upsample+t_conv1+relu) -> stage2 (+classifier)
# --------------------------------------------------------------------------
def _decoder_kernel(x_ref, w1_ref, b1_ref, w2_ref, b2_ref, w3_ref, b3_ref,
                    c1_ref, c2_ref, m2c_ref, bc_ref,
                    m1_hbm, m2_hbm,
                    img_ref, logits_ref,
                    m1_vmem, m2_vmem, sem):
    f32 = jnp.float32

    # Kick off DMAs of the big stage matrices so they overlap the MLP compute.
    cp1 = pltpu.make_async_copy(m1_hbm, m1_vmem, sem.at[0])
    cp2 = pltpu.make_async_copy(m2_hbm, m2_vmem, sem.at[1])
    cp1.start()
    cp2.start()

    # ---- fused MLP:  relu(fc1) -> relu(fc2) -> fc3 ---------------------------
    h = jnp.dot(x_ref[...], w1_ref[...], preferred_element_type=f32) + b1_ref[...]
    h = jnp.maximum(h, 0.0)
    h = jnp.dot(h, w2_ref[...], preferred_element_type=f32) + b2_ref[...]
    h = jnp.maximum(h, 0.0)
    h3 = jnp.dot(h, w3_ref[...], preferred_element_type=f32) + b3_ref[...]   # (B, 256)

    # ---- stage 1: upsample + zero-pad + t_conv1 + relu, as one dense matmul --
    cp1.wait()
    a1 = jnp.dot(h3, m1_vmem[...], preferred_element_type=f32) + c1_ref[...]  # (B, 864)
    a1 = jnp.maximum(a1, 0.0)

    # ---- classifier fused into stage 2 (small, overlaps the image matmul) ----
    logits_ref[...] = (jnp.dot(a1, m2c_ref[...], preferred_element_type=f32)
                       + bc_ref[...])

    # ---- stage 2: upsample + zero-pad + t_conv2, as one dense matmul ---------
    cp2.wait()
    img_ref[...] = (jnp.dot(a1, m2_vmem[...], preferred_element_type=f32)
                    + c2_ref[...])                                            # (B, 784)


# --------------------------------------------------------------------------
# wrapper
# --------------------------------------------------------------------------
def decoder_forward(params, x, *, input_size, num_labels):
    B = x.shape[0]
    P = input_size * input_size

    vmem = lambda: pl.BlockSpec(memory_space=pltpu.MemorySpace.VMEM)
    hbm = lambda: pl.BlockSpec(memory_space=pl.ANY)

    operands = (x,
                params["w1"], params["b1"], params["w2"], params["b2"],
                params["w3"], params["b3"],
                params["c1"], params["c2"], params["m2c"], params["bc"],
                params["m1"], params["m2"])

    img_flat, logits = pl.pallas_call(
        _decoder_kernel,
        out_shape=(jax.ShapeDtypeStruct((B, P), jnp.float32),
                   jax.ShapeDtypeStruct((B, num_labels), jnp.float32)),
        in_specs=[vmem() for _ in range(11)] + [hbm(), hbm()],
        out_specs=(vmem(), vmem()),
        scratch_shapes=[
            pltpu.VMEM(params["m1"].shape, jnp.float32),   # ~0.9 MB
            pltpu.VMEM(params["m2"].shape, jnp.float32),   # ~2.7 MB
            pltpu.SemaphoreType.DMA((2,)),
        ],
    )(*operands)

    # layout-only wrapper reshape to NCHW (no junk columns to strip anymore)
    img = img_flat.reshape(B, 1, input_size, input_size)
    return img, logits


# --------------------------------------------------------------------------
# parameters (torch-default init)
# --------------------------------------------------------------------------
def init_raw_params(key, input_size, num_labels):
    up2, up1, fc3 = _derived_sizes(input_size)
    keys = jax.random.split(key, 12)

    def linear(kw, kb, fan_in, fan_out):
        bound = 1.0 / (fan_in ** 0.5)
        w = jax.random.uniform(kw, (fan_in, fan_out), jnp.float32, -bound, bound)
        b = jax.random.uniform(kb, (1, fan_out), jnp.float32, -bound, bound)
        return w, b

    def tconv(kw, kb, ic, oc):
        # PyTorch ConvTranspose2d default: fan_in = weight.size(1)*K*K = oc*K*K
        bound = 1.0 / ((oc * KSIZE * KSIZE) ** 0.5)
        w = jax.random.uniform(kw, (ic, oc, KSIZE, KSIZE), jnp.float32, -bound, bound)
        b = jax.random.uniform(kb, (oc,), jnp.float32, -bound, bound)
        return w, b

    w1, b1 = linear(keys[0], keys[1], 150, 250)
    w2, b2 = linear(keys[2], keys[3], 250, 300)
    w3, b3 = linear(keys[4], keys[5], 300, C1 * fc3 * fc3)
    wt1, bt1 = tconv(keys[6], keys[7], C1, C2)
    wt2, bt2 = tconv(keys[8], keys[9], C2, 1)
    wcls, bcls = linear(keys[10], keys[11], input_size ** 2, num_labels)

    return dict(w1=w1, b1=b1, w2=w2, b2=b2, w3=w3, b3=b3,
                wt1=wt1, bt1=bt1, wt2=wt2, bt2=bt2, wcls=wcls, bcls=bcls)


# --------------------------------------------------------------------------
# one-time folding: (upsample + pad + transposed conv [+ classifier]) -> dense
# stage matrices.  Done in numpy f32 on host, batch-independent.
# --------------------------------------------------------------------------
def build_kernel_params(raw, input_size, num_labels):
    up2, up1, fc3 = _derived_sizes(input_size)
    oh1 = up1 + KSIZE - 1          # t_conv1 output spatial size (12)
    oh2 = up2 + KSIZE - 1          # t_conv2 output spatial size (== input_size)

    def up2x(x):                   # (N,C,H,W) -> (N,C,2H,2W) nearest
        return x.repeat(2, axis=2).repeat(2, axis=3)

    def tconv_np(x, w):            # ConvTranspose2d, stride 1, pad 0, no bias
        N, IC, H, W = x.shape
        _, OC, K, _ = w.shape
        out = np.zeros((N, OC, H + K - 1, W + K - 1), np.float32)
        for ky in range(K):
            for kx in range(K):
                out[:, :, ky:ky + H, kx:kx + W] += np.einsum(
                    "nihw,io->nohw", x, w[:, :, ky, kx])
        return out

    wt1 = np.asarray(raw["wt1"], np.float32)
    bt1 = np.asarray(raw["bt1"], np.float32)
    wt2 = np.asarray(raw["wt2"], np.float32)
    bt2 = np.asarray(raw["bt2"], np.float32)
    wcls = np.asarray(raw["wcls"], np.float32)
    bcls = np.asarray(raw["bcls"], np.float32)

    # Stage 1: fc3 output (C1*fc3*fc3) -> pre-relu t_conv1 output (C2*oh1*oh1)
    n1 = C1 * fc3 * fc3
    eye1 = np.eye(n1, dtype=np.float32).reshape(n1, C1, fc3, fc3)
    m1 = tconv_np(up2x(eye1), wt1).reshape(n1, C2 * oh1 * oh1)
    c1 = np.broadcast_to(bt1[:, None, None], (C2, oh1, oh1)).reshape(1, -1).copy()

    # Stage 2: t_conv1 activations (C2*oh1*oh1) -> image pixels (oh2*oh2)
    n2 = C2 * oh1 * oh1
    eye2 = np.eye(n2, dtype=np.float32).reshape(n2, C2, oh1, oh1)
    m2 = tconv_np(up2x(eye2), wt2).reshape(n2, oh2 * oh2)
    c2 = np.broadcast_to(bt2[:, None, None], (1, oh2, oh2)).reshape(1, -1).copy()

    # Classifier fused into stage 2:  logits = a1 @ (m2 @ wcls) + (c2 @ wcls + bcls)
    m2c = (m2 @ wcls).astype(np.float32)
    bc = (c2 @ wcls + bcls).astype(np.float32)

    return dict(w1=raw["w1"], b1=raw["b1"], w2=raw["w2"], b2=raw["b2"],
                w3=raw["w3"], b3=raw["b3"],
                m1=jnp.asarray(m1), c1=jnp.asarray(c1),
                m2=jnp.asarray(m2), c2=jnp.asarray(c2),
                m2c=jnp.asarray(m2c), bc=jnp.asarray(bc))


# --------------------------------------------------------------------------
# pure-JAX reference (mirrors the PyTorch module) for a self-check
# --------------------------------------------------------------------------
def _conv_transpose_nchw(x, w, b):
    # x: (B, IC, H, W); w: torch layout (IC, OC, K, K); stride=1, padding=0
    B, IC, H, W = x.shape
    _, OC, K, _ = w.shape
    OH, OW = H + K - 1, W + K - 1
    xp = jnp.pad(x, ((0, 0), (0, 0), (K - 1, K - 1), (K - 1, K - 1)))
    wf = w[:, :, ::-1, ::-1]
    out = jnp.zeros((B, OC, OH, OW), jnp.float32) + b.reshape(1, OC, 1, 1)
    for ki in range(K):
        for kj in range(K):
            patch = xp[:, :, ki:ki + OH, kj:kj + OW]
            out = out + jnp.einsum('bihw,io->bohw', patch, wf[:, :, ki, kj])
    return out


def reference_forward(raw, x, input_size):
    up2, up1, fc3 = _derived_sizes(input_size)
    h = jax.nn.relu(x @ raw["w1"] + raw["b1"][0])
    h = jax.nn.relu(h @ raw["w2"] + raw["b2"][0])
    h = h @ raw["w3"] + raw["b3"][0]
    h = h.reshape(-1, C1, fc3, fc3)
    h = jnp.repeat(jnp.repeat(h, 2, axis=2), 2, axis=3)        # nearest 2x
    h = jax.nn.relu(_conv_transpose_nchw(h, raw["wt1"], raw["bt1"]))
    h = jnp.repeat(jnp.repeat(h, 2, axis=2), 2, axis=3)        # nearest 2x
    img = _conv_transpose_nchw(h, raw["wt2"], raw["bt2"])
    logits = img.reshape(img.shape[0], -1) @ raw["wcls"] + raw["bcls"][0]
    return img, logits


# --------------------------------------------------------------------------
if __name__ == "__main__":
    input_size = 28      # -> upsample2=24, upsample1=8, fc3_input=4
    num_labels = 10
    batch = 2

    key = jax.random.PRNGKey(0)
    kp, kx = jax.random.split(key)
    raw = init_raw_params(kp, input_size, num_labels)
    params = build_kernel_params(raw, input_size, num_labels)
    x = jax.random.normal(kx, (batch, 150), jnp.float32)

    fwd = jax.jit(functools.partial(decoder_forward,
                                    input_size=input_size,
                                    num_labels=num_labels))
    img, logits = fwd(params, x)
    jax.block_until_ready((img, logits))

    assert img.shape == (batch, 1, input_size, input_size), img.shape
    assert logits.shape == (batch, num_labels), logits.shape
    assert img.dtype == jnp.float32 and logits.dtype == jnp.float32

    # self-check against a pure-JAX reference of the original module
    img_ref, logits_ref = jax.jit(
        functools.partial(reference_forward, input_size=input_size))(raw, x)
    jax.block_until_ready((img_ref, logits_ref))
    assert bool(jnp.allclose(img, img_ref, rtol=1e-2, atol=1e-2)), "image mismatch"
    assert bool(jnp.allclose(logits, logits_ref, rtol=1e-2, atol=1e-2)), "logits mismatch"

    print("KERNEL_OK")
</pallas_src>

<mosaic_0001>
module attributes {stable_mosaic.version = 11 : i64} {
  func.func @_decoder_kernel(%arg0: memref<2x150xf32, #tpu.memory_space<vmem>>, %arg1: memref<150x250xf32, #tpu.memory_space<vmem>>, %arg2: memref<1x250xf32, #tpu.memory_space<vmem>>, %arg3: memref<250x300xf32, #tpu.memory_space<vmem>>, %arg4: memref<1x300xf32, #tpu.memory_space<vmem>>, %arg5: memref<300x256xf32, #tpu.memory_space<vmem>>, %arg6: memref<1x256xf32, #tpu.memory_space<vmem>>, %arg7: memref<1x864xf32, #tpu.memory_space<vmem>>, %arg8: memref<1x784xf32, #tpu.memory_space<vmem>>, %arg9: memref<864x10xf32, #tpu.memory_space<vmem>>, %arg10: memref<1x10xf32, #tpu.memory_space<vmem>>, %arg11: memref<256x864xf32, #tpu.memory_space<any>>, %arg12: memref<864x784xf32, #tpu.memory_space<any>>, %arg13: memref<2x784xf32, #tpu.memory_space<vmem>>, %arg14: memref<2x10xf32, #tpu.memory_space<vmem>>, %arg15: memref<256x864xf32, #tpu.memory_space<vmem>>, %arg16: memref<864x784xf32, #tpu.memory_space<vmem>>, %arg17: memref<2x!tpu.dma_semaphore, #tpu.memory_space<semaphore_mem>>) attributes {dimension_semantics = [], scalar_prefetch = 0 : i64, scratch_operands = 3 : i64, tpu.core_type = #tpu.core_type<tc>} {
    %c0_i32 = arith.constant 0 : i32
    %0 = tpu.memref_slice %arg17[%c0_i32] : memref<2x!tpu.dma_semaphore, #tpu.memory_space<semaphore_mem>> -> memref<1x!tpu.dma_semaphore, #tpu.memory_space<semaphore_mem>>
    %1 = tpu.memref_squeeze %0 : memref<1x!tpu.dma_semaphore, #tpu.memory_space<semaphore_mem>> -> memref<!tpu.dma_semaphore, #tpu.memory_space<semaphore_mem>>
    tpu.enqueue_dma source(%arg11 : memref<256x864xf32, #tpu.memory_space<any>>) target(%arg15 : memref<256x864xf32, #tpu.memory_space<vmem>>) target_semaphore(%1 : memref<!tpu.dma_semaphore, #tpu.memory_space<semaphore_mem>>)
    %c1_i32 = arith.constant 1 : i32
    %2 = tpu.memref_slice %arg17[%c1_i32] : memref<2x!tpu.dma_semaphore, #tpu.memory_space<semaphore_mem>> -> memref<1x!tpu.dma_semaphore, #tpu.memory_space<semaphore_mem>>
    %3 = tpu.memref_squeeze %2 : memref<1x!tpu.dma_semaphore, #tpu.memory_space<semaphore_mem>> -> memref<!tpu.dma_semaphore, #tpu.memory_space<semaphore_mem>>
    tpu.enqueue_dma source(%arg12 : memref<864x784xf32, #tpu.memory_space<any>>) target(%arg16 : memref<864x784xf32, #tpu.memory_space<vmem>>) target_semaphore(%3 : memref<!tpu.dma_semaphore, #tpu.memory_space<semaphore_mem>>)
    %c0 = arith.constant 0 : index
    %c0_0 = arith.constant 0 : index
    %4 = vector.load %arg0[%c0, %c0_0] : memref<2x150xf32, #tpu.memory_space<vmem>>, vector<2x150xf32>
    %c0_1 = arith.constant 0 : index
    %c0_2 = arith.constant 0 : index
    %5 = vector.load %arg1[%c0_1, %c0_2] : memref<150x250xf32, #tpu.memory_space<vmem>>, vector<150x250xf32>
    %cst = arith.constant dense<0.000000e+00> : vector<2x250xf32>
    %6 = tpu.matmul %4, %5, %cst {dimension_numbers = #tpu.dot_dimension_numbers<[1], [0], [0], [1], [0, 0, 1, 1], [], []>} : vector<2x150xf32>, vector<150x250xf32>, vector<2x250xf32> -> vector<2x250xf32>
    %c0_3 = arith.constant 0 : index
    %c0_4 = arith.constant 0 : index
    %7 = vector.load %arg2[%c0_3, %c0_4] : memref<1x250xf32, #tpu.memory_space<vmem>>, vector<1x250xf32>
    %8 = vector.broadcast %7 : vector<1x250xf32> to vector<2x250xf32>
    %9 = arith.addf %6, %8 : vector<2x250xf32>
    %cst_5 = arith.constant 0.000000e+00 : f32
    %10 = vector.broadcast %cst_5 : f32 to vector<2x250xf32>
    %11 = arith.maximumf %9, %10 : vector<2x250xf32>
    %c0_6 = arith.constant 0 : index
    %c0_7 = arith.constant 0 : index
    %12 = vector.load %arg3[%c0_6, %c0_7] : memref<250x300xf32, #tpu.memory_space<vmem>>, vector<250x300xf32>
    %cst_8 = arith.constant dense<0.000000e+00> : vector<2x300xf32>
    %13 = tpu.matmul %11, %12, %cst_8 {dimension_numbers = #tpu.dot_dimension_numbers<[1], [0], [0], [1], [0, 0, 1, 1], [], []>} : vector<2x250xf32>, vector<250x300xf32>, vector<2x300xf32> -> vector<2x300xf32>
    %c0_9 = arith.constant 0 : index
    %c0_10 = arith.constant 0 : index
    %14 = vector.load %arg4[%c0_9, %c0_10] : memref<1x300xf32, #tpu.memory_space<vmem>>, vector<1x300xf32>
    %15 = vector.broadcast %14 : vector<1x300xf32> to vector<2x300xf32>
    %16 = arith.addf %13, %15 : vector<2x300xf32>
    %cst_11 = arith.constant 0.000000e+00 : f32
    %17 = vector.broadcast %cst_11 : f32 to vector<2x300xf32>
    %18 = arith.maximumf %16, %17 : vector<2x300xf32>
    %c0_12 = arith.constant 0 : index
    %c0_13 = arith.constant 0 : index
    %19 = vector.load %arg5[%c0_12, %c0_13] : memref<300x256xf32, #tpu.memory_space<vmem>>, vector<300x256xf32>
    %cst_14 = arith.constant dense<0.000000e+00> : vector<2x256xf32>
    %20 = tpu.matmul %18, %19, %cst_14 {dimension_numbers = #tpu.dot_dimension_numbers<[1], [0], [0], [1], [0, 0, 1, 1], [], []>} : vector<2x300xf32>, vector<300x256xf32>, vector<2x256xf32> -> vector<2x256xf32>
    %c0_15 = arith.constant 0 : index
    %c0_16 = arith.constant 0 : index
    %21 = vector.load %arg6[%c0_15, %c0_16] : memref<1x256xf32, #tpu.memory_space<vmem>>, vector<1x256xf32>
    %22 = vector.broadcast %21 : vector<1x256xf32> to vector<2x256xf32>
    %23 = arith.addf %20, %22 : vector<2x256xf32>
    %c0_i32_17 = arith.constant 0 : i32
    %24 = tpu.memref_slice %arg17[%c0_i32_17] : memref<2x!tpu.dma_semaphore, #tpu.memory_space<semaphore_mem>> -> memref<1x!tpu.dma_semaphore, #tpu.memory_space<semaphore_mem>>
    %25 = tpu.memref_squeeze %24 : memref<1x!tpu.dma_semaphore, #tpu.memory_space<semaphore_mem>> -> memref<!tpu.dma_semaphore, #tpu.memory_space<semaphore_mem>>
    tpu.wait_dma2 semaphore(%25 : memref<!tpu.dma_semaphore, #tpu.memory_space<semaphore_mem>>) src(%arg11 : memref<256x864xf32, #tpu.memory_space<any>>) dst(%arg15 : memref<256x864xf32, #tpu.memory_space<vmem>>)
    %c0_18 = arith.constant 0 : index
    %c0_19 = arith.constant 0 : index
    %26 = vector.load %arg15[%c0_18, %c0_19] : memref<256x864xf32, #tpu.memory_space<vmem>>, vector<256x864xf32>
    %cst_20 = arith.constant dense<0.000000e+00> : vector<2x864xf32>
    %27 = tpu.matmul %23, %26, %cst_20 {dimension_numbers = #tpu.dot_dimension_numbers<[1], [0], [0], [1], [0, 0, 1, 1], [], []>} : vector<2x256xf32>, vector<256x864xf32>, vector<2x864xf32> -> vector<2x864xf32>
    %c0_21 = arith.constant 0 : index
    %c0_22 = arith.constant 0 : index
    %28 = vector.load %arg7[%c0_21, %c0_22] : memref<1x864xf32, #tpu.memory_space<vmem>>, vector<1x864xf32>
    %29 = vector.broadcast %28 : vector<1x864xf32> to vector<2x864xf32>
    %30 = arith.addf %27, %29 : vector<2x864xf32>
    %cst_23 = arith.constant 0.000000e+00 : f32
    %31 = vector.broadcast %cst_23 : f32 to vector<2x864xf32>
    %32 = arith.maximumf %30, %31 : vector<2x864xf32>
    %c0_24 = arith.constant 0 : index
    %c0_25 = arith.constant 0 : index
    %33 = vector.load %arg9[%c0_24, %c0_25] : memref<864x10xf32, #tpu.memory_space<vmem>>, vector<864x10xf32>
    %cst_26 = arith.constant dense<0.000000e+00> : vector<2x10xf32>
    %34 = tpu.matmul %32, %33, %cst_26 {dimension_numbers = #tpu.dot_dimension_numbers<[1], [0], [0], [1], [0, 0, 1, 1], [], []>} : vector<2x864xf32>, vector<864x10xf32>, vector<2x10xf32> -> vector<2x10xf32>
    %c0_27 = arith.constant 0 : index
    %c0_28 = arith.constant 0 : index
    %35 = vector.load %arg10[%c0_27, %c0_28] : memref<1x10xf32, #tpu.memory_space<vmem>>, vector<1x10xf32>
    %36 = vector.broadcast %35 : vector<1x10xf32> to vector<2x10xf32>
    %37 = arith.addf %34, %36 : vector<2x10xf32>
    %c0_29 = arith.constant 0 : index
    %c0_30 = arith.constant 0 : index
    %38 = vector.load %arg14[%c0_29, %c0_30] : memref<2x10xf32, #tpu.memory_space<vmem>>, vector<2x10xf32>
    tpu.vector_store %arg14[%c0_29, %c0_30], %37 {strides = array<i32>} : memref<2x10xf32, #tpu.memory_space<vmem>>, vector<2x10xf32>,
    %c1_i32_31 = arith.constant 1 : i32
    %39 = tpu.memref_slice %arg17[%c1_i32_31] : memref<2x!tpu.dma_semaphore, #tpu.memory_space<semaphore_mem>> -> memref<1x!tpu.dma_semaphore, #tpu.memory_space<semaphore_mem>>
    %40 = tpu.memref_squeeze %39 : memref<1x!tpu.dma_semaphore, #tpu.memory_space<semaphore_mem>> -> memref<!tpu.dma_semaphore, #tpu.memory_space<semaphore_mem>>
    tpu.wait_dma2 semaphore(%40 : memref<!tpu.dma_semaphore, #tpu.memory_space<semaphore_mem>>) src(%arg12 : memref<864x784xf32, #tpu.memory_space<any>>) dst(%arg16 : memref<864x784xf32, #tpu.memory_space<vmem>>)
    %c0_32 = arith.constant 0 : index
    %c0_33 = arith.constant 0 : index
    %41 = vector.load %arg16[%c0_32, %c0_33] : memref<864x784xf32, #tpu.memory_space<vmem>>, vector<864x784xf32>
    %cst_34 = arith.constant dense<0.000000e+00> : vector<2x784xf32>
    %42 = tpu.matmul %32, %41, %cst_34 {dimension_numbers = #tpu.dot_dimension_numbers<[1], [0], [0], [1], [0, 0, 1, 1], [], []>} : vector<2x864xf32>, vector<864x784xf32>, vector<2x784xf32> -> vector<2x784xf32>
    %c0_35 = arith.constant 0 : index
    %c0_36 = arith.constant 0 : index
    %43 = vector.load %arg8[%c0_35, %c0_36] : memref<1x784xf32, #tpu.memory_space<vmem>>, vector<1x784xf32>
    %44 = vector.broadcast %43 : vector<1x784xf32> to vector<2x784xf32>
    %45 = arith.addf %42, %44 : vector<2x784xf32>
    %c0_37 = arith.constant 0 : index
    %c0_38 = arith.constant 0 : index
    %46 = vector.load %arg13[%c0_37, %c0_38] : memref<2x784xf32, #tpu.memory_space<vmem>>, vector<2x784xf32>
    tpu.vector_store %arg13[%c0_37, %c0_38], %45 {strides = array<i32>} : memref<2x784xf32, #tpu.memory_space<vmem>>, vector<2x784xf32>,
    return
  }
}

</mosaic_0001>

<bundles_post_ra>
// kernel: decoder_forward.1
= control target key start
LH: loop header
LB: loop body
LE: loop exit
PB: predicated region body
PF: predicated region fallthrough
CT: control target
= control target key end

     0   :  { %20 = vsyncpa [#allocation6], 0  ;;  %s12403_s0 = inlined_call_operand.vmem [shape: f32[2,150], index: 0, kind: input, shape index: {}]   ;;  %s12404_s1 = inlined_call_operand.vmem [shape: f32[150,250], index: 1, kind: input, shape index: {}]   ;;  %s12405_s2 = inlined_call_operand.vmem [shape: f32[1,250], index: 2, kind: input, shape index: {}]   ;;  %s12406_s3 = inlined_call_operand.vmem [shape: f32[250,300], index: 3, kind: input, shape index: {}]   ;;  %s12407_s4 = inlined_call_operand.vmem [shape: f32[1,300], index: 4, kind: input, shape index: {}]   ;;  %s12408_s5 = inlined_call_operand.vmem [shape: f32[300,256], index: 5, kind: input, shape index: {}]   ;;  %s12409_s6 = inlined_call_operand.vmem [shape: f32[1,256], index: 6, kind: input, shape index: {}]   ;;  %s12410_s7 = inlined_call_operand.vmem [shape: f32[1,864], index: 7, kind: input, shape index: {}]   ;;  %s12411_s8 = inlined_call_operand.vmem [shape: f32[1,784], index: 8, kind: input, shape index: {}]   ;;  %s12412_s9 = inlined_call_operand.vmem [shape: f32[864,10], index: 9, kind: input, shape index: {}]   ;;  %s12413_s10 = inlined_call_operand.vmem [shape: f32[1,10], index: 10, kind: input, shape index: {}]   ;;  %s12414_s11 = inlined_call_operand.vmem [shape: f32[256,864], index: 11, kind: input, shape index: {}]   ;;  %s12415_s12 = inlined_call_operand.vmem [shape: f32[864,784], index: 12, kind: input, shape index: {}]   ;;  %s12416_s13 = inlined_call_operand.vmem [shape: f32[2,784], index: 13, kind: output, shape index: {0}]   ;;  %s12417_s14 = inlined_call_operand.hbm [shape: f32[2,10], index: 14, kind: output, shape index: {1}]  }
   0x1   :  { %v5379_v0 = vld [vmem:[%s12414_s11] sm:$0xff]  ;;  %v5384_v1 = vld [vmem:[%s12414_s11 + $0x8] sm:$0xff]  ;;  %v5389_v2 = vld [vmem:[%s12414_s11 + $0x10] sm:$0xff] }
   0x2   :  { %12418 = vst [vmem:[#allocation12_spill] sm:$0xff] %v5379_v0  ;;  %v5394_v3 = vld [vmem:[%s12414_s11 + $0x18] sm:$0xff]  ;;  %v5399_v4 = vld [vmem:[%s12414_s11 + $0x20] sm:$0xff]  ;;  %v5404_v5 = vld [vmem:[%s12414_s11 + $0x28] sm:$0xff] }
   0x3   :  { %12419 = vst [vmem:[#allocation13_spill] sm:$0xff] %v5384_v1  ;;  %v5409_v6 = vld [vmem:[%s12414_s11 + $0x30] sm:$0xff]  ;;  %v5414_v7 = vld [vmem:[%s12414_s11 + $0x38] sm:$0xff]  ;;  %v5419_v8 = vld [vmem:[%s12414_s11 + $0x40] sm:$0xff] }
   0x4   :  { %12420 = vst [vmem:[#allocation14_spill] sm:$0xff] %v5389_v2  ;;  %v5424_v9 = vld [vmem:[%s12414_s11 + $0x48] sm:$0xff]  ;;  %v5429_v10 = vld [vmem:[%s12414_s11 + $0x50] sm:$0xff]  ;;  %v5434_v11 = vld [vmem:[%s12414_s11 + $0x58] sm:$0xff] }
   0x5   :  { %12421 = vst [vmem:[#allocation15_spill] sm:$0xff] %v5394_v3  ;;  %v5439_v12 = vld [vmem:[%s12414_s11 + $0x60] sm:$0xff]  ;;  %v5444_v13 = vld [vmem:[%s12414_s11 + $0x68] sm:$0xff]  ;;  %v5449_v14 = vld [vmem:[%s12414_s11 + $0x70] sm:$0xff] }
   0x6   :  { %12422 = vst [vmem:[#allocation16_spill] sm:$0xff] %v5399_v4  ;;  %v5454_v15 = vld [vmem:[%s12414_s11 + $0x78] sm:$0xff]  ;;  %v5459_v16 = vld [vmem:[%s12414_s11 + $0x80] sm:$0xff]  ;;  %v5464_v17 = vld [vmem:[%s12414_s11 + $0x88] sm:$0xff] }
   0x7   :  { %12423 = vst [vmem:[#allocation17_spill] sm:$0xff] %v5404_v5  ;;  %v5469_v18 = vld [vmem:[%s12414_s11 + $0x90] sm:$0xff]  ;;  %v5474_v19 = vld [vmem:[%s12414_s11 + $0x98] sm:$0xff]  ;;  %v5479_v20 = vld [vmem:[%s12414_s11 + $0xa0] sm:$0xff] }
   0x8   :  { %12424 = vst [vmem:[#allocation18_spill] sm:$0xff] %v5409_v6  ;;  %v5484_v21 = vld [vmem:[%s12414_s11 + $0xa8] sm:$0xff]  ;;  %v5489_v22 = vld [vmem:[%s12414_s11 + $0xb0] sm:$0xff]  ;;  %v5494_v23 = vld [vmem:[%s12414_s11 + $0xb8] sm:$0xff] }
   0x9   :  { %12425 = vst [vmem:[#allocation19_spill] sm:$0xff] %v5414_v7  ;;  %v5499_v24 = vld [vmem:[%s12414_s11 + $0xc0] sm:$0xff]  ;;  %v5504_v25 = vld [vmem:[%s12414_s11 + $0xc8] sm:$0xff]  ;;  %v5509_v26 = vld [vmem:[%s12414_s11 + $0xd0] sm:$0xff] }
   0xa   :  { %12426 = vst [vmem:[#allocation20_spill] sm:$0xff] %v5419_v8  ;;  %v5514_v27 = vld [vmem:[%s12414_s11 + $0xd8] sm:$0xff]  ;;  %v5519_v28 = vld [vmem:[%s12414_s11 + $0xe0] sm:$0xff]  ;;  %v5524_v29 = vld [vmem:[%s12414_s11 + $0xe8] sm:$0xff] }
   0xb   :  { %12427 = vst [vmem:[#allocation21_spill] sm:$0xff] %v5424_v9  ;;  %v5529_v30 = vld [vmem:[%s12414_s11 + $0xf0] sm:$0xff]  ;;  %v5534_v31 = vld [vmem:[%s12414_s11 + $0xf8] sm:$0xff]  ;;  %v5539_v32 = vld [vmem:[%s12414_s11 + $0x100] sm:$0xff] }
   0xc   :  { %12428 = vst [vmem:[#allocation22_spill] sm:$0xff] %v5429_v10  ;;  %v5544_v33 = vld [vmem:[%s12414_s11 + $0x108] sm:$0xff]  ;;  %v5549_v34 = vld [vmem:[%s12414_s11 + $0x110] sm:$0xff]  ;;  %v5554_v35 = vld [vmem:[%s12414_s11 + $0x118] sm:$0xff] }
   0xd   :  { %12429 = vst [vmem:[#allocation23_spill] sm:$0xff] %v5434_v11  ;;  %v5559_v36 = vld [vmem:[%s12414_s11 + $0x120] sm:$0xff]  ;;  %v5564_v37 = vld [vmem:[%s12414_s11 + $0x128] sm:$0xff]  ;;  %v5569_v38 = vld [vmem:[%s12414_s11 + $0x130] sm:$0xff] }
   0xe   :  { %12430 = vst [vmem:[#allocation24_spill] sm:$0xff] %v5439_v12  ;;  %v5574_v39 = vld [vmem:[%s12414_s11 + $0x138] sm:$0xff]  ;;  %v5579_v40 = vld [vmem:[%s12414_s11 + $0x140] sm:$0xff]  ;;  %v5584_v41 = vld [vmem:[%s12414_s11 + $0x148] sm:$0xff] }
   0xf   :  { %12431 = vst [vmem:[#allocation25_spill] sm:$0xff] %v5444_v13  ;;  %v5589_v42 = vld [vmem:[%s12414_s11 + $0x150] sm:$0xff]  ;;  %v5594_v43 = vld [vmem:[%s12414_s11 + $0x158] sm:$0xff]  ;;  %v5599_v44 = vld [vmem:[%s12414_s11 + $0x160] sm:$0xff] }
  0x10   :  { %12432 = vst [vmem:[#allocation26_spill] sm:$0xff] %v5449_v14  ;;  %v5604_v45 = vld [vmem:[%s12414_s11 + $0x168] sm:$0xff]  ;;  %v5609_v46 = vld [vmem:[%s12414_s11 + $0x170] sm:$0xff]  ;;  %v5614_v47 = vld [vmem:[%s12414_s11 + $0x178] sm:$0xff] }
  0x11   :  { %12433 = vst [vmem:[#allocation27_spill] sm:$0xff] %v5454_v15  ;;  %v5619_v48 = vld [vmem:[%s12414_s11 + $0x180] sm:$0xff]  ;;  %v5624_v49 = vld [vmem:[%s12414_s11 + $0x188] sm:$0xff]  ;;  %v5629_v50 = vld [vmem:[%s12414_s11 + $0x190] sm:$0xff] }
  0x12   :  { %12434 = vst [vmem:[#allocation28_spill] sm:$0xff] %v5459_v16  ;;  %v5634_v51 = vld [vmem:[%s12414_s11 + $0x198] sm:$0xff]  ;;  %v5639_v52 = vld [vmem:[%s12414_s11 + $0x1a0] sm:$0xff]  ;;  %v5644_v53 = vld [vmem:[%s12414_s11 + $0x1a8] sm:$0xff] }
  0x13   :  { %12435 = vst [vmem:[#allocation29_spill] sm:$0xff] %v5464_v17  ;;  %v5649_v54 = vld [vmem:[%s12414_s11 + $0x1b0] sm:$0xff]  ;;  %v5654_v55 = vld [vmem:[%s12414_s11 + $0x1b8] sm:$0xff]  ;;  %v5659_v56 = vld [vmem:[%s12414_s11 + $0x1c0] sm:$0xff] }
  0x14   :  { %12436 = vst [vmem:[#allocation30_spill] sm:$0xff] %v5469_v18  ;;  %v5664_v57 = vld [vmem:[%s12414_s11 + $0x1c8] sm:$0xff]  ;;  %v5669_v58 = vld [vmem:[%s12414_s11 + $0x1d0] sm:$0xff]  ;;  %v5674_v59 = vld [vmem:[%s12414_s11 + $0x1d8] sm:$0xff] }
  0x15   :  { %12437 = vst [vmem:[#allocation31_spill] sm:$0xff] %v5474_v19  ;;  %v5679_v60 = vld [vmem:[%s12414_s11 + $0x1e0] sm:$0xff]  ;;  %v5684_v61 = vld [vmem:[%s12414_s11 + $0x1e8] sm:$0xff]  ;;  %v5689_v62 = vld [vmem:[%s12414_s11 + $0x1f0] sm:$0xff] }
  0x16   :  { %12438 = vst [vmem:[#allocation32_spill] sm:$0xff] %v5479_v20  ;;  %v5694_v63 = vld [vmem:[%s12414_s11 + $0x1f8] sm:$0xff]  ;;  %v5699_v6 = vld [vmem:[%s12414_s11 + $0x200] sm:$0xff]  ;;  %v5704_v13 = vld [vmem:[%s12414_s11 + $0x208] sm:$0xff] }
  0x17   :  { %12439 = vst [vmem:[#allocation33_spill] sm:$0xff] %v5484_v21  ;;  %v5709_v20 = vld [vmem:[%s12414_s11 + $0x210] sm:$0xff]  ;;  %v5744_v5 = vld [vmem:[%s12414_s11 + $0x248] sm:$0xff]  ;;  %v5754_v12 = vld [vmem:[%s12414_s11 + $0x258] sm:$0xff] }
  0x18   :  { %12440 = vst [vmem:[#allocation34_spill] sm:$0xff] %v5489_v22  ;;  %v5759_v19 = vld [vmem:[%s12414_s11 + $0x260] sm:$0xff]  ;;  %v5774_v4 = vld [vmem:[%s12414_s11 + $0x278] sm:$0xff]  ;;  %v5789_v11 = vld [vmem:[%s12414_s11 + $0x290] sm:$0xff] }
  0x19   :  { %12441 = vst [vmem:[#allocation35_spill] sm:$0xff] %v5494_v23  ;;  %v5799_v18 = vld [vmem:[%s12414_s11 + $0x2a0] sm:$0xff]  ;;  %v5904_v3 = vld [vmem:[%s12414_s11 + $0x348] sm:$0xff]  ;;  %v5914_v10 = vld [vmem:[%s12414_s11 + $0x358] sm:$0xff] }
  0x1a   :  { %12442 = vst [vmem:[#allocation36_spill] sm:$0xff] %v5499_v24  ;;  %v5934_v17 = vld [vmem:[%s12414_s11 + $0x378] sm:$0xff]  ;;  %v5939_v2 = vld [vmem:[%s12414_s11 + $0x380] sm:$0xff]  ;;  %v5944_v24 = vld [vmem:[%s12414_s11 + $0x388] sm:$0xff] }
  0x1b   :  { %12443 = vst [vmem:[#allocation37_spill] sm:$0xff] %v5504_v25  ;;  %v5809_v25 = vld [vmem:[%s12414_s11 + $0x2b0] sm:$0xff]  ;;  %v5964_v9 = vld [vmem:[%s12414_s11 + $0x3a8] sm:$0xff] }
  0x1c   :  { %12444 = vst [vmem:[#allocation38_spill] sm:$0xff] %v5509_v26  ;;  %v5764_v26 = vld [vmem:[%s12414_s11 + $0x268] sm:$0xff]  ;;  %v5969_v16 = vld [vmem:[%s12414_s11 + $0x3b0] sm:$0xff] }
  0x1d   :  { %12445 = vst [vmem:[#allocation39_spill] sm:$0xff] %v5514_v27  ;;  %v5714_v27 = vld [vmem:[%s12414_s11 + $0x218] sm:$0xff]  ;;  %v6004_v23 = vld [vmem:[%s12414_s11 + $0x3e8] sm:$0xff]  ;;  %v6489_v0 = vld [vmem:[%s12414_s11 + $0x6f0] sm:$0xff] }
  0x1e   :  { %12446 = vst [vmem:[#allocation40_spill] sm:$0xff] %v5529_v30  ;;  %v6039_v30 = vld [vmem:[%s12414_s11 + $0x420] sm:$0xff]  ;;  %v6424_v1 = vld [vmem:[%s12414_s11 + $0x688] sm:$0xff] }
  0x1f   :  { %12447 = vst [vmem:[#allocation41_spill] sm:$0xff] %v5534_v31  ;;  %v5999_v31 = vld [vmem:[%s12414_s11 + $0x3e0] sm:$0xff] }
  0x20   :  { %12448 = vst [vmem:[#allocation42_spill] sm:$0xff] %v5539_v32  ;;  %v5824_v32 = vld [vmem:[%s12414_s11 + $0x2c8] sm:$0xff] }
  0x21   :  { %12449 = vst [vmem:[#allocation43_spill] sm:$0xff] %v5544_v33  ;;  %v5769_v33 = vld [vmem:[%s12414_s11 + $0x270] sm:$0xff] }
  0x22   :  { %12450 = vst [vmem:[#allocation44_spill] sm:$0xff] %v5549_v34  ;;  %v5719_v34 = vld [vmem:[%s12414_s11 + $0x220] sm:$0xff] }
  0x23   :  { %12451 = vst [vmem:[#allocation45_spill] sm:$0xff] %v5564_v37  ;;  %v6074_v37 = vld [vmem:[%s12414_s11 + $0x458] sm:$0xff] }
  0x24   :  { %12452 = vst [vmem:[#allocation46_spill] sm:$0xff] %v5569_v38  ;;  %v6034_v38 = vld [vmem:[%s12414_s11 + $0x418] sm:$0xff] }
  0x25   :  { %12453 = vst [vmem:[#allocation47_spill] sm:$0xff] %v5574_v39  ;;  %v5834_v39 = vld [vmem:[%s12414_s11 + $0x2d8] sm:$0xff] }
  0x26   :  { %12454 = vst [vmem:[#allocation48_spill] sm:$0xff] %v5579_v40  ;;  %v5779_v40 = vld [vmem:[%s12414_s11 + $0x280] sm:$0xff] }
  0x27   :  { %12455 = vst [vmem:[#allocation49_spill] sm:$0xff] %v5584_v41  ;;  %v5724_v41 = vld [vmem:[%s12414_s11 + $0x228] sm:$0xff] }
  0x28   :  { %12456 = vst [vmem:[#allocation50_spill] sm:$0xff] %v5599_v44  ;;  %v6109_v44 = vld [vmem:[%s12414_s11 + $0x490] sm:$0xff] }
  0x29   :  { %12457 = vst [vmem:[#allocation51_spill] sm:$0xff] %v5604_v45  ;;  %v6069_v45 = vld [vmem:[%s12414_s11 + $0x450] sm:$0xff] }
  0x2a   :  { %12458 = vst [vmem:[#allocation52_spill] sm:$0xff] %v5609_v46  ;;  %v5844_v46 = vld [vmem:[%s12414_s11 + $0x2e8] sm:$0xff] }
  0x2b   :  { %12459 = vst [vmem:[#allocation53_spill] sm:$0xff] %v5614_v47  ;;  %v5794_v47 = vld [vmem:[%s12414_s11 + $0x298] sm:$0xff] }
  0x2c   :  { %12460 = vst [vmem:[#allocation54_spill] sm:$0xff] %v5619_v48  ;;  %v5729_v48 = vld [vmem:[%s12414_s11 + $0x230] sm:$0xff] }
  0x2d   :  { %12461 = vst [vmem:[#allocation55_spill] sm:$0xff] %v5634_v51  ;;  %v6144_v51 = vld [vmem:[%s12414_s11 + $0x4c8] sm:$0xff] }
  0x2e   :  { %12462 = vst [vmem:[#allocation56_spill] sm:$0xff] %v5639_v52  ;;  %v6104_v52 = vld [vmem:[%s12414_s11 + $0x488] sm:$0xff] }
  0x2f   :  { %12463 = vst [vmem:[#allocation57_spill] sm:$0xff] %v5644_v53  ;;  %v5859_v53 = vld [vmem:[%s12414_s11 + $0x300] sm:$0xff] }
  0x30   :  { %12464 = vst [vmem:[#allocation58_spill] sm:$0xff] %v5649_v54  ;;  %v5804_v54 = vld [vmem:[%s12414_s11 + $0x2a8] sm:$0xff] }
  0x31   :  { %12465 = vst [vmem:[#allocation59_spill] sm:$0xff] %v5654_v55  ;;  %v5734_v55 = vld [vmem:[%s12414_s11 + $0x238] sm:$0xff] }
  0x32   :  { %12466 = vst [vmem:[#allocation60_spill] sm:$0xff] %v5669_v58  ;;  %v6179_v58 = vld [vmem:[%s12414_s11 + $0x500] sm:$0xff] }
  0x33   :  { %12467 = vst [vmem:[#allocation61_spill] sm:$0xff] %v5674_v59  ;;  %v6139_v59 = vld [vmem:[%s12414_s11 + $0x4c0] sm:$0xff] }
  0x34   :  { %12468 = vst [vmem:[#allocation62_spill] sm:$0xff] %v5679_v60  ;;  %v5869_v60 = vld [vmem:[%s12414_s11 + $0x310] sm:$0xff] }
  0x35   :  { %12469 = vst [vmem:[#allocation63_spill] sm:$0xff] %v5684_v61  ;;  %v5814_v61 = vld [vmem:[%s12414_s11 + $0x2b8] sm:$0xff] }
  0x36   :  { %12470 = vst [vmem:[#allocation64_spill] sm:$0xff] %v5689_v62  ;;  %v5739_v62 = vld [vmem:[%s12414_s11 + $0x240] sm:$0xff] }
  0x37   :  { %12471 = vst [vmem:[#allocation65_spill] sm:$0xff] %v5704_v13  ;;  %v6214_v13 = vld [vmem:[%s12414_s11 + $0x538] sm:$0xff] }
  0x38   :  { %12472 = vst [vmem:[#allocation66_spill] sm:$0xff] %v5709_v20  ;;  %v6174_v20 = vld [vmem:[%s12414_s11 + $0x4f8] sm:$0xff] }
  0x39   :  { %12473 = vst [vmem:[#allocation67_spill] sm:$0xff] %v5714_v27  ;;  %v5874_v27 = vld [vmem:[%s12414_s11 + $0x318] sm:$0xff] }
  0x3a   :  { %12474 = vst [vmem:[#allocation68_spill] sm:$0xff] %v5719_v34  ;;  %v5829_v34 = vld [vmem:[%s12414_s11 + $0x2d0] sm:$0xff] }
  0x3b   :  { %12475 = vst [vmem:[#allocation69_spill] sm:$0xff] %v5724_v41  ;;  %v5749_v41 = vld [vmem:[%s12414_s11 + $0x250] sm:$0xff] }
  0x3c   :  { %12476 = vst [vmem:[#allocation70_spill] sm:$0xff] %v5739_v62  ;;  %v6249_v62 = vld [vmem:[%s12414_s11 + $0x570] sm:$0xff] }
  0x3d   :  { %12477 = vst [vmem:[#allocation71_spill] sm:$0xff] %v5744_v5  ;;  %v6209_v5 = vld [vmem:[%s12414_s11 + $0x530] sm:$0xff] }
  0x3e   :  { %12478 = vst [vmem:[#allocation72_spill] sm:$0xff] %v5749_v41  ;;  %v5879_v41 = vld [vmem:[%s12414_s11 + $0x320] sm:$0xff] }
  0x3f   :  { %12479 = vst [vmem:[#allocation73_spill] sm:$0xff] %v5754_v12  ;;  %v5839_v12 = vld [vmem:[%s12414_s11 + $0x2e0] sm:$0xff] }
  0x40   :  { %12480 = vst [vmem:[#allocation74_spill] sm:$0xff] %v5759_v19  ;;  %v5784_v19 = vld [vmem:[%s12414_s11 + $0x288] sm:$0xff] }
  0x41   :  { %12481 = vst [vmem:[#allocation75_spill] sm:$0xff] %v5774_v4  ;;  %v6284_v4 = vld [vmem:[%s12414_s11 + $0x5a8] sm:$0xff] }
  0x42   :  { %12482 = vst [vmem:[#allocation76_spill] sm:$0xff] %v5779_v40  ;;  %v6244_v40 = vld [vmem:[%s12414_s11 + $0x568] sm:$0xff] }
  0x43   :  { %12483 = vst [vmem:[#allocation77_spill] sm:$0xff] %v5784_v19  ;;  %v5894_v19 = vld [vmem:[%s12414_s11 + $0x338] sm:$0xff] }
  0x44   :  { %12484 = vst [vmem:[#allocation78_spill] sm:$0xff] %v5789_v11  ;;  %v5849_v11 = vld [vmem:[%s12414_s11 + $0x2f0] sm:$0xff] }
  0x45   :  { %12485 = vst [vmem:[#allocation79_spill] sm:$0xff] %v5794_v47  ;;  %v5819_v47 = vld [vmem:[%s12414_s11 + $0x2c0] sm:$0xff] }
  0x46   :  { %12486 = vst [vmem:[#allocation80_spill] sm:$0xff] %v5809_v25  ;;  %v6319_v25 = vld [vmem:[%s12414_s11 + $0x5e0] sm:$0xff] }
  0x47   :  { %12487 = vst [vmem:[#allocation81_spill] sm:$0xff] %v5814_v61  ;;  %v6279_v61 = vld [vmem:[%s12414_s11 + $0x5a0] sm:$0xff] }
  0x48   :  { %12488 = vst [vmem:[#allocation82_spill] sm:$0xff] %v5819_v47  ;;  %v5899_v47 = vld [vmem:[%s12414_s11 + $0x340] sm:$0xff] }
  0x49   :  { %12489 = vst [vmem:[#allocation83_spill] sm:$0xff] %v5824_v32  ;;  %v5864_v32 = vld [vmem:[%s12414_s11 + $0x308] sm:$0xff] }
  0x4a   :  { %12490 = vst [vmem:[#allocation84_spill] sm:$0xff] %v5829_v34  ;;  %v5854_v34 = vld [vmem:[%s12414_s11 + $0x2f8] sm:$0xff] }
  0x4b   :  { %12491 = vst [vmem:[#allocation85_spill] sm:$0xff] %v5844_v46  ;;  %v6354_v46 = vld [vmem:[%s12414_s11 + $0x618] sm:$0xff] }
  0x4c   :  { %12492 = vst [vmem:[#allocation86_spill] sm:$0xff] %v5849_v11  ;;  %v6314_v11 = vld [vmem:[%s12414_s11 + $0x5d8] sm:$0xff] }
  0x4d   :  { %12493 = vst [vmem:[#allocation87_spill] sm:$0xff] %v5854_v34  ;;  %v5909_v34 = vld [vmem:[%s12414_s11 + $0x350] sm:$0xff] }
  0x4e   :  { %12494 = vst [vmem:[#allocation88_spill] sm:$0xff] %v5859_v53  ;;  %v5884_v53 = vld [vmem:[%s12414_s11 + $0x328] sm:$0xff] }
  0x4f   :  { %12495 = vst [vmem:[#allocation89_spill] sm:$0xff] %v5864_v32  ;;  %v5889_v32 = vld [vmem:[%s12414_s11 + $0x330] sm:$0xff] }
  0x50   :  { %12496 = vst [vmem:[#allocation90_spill] sm:$0xff] %v5879_v41  ;;  %v6389_v41 = vld [vmem:[%s12414_s11 + $0x650] sm:$0xff] }
  0x51   :  { %12497 = vst [vmem:[#allocation91_spill] sm:$0xff] %v5884_v53  ;;  %v6349_v53 = vld [vmem:[%s12414_s11 + $0x610] sm:$0xff] }
  0x52   :  { %12498 = vst [vmem:[#allocation92_spill] sm:$0xff] %v5889_v32  ;;  %v5929_v32 = vld [vmem:[%s12414_s11 + $0x370] sm:$0xff] }
  0x53   :  { %12499 = vst [vmem:[#allocation93_spill] sm:$0xff] %v5894_v19  ;;  %v5919_v19 = vld [vmem:[%s12414_s11 + $0x360] sm:$0xff] }
  0x54   :  { %12500 = vst [vmem:[#allocation94_spill] sm:$0xff] %v5899_v47  ;;  %v5924_v47 = vld [vmem:[%s12414_s11 + $0x368] sm:$0xff] }
  0x55   :  { %12501 = vst [vmem:[#allocation95_spill] sm:$0xff] %v5914_v10  ;;  %v6454_v10 = vld [vmem:[%s12414_s11 + $0x6b8] sm:$0xff] }
  0x56   :  { %12502 = vst [vmem:[#allocation96_spill] sm:$0xff] %v5919_v19  ;;  %v6384_v19 = vld [vmem:[%s12414_s11 + $0x648] sm:$0xff] }
  0x57   :  { %12503 = vst [vmem:[#allocation97_spill] sm:$0xff] %v5924_v47  ;;  %v5949_v47 = vld [vmem:[%s12414_s11 + $0x390] sm:$0xff] }
  0x58   :  { %12504 = vst [vmem:[#allocation98_spill] sm:$0xff] %v5929_v32  ;;  %v5954_v32 = vld [vmem:[%s12414_s11 + $0x398] sm:$0xff] }
  0x59   :  { %12505 = vst [vmem:[#allocation99_spill] sm:$0xff] %v5934_v17  ;;  %v5959_v17 = vld [vmem:[%s12414_s11 + $0x3a0] sm:$0xff] }
  0x5a   :  { %12506 = vst [vmem:[#allocation100_spill] sm:$0xff] %v5939_v2  ;;  %v6459_v2 = vld [vmem:[%s12414_s11 + $0x6c0] sm:$0xff] }
  0x5b   :  { %12507 = vst [vmem:[#allocation101_spill] sm:$0xff] %v5944_v24  ;;  %v6419_v24 = vld [vmem:[%s12414_s11 + $0x680] sm:$0xff] }
  0x5c   :  { %12508 = vst [vmem:[#allocation102_spill] sm:$0xff] %v5949_v47  ;;  %v5974_v47 = vld [vmem:[%s12414_s11 + $0x3b8] sm:$0xff] }
  0x5d   :  { %12509 = vst [vmem:[#allocation103_spill] sm:$0xff] %v5954_v32  ;;  %v5979_v32 = vld [vmem:[%s12414_s11 + $0x3c0] sm:$0xff] }
  0x5e   :  { %12510 = vst [vmem:[#allocation104_spill] sm:$0xff] %v5959_v17  ;;  %v5984_v17 = vld [vmem:[%s12414_s11 + $0x3c8] sm:$0xff] }
  0x5f   :  { %12511 = vst [vmem:[#allocation105_spill] sm:$0xff] %v5964_v9  ;;  %v5989_v9 = vld [vmem:[%s12414_s11 + $0x3d0] sm:$0xff] }
  0x60   :  { %12512 = vst [vmem:[#allocation106_spill] sm:$0xff] %v5969_v16  ;;  %v5994_v16 = vld [vmem:[%s12414_s11 + $0x3d8] sm:$0xff] }
  0x61   :  { %12513 = vst [vmem:[#allocation107_spill] sm:$0xff] %v5974_v47 }
  0x62   :  { %12514 = vst [vmem:[#allocation108_spill] sm:$0xff] %v5979_v32  ;;  %v6494_v32 = vld [vmem:[%s12414_s11 + $0x6f8] sm:$0xff] }
  0x63   :  { %12515 = vst [vmem:[#allocation109_spill] sm:$0xff] %v5984_v17  ;;  %v6009_v17 = vld [vmem:[%s12414_s11 + $0x3f0] sm:$0xff] }
  0x64   :  { %12516 = vst [vmem:[#allocation110_spill] sm:$0xff] %v5989_v9  ;;  %v6014_v9 = vld [vmem:[%s12414_s11 + $0x3f8] sm:$0xff] }
  0x65   :  { %12517 = vst [vmem:[#allocation111_spill] sm:$0xff] %v5994_v16  ;;  %v6019_v16 = vld [vmem:[%s12414_s11 + $0x400] sm:$0xff] }
  0x66   :  { %12518 = vst [vmem:[#allocation112_spill] sm:$0xff] %v5999_v31  ;;  %v6024_v31 = vld [vmem:[%s12414_s11 + $0x408] sm:$0xff] }
  0x67   :  { %12519 = vst [vmem:[#allocation113_spill] sm:$0xff] %v6004_v23  ;;  %v6029_v23 = vld [vmem:[%s12414_s11 + $0x410] sm:$0xff] }
  0x68   :  { %12520 = vst [vmem:[#allocation114_spill] sm:$0xff] %v6009_v17 }
  0x69   :  { %12521 = vst [vmem:[#allocation115_spill] sm:$0xff] %v6014_v9 }
  0x6a   :  { %12522 = vst [vmem:[#allocation116_spill] sm:$0xff] %v6019_v16  ;;  %v6044_v16 = vld [vmem:[%s12414_s11 + $0x428] sm:$0xff] }
  0x6b   :  { %12523 = vst [vmem:[#allocation117_spill] sm:$0xff] %v6024_v31  ;;  %v6049_v31 = vld [vmem:[%s12414_s11 + $0x430] sm:$0xff] }
  0x6c   :  { %12524 = vst [vmem:[#allocation118_spill] sm:$0xff] %v6029_v23  ;;  %v6054_v23 = vld [vmem:[%s12414_s11 + $0x438] sm:$0xff] }
  0x6d   :  { %12525 = vst [vmem:[#allocation119_spill] sm:$0xff] %v6034_v38  ;;  %v6059_v38 = vld [vmem:[%s12414_s11 + $0x440] sm:$0xff] }
  0x6e   :  { %12526 = vst [vmem:[#allocation120_spill] sm:$0xff] %v6039_v30  ;;  %v6064_v30 = vld [vmem:[%s12414_s11 + $0x448] sm:$0xff] }
  0x6f   :  { %12527 = vst [vmem:[#allocation121_spill] sm:$0xff] %v6044_v16 }
  0x70   :  { %12528 = vst [vmem:[#allocation122_spill] sm:$0xff] %v6049_v31 }
  0x71   :  { %12529 = vst [vmem:[#allocation123_spill] sm:$0xff] %v6054_v23  ;;  %v6079_v23 = vld [vmem:[%s12414_s11 + $0x460] sm:$0xff] }
  0x72   :  { %12530 = vst [vmem:[#allocation124_spill] sm:$0xff] %v6059_v38  ;;  %v6084_v38 = vld [vmem:[%s12414_s11 + $0x468] sm:$0xff] }
  0x73   :  { %12531 = vst [vmem:[#allocation125_spill] sm:$0xff] %v6064_v30  ;;  %v6089_v30 = vld [vmem:[%s12414_s11 + $0x470] sm:$0xff] }
  0x74   :  { %12532 = vst [vmem:[#allocation126_spill] sm:$0xff] %v6069_v45  ;;  %v6094_v45 = vld [vmem:[%s12414_s11 + $0x478] sm:$0xff] }
  0x75   :  { %12533 = vst [vmem:[#allocation127_spill] sm:$0xff] %v6074_v37  ;;  %v6099_v37 = vld [vmem:[%s12414_s11 + $0x480] sm:$0xff] }
  0x76   :  { %12534 = vst [vmem:[#allocation128_spill] sm:$0xff] %v6089_v30  ;;  %v6114_v30 = vld [vmem:[%s12414_s11 + $0x498] sm:$0xff] }
  0x77   :  { %12535 = vst [vmem:[#allocation129_spill] sm:$0xff] %v6094_v45  ;;  %v6119_v45 = vld [vmem:[%s12414_s11 + $0x4a0] sm:$0xff] }
  0x78   :  { %12536 = vst [vmem:[#allocation130_spill] sm:$0xff] %v6099_v37  ;;  %v6124_v37 = vld [vmem:[%s12414_s11 + $0x4a8] sm:$0xff] }
  0x79   :  { %12537 = vst [vmem:[#allocation131_spill] sm:$0xff] %v6104_v52  ;;  %v6129_v52 = vld [vmem:[%s12414_s11 + $0x4b0] sm:$0xff] }
  0x7a   :  { %12538 = vst [vmem:[#allocation132_spill] sm:$0xff] %v6109_v44  ;;  %v6134_v44 = vld [vmem:[%s12414_s11 + $0x4b8] sm:$0xff] }
  0x7b   :  { %12539 = vst [vmem:[#allocation133_spill] sm:$0xff] %v6124_v37  ;;  %v6149_v37 = vld [vmem:[%s12414_s11 + $0x4d0] sm:$0xff] }
  0x7c   :  { %12540 = vst [vmem:[#allocation134_spill] sm:$0xff] %v6129_v52  ;;  %v6154_v52 = vld [vmem:[%s12414_s11 + $0x4d8] sm:$0xff] }
  0x7d   :  { %12541 = vst [vmem:[#allocation135_spill] sm:$0xff] %v6134_v44  ;;  %v6159_v44 = vld [vmem:[%s12414_s11 + $0x4e0] sm:$0xff] }
  0x7e   :  { %12542 = vst [vmem:[#allocation136_spill] sm:$0xff] %v6139_v59  ;;  %v6164_v59 = vld [vmem:[%s12414_s11 + $0x4e8] sm:$0xff] }
  0x7f   :  { %12543 = vst [vmem:[#allocation137_spill] sm:$0xff] %v6144_v51  ;;  %v6169_v51 = vld [vmem:[%s12414_s11 + $0x4f0] sm:$0xff] }
  0x80   :  { %12544 = vst [vmem:[#allocation138_spill] sm:$0xff] %v6159_v44  ;;  %v6184_v44 = vld [vmem:[%s12414_s11 + $0x508] sm:$0xff] }
  0x81   :  { %12545 = vst [vmem:[#allocation139_spill] sm:$0xff] %v6164_v59  ;;  %v6189_v59 = vld [vmem:[%s12414_s11 + $0x510] sm:$0xff] }
  0x82   :  { %12546 = vst [vmem:[#allocation140_spill] sm:$0xff] %v6169_v51  ;;  %v6194_v51 = vld [vmem:[%s12414_s11 + $0x518] sm:$0xff] }
  0x83   :  { %12547 = vst [vmem:[#allocation141_spill] sm:$0xff] %v6174_v20  ;;  %v6199_v20 = vld [vmem:[%s12414_s11 + $0x520] sm:$0xff] }
  0x84   :  { %12548 = vst [vmem:[#allocation142_spill] sm:$0xff] %v6179_v58  ;;  %v6204_v58 = vld [vmem:[%s12414_s11 + $0x528] sm:$0xff] }
  0x85   :  { %12549 = vst [vmem:[#allocation143_spill] sm:$0xff] %v6194_v51  ;;  %v6219_v51 = vld [vmem:[%s12414_s11 + $0x540] sm:$0xff] }
  0x86   :  { %12550 = vst [vmem:[#allocation144_spill] sm:$0xff] %v6199_v20  ;;  %v6224_v20 = vld [vmem:[%s12414_s11 + $0x548] sm:$0xff] }
  0x87   :  { %12551 = vst [vmem:[#allocation145_spill] sm:$0xff] %v6204_v58  ;;  %v6229_v58 = vld [vmem:[%s12414_s11 + $0x550] sm:$0xff] }
  0x88   :  { %12552 = vst [vmem:[#allocation146_spill] sm:$0xff] %v6209_v5  ;;  %v6234_v5 = vld [vmem:[%s12414_s11 + $0x558] sm:$0xff] }
  0x89   :  { %12553 = vst [vmem:[#allocation147_spill] sm:$0xff] %v6214_v13  ;;  %v6239_v13 = vld [vmem:[%s12414_s11 + $0x560] sm:$0xff] }
  0x8a   :  { %12554 = vst [vmem:[#allocation148_spill] sm:$0xff] %v6229_v58  ;;  %v6254_v58 = vld [vmem:[%s12414_s11 + $0x578] sm:$0xff] }
  0x8b   :  { %12555 = vst [vmem:[#allocation149_spill] sm:$0xff] %v6234_v5  ;;  %v6259_v5 = vld [vmem:[%s12414_s11 + $0x580] sm:$0xff] }
  0x8c   :  { %12556 = vst [vmem:[#allocation150_spill] sm:$0xff] %v6239_v13  ;;  %v6264_v13 = vld [vmem:[%s12414_s11 + $0x588] sm:$0xff] }
  0x8d   :  { %12557 = vst [vmem:[#allocation151_spill] sm:$0xff] %v6244_v40  ;;  %v6269_v40 = vld [vmem:[%s12414_s11 + $0x590] sm:$0xff] }
  0x8e   :  { %12558 = vst [vmem:[#allocation152_spill] sm:$0xff] %v6249_v62  ;;  %v6274_v62 = vld [vmem:[%s12414_s11 + $0x598] sm:$0xff] }
  0x8f   :  { %12559 = vst [vmem:[#allocation153_spill] sm:$0xff] %v6264_v13  ;;  %v6289_v13 = vld [vmem:[%s12414_s11 + $0x5b0] sm:$0xff] }
  0x90   :  { %12560 = vst [vmem:[#allocation154_spill] sm:$0xff] %v6269_v40  ;;  %v6294_v40 = vld [vmem:[%s12414_s11 + $0x5b8] sm:$0xff] }
  0x91   :  { %12561 = vst [vmem:[#allocation155_spill] sm:$0xff] %v6274_v62  ;;  %v6299_v62 = vld [vmem:[%s12414_s11 + $0x5c0] sm:$0xff] }
  0x92   :  { %12562 = vst [vmem:[#allocation156_spill] sm:$0xff] %v6279_v61  ;;  %v6304_v61 = vld [vmem:[%s12414_s11 + $0x5c8] sm:$0xff] }
  0x93   :  { %12563 = vst [vmem:[#allocation157_spill] sm:$0xff] %v6284_v4  ;;  %v6309_v4 = vld [vmem:[%s12414_s11 + $0x5d0] sm:$0xff] }
  0x94   :  { %12564 = vst [vmem:[#allocation158_spill] sm:$0xff] %v6299_v62  ;;  %v6324_v62 = vld [vmem:[%s12414_s11 + $0x5e8] sm:$0xff] }
  0x95   :  { %12565 = vst [vmem:[#allocation159_spill] sm:$0xff] %v6304_v61  ;;  %v6329_v61 = vld [vmem:[%s12414_s11 + $0x5f0] sm:$0xff] }
  0x96   :  { %12566 = vst [vmem:[#allocation160_spill] sm:$0xff] %v6309_v4  ;;  %v6334_v4 = vld [vmem:[%s12414_s11 + $0x5f8] sm:$0xff] }
  0x97   :  { %12567 = vst [vmem:[#allocation161_spill] sm:$0xff] %v6314_v11  ;;  %v6339_v11 = vld [vmem:[%s12414_s11 + $0x600] sm:$0xff] }
  0x98   :  { %12568 = vst [vmem:[#allocation162_spill] sm:$0xff] %v6319_v25  ;;  %v6344_v25 = vld [vmem:[%s12414_s11 + $0x608] sm:$0xff] }
  0x99   :  { %12569 = vst [vmem:[#allocation163_spill] sm:$0xff] %v6334_v4  ;;  %v6359_v4 = vld [vmem:[%s12414_s11 + $0x620] sm:$0xff] }
  0x9a   :  { %12570 = vst [vmem:[#allocation164_spill] sm:$0xff] %v6339_v11  ;;  %v6364_v11 = vld [vmem:[%s12414_s11 + $0x628] sm:$0xff] }
  0x9b   :  { %12571 = vst [vmem:[#allocation165_spill] sm:$0xff] %v6344_v25  ;;  %v6369_v25 = vld [vmem:[%s12414_s11 + $0x630] sm:$0xff] }
  0x9c   :  { %12572 = vst [vmem:[#allocation166_spill] sm:$0xff] %v6349_v53  ;;  %v6374_v53 = vld [vmem:[%s12414_s11 + $0x638] sm:$0xff] }
  0x9d   :  { %12573 = vst [vmem:[#allocation167_spill] sm:$0xff] %v6354_v46  ;;  %v6379_v46 = vld [vmem:[%s12414_s11 + $0x640] sm:$0xff] }
  0x9e   :  { %12574 = vst [vmem:[#allocation168_spill] sm:$0xff] %v6369_v25  ;;  %v6394_v25 = vld [vmem:[%s12414_s11 + $0x658] sm:$0xff] }
  0x9f   :  { %12575 = vst [vmem:[#allocation169_spill] sm:$0xff] %v6374_v53  ;;  %v6399_v53 = vld [vmem:[%s12414_s11 + $0x660] sm:$0xff] }
  0xa0   :  { %12576 = vst [vmem:[#allocation170_spill] sm:$0xff] %v6379_v46  ;;  %v6404_v46 = vld [vmem:[%s12414_s11 + $0x668] sm:$0xff] }
  0xa1   :  { %12577 = vst [vmem:[#allocation171_spill] sm:$0xff] %v6384_v19  ;;  %v6409_v19 = vld [vmem:[%s12414_s11 + $0x670] sm:$0xff] }
  0xa2   :  { %12578 = vst [vmem:[#allocation172_spill] sm:$0xff] %v6389_v41  ;;  %v6414_v41 = vld [vmem:[%s12414_s11 + $0x678] sm:$0xff] }
  0xa3   :  { %12579 = vst [vmem:[#allocation173_spill] sm:$0xff] %v6404_v46  ;;  %v6429_v46 = vld [vmem:[%s12414_s11 + $0x690] sm:$0xff] }
  0xa4   :  { %12580 = vst [vmem:[#allocation174_spill] sm:$0xff] %v6409_v19  ;;  %v6434_v19 = vld [vmem:[%s12414_s11 + $0x698] sm:$0xff] }
  0xa5   :  { %12581 = vst [vmem:[#allocation175_spill] sm:$0xff] %v6414_v41  ;;  %v6439_v41 = vld [vmem:[%s12414_s11 + $0x6a0] sm:$0xff] }
  0xa6   :  { %12582 = vst [vmem:[#allocation176_spill] sm:$0xff] %v6419_v24  ;;  %v6444_v24 = vld [vmem:[%s12414_s11 + $0x6a8] sm:$0xff] }
  0xa7   :  { %12583 = vst [vmem:[#allocation177_spill] sm:$0xff] %v6424_v1  ;;  %v6449_v1 = vld [vmem:[%s12414_s11 + $0x6b0] sm:$0xff] }
  0xa8   :  { %12584 = vst [vmem:[#allocation178_spill] sm:$0xff] %v6439_v41  ;;  %v6464_v41 = vld [vmem:[%s12414_s11 + $0x6c8] sm:$0xff] }
  0xa9   :  { %12585 = vst [vmem:[#allocation179_spill] sm:$0xff] %v6444_v24  ;;  %v6469_v24 = vld [vmem:[%s12414_s11 + $0x6d0] sm:$0xff] }
  0xaa   :  { %12586 = vst [vmem:[#allocation180_spill] sm:$0xff] %v6449_v1  ;;  %v6474_v1 = vld [vmem:[%s12414_s11 + $0x6d8] sm:$0xff] }
  0xab   :  { %12587 = vst [vmem:[#allocation181_spill] sm:$0xff] %v6454_v10  ;;  %v6479_v10 = vld [vmem:[%s12414_s11 + $0x6e0] sm:$0xff] }
  0xac   :  { %12588 = vst [vmem:[#allocation182_spill] sm:$0xff] %v6459_v2  ;;  %v6484_v2 = vld [vmem:[%s12414_s11 + $0x6e8] sm:$0xff] }
  0xad   :  { %12589 = vst [vmem:[#allocation183_spill] sm:$0xff] %v6474_v1 }
  0xae   :  { %12590 = vst [vmem:[#allocation184_spill] sm:$0xff] %v6479_v10 }
  0xaf   :  { %12591 = vst [vmem:[#allocation185_spill] sm:$0xff] %v6484_v2 }
  0xb0   :  { %12592 = vst [vmem:[#allocation186_spill] sm:$0xff] %v6489_v0 }
  0xb1   :  { %12593 = vst [vmem:[#allocation187_spill] sm:$0xff] %v6494_v32 }
  0xb2   :  { %506 = vsyncadd [#allocation4], 28672  ;;  %v6499_v10 = vld [vmem:[%s12415_s12] sm:$0xff]  ;;  %v6504_v2 = vld [vmem:[%s12415_s12 + $0x8] sm:$0xff] }
  0xb3   :  { %12594 = vst [vmem:[#allocation188_spill] sm:$0xff] %v6499_v10  ;;  %v6509_v0 = vld [vmem:[%s12415_s12 + $0x10] sm:$0xff]  ;;  %v6514_v32 = vld [vmem:[%s12415_s12 + $0x18] sm:$0xff]  ;;  %v6519_v1 = vld [vmem:[%s12415_s12 + $0x20] sm:$0xff] }
  0xb4   :  { %12595 = vst [vmem:[#allocation189_spill] sm:$0xff] %v6504_v2  ;;  %v6524_v10 = vld [vmem:[%s12415_s12 + $0x28] sm:$0xff]  ;;  %v6529_v2 = vld [vmem:[%s12415_s12 + $0x30] sm:$0xff] }
  0xb5   :  { %12596 = vst [vmem:[#allocation190_spill] sm:$0xff] %v6509_v0  ;;  %v6534_v0 = vld [vmem:[%s12415_s12 + $0x38] sm:$0xff] }
  0xb6   :  { %12597 = vst [vmem:[#allocation191_spill] sm:$0xff] %v6514_v32  ;;  %v6539_v32 = vld [vmem:[%s12415_s12 + $0x40] sm:$0xff] }
  0xb7   :  { %12598 = vst [vmem:[#allocation192_spill] sm:$0xff] %v6519_v1  ;;  %v6544_v1 = vld [vmem:[%s12415_s12 + $0x48] sm:$0xff] }
  0xb8   :  { %12599 = vst [vmem:[#allocation193_spill] sm:$0xff] %v6524_v10  ;;  %v6549_v10 = vld [vmem:[%s12415_s12 + $0x50] sm:$0xff] }
  0xb9   :  { %12600 = vst [vmem:[#allocation194_spill] sm:$0xff] %v6529_v2  ;;  %v6554_v2 = vld [vmem:[%s12415_s12 + $0x58] sm:$0xff] }
  0xba   :  { %12601 = vst [vmem:[#allocation195_spill] sm:$0xff] %v6534_v0  ;;  %v6559_v0 = vld [vmem:[%s12415_s12 + $0x60] sm:$0xff] }
  0xbb   :  { %12602 = vst [vmem:[#allocation196_spill] sm:$0xff] %v6539_v32  ;;  %v6564_v32 = vld [vmem:[%s12415_s12 + $0x68] sm:$0xff] }
  0xbc   :  { %12603 = vst [vmem:[#allocation197_spill] sm:$0xff] %v6544_v1  ;;  %v6569_v1 = vld [vmem:[%s12415_s12 + $0x70] sm:$0xff] }
  0xbd   :  { %12604 = vst [vmem:[#allocation198_spill] sm:$0xff] %v6549_v10  ;;  %v6574_v10 = vld [vmem:[%s12415_s12 + $0x78] sm:$0xff] }
  0xbe   :  { %12605 = vst [vmem:[#allocation199_spill] sm:$0xff] %v6554_v2  ;;  %v6579_v2 = vld [vmem:[%s12415_s12 + $0x80] sm:$0xff] }
  0xbf   :  { %12606 = vst [vmem:[#allocation200_spill] sm:$0xff] %v6559_v0  ;;  %v6584_v0 = vld [vmem:[%s12415_s12 + $0x88] sm:$0xff] }
  0xc0   :  { %12607 = vst [vmem:[#allocation201_spill] sm:$0xff] %v6564_v32  ;;  %v6589_v32 = vld [vmem:[%s12415_s12 + $0x90] sm:$0xff] }
  0xc1   :  { %12608 = vst [vmem:[#allocation202_spill] sm:$0xff] %v6569_v1  ;;  %v6594_v1 = vld [vmem:[%s12415_s12 + $0x98] sm:$0xff] }
  0xc2   :  { %12609 = vst [vmem:[#allocation203_spill] sm:$0xff] %v6574_v10  ;;  %v6599_v10 = vld [vmem:[%s12415_s12 + $0xa0] sm:$0xff] }
  0xc3   :  { %12610 = vst [vmem:[#allocation204_spill] sm:$0xff] %v6579_v2  ;;  %v6604_v2 = vld [vmem:[%s12415_s12 + $0xa8] sm:$0xff] }
  0xc4   :  { %12611 = vst [vmem:[#allocation205_spill] sm:$0xff] %v6584_v0  ;;  %v6609_v0 = vld [vmem:[%s12415_s12 + $0xb0] sm:$0xff] }
  0xc5   :  { %12612 = vst [vmem:[#allocation206_spill] sm:$0xff] %v6589_v32  ;;  %v6614_v32 = vld [vmem:[%s12415_s12 + $0xb8] sm:$0xff] }
  0xc6   :  { %12613 = vst [vmem:[#allocation207_spill] sm:$0xff] %v6594_v1  ;;  %v6619_v1 = vld [vmem:[%s12415_s12 + $0xc0] sm:$0xff] }
  0xc7   :  { %12614 = vst [vmem:[#allocation208_spill] sm:$0xff] %v6599_v10  ;;  %v6624_v10 = vld [vmem:[%s12415_s12 + $0xc8] sm:$0xff] }
  0xc8   :  { %12615 = vst [vmem:[#allocation209_spill] sm:$0xff] %v6604_v2  ;;  %v6629_v2 = vld [vmem:[%s12415_s12 + $0xd0] sm:$0xff] }
  0xc9   :  { %12616 = vst [vmem:[#allocation210_spill] sm:$0xff] %v6609_v0  ;;  %v6634_v0 = vld [vmem:[%s12415_s12 + $0xd8] sm:$0xff] }
  0xca   :  { %12617 = vst [vmem:[#allocation211_spill] sm:$0xff] %v6614_v32  ;;  %v6639_v32 = vld [vmem:[%s12415_s12 + $0xe0] sm:$0xff] }
  0xcb   :  { %12618 = vst [vmem:[#allocation212_spill] sm:$0xff] %v6619_v1  ;;  %v6644_v1 = vld [vmem:[%s12415_s12 + $0xe8] sm:$0xff] }
  0xcc   :  { %12619 = vst [vmem:[#allocation213_spill] sm:$0xff] %v6624_v10  ;;  %v6649_v10 = vld [vmem:[%s12415_s12 + $0xf0] sm:$0xff] }
  0xcd   :  { %12620 = vst [vmem:[#allocation214_spill] sm:$0xff] %v6629_v2  ;;  %v6654_v2 = vld [vmem:[%s12415_s12 + $0xf8] sm:$0xff] }
  0xce   :  { %12621 = vst [vmem:[#allocation215_spill] sm:$0xff] %v6634_v0  ;;  %v6659_v0 = vld [vmem:[%s12415_s12 + $0x100] sm:$0xff] }
  0xcf   :  { %12622 = vst [vmem:[#allocation216_spill] sm:$0xff] %v6639_v32  ;;  %v6664_v32 = vld [vmem:[%s12415_s12 + $0x108] sm:$0xff] }
  0xd0   :  { %12623 = vst [vmem:[#allocation217_spill] sm:$0xff] %v6644_v1  ;;  %v6669_v1 = vld [vmem:[%s12415_s12 + $0x110] sm:$0xff] }
  0xd1   :  { %12624 = vst [vmem:[#allocation218_spill] sm:$0xff] %v6649_v10  ;;  %v6674_v10 = vld [vmem:[%s12415_s12 + $0x118] sm:$0xff] }
  0xd2   :  { %12625 = vst [vmem:[#allocation219_spill] sm:$0xff] %v6654_v2  ;;  %v6679_v2 = vld [vmem:[%s12415_s12 + $0x120] sm:$0xff] }
  0xd3   :  { %12626 = vst [vmem:[#allocation220_spill] sm:$0xff] %v6659_v0  ;;  %v6684_v0 = vld [vmem:[%s12415_s12 + $0x128] sm:$0xff] }
  0xd4   :  { %12627 = vst [vmem:[#allocation221_spill] sm:$0xff] %v6664_v32  ;;  %v6689_v32 = vld [vmem:[%s12415_s12 + $0x130] sm:$0xff] }
  0xd5   :  { %12628 = vst [vmem:[#allocation222_spill] sm:$0xff] %v6669_v1  ;;  %v6694_v1 = vld [vmem:[%s12415_s12 + $0x138] sm:$0xff] }
  0xd6   :  { %12629 = vst [vmem:[#allocation223_spill] sm:$0xff] %v6674_v10  ;;  %v6699_v10 = vld [vmem:[%s12415_s12 + $0x140] sm:$0xff] }
  0xd7   :  { %12630 = vst [vmem:[#allocation224_spill] sm:$0xff] %v6679_v2  ;;  %v6704_v2 = vld [vmem:[%s12415_s12 + $0x148] sm:$0xff] }
  0xd8   :  { %12631 = vst [vmem:[#allocation225_spill] sm:$0xff] %v6684_v0  ;;  %v6709_v0 = vld [vmem:[%s12415_s12 + $0x150] sm:$0xff] }
  0xd9   :  { %12632 = vst [vmem:[#allocation226_spill] sm:$0xff] %v6689_v32  ;;  %v6714_v32 = vld [vmem:[%s12415_s12 + $0x158] sm:$0xff] }
  0xda   :  { %12633 = vst [vmem:[#allocation227_spill] sm:$0xff] %v6694_v1  ;;  %v6719_v1 = vld [vmem:[%s12415_s12 + $0x160] sm:$0xff] }
  0xdb   :  { %12634 = vst [vmem:[#allocation228_spill] sm:$0xff] %v6699_v10  ;;  %v6724_v10 = vld [vmem:[%s12415_s12 + $0x168] sm:$0xff] }
  0xdc   :  { %12635 = vst [vmem:[#allocation229_spill] sm:$0xff] %v6704_v2  ;;  %v6729_v2 = vld [vmem:[%s12415_s12 + $0x170] sm:$0xff] }
  0xdd   :  { %12636 = vst [vmem:[#allocation230_spill] sm:$0xff] %v6709_v0  ;;  %v6734_v0 = vld [vmem:[%s12415_s12 + $0x178] sm:$0xff] }
  0xde   :  { %12637 = vst [vmem:[#allocation231_spill] sm:$0xff] %v6714_v32  ;;  %v6739_v32 = vld [vmem:[%s12415_s12 + $0x180] sm:$0xff] }
  0xdf   :  { %12638 = vst [vmem:[#allocation232_spill] sm:$0xff] %v6719_v1  ;;  %v6744_v1 = vld [vmem:[%s12415_s12 + $0x188] sm:$0xff] }
  0xe0   :  { %12639 = vst [vmem:[#allocation233_spill] sm:$0xff] %v6724_v10  ;;  %v6749_v10 = vld [vmem:[%s12415_s12 + $0x190] sm:$0xff] }
  0xe1   :  { %12640 = vst [vmem:[#allocation234_spill] sm:$0xff] %v6729_v2  ;;  %v6754_v2 = vld [vmem:[%s12415_s12 + $0x198] sm:$0xff] }
  0xe2   :  { %12641 = vst [vmem:[#allocation235_spill] sm:$0xff] %v6734_v0  ;;  %v6759_v0 = vld [vmem:[%s12415_s12 + $0x1a0] sm:$0xff] }
  0xe3   :  { %12642 = vst [vmem:[#allocation236_spill] sm:$0xff] %v6739_v32  ;;  %v6764_v32 = vld [vmem:[%s12415_s12 + $0x1a8] sm:$0xff] }
  0xe4   :  { %12643 = vst [vmem:[#allocation237_spill] sm:$0xff] %v6744_v1  ;;  %v6769_v1 = vld [vmem:[%s12415_s12 + $0x1b0] sm:$0xff] }
  0xe5   :  { %12644 = vst [vmem:[#allocation238_spill] sm:$0xff] %v6749_v10  ;;  %v6774_v10 = vld [vmem:[%s12415_s12 + $0x1b8] sm:$0xff] }
  0xe6   :  { %12645 = vst [vmem:[#allocation239_spill] sm:$0xff] %v6754_v2  ;;  %v6779_v2 = vld [vmem:[%s12415_s12 + $0x1c0] sm:$0xff] }
  0xe7   :  { %12646 = vst [vmem:[#allocation240_spill] sm:$0xff] %v6759_v0  ;;  %v6784_v0 = vld [vmem:[%s12415_s12 + $0x1c8] sm:$0xff] }
  0xe8   :  { %12647 = vst [vmem:[#allocation241_spill] sm:$0xff] %v6764_v32  ;;  %v6789_v32 = vld [vmem:[%s12415_s12 + $0x1d0] sm:$0xff] }
  0xe9   :  { %12648 = vst [vmem:[#allocation242_spill] sm:$0xff] %v6769_v1  ;;  %v6794_v1 = vld [vmem:[%s12415_s12 + $0x1d8] sm:$0xff] }
  0xea   :  { %12649 = vst [vmem:[#allocation243_spill] sm:$0xff] %v6774_v10  ;;  %v6799_v10 = vld [vmem:[%s12415_s12 + $0x1e0] sm:$0xff] }
  0xeb   :  { %12650 = vst [vmem:[#allocation244_spill] sm:$0xff] %v6779_v2  ;;  %v6804_v2 = vld [vmem:[%s12415_s12 + $0x1e8] sm:$0xff] }
  0xec   :  { %12651 = vst [vmem:[#allocation245_spill] sm:$0xff] %v6784_v0  ;;  %v6809_v0 = vld [vmem:[%s12415_s12 + $0x1f0] sm:$0xff] }
  0xed   :  { %12652 = vst [vmem:[#allocation246_spill] sm:$0xff] %v6789_v32  ;;  %v6814_v32 = vld [vmem:[%s12415_s12 + $0x1f8] sm:$0xff] }
  0xee   :  { %12653 = vst [vmem:[#allocation247_spill] sm:$0xff] %v6794_v1  ;;  %v6819_v1 = vld [vmem:[%s12415_s12 + $0x200] sm:$0xff] }
  0xef   :  { %12654 = vst [vmem:[#allocation248_spill] sm:$0xff] %v6799_v10  ;;  %v6824_v10 = vld [vmem:[%s12415_s12 + $0x208] sm:$0xff] }
  0xf0   :  { %12655 = vst [vmem:[#allocation249_spill] sm:$0xff] %v6804_v2  ;;  %v6829_v2 = vld [vmem:[%s12415_s12 + $0x210] sm:$0xff] }
  0xf1   :  { %12656 = vst [vmem:[#allocation250_spill] sm:$0xff] %v6809_v0  ;;  %v6834_v0 = vld [vmem:[%s12415_s12 + $0x218] sm:$0xff] }
  0xf2   :  { %12657 = vst [vmem:[#allocation251_spill] sm:$0xff] %v6814_v32  ;;  %v6839_v32 = vld [vmem:[%s12415_s12 + $0x220] sm:$0xff] }
  0xf3   :  { %12658 = vst [vmem:[#allocation252_spill] sm:$0xff] %v6819_v1  ;;  %v6844_v1 = vld [vmem:[%s12415_s12 + $0x228] sm:$0xff] }
  0xf4   :  { %12659 = vst [vmem:[#allocation253_spill] sm:$0xff] %v6824_v10  ;;  %v6849_v10 = vld [vmem:[%s12415_s12 + $0x230] sm:$0xff] }
  0xf5   :  { %12660 = vst [vmem:[#allocation254_spill] sm:$0xff] %v6829_v2  ;;  %v6854_v2 = vld [vmem:[%s12415_s12 + $0x238] sm:$0xff] }
  0xf6   :  { %12661 = vst [vmem:[#allocation255_spill] sm:$0xff] %v6834_v0  ;;  %v6859_v0 = vld [vmem:[%s12415_s12 + $0x240] sm:$0xff] }
  0xf7   :  { %12662 = vst [vmem:[#allocation256_spill] sm:$0xff] %v6839_v32  ;;  %v6864_v32 = vld [vmem:[%s12415_s12 + $0x248] sm:$0xff] }
  0xf8   :  { %12663 = vst [vmem:[#allocation257_spill] sm:$0xff] %v6844_v1  ;;  %v6869_v1 = vld [vmem:[%s12415_s12 + $0x250] sm:$0xff] }
  0xf9   :  { %12664 = vst [vmem:[#allocation258_spill] sm:$0xff] %v6849_v10  ;;  %v6874_v10 = vld [vmem:[%s12415_s12 + $0x258] sm:$0xff] }
  0xfa   :  { %12665 = vst [vmem:[#allocation259_spill] sm:$0xff] %v6854_v2  ;;  %v6879_v2 = vld [vmem:[%s12415_s12 + $0x260] sm:$0xff] }
  0xfb   :  { %12666 = vst [vmem:[#allocation260_spill] sm:$0xff] %v6859_v0  ;;  %v6884_v0 = vld [vmem:[%s12415_s12 + $0x268] sm:$0xff] }
  0xfc   :  { %12667 = vst [vmem:[#allocation261_spill] sm:$0xff] %v6864_v32  ;;  %v6889_v32 = vld [vmem:[%s12415_s12 + $0x270] sm:$0xff] }
  0xfd   :  { %12668 = vst [vmem:[#allocation262_spill] sm:$0xff] %v6869_v1  ;;  %v6894_v1 = vld [vmem:[%s12415_s12 + $0x278] sm:$0xff] }
  0xfe   :  { %12669 = vst [vmem:[#allocation263_spill] sm:$0xff] %v6874_v10  ;;  %v6899_v10 = vld [vmem:[%s12415_s12 + $0x280] sm:$0xff] }
  0xff   :  { %12670 = vst [vmem:[#allocation264_spill] sm:$0xff] %v6879_v2  ;;  %v6904_v2 = vld [vmem:[%s12415_s12 + $0x288] sm:$0xff] }
 0x100   :  { %12671 = vst [vmem:[#allocation265_spill] sm:$0xff] %v6884_v0  ;;  %v6909_v0 = vld [vmem:[%s12415_s12 + $0x290] sm:$0xff] }
 0x101   :  { %12672 = vst [vmem:[#allocation266_spill] sm:$0xff] %v6889_v32  ;;  %v6914_v32 = vld [vmem:[%s12415_s12 + $0x298] sm:$0xff] }
 0x102   :  { %12673 = vst [vmem:[#allocation267_spill] sm:$0xff] %v6894_v1  ;;  %v6919_v1 = vld [vmem:[%s12415_s12 + $0x2a0] sm:$0xff] }
 0x103   :  { %12674 = vst [vmem:[#allocation268_spill] sm:$0xff] %v6899_v10  ;;  %v6924_v10 = vld [vmem:[%s12415_s12 + $0x2a8] sm:$0xff] }
 0x104   :  { %12675 = vst [vmem:[#allocation269_spill] sm:$0xff] %v6904_v2  ;;  %v6929_v2 = vld [vmem:[%s12415_s12 + $0x2b0] sm:$0xff] }
 0x105   :  { %12676 = vst [vmem:[#allocation270_spill] sm:$0xff] %v6909_v0  ;;  %v6934_v0 = vld [vmem:[%s12415_s12 + $0x2b8] sm:$0xff] }
 0x106   :  { %12677 = vst [vmem:[#allocation271_spill] sm:$0xff] %v6914_v32  ;;  %v6939_v32 = vld [vmem:[%s12415_s12 + $0x2c0] sm:$0xff] }
 0x107   :  { %12678 = vst [vmem:[#allocation272_spill] sm:$0xff] %v6919_v1  ;;  %v6944_v1 = vld [vmem:[%s12415_s12 + $0x2c8] sm:$0xff] }
 0x108   :  { %12679 = vst [vmem:[#allocation273_spill] sm:$0xff] %v6924_v10  ;;  %v6949_v10 = vld [vmem:[%s12415_s12 + $0x2d0] sm:$0xff] }
 0x109   :  { %12680 = vst [vmem:[#allocation274_spill] sm:$0xff] %v6929_v2  ;;  %v6954_v2 = vld [vmem:[%s12415_s12 + $0x2d8] sm:$0xff] }
 0x10a   :  { %12681 = vst [vmem:[#allocation275_spill] sm:$0xff] %v6934_v0  ;;  %v6959_v0 = vld [vmem:[%s12415_s12 + $0x2e0] sm:$0xff] }
 0x10b   :  { %12682 = vst [vmem:[#allocation276_spill] sm:$0xff] %v6939_v32  ;;  %v6964_v32 = vld [vmem:[%s12415_s12 + $0x2e8] sm:$0xff] }
 0x10c   :  { %12683 = vst [vmem:[#allocation277_spill] sm:$0xff] %v6944_v1  ;;  %v6969_v1 = vld [vmem:[%s12415_s12 + $0x2f0] sm:$0xff] }
 0x10d   :  { %12684 = vst [vmem:[#allocation278_spill] sm:$0xff] %v6949_v10  ;;  %v6974_v10 = vld [vmem:[%s12415_s12 + $0x2f8] sm:$0xff] }
 0x10e   :  { %12685 = vst [vmem:[#allocation279_spill] sm:$0xff] %v6954_v2  ;;  %v6979_v2 = vld [vmem:[%s12415_s12 + $0x300] sm:$0xff] }
 0x10f   :  { %12686 = vst [vmem:[#allocation280_spill] sm:$0xff] %v6959_v0  ;;  %v6984_v0 = vld [vmem:[%s12415_s12 + $0x308] sm:$0xff] }
 0x110   :  { %12687 = vst [vmem:[#allocation281_spill] sm:$0xff] %v6964_v32  ;;  %v6989_v32 = vld [vmem:[%s12415_s12 + $0x310] sm:$0xff] }
 0x111   :  { %12688 = vst [vmem:[#allocation282_spill] sm:$0xff] %v6969_v1  ;;  %v6994_v1 = vld [vmem:[%s12415_s12 + $0x318] sm:$0xff] }
 0x112   :  { %12689 = vst [vmem:[#allocation283_spill] sm:$0xff] %v6974_v10  ;;  %v6999_v10 = vld [vmem:[%s12415_s12 + $0x320] sm:$0xff] }
 0x113   :  { %12690 = vst [vmem:[#allocation284_spill] sm:$0xff] %v6979_v2  ;;  %v7004_v2 = vld [vmem:[%s12415_s12 + $0x328] sm:$0xff] }
 0x114   :  { %12691 = vst [vmem:[#allocation285_spill] sm:$0xff] %v6984_v0  ;;  %v7009_v0 = vld [vmem:[%s12415_s12 + $0x330] sm:$0xff] }
 0x115   :  { %12692 = vst [vmem:[#allocation286_spill] sm:$0xff] %v6989_v32  ;;  %v7014_v32 = vld [vmem:[%s12415_s12 + $0x338] sm:$0xff] }
 0x116   :  { %12693 = vst [vmem:[#allocation287_spill] sm:$0xff] %v6994_v1  ;;  %v7019_v1 = vld [vmem:[%s12415_s12 + $0x340] sm:$0xff] }
 0x117   :  { %12694 = vst [vmem:[#allocation288_spill] sm:$0xff] %v6999_v10  ;;  %v7024_v10 = vld [vmem:[%s12415_s12 + $0x348] sm:$0xff] }
 0x118   :  { %12695 = vst [vmem:[#allocation289_spill] sm:$0xff] %v7004_v2  ;;  %v7029_v2 = vld [vmem:[%s12415_s12 + $0x350] sm:$0xff] }
 0x119   :  { %12696 = vst [vmem:[#allocation290_spill] sm:$0xff] %v7009_v0  ;;  %v7034_v0 = vld [vmem:[%s12415_s12 + $0x358] sm:$0xff] }
 0x11a   :  { %12697 = vst [vmem:[#allocation291_spill] sm:$0xff] %v7014_v32  ;;  %v7039_v32 = vld [vmem:[%s12415_s12 + $0x360] sm:$0xff] }
 0x11b   :  { %12698 = vst [vmem:[#allocation292_spill] sm:$0xff] %v7019_v1  ;;  %v7044_v1 = vld [vmem:[%s12415_s12 + $0x368] sm:$0xff] }
 0x11c   :  { %12699 = vst [vmem:[#allocation293_spill] sm:$0xff] %v7024_v10  ;;  %v7049_v10 = vld [vmem:[%s12415_s12 + $0x370] sm:$0xff] }
 0x11d   :  { %12700 = vst [vmem:[#allocation294_spill] sm:$0xff] %v7029_v2  ;;  %v7054_v2 = vld [vmem:[%s12415_s12 + $0x378] sm:$0xff] }
 0x11e   :  { %12701 = vst [vmem:[#allocation295_spill] sm:$0xff] %v7034_v0  ;;  %v7059_v0 = vld [vmem:[%s12415_s12 + $0x380] sm:$0xff] }
 0x11f   :  { %12702 = vst [vmem:[#allocation296_spill] sm:$0xff] %v7039_v32  ;;  %v7064_v32 = vld [vmem:[%s12415_s12 + $0x388] sm:$0xff] }
 0x120   :  { %12703 = vst [vmem:[#allocation297_spill] sm:$0xff] %v7044_v1  ;;  %v7069_v1 = vld [vmem:[%s12415_s12 + $0x390] sm:$0xff] }
 0x121   :  { %12704 = vst [vmem:[#allocation298_spill] sm:$0xff] %v7049_v10  ;;  %v7074_v10 = vld [vmem:[%s12415_s12 + $0x398] sm:$0xff] }
 0x122   :  { %12705 = vst [vmem:[#allocation299_spill] sm:$0xff] %v7054_v2  ;;  %v7079_v2 = vld [vmem:[%s12415_s12 + $0x3a0] sm:$0xff] }
 0x123   :  { %12706 = vst [vmem:[#allocation300_spill] sm:$0xff] %v7059_v0  ;;  %v7084_v0 = vld [vmem:[%s12415_s12 + $0x3a8] sm:$0xff] }
 0x124   :  { %12707 = vst [vmem:[#allocation301_spill] sm:$0xff] %v7064_v32  ;;  %v7089_v32 = vld [vmem:[%s12415_s12 + $0x3b0] sm:$0xff] }
 0x125   :  { %12708 = vst [vmem:[#allocation302_spill] sm:$0xff] %v7069_v1  ;;  %v7094_v1 = vld [vmem:[%s12415_s12 + $0x3b8] sm:$0xff] }
 0x126   :  { %12709 = vst [vmem:[#allocation303_spill] sm:$0xff] %v7074_v10  ;;  %v7099_v10 = vld [vmem:[%s12415_s12 + $0x3c0] sm:$0xff] }
 0x127   :  { %12710 = vst [vmem:[#allocation304_spill] sm:$0xff] %v7079_v2  ;;  %v7104_v2 = vld [vmem:[%s12415_s12 + $0x3c8] sm:$0xff] }
 0x128   :  { %12711 = vst [vmem:[#allocation305_spill] sm:$0xff] %v7084_v0  ;;  %v7109_v0 = vld [vmem:[%s12415_s12 + $0x3d0] sm:$0xff] }
 0x129   :  { %12712 = vst [vmem:[#allocation306_spill] sm:$0xff] %v7089_v32  ;;  %v7114_v32 = vld [vmem:[%s12415_s12 + $0x3d8] sm:$0xff] }
 0x12a   :  { %12713 = vst [vmem:[#allocation307_spill] sm:$0xff] %v7094_v1  ;;  %v7119_v1 = vld [vmem:[%s12415_s12 + $0x3e0] sm:$0xff] }
 0x12b   :  { %12714 = vst [vmem:[#allocation308_spill] sm:$0xff] %v7099_v10  ;;  %v7124_v10 = vld [vmem:[%s12415_s12 + $0x3e8] sm:$0xff] }
 0x12c   :  { %12715 = vst [vmem:[#allocation309_spill] sm:$0xff] %v7104_v2  ;;  %v7129_v2 = vld [vmem:[%s12415_s12 + $0x3f0] sm:$0xff] }
 0x12d   :  { %12716 = vst [vmem:[#allocation310_spill] sm:$0xff] %v7109_v0  ;;  %v7134_v0 = vld [vmem:[%s12415_s12 + $0x3f8] sm:$0xff] }
 0x12e   :  { %12717 = vst [vmem:[#allocation311_spill] sm:$0xff] %v7114_v32  ;;  %v7139_v32 = vld [vmem:[%s12415_s12 + $0x400] sm:$0xff] }
 0x12f   :  { %12718 = vst [vmem:[#allocation312_spill] sm:$0xff] %v7119_v1  ;;  %v7144_v1 = vld [vmem:[%s12415_s12 + $0x408] sm:$0xff] }
 0x130   :  { %12719 = vst [vmem:[#allocation313_spill] sm:$0xff] %v7124_v10  ;;  %v7149_v10 = vld [vmem:[%s12415_s12 + $0x410] sm:$0xff] }
 0x131   :  { %12720 = vst [vmem:[#allocation314_spill] sm:$0xff] %v7129_v2  ;;  %v7154_v2 = vld [vmem:[%s12415_s12 + $0x418] sm:$0xff] }
 0x132   :  { %12721 = vst [vmem:[#allocation315_spill] sm:$0xff] %v7134_v0  ;;  %v7159_v0 = vld [vmem:[%s12415_s12 + $0x420] sm:$0xff] }
 0x133   :  { %12722 = vst [vmem:[#allocation316_spill] sm:$0xff] %v7139_v32  ;;  %v7164_v32 = vld [vmem:[%s12415_s12 + $0x428] sm:$0xff] }
 0x134   :  { %12723 = vst [vmem:[#allocation317_spill] sm:$0xff] %v7144_v1  ;;  %v7169_v1 = vld [vmem:[%s12415_s12 + $0x430] sm:$0xff] }
 0x135   :  { %12724 = vst [vmem:[#allocation318_spill] sm:$0xff] %v7149_v10  ;;  %v7174_v10 = vld [vmem:[%s12415_s12 + $0x438] sm:$0xff] }
 0x136   :  { %12725 = vst [vmem:[#allocation319_spill] sm:$0xff] %v7154_v2  ;;  %v7179_v2 = vld [vmem:[%s12415_s12 + $0x440] sm:$0xff] }
 0x137   :  { %12726 = vst [vmem:[#allocation320_spill] sm:$0xff] %v7159_v0  ;;  %v7184_v0 = vld [vmem:[%s12415_s12 + $0x448] sm:$0xff] }
 0x138   :  { %12727 = vst [vmem:[#allocation321_spill] sm:$0xff] %v7164_v32  ;;  %v7189_v32 = vld [vmem:[%s12415_s12 + $0x450] sm:$0xff] }
 0x139   :  { %12728 = vst [vmem:[#allocation322_spill] sm:$0xff] %v7169_v1  ;;  %v7194_v1 = vld [vmem:[%s12415_s12 + $0x458] sm:$0xff] }
 0x13a   :  { %12729 = vst [vmem:[#allocation323_spill] sm:$0xff] %v7174_v10  ;;  %v7199_v10 = vld [vmem:[%s12415_s12 + $0x460] sm:$0xff] }
 0x13b   :  { %12730 = vst [vmem:[#allocation324_spill] sm:$0xff] %v7179_v2  ;;  %v7204_v2 = vld [vmem:[%s12415_s12 + $0x468] sm:$0xff] }
 0x13c   :  { %12731 = vst [vmem:[#allocation325_spill] sm:$0xff] %v7184_v0  ;;  %v7209_v0 = vld [vmem:[%s12415_s12 + $0x470] sm:$0xff] }
 0x13d   :  { %12732 = vst [vmem:[#allocation326_spill] sm:$0xff] %v7189_v32  ;;  %v7214_v32 = vld [vmem:[%s12415_s12 + $0x478] sm:$0xff] }
 0x13e   :  { %12733 = vst [vmem:[#allocation327_spill] sm:$0xff] %v7194_v1  ;;  %v7219_v1 = vld [vmem:[%s12415_s12 + $0x480] sm:$0xff] }
 0x13f   :  { %12734 = vst [vmem:[#allocation328_spill] sm:$0xff] %v7199_v10  ;;  %v7224_v10 = vld [vmem:[%s12415_s12 + $0x488] sm:$0xff] }
 0x140   :  { %12735 = vst [vmem:[#allocation329_spill] sm:$0xff] %v7204_v2  ;;  %v7229_v2 = vld [vmem:[%s12415_s12 + $0x490] sm:$0xff] }
 0x141   :  { %12736 = vst [vmem:[#allocation330_spill] sm:$0xff] %v7209_v0  ;;  %v7234_v0 = vld [vmem:[%s12415_s12 + $0x498] sm:$0xff] }
 0x142   :  { %12737 = vst [vmem:[#allocation331_spill] sm:$0xff] %v7214_v32  ;;  %v7239_v32 = vld [vmem:[%s12415_s12 + $0x4a0] sm:$0xff] }
 0x143   :  { %12738 = vst [vmem:[#allocation332_spill] sm:$0xff] %v7219_v1  ;;  %v7244_v1 = vld [vmem:[%s12415_s12 + $0x4a8] sm:$0xff] }
 0x144   :  { %12739 = vst [vmem:[#allocation333_spill] sm:$0xff] %v7224_v10  ;;  %v7249_v10 = vld [vmem:[%s12415_s12 + $0x4b0] sm:$0xff] }
 0x145   :  { %12740 = vst [vmem:[#allocation334_spill] sm:$0xff] %v7229_v2  ;;  %v7254_v2 = vld [vmem:[%s12415_s12 + $0x4b8] sm:$0xff] }
 0x146   :  { %12741 = vst [vmem:[#allocation335_spill] sm:$0xff] %v7234_v0  ;;  %v7259_v0 = vld [vmem:[%s12415_s12 + $0x4c0] sm:$0xff] }
 0x147   :  { %12742 = vst [vmem:[#allocation336_spill] sm:$0xff] %v7239_v32  ;;  %v7264_v32 = vld [vmem:[%s12415_s12 + $0x4c8] sm:$0xff] }
 0x148   :  { %12743 = vst [vmem:[#allocation337_spill] sm:$0xff] %v7244_v1  ;;  %v7269_v1 = vld [vmem:[%s12415_s12 + $0x4d0] sm:$0xff] }
 0x149   :  { %12744 = vst [vmem:[#allocation338_spill] sm:$0xff] %v7249_v10  ;;  %v7274_v10 = vld [vmem:[%s12415_s12 + $0x4d8] sm:$0xff] }
 0x14a   :  { %12745 = vst [vmem:[#allocation339_spill] sm:$0xff] %v7254_v2  ;;  %v7279_v2 = vld [vmem:[%s12415_s12 + $0x4e0] sm:$0xff] }
 0x14b   :  { %12746 = vst [vmem:[#allocation340_spill] sm:$0xff] %v7259_v0  ;;  %v7284_v0 = vld [vmem:[%s12415_s12 + $0x4e8] sm:$0xff] }
 0x14c   :  { %12747 = vst [vmem:[#allocation341_spill] sm:$0xff] %v7264_v32  ;;  %v7289_v32 = vld [vmem:[%s12415_s12 + $0x4f0] sm:$0xff] }
 0x14d   :  { %12748 = vst [vmem:[#allocation342_spill] sm:$0xff] %v7269_v1  ;;  %v7294_v1 = vld [vmem:[%s12415_s12 + $0x4f8] sm:$0xff] }
 0x14e   :  { %12749 = vst [vmem:[#allocation343_spill] sm:$0xff] %v7274_v10  ;;  %v7299_v10 = vld [vmem:[%s12415_s12 + $0x500] sm:$0xff] }
 0x14f   :  { %12750 = vst [vmem:[#allocation344_spill] sm:$0xff] %v7279_v2  ;;  %v7304_v2 = vld [vmem:[%s12415_s12 + $0x508] sm:$0xff] }
 0x150   :  { %12751 = vst [vmem:[#allocation345_spill] sm:$0xff] %v7284_v0  ;;  %v7309_v0 = vld [vmem:[%s12415_s12 + $0x510] sm:$0xff] }
 0x151   :  { %12752 = vst [vmem:[#allocation346_spill] sm:$0xff] %v7289_v32  ;;  %v7314_v32 = vld [vmem:[%s12415_s12 + $0x518] sm:$0xff] }
 0x152   :  { %12753 = vst [vmem:[#allocation347_spill] sm:$0xff] %v7294_v1  ;;  %v7319_v1 = vld [vmem:[%s12415_s12 + $0x520] sm:$0xff] }
 0x153   :  { %12754 = vst [vmem:[#allocation348_spill] sm:$0xff] %v7299_v10  ;;  %v7324_v10 = vld [vmem:[%s12415_s12 + $0x528] sm:$0xff] }
 0x154   :  { %12755 = vst [vmem:[#allocation349_spill] sm:$0xff] %v7304_v2  ;;  %v7329_v2 = vld [vmem:[%s12415_s12 + $0x530] sm:$0xff] }
 0x155   :  { %12756 = vst [vmem:[#allocation350_spill] sm:$0xff] %v7309_v0  ;;  %v7334_v0 = vld [vmem:[%s12415_s12 + $0x538] sm:$0xff] }
 0x156   :  { %12757 = vst [vmem:[#allocation351_spill] sm:$0xff] %v7314_v32  ;;  %v7339_v32 = vld [vmem:[%s12415_s12 + $0x540] sm:$0xff] }
 0x157   :  { %12758 = vst [vmem:[#allocation352_spill] sm:$0xff] %v7319_v1  ;;  %v7344_v1 = vld [vmem:[%s12415_s12 + $0x548] sm:$0xff] }
 0x158   :  { %12759 = vst [vmem:[#allocation353_spill] sm:$0xff] %v7324_v10  ;;  %v7349_v10 = vld [vmem:[%s12415_s12 + $0x550] sm:$0xff] }
 0x159   :  { %12760 = vst [vmem:[#allocation354_spill] sm:$0xff] %v7329_v2  ;;  %v7354_v2 = vld [vmem:[%s12415_s12 + $0x558] sm:$0xff] }
 0x15a   :  { %12761 = vst [vmem:[#allocation355_spill] sm:$0xff] %v7334_v0  ;;  %v7359_v0 = vld [vmem:[%s12415_s12 + $0x560] sm:$0xff] }
 0x15b   :  { %12762 = vst [vmem:[#allocation356_spill] sm:$0xff] %v7339_v32  ;;  %v7364_v32 = vld [vmem:[%s12415_s12 + $0x568] sm:$0xff] }
 0x15c   :  { %12763 = vst [vmem:[#allocation357_spill] sm:$0xff] %v7344_v1  ;;  %v7369_v1 = vld [vmem:[%s12415_s12 + $0x570] sm:$0xff] }
 0x15d   :  { %12764 = vst [vmem:[#allocation358_spill] sm:$0xff] %v7349_v10  ;;  %v7374_v10 = vld [vmem:[%s12415_s12 + $0x578] sm:$0xff] }
 0x15e   :  { %12765 = vst [vmem:[#allocation359_spill] sm:$0xff] %v7354_v2  ;;  %v7379_v2 = vld [vmem:[%s12415_s12 + $0x580] sm:$0xff] }
 0x15f   :  { %12766 = vst [vmem:[#allocation360_spill] sm:$0xff] %v7359_v0  ;;  %v7384_v0 = vld [vmem:[%s12415_s12 + $0x588] sm:$0xff] }
 0x160   :  { %12767 = vst [vmem:[#allocation361_spill] sm:$0xff] %v7364_v32  ;;  %v7389_v32 = vld [vmem:[%s12415_s12 + $0x590] sm:$0xff] }
 0x161   :  { %12768 = vst [vmem:[#allocation362_spill] sm:$0xff] %v7369_v1  ;;  %v7394_v1 = vld [vmem:[%s12415_s12 + $0x598] sm:$0xff] }
 0x162   :  { %12769 = vst [vmem:[#allocation363_spill] sm:$0xff] %v7374_v10  ;;  %v7399_v10 = vld [vmem:[%s12415_s12 + $0x5a0] sm:$0xff] }
 0x163   :  { %12770 = vst [vmem:[#allocation364_spill] sm:$0xff] %v7379_v2  ;;  %v7404_v2 = vld [vmem:[%s12415_s12 + $0x5a8] sm:$0xff] }
 0x164   :  { %12771 = vst [vmem:[#allocation365_spill] sm:$0xff] %v7384_v0  ;;  %v7409_v0 = vld [vmem:[%s12415_s12 + $0x5b0] sm:$0xff] }
 0x165   :  { %12772 = vst [vmem:[#allocation366_spill] sm:$0xff] %v7389_v32  ;;  %v7414_v32 = vld [vmem:[%s12415_s12 + $0x5b8] sm:$0xff] }
 0x166   :  { %12773 = vst [vmem:[#allocation367_spill] sm:$0xff] %v7394_v1  ;;  %v7419_v1 = vld [vmem:[%s12415_s12 + $0x5c0] sm:$0xff] }
 0x167   :  { %12774 = vst [vmem:[#allocation368_spill] sm:$0xff] %v7399_v10  ;;  %v7424_v10 = vld [vmem:[%s12415_s12 + $0x5c8] sm:$0xff] }
 0x168   :  { %12775 = vst [vmem:[#allocation369_spill] sm:$0xff] %v7404_v2  ;;  %v7429_v2 = vld [vmem:[%s12415_s12 + $0x5d0] sm:$0xff] }
 0x169   :  { %12776 = vst [vmem:[#allocation370_spill] sm:$0xff] %v7409_v0  ;;  %v7434_v0 = vld [vmem:[%s12415_s12 + $0x5d8] sm:$0xff] }
 0x16a   :  { %12777 = vst [vmem:[#allocation371_spill] sm:$0xff] %v7414_v32  ;;  %v7439_v32 = vld [vmem:[%s12415_s12 + $0x5e0] sm:$0xff] }
 0x16b   :  { %12778 = vst [vmem:[#allocation372_spill] sm:$0xff] %v7419_v1  ;;  %v7444_v1 = vld [vmem:[%s12415_s12 + $0x5e8] sm:$0xff] }
 0x16c   :  { %12779 = vst [vmem:[#allocation373_spill] sm:$0xff] %v7424_v10  ;;  %v7449_v10 = vld [vmem:[%s12415_s12 + $0x5f0] sm:$0xff] }
 0x16d   :  { %12780 = vst [vmem:[#allocation374_spill] sm:$0xff] %v7429_v2  ;;  %v7454_v2 = vld [vmem:[%s12415_s12 + $0x5f8] sm:$0xff] }
 0x16e   :  { %12781 = vst [vmem:[#allocation375_spill] sm:$0xff] %v7434_v0  ;;  %v7459_v0 = vld [vmem:[%s12415_s12 + $0x600] sm:$0xff] }
 0x16f   :  { %12782 = vst [vmem:[#allocation376_spill] sm:$0xff] %v7439_v32  ;;  %v7464_v32 = vld [vmem:[%s12415_s12 + $0x608] sm:$0xff] }
 0x170   :  { %12783 = vst [vmem:[#allocation377_spill] sm:$0xff] %v7444_v1  ;;  %v7469_v1 = vld [vmem:[%s12415_s12 + $0x610] sm:$0xff] }
 0x171   :  { %12784 = vst [vmem:[#allocation378_spill] sm:$0xff] %v7449_v10  ;;  %v7474_v10 = vld [vmem:[%s12415_s12 + $0x618] sm:$0xff] }
 0x172   :  { %12785 = vst [vmem:[#allocation379_spill] sm:$0xff] %v7454_v2  ;;  %v7479_v2 = vld [vmem:[%s12415_s12 + $0x620] sm:$0xff] }
 0x173   :  { %12786 = vst [vmem:[#allocation380_spill] sm:$0xff] %v7459_v0  ;;  %v7484_v0 = vld [vmem:[%s12415_s12 + $0x628] sm:$0xff] }
 0x174   :  { %12787 = vst [vmem:[#allocation381_spill] sm:$0xff] %v7464_v32  ;;  %v7489_v32 = vld [vmem:[%s12415_s12 + $0x630] sm:$0xff] }
 0x175   :  { %12788 = vst [vmem:[#allocation382_spill] sm:$0xff] %v7469_v1  ;;  %v7494_v1 = vld [vmem:[%s12415_s12 + $0x638] sm:$0xff] }
 0x176   :  { %12789 = vst [vmem:[#allocation383_spill] sm:$0xff] %v7474_v10  ;;  %v7499_v10 = vld [vmem:[%s12415_s12 + $0x640] sm:$0xff] }
 0x177   :  { %12790 = vst [vmem:[#allocation384_spill] sm:$0xff] %v7479_v2  ;;  %v7504_v2 = vld [vmem:[%s12415_s12 + $0x648] sm:$0xff] }
 0x178   :  { %12791 = vst [vmem:[#allocation385_spill] sm:$0xff] %v7484_v0  ;;  %v7509_v0 = vld [vmem:[%s12415_s12 + $0x650] sm:$0xff] }
 0x179   :  { %12792 = vst [vmem:[#allocation386_spill] sm:$0xff] %v7489_v32  ;;  %v7514_v32 = vld [vmem:[%s12415_s12 + $0x658] sm:$0xff] }
 0x17a   :  { %12793 = vst [vmem:[#allocation387_spill] sm:$0xff] %v7494_v1  ;;  %v7519_v1 = vld [vmem:[%s12415_s12 + $0x660] sm:$0xff] }
 0x17b   :  { %12794 = vst [vmem:[#allocation388_spill] sm:$0xff] %v7499_v10  ;;  %v7524_v10 = vld [vmem:[%s12415_s12 + $0x668] sm:$0xff] }
 0x17c   :  { %12795 = vst [vmem:[#allocation389_spill] sm:$0xff] %v7504_v2  ;;  %v7529_v2 = vld [vmem:[%s12415_s12 + $0x670] sm:$0xff] }
 0x17d   :  { %12796 = vst [vmem:[#allocation390_spill] sm:$0xff] %v7509_v0  ;;  %v7534_v0 = vld [vmem:[%s12415_s12 + $0x678] sm:$0xff] }
 0x17e   :  { %12797 = vst [vmem:[#allocation391_spill] sm:$0xff] %v7514_v32  ;;  %v7539_v32 = vld [vmem:[%s12415_s12 + $0x680] sm:$0xff] }
 0x17f   :  { %12798 = vst [vmem:[#allocation392_spill] sm:$0xff] %v7519_v1  ;;  %v7544_v1 = vld [vmem:[%s12415_s12 + $0x688] sm:$0xff] }
 0x180   :  { %12799 = vst [vmem:[#allocation393_spill] sm:$0xff] %v7524_v10  ;;  %v7549_v10 = vld [vmem:[%s12415_s12 + $0x690] sm:$0xff] }
 0x181   :  { %12800 = vst [vmem:[#allocation394_spill] sm:$0xff] %v7529_v2  ;;  %v7554_v2 = vld [vmem:[%s12415_s12 + $0x698] sm:$0xff] }
 0x182   :  { %12801 = vst [vmem:[#allocation395_spill] sm:$0xff] %v7534_v0  ;;  %v7559_v0 = vld [vmem:[%s12415_s12 + $0x6a0] sm:$0xff] }
 0x183   :  { %12802 = vst [vmem:[#allocation396_spill] sm:$0xff] %v7539_v32  ;;  %v7564_v32 = vld [vmem:[%s12415_s12 + $0x6a8] sm:$0xff] }
 0x184   :  { %12803 = vst [vmem:[#allocation397_spill] sm:$0xff] %v7544_v1  ;;  %v7569_v1 = vld [vmem:[%s12415_s12 + $0x6b0] sm:$0xff] }
 0x185   :  { %12804 = vst [vmem:[#allocation398_spill] sm:$0xff] %v7549_v10  ;;  %v7574_v10 = vld [vmem:[%s12415_s12 + $0x6b8] sm:$0xff] }
 0x186   :  { %12805 = vst [vmem:[#allocation399_spill] sm:$0xff] %v7554_v2  ;;  %v7579_v2 = vld [vmem:[%s12415_s12 + $0x6c0] sm:$0xff] }
 0x187   :  { %12806 = vst [vmem:[#allocation400_spill] sm:$0xff] %v7559_v0  ;;  %v7584_v0 = vld [vmem:[%s12415_s12 + $0x6c8] sm:$0xff] }
 0x188   :  { %12807 = vst [vmem:[#allocation401_spill] sm:$0xff] %v7564_v32  ;;  %v7589_v32 = vld [vmem:[%s12415_s12 + $0x6d0] sm:$0xff] }
 0x189   :  { %12808 = vst [vmem:[#allocation402_spill] sm:$0xff] %v7569_v1  ;;  %v7594_v1 = vld [vmem:[%s12415_s12 + $0x6d8] sm:$0xff] }
 0x18a   :  { %12809 = vst [vmem:[#allocation403_spill] sm:$0xff] %v7574_v10  ;;  %v7599_v10 = vld [vmem:[%s12415_s12 + $0x6e0] sm:$0xff] }
 0x18b   :  { %12810 = vst [vmem:[#allocation404_spill] sm:$0xff] %v7579_v2  ;;  %v7604_v2 = vld [vmem:[%s12415_s12 + $0x6e8] sm:$0xff] }
 0x18c   :  { %12811 = vst [vmem:[#allocation405_spill] sm:$0xff] %v7584_v0  ;;  %v7609_v0 = vld [vmem:[%s12415_s12 + $0x6f0] sm:$0xff] }
 0x18d   :  { %12812 = vst [vmem:[#allocation406_spill] sm:$0xff] %v7589_v32  ;;  %v7614_v32 = vld [vmem:[%s12415_s12 + $0x6f8] sm:$0xff] }
 0x18e   :  { %12813 = vst [vmem:[#allocation407_spill] sm:$0xff] %v7594_v1  ;;  %v7619_v1 = vld [vmem:[%s12415_s12 + $0x700] sm:$0xff] }
 0x18f   :  { %12814 = vst [vmem:[#allocation408_spill] sm:$0xff] %v7599_v10  ;;  %v7624_v10 = vld [vmem:[%s12415_s12 + $0x708] sm:$0xff] }
 0x190   :  { %12815 = vst [vmem:[#allocation409_spill] sm:$0xff] %v7604_v2  ;;  %v7629_v2 = vld [vmem:[%s12415_s12 + $0x710] sm:$0xff] }
 0x191   :  { %12816 = vst [vmem:[#allocation410_spill] sm:$0xff] %v7609_v0  ;;  %v7634_v0 = vld [vmem:[%s12415_s12 + $0x718] sm:$0xff] }
 0x192   :  { %12817 = vst [vmem:[#allocation411_spill] sm:$0xff] %v7614_v32  ;;  %v7639_v32 = vld [vmem:[%s12415_s12 + $0x720] sm:$0xff] }
 0x193   :  { %12818 = vst [vmem:[#allocation412_spill] sm:$0xff] %v7619_v1  ;;  %v7644_v1 = vld [vmem:[%s12415_s12 + $0x728] sm:$0xff] }
 0x194   :  { %12819 = vst [vmem:[#allocation413_spill] sm:$0xff] %v7624_v10  ;;  %v7649_v10 = vld [vmem:[%s12415_s12 + $0x730] sm:$0xff] }
 0x195   :  { %12820 = vst [vmem:[#allocation414_spill] sm:$0xff] %v7629_v2  ;;  %v7654_v2 = vld [vmem:[%s12415_s12 + $0x738] sm:$0xff] }
 0x196   :  { %12821 = vst [vmem:[#allocation415_spill] sm:$0xff] %v7634_v0  ;;  %v7659_v0 = vld [vmem:[%s12415_s12 + $0x740] sm:$0xff] }
 0x197   :  { %12822 = vst [vmem:[#allocation416_spill] sm:$0xff] %v7639_v32  ;;  %v7664_v32 = vld [vmem:[%s12415_s12 + $0x748] sm:$0xff] }
 0x198   :  { %12823 = vst [vmem:[#allocation417_spill] sm:$0xff] %v7644_v1  ;;  %v7669_v1 = vld [vmem:[%s12415_s12 + $0x750] sm:$0xff] }
 0x199   :  { %12824 = vst [vmem:[#allocation418_spill] sm:$0xff] %v7649_v10  ;;  %v7674_v10 = vld [vmem:[%s12415_s12 + $0x758] sm:$0xff] }
 0x19a   :  { %12825 = vst [vmem:[#allocation419_spill] sm:$0xff] %v7654_v2  ;;  %v7679_v2 = vld [vmem:[%s12415_s12 + $0x760] sm:$0xff] }
 0x19b   :  { %12826 = vst [vmem:[#allocation420_spill] sm:$0xff] %v7659_v0  ;;  %v7684_v0 = vld [vmem:[%s12415_s12 + $0x768] sm:$0xff] }
 0x19c   :  { %12827 = vst [vmem:[#allocation421_spill] sm:$0xff] %v7664_v32  ;;  %v7689_v32 = vld [vmem:[%s12415_s12 + $0x770] sm:$0xff] }
 0x19d   :  { %12828 = vst [vmem:[#allocation422_spill] sm:$0xff] %v7669_v1  ;;  %v7694_v1 = vld [vmem:[%s12415_s12 + $0x778] sm:$0xff] }
 0x19e   :  { %12829 = vst [vmem:[#allocation423_spill] sm:$0xff] %v7674_v10  ;;  %v7699_v10 = vld [vmem:[%s12415_s12 + $0x780] sm:$0xff] }
 0x19f   :  { %12830 = vst [vmem:[#allocation424_spill] sm:$0xff] %v7679_v2  ;;  %v7704_v2 = vld [vmem:[%s12415_s12 + $0x788] sm:$0xff] }
 0x1a0   :  { %12831 = vst [vmem:[#allocation425_spill] sm:$0xff] %v7684_v0  ;;  %v7709_v0 = vld [vmem:[%s12415_s12 + $0x790] sm:$0xff] }
 0x1a1   :  { %12832 = vst [vmem:[#allocation426_spill] sm:$0xff] %v7689_v32  ;;  %v7714_v32 = vld [vmem:[%s12415_s12 + $0x798] sm:$0xff] }
 0x1a2   :  { %12833 = vst [vmem:[#allocation427_spill] sm:$0xff] %v7694_v1  ;;  %v7719_v1 = vld [vmem:[%s12415_s12 + $0x7a0] sm:$0xff] }
 0x1a3   :  { %12834 = vst [vmem:[#allocation428_spill] sm:$0xff] %v7699_v10  ;;  %v7724_v10 = vld [vmem:[%s12415_s12 + $0x7a8] sm:$0xff] }
 0x1a4   :  { %12835 = vst [vmem:[#allocation429_spill] sm:$0xff] %v7704_v2  ;;  %v7729_v2 = vld [vmem:[%s12415_s12 + $0x7b0] sm:$0xff] }
 0x1a5   :  { %12836 = vst [vmem:[#allocation430_spill] sm:$0xff] %v7709_v0  ;;  %v7734_v0 = vld [vmem:[%s12415_s12 + $0x7b8] sm:$0xff] }
 0x1a6   :  { %12837 = vst [vmem:[#allocation431_spill] sm:$0xff] %v7714_v32  ;;  %v7739_v32 = vld [vmem:[%s12415_s12 + $0x7c0] sm:$0xff] }
 0x1a7   :  { %12838 = vst [vmem:[#allocation432_spill] sm:$0xff] %v7719_v1  ;;  %v7744_v1 = vld [vmem:[%s12415_s12 + $0x7c8] sm:$0xff] }
 0x1a8   :  { %12839 = vst [vmem:[#allocation433_spill] sm:$0xff] %v7724_v10  ;;  %v7749_v10 = vld [vmem:[%s12415_s12 + $0x7d0] sm:$0xff] }
 0x1a9   :  { %12840 = vst [vmem:[#allocation434_spill] sm:$0xff] %v7729_v2  ;;  %v7754_v2 = vld [vmem:[%s12415_s12 + $0x7d8] sm:$0xff] }
 0x1aa   :  { %12841 = vst [vmem:[#allocation435_spill] sm:$0xff] %v7734_v0  ;;  %v7759_v0 = vld [vmem:[%s12415_s12 + $0x7e0] sm:$0xff] }
 0x1ab   :  { %12842 = vst [vmem:[#allocation436_spill] sm:$0xff] %v7739_v32  ;;  %v7764_v32 = vld [vmem:[%s12415_s12 + $0x7e8] sm:$0xff] }
 0x1ac   :  { %12843 = vst [vmem:[#allocation437_spill] sm:$0xff] %v7744_v1  ;;  %v7769_v1 = vld [vmem:[%s12415_s12 + $0x7f0] sm:$0xff] }
 0x1ad   :  { %12844 = vst [vmem:[#allocation438_spill] sm:$0xff] %v7749_v10  ;;  %v7774_v10 = vld [vmem:[%s12415_s12 + $0x7f8] sm:$0xff] }
 0x1ae   :  { %12845 = vst [vmem:[#allocation439_spill] sm:$0xff] %v7754_v2  ;;  %v7779_v2 = vld [vmem:[%s12415_s12 + $0x800] sm:$0xff] }
 0x1af   :  { %12846 = vst [vmem:[#allocation440_spill] sm:$0xff] %v7759_v0  ;;  %v7784_v0 = vld [vmem:[%s12415_s12 + $0x808] sm:$0xff] }
 0x1b0   :  { %12847 = vst [vmem:[#allocation441_spill] sm:$0xff] %v7764_v32  ;;  %v7789_v32 = vld [vmem:[%s12415_s12 + $0x810] sm:$0xff] }
 0x1b1   :  { %12848 = vst [vmem:[#allocation442_spill] sm:$0xff] %v7769_v1  ;;  %v7794_v1 = vld [vmem:[%s12415_s12 + $0x818] sm:$0xff] }
 0x1b2   :  { %12849 = vst [vmem:[#allocation443_spill] sm:$0xff] %v7774_v10  ;;  %v7799_v10 = vld [vmem:[%s12415_s12 + $0x820] sm:$0xff] }
 0x1b3   :  { %12850 = vst [vmem:[#allocation444_spill] sm:$0xff] %v7779_v2  ;;  %v7804_v2 = vld [vmem:[%s12415_s12 + $0x828] sm:$0xff] }
 0x1b4   :  { %12851 = vst [vmem:[#allocation445_spill] sm:$0xff] %v7784_v0  ;;  %v7809_v0 = vld [vmem:[%s12415_s12 + $0x830] sm:$0xff] }
 0x1b5   :  { %12852 = vst [vmem:[#allocation446_spill] sm:$0xff] %v7789_v32  ;;  %v7814_v32 = vld [vmem:[%s12415_s12 + $0x838] sm:$0xff] }
 0x1b6   :  { %12853 = vst [vmem:[#allocation447_spill] sm:$0xff] %v7794_v1  ;;  %v7819_v1 = vld [vmem:[%s12415_s12 + $0x840] sm:$0xff] }
 0x1b7   :  { %12854 = vst [vmem:[#allocation448_spill] sm:$0xff] %v7799_v10  ;;  %v7824_v10 = vld [vmem:[%s12415_s12 + $0x848] sm:$0xff] }
 0x1b8   :  { %12855 = vst [vmem:[#allocation449_spill] sm:$0xff] %v7804_v2  ;;  %v7829_v2 = vld [vmem:[%s12415_s12 + $0x850] sm:$0xff] }
 0x1b9   :  { %12856 = vst [vmem:[#allocation450_spill] sm:$0xff] %v7809_v0  ;;  %v7834_v0 = vld [vmem:[%s12415_s12 + $0x858] sm:$0xff] }
 0x1ba   :  { %12857 = vst [vmem:[#allocation451_spill] sm:$0xff] %v7814_v32  ;;  %v7839_v32 = vld [vmem:[%s12415_s12 + $0x860] sm:$0xff] }
 0x1bb   :  { %12858 = vst [vmem:[#allocation452_spill] sm:$0xff] %v7819_v1  ;;  %v7844_v1 = vld [vmem:[%s12415_s12 + $0x868] sm:$0xff] }
 0x1bc   :  { %12859 = vst [vmem:[#allocation453_spill] sm:$0xff] %v7824_v10  ;;  %v7849_v10 = vld [vmem:[%s12415_s12 + $0x870] sm:$0xff] }
 0x1bd   :  { %12860 = vst [vmem:[#allocation454_spill] sm:$0xff] %v7829_v2  ;;  %v7854_v2 = vld [vmem:[%s12415_s12 + $0x878] sm:$0xff] }
 0x1be   :  { %12861 = vst [vmem:[#allocation455_spill] sm:$0xff] %v7834_v0  ;;  %v7859_v0 = vld [vmem:[%s12415_s12 + $0x880] sm:$0xff] }
 0x1bf   :  { %12862 = vst [vmem:[#allocation456_spill] sm:$0xff] %v7839_v32  ;;  %v7864_v32 = vld [vmem:[%s12415_s12 + $0x888] sm:$0xff] }
 0x1c0   :  { %12863 = vst [vmem:[#allocation457_spill] sm:$0xff] %v7844_v1  ;;  %v7869_v1 = vld [vmem:[%s12415_s12 + $0x890] sm:$0xff] }
 0x1c1   :  { %12864 = vst [vmem:[#allocation458_spill] sm:$0xff] %v7849_v10  ;;  %v7874_v10 = vld [vmem:[%s12415_s12 + $0x898] sm:$0xff] }
 0x1c2   :  { %12865 = vst [vmem:[#allocation459_spill] sm:$0xff] %v7854_v2  ;;  %v7879_v2 = vld [vmem:[%s12415_s12 + $0x8a0] sm:$0xff] }
 0x1c3   :  { %12866 = vst [vmem:[#allocation460_spill] sm:$0xff] %v7859_v0  ;;  %v7884_v0 = vld [vmem:[%s12415_s12 + $0x8a8] sm:$0xff] }
 0x1c4   :  { %12867 = vst [vmem:[#allocation461_spill] sm:$0xff] %v7864_v32  ;;  %v7889_v32 = vld [vmem:[%s12415_s12 + $0x8b0] sm:$0xff] }
 0x1c5   :  { %12868 = vst [vmem:[#allocation462_spill] sm:$0xff] %v7869_v1  ;;  %v7894_v1 = vld [vmem:[%s12415_s12 + $0x8b8] sm:$0xff] }
 0x1c6   :  { %12869 = vst [vmem:[#allocation463_spill] sm:$0xff] %v7874_v10  ;;  %v7899_v10 = vld [vmem:[%s12415_s12 + $0x8c0] sm:$0xff] }
 0x1c7   :  { %12870 = vst [vmem:[#allocation464_spill] sm:$0xff] %v7879_v2  ;;  %v7904_v2 = vld [vmem:[%s12415_s12 + $0x8c8] sm:$0xff] }
 0x1c8   :  { %12871 = vst [vmem:[#allocation465_spill] sm:$0xff] %v7884_v0  ;;  %v7909_v0 = vld [vmem:[%s12415_s12 + $0x8d0] sm:$0xff] }
 0x1c9   :  { %12872 = vst [vmem:[#allocation466_spill] sm:$0xff] %v7889_v32  ;;  %v7914_v32 = vld [vmem:[%s12415_s12 + $0x8d8] sm:$0xff] }
 0x1ca   :  { %12873 = vst [vmem:[#allocation467_spill] sm:$0xff] %v7894_v1  ;;  %v7919_v1 = vld [vmem:[%s12415_s12 + $0x8e0] sm:$0xff] }
 0x1cb   :  { %12874 = vst [vmem:[#allocation468_spill] sm:$0xff] %v7899_v10  ;;  %v7924_v10 = vld [vmem:[%s12415_s12 + $0x8e8] sm:$0xff] }
 0x1cc   :  { %12875 = vst [vmem:[#allocation469_spill] sm:$0xff] %v7904_v2  ;;  %v7929_v2 = vld [vmem:[%s12415_s12 + $0x8f0] sm:$0xff] }
 0x1cd   :  { %12876 = vst [vmem:[#allocation470_spill] sm:$0xff] %v7909_v0  ;;  %v7934_v0 = vld [vmem:[%s12415_s12 + $0x8f8] sm:$0xff] }
 0x1ce   :  { %12877 = vst [vmem:[#allocation471_spill] sm:$0xff] %v7914_v32  ;;  %v7939_v32 = vld [vmem:[%s12415_s12 + $0x900] sm:$0xff] }
 0x1cf   :  { %12878 = vst [vmem:[#allocation472_spill] sm:$0xff] %v7919_v1  ;;  %v7944_v1 = vld [vmem:[%s12415_s12 + $0x908] sm:$0xff] }
 0x1d0   :  { %12879 = vst [vmem:[#allocation473_spill] sm:$0xff] %v7924_v10  ;;  %v7949_v10 = vld [vmem:[%s12415_s12 + $0x910] sm:$0xff] }
 0x1d1   :  { %12880 = vst [vmem:[#allocation474_spill] sm:$0xff] %v7929_v2  ;;  %v7954_v2 = vld [vmem:[%s12415_s12 + $0x918] sm:$0xff] }
 0x1d2   :  { %12881 = vst [vmem:[#allocation475_spill] sm:$0xff] %v7934_v0  ;;  %v7959_v0 = vld [vmem:[%s12415_s12 + $0x920] sm:$0xff] }
 0x1d3   :  { %12882 = vst [vmem:[#allocation476_spill] sm:$0xff] %v7939_v32  ;;  %v7964_v32 = vld [vmem:[%s12415_s12 + $0x928] sm:$0xff] }
 0x1d4   :  { %12883 = vst [vmem:[#allocation477_spill] sm:$0xff] %v7944_v1  ;;  %v7969_v1 = vld [vmem:[%s12415_s12 + $0x930] sm:$0xff] }
 0x1d5   :  { %12884 = vst [vmem:[#allocation478_spill] sm:$0xff] %v7949_v10  ;;  %v7974_v10 = vld [vmem:[%s12415_s12 + $0x938] sm:$0xff] }
 0x1d6   :  { %12885 = vst [vmem:[#allocation479_spill] sm:$0xff] %v7954_v2  ;;  %v7979_v2 = vld [vmem:[%s12415_s12 + $0x940] sm:$0xff] }
 0x1d7   :  { %12886 = vst [vmem:[#allocation480_spill] sm:$0xff] %v7959_v0  ;;  %v7984_v0 = vld [vmem:[%s12415_s12 + $0x948] sm:$0xff] }
 0x1d8   :  { %12887 = vst [vmem:[#allocation481_spill] sm:$0xff] %v7964_v32  ;;  %v7989_v32 = vld [vmem:[%s12415_s12 + $0x950] sm:$0xff] }
 0x1d9   :  { %12888 = vst [vmem:[#allocation482_spill] sm:$0xff] %v7969_v1  ;;  %v7994_v1 = vld [vmem:[%s12415_s12 + $0x958] sm:$0xff] }
 0x1da   :  { %12889 = vst [vmem:[#allocation483_spill] sm:$0xff] %v7974_v10  ;;  %v7999_v10 = vld [vmem:[%s12415_s12 + $0x960] sm:$0xff] }
 0x1db   :  { %12890 = vst [vmem:[#allocation484_spill] sm:$0xff] %v7979_v2  ;;  %v8004_v2 = vld [vmem:[%s12415_s12 + $0x968] sm:$0xff] }
 0x1dc   :  { %12891 = vst [vmem:[#allocation485_spill] sm:$0xff] %v7984_v0  ;;  %v8009_v0 = vld [vmem:[%s12415_s12 + $0x970] sm:$0xff] }
 0x1dd   :  { %12892 = vst [vmem:[#allocation486_spill] sm:$0xff] %v7989_v32  ;;  %v8014_v32 = vld [vmem:[%s12415_s12 + $0x978] sm:$0xff] }
 0x1de   :  { %12893 = vst [vmem:[#allocation487_spill] sm:$0xff] %v7994_v1  ;;  %v8019_v1 = vld [vmem:[%s12415_s12 + $0x980] sm:$0xff] }
 0x1df   :  { %12894 = vst [vmem:[#allocation488_spill] sm:$0xff] %v7999_v10  ;;  %v8024_v10 = vld [vmem:[%s12415_s12 + $0x988] sm:$0xff] }
 0x1e0   :  { %12895 = vst [vmem:[#allocation489_spill] sm:$0xff] %v8004_v2  ;;  %v8029_v2 = vld [vmem:[%s12415_s12 + $0x990] sm:$0xff] }
 0x1e1   :  { %12896 = vst [vmem:[#allocation490_spill] sm:$0xff] %v8009_v0  ;;  %v8034_v0 = vld [vmem:[%s12415_s12 + $0x998] sm:$0xff] }
 0x1e2   :  { %12897 = vst [vmem:[#allocation491_spill] sm:$0xff] %v8014_v32  ;;  %v8039_v32 = vld [vmem:[%s12415_s12 + $0x9a0] sm:$0xff] }
 0x1e3   :  { %12898 = vst [vmem:[#allocation492_spill] sm:$0xff] %v8019_v1  ;;  %v8044_v1 = vld [vmem:[%s12415_s12 + $0x9a8] sm:$0xff] }
 0x1e4   :  { %12899 = vst [vmem:[#allocation493_spill] sm:$0xff] %v8024_v10  ;;  %v8049_v10 = vld [vmem:[%s12415_s12 + $0x9b0] sm:$0xff] }
 0x1e5   :  { %12900 = vst [vmem:[#allocation494_spill] sm:$0xff] %v8029_v2  ;;  %v8054_v2 = vld [vmem:[%s12415_s12 + $0x9b8] sm:$0xff] }
 0x1e6   :  { %12901 = vst [vmem:[#allocation495_spill] sm:$0xff] %v8034_v0  ;;  %v8059_v0 = vld [vmem:[%s12415_s12 + $0x9c0] sm:$0xff] }
 0x1e7   :  { %12902 = vst [vmem:[#allocation496_spill] sm:$0xff] %v8039_v32  ;;  %v8064_v32 = vld [vmem:[%s12415_s12 + $0x9c8] sm:$0xff] }
 0x1e8   :  { %12903 = vst [vmem:[#allocation497_spill] sm:$0xff] %v8044_v1  ;;  %v8069_v1 = vld [vmem:[%s12415_s12 + $0x9d0] sm:$0xff] }
 0x1e9   :  { %12904 = vst [vmem:[#allocation498_spill] sm:$0xff] %v8049_v10  ;;  %v8074_v10 = vld [vmem:[%s12415_s12 + $0x9d8] sm:$0xff] }
 0x1ea   :  { %12905 = vst [vmem:[#allocation499_spill] sm:$0xff] %v8054_v2  ;;  %v8079_v2 = vld [vmem:[%s12415_s12 + $0x9e0] sm:$0xff] }
 0x1eb   :  { %12906 = vst [vmem:[#allocation500_spill] sm:$0xff] %v8059_v0  ;;  %v8084_v0 = vld [vmem:[%s12415_s12 + $0x9e8] sm:$0xff] }
 0x1ec   :  { %12907 = vst [vmem:[#allocation501_spill] sm:$0xff] %v8064_v32  ;;  %v8089_v32 = vld [vmem:[%s12415_s12 + $0x9f0] sm:$0xff] }
 0x1ed   :  { %12908 = vst [vmem:[#allocation502_spill] sm:$0xff] %v8069_v1  ;;  %v8094_v1 = vld [vmem:[%s12415_s12 + $0x9f8] sm:$0xff] }
 0x1ee   :  { %12909 = vst [vmem:[#allocation503_spill] sm:$0xff] %v8074_v10  ;;  %v8099_v10 = vld [vmem:[%s12415_s12 + $0xa00] sm:$0xff] }
 0x1ef   :  { %12910 = vst [vmem:[#allocation504_spill] sm:$0xff] %v8079_v2  ;;  %v8104_v2 = vld [vmem:[%s12415_s12 + $0xa08] sm:$0xff] }
 0x1f0   :  { %12911 = vst [vmem:[#allocation505_spill] sm:$0xff] %v8084_v0  ;;  %v8109_v0 = vld [vmem:[%s12415_s12 + $0xa10] sm:$0xff] }
 0x1f1   :  { %12912 = vst [vmem:[#allocation506_spill] sm:$0xff] %v8089_v32  ;;  %v8114_v32 = vld [vmem:[%s12415_s12 + $0xa18] sm:$0xff] }
 0x1f2   :  { %12913 = vst [vmem:[#allocation507_spill] sm:$0xff] %v8094_v1  ;;  %v8119_v1 = vld [vmem:[%s12415_s12 + $0xa20] sm:$0xff] }
 0x1f3   :  { %12914 = vst [vmem:[#allocation508_spill] sm:$0xff] %v8099_v10  ;;  %v8124_v10 = vld [vmem:[%s12415_s12 + $0xa28] sm:$0xff] }
 0x1f4   :  { %12915 = vst [vmem:[#allocation509_spill] sm:$0xff] %v8104_v2  ;;  %v8129_v2 = vld [vmem:[%s12415_s12 + $0xa30] sm:$0xff] }
 0x1f5   :  { %12916 = vst [vmem:[#allocation510_spill] sm:$0xff] %v8109_v0  ;;  %v8134_v0 = vld [vmem:[%s12415_s12 + $0xa38] sm:$0xff] }
 0x1f6   :  { %12917 = vst [vmem:[#allocation511_spill] sm:$0xff] %v8114_v32  ;;  %v8139_v32 = vld [vmem:[%s12415_s12 + $0xa40] sm:$0xff] }
 0x1f7   :  { %12918 = vst [vmem:[#allocation512_spill] sm:$0xff] %v8119_v1  ;;  %v8144_v1 = vld [vmem:[%s12415_s12 + $0xa48] sm:$0xff] }
 0x1f8   :  { %12919 = vst [vmem:[#allocation513_spill] sm:$0xff] %v8124_v10  ;;  %v8149_v10 = vld [vmem:[%s12415_s12 + $0xa50] sm:$0xff] }
 0x1f9   :  { %12920 = vst [vmem:[#allocation514_spill] sm:$0xff] %v8129_v2  ;;  %v8154_v2 = vld [vmem:[%s12415_s12 + $0xa58] sm:$0xff] }
 0x1fa   :  { %12921 = vst [vmem:[#allocation515_spill] sm:$0xff] %v8134_v0  ;;  %v8159_v0 = vld [vmem:[%s12415_s12 + $0xa60] sm:$0xff] }
 0x1fb   :  { %12922 = vst [vmem:[#allocation516_spill] sm:$0xff] %v8139_v32  ;;  %v8164_v32 = vld [vmem:[%s12415_s12 + $0xa68] sm:$0xff] }
 0x1fc   :  { %12923 = vst [vmem:[#allocation517_spill] sm:$0xff] %v8144_v1  ;;  %v8169_v1 = vld [vmem:[%s12415_s12 + $0xa70] sm:$0xff] }
 0x1fd   :  { %12924 = vst [vmem:[#allocation518_spill] sm:$0xff] %v8149_v10  ;;  %v8174_v10 = vld [vmem:[%s12415_s12 + $0xa78] sm:$0xff] }
 0x1fe   :  { %12925 = vst [vmem:[#allocation519_spill] sm:$0xff] %v8154_v2  ;;  %v8179_v2 = vld [vmem:[%s12415_s12 + $0xa80] sm:$0xff] }
 0x1ff   :  { %12926 = vst [vmem:[#allocation520_spill] sm:$0xff] %v8159_v0  ;;  %v8184_v0 = vld [vmem:[%s12415_s12 + $0xa88] sm:$0xff] }
 0x200   :  { %12927 = vst [vmem:[#allocation521_spill] sm:$0xff] %v8164_v32  ;;  %v8189_v32 = vld [vmem:[%s12415_s12 + $0xa90] sm:$0xff] }
 0x201   :  { %12928 = vst [vmem:[#allocation522_spill] sm:$0xff] %v8169_v1  ;;  %v8194_v1 = vld [vmem:[%s12415_s12 + $0xa98] sm:$0xff] }
 0x202   :  { %12929 = vst [vmem:[#allocation523_spill] sm:$0xff] %v8174_v10  ;;  %v8199_v10 = vld [vmem:[%s12415_s12 + $0xaa0] sm:$0xff] }
 0x203   :  { %12930 = vst [vmem:[#allocation524_spill] sm:$0xff] %v8179_v2  ;;  %v8204_v2 = vld [vmem:[%s12415_s12 + $0xaa8] sm:$0xff] }
 0x204   :  { %12931 = vst [vmem:[#allocation525_spill] sm:$0xff] %v8184_v0  ;;  %v8209_v0 = vld [vmem:[%s12415_s12 + $0xab0] sm:$0xff] }
 0x205   :  { %12932 = vst [vmem:[#allocation526_spill] sm:$0xff] %v8189_v32  ;;  %v8214_v32 = vld [vmem:[%s12415_s12 + $0xab8] sm:$0xff] }
 0x206   :  { %12933 = vst [vmem:[#allocation527_spill] sm:$0xff] %v8194_v1  ;;  %v8219_v1 = vld [vmem:[%s12415_s12 + $0xac0] sm:$0xff] }
 0x207   :  { %12934 = vst [vmem:[#allocation528_spill] sm:$0xff] %v8199_v10  ;;  %v8224_v10 = vld [vmem:[%s12415_s12 + $0xac8] sm:$0xff] }
 0x208   :  { %12935 = vst [vmem:[#allocation529_spill] sm:$0xff] %v8204_v2  ;;  %v8229_v2 = vld [vmem:[%s12415_s12 + $0xad0] sm:$0xff] }
 0x209   :  { %12936 = vst [vmem:[#allocation530_spill] sm:$0xff] %v8209_v0  ;;  %v8234_v0 = vld [vmem:[%s12415_s12 + $0xad8] sm:$0xff] }
 0x20a   :  { %12937 = vst [vmem:[#allocation531_spill] sm:$0xff] %v8214_v32  ;;  %v8239_v32 = vld [vmem:[%s12415_s12 + $0xae0] sm:$0xff] }
 0x20b   :  { %12938 = vst [vmem:[#allocation532_spill] sm:$0xff] %v8219_v1  ;;  %v8244_v1 = vld [vmem:[%s12415_s12 + $0xae8] sm:$0xff] }
 0x20c   :  { %12939 = vst [vmem:[#allocation533_spill] sm:$0xff] %v8224_v10  ;;  %v8249_v10 = vld [vmem:[%s12415_s12 + $0xaf0] sm:$0xff] }
 0x20d   :  { %12940 = vst [vmem:[#allocation534_spill] sm:$0xff] %v8229_v2  ;;  %v8254_v2 = vld [vmem:[%s12415_s12 + $0xaf8] sm:$0xff] }
 0x20e   :  { %12941 = vst [vmem:[#allocation535_spill] sm:$0xff] %v8234_v0  ;;  %v8259_v0 = vld [vmem:[%s12415_s12 + $0xb00] sm:$0xff] }
 0x20f   :  { %12942 = vst [vmem:[#allocation536_spill] sm:$0xff] %v8239_v32  ;;  %v8264_v32 = vld [vmem:[%s12415_s12 + $0xb08] sm:$0xff] }
 0x210   :  { %12943 = vst [vmem:[#allocation537_spill] sm:$0xff] %v8244_v1  ;;  %v8269_v1 = vld [vmem:[%s12415_s12 + $0xb10] sm:$0xff] }
 0x211   :  { %12944 = vst [vmem:[#allocation538_spill] sm:$0xff] %v8249_v10  ;;  %v8274_v10 = vld [vmem:[%s12415_s12 + $0xb18] sm:$0xff] }
 0x212   :  { %12945 = vst [vmem:[#allocation539_spill] sm:$0xff] %v8254_v2  ;;  %v8279_v2 = vld [vmem:[%s12415_s12 + $0xb20] sm:$0xff] }
 0x213   :  { %12946 = vst [vmem:[#allocation540_spill] sm:$0xff] %v8259_v0  ;;  %v8284_v0 = vld [vmem:[%s12415_s12 + $0xb28] sm:$0xff] }
 0x214   :  { %12947 = vst [vmem:[#allocation541_spill] sm:$0xff] %v8264_v32  ;;  %v8289_v32 = vld [vmem:[%s12415_s12 + $0xb30] sm:$0xff] }
 0x215   :  { %12948 = vst [vmem:[#allocation542_spill] sm:$0xff] %v8269_v1  ;;  %v8294_v1 = vld [vmem:[%s12415_s12 + $0xb38] sm:$0xff] }
 0x216   :  { %12949 = vst [vmem:[#allocation543_spill] sm:$0xff] %v8274_v10  ;;  %v8299_v10 = vld [vmem:[%s12415_s12 + $0xb40] sm:$0xff] }
 0x217   :  { %12950 = vst [vmem:[#allocation544_spill] sm:$0xff] %v8279_v2  ;;  %v8304_v2 = vld [vmem:[%s12415_s12 + $0xb48] sm:$0xff] }
 0x218   :  { %12951 = vst [vmem:[#allocation545_spill] sm:$0xff] %v8284_v0  ;;  %v8309_v0 = vld [vmem:[%s12415_s12 + $0xb50] sm:$0xff] }
 0x219   :  { %12952 = vst [vmem:[#allocation546_spill] sm:$0xff] %v8289_v32  ;;  %v8314_v32 = vld [vmem:[%s12415_s12 + $0xb58] sm:$0xff] }
 0x21a   :  { %12953 = vst [vmem:[#allocation547_spill] sm:$0xff] %v8294_v1  ;;  %v8319_v1 = vld [vmem:[%s12415_s12 + $0xb60] sm:$0xff] }
 0x21b   :  { %12954 = vst [vmem:[#allocation548_spill] sm:$0xff] %v8299_v10  ;;  %v8324_v10 = vld [vmem:[%s12415_s12 + $0xb68] sm:$0xff] }
 0x21c   :  { %12955 = vst [vmem:[#allocation549_spill] sm:$0xff] %v8304_v2  ;;  %v8329_v2 = vld [vmem:[%s12415_s12 + $0xb70] sm:$0xff] }
 0x21d   :  { %12956 = vst [vmem:[#allocation550_spill] sm:$0xff] %v8309_v0  ;;  %v8334_v0 = vld [vmem:[%s12415_s12 + $0xb78] sm:$0xff] }
 0x21e   :  { %12957 = vst [vmem:[#allocation551_spill] sm:$0xff] %v8314_v32  ;;  %v8339_v32 = vld [vmem:[%s12415_s12 + $0xb80] sm:$0xff] }
 0x21f   :  { %12958 = vst [vmem:[#allocation552_spill] sm:$0xff] %v8319_v1  ;;  %v8344_v1 = vld [vmem:[%s12415_s12 + $0xb88] sm:$0xff] }
 0x220   :  { %12959 = vst [vmem:[#allocation553_spill] sm:$0xff] %v8324_v10  ;;  %v8349_v10 = vld [vmem:[%s12415_s12 + $0xb90] sm:$0xff] }
 0x221   :  { %12960 = vst [vmem:[#allocation554_spill] sm:$0xff] %v8329_v2  ;;  %v8354_v2 = vld [vmem:[%s12415_s12 + $0xb98] sm:$0xff] }
 0x222   :  { %12961 = vst [vmem:[#allocation555_spill] sm:$0xff] %v8334_v0  ;;  %v8359_v0 = vld [vmem:[%s12415_s12 + $0xba0] sm:$0xff] }
 0x223   :  { %12962 = vst [vmem:[#allocation556_spill] sm:$0xff] %v8339_v32  ;;  %v8364_v32 = vld [vmem:[%s12415_s12 + $0xba8] sm:$0xff] }
 0x224   :  { %12963 = vst [vmem:[#allocation557_spill] sm:$0xff] %v8344_v1  ;;  %v8369_v1 = vld [vmem:[%s12415_s12 + $0xbb0] sm:$0xff] }
 0x225   :  { %12964 = vst [vmem:[#allocation558_spill] sm:$0xff] %v8349_v10  ;;  %v8374_v10 = vld [vmem:[%s12415_s12 + $0xbb8] sm:$0xff] }
 0x226   :  { %12965 = vst [vmem:[#allocation559_spill] sm:$0xff] %v8354_v2  ;;  %v8379_v2 = vld [vmem:[%s12415_s12 + $0xbc0] sm:$0xff] }
 0x227   :  { %12966 = vst [vmem:[#allocation560_spill] sm:$0xff] %v8359_v0  ;;  %v8384_v0 = vld [vmem:[%s12415_s12 + $0xbc8] sm:$0xff] }
 0x228   :  { %12967 = vst [vmem:[#allocation561_spill] sm:$0xff] %v8364_v32  ;;  %v8389_v32 = vld [vmem:[%s12415_s12 + $0xbd0] sm:$0xff] }
 0x229   :  { %12968 = vst [vmem:[#allocation562_spill] sm:$0xff] %v8369_v1  ;;  %v8394_v1 = vld [vmem:[%s12415_s12 + $0xbd8] sm:$0xff] }
 0x22a   :  { %12969 = vst [vmem:[#allocation563_spill] sm:$0xff] %v8374_v10  ;;  %v8399_v10 = vld [vmem:[%s12415_s12 + $0xbe0] sm:$0xff] }
 0x22b   :  { %12970 = vst [vmem:[#allocation564_spill] sm:$0xff] %v8379_v2  ;;  %v8404_v2 = vld [vmem:[%s12415_s12 + $0xbe8] sm:$0xff] }
 0x22c   :  { %12971 = vst [vmem:[#allocation565_spill] sm:$0xff] %v8384_v0  ;;  %v8409_v0 = vld [vmem:[%s12415_s12 + $0xbf0] sm:$0xff] }
 0x22d   :  { %12972 = vst [vmem:[#allocation566_spill] sm:$0xff] %v8389_v32  ;;  %v8414_v32 = vld [vmem:[%s12415_s12 + $0xbf8] sm:$0xff] }
 0x22e   :  { %12973 = vst [vmem:[#allocation567_spill] sm:$0xff] %v8394_v1  ;;  %v8419_v1 = vld [vmem:[%s12415_s12 + $0xc00] sm:$0xff] }
 0x22f   :  { %12974 = vst [vmem:[#allocation568_spill] sm:$0xff] %v8399_v10  ;;  %v8424_v10 = vld [vmem:[%s12415_s12 + $0xc08] sm:$0xff] }
 0x230   :  { %12975 = vst [vmem:[#allocation569_spill] sm:$0xff] %v8404_v2  ;;  %v8429_v2 = vld [vmem:[%s12415_s12 + $0xc10] sm:$0xff] }
 0x231   :  { %12976 = vst [vmem:[#allocation570_spill] sm:$0xff] %v8409_v0  ;;  %v8434_v0 = vld [vmem:[%s12415_s12 + $0xc18] sm:$0xff] }
 0x232   :  { %12977 = vst [vmem:[#allocation571_spill] sm:$0xff] %v8414_v32  ;;  %v8439_v32 = vld [vmem:[%s12415_s12 + $0xc20] sm:$0xff] }
 0x233   :  { %12978 = vst [vmem:[#allocation572_spill] sm:$0xff] %v8419_v1  ;;  %v8444_v1 = vld [vmem:[%s12415_s12 + $0xc28] sm:$0xff] }
 0x234   :  { %12979 = vst [vmem:[#allocation573_spill] sm:$0xff] %v8424_v10  ;;  %v8449_v10 = vld [vmem:[%s12415_s12 + $0xc30] sm:$0xff] }
 0x235   :  { %12980 = vst [vmem:[#allocation574_spill] sm:$0xff] %v8429_v2  ;;  %v8454_v2 = vld [vmem:[%s12415_s12 + $0xc38] sm:$0xff] }
 0x236   :  { %12981 = vst [vmem:[#allocation575_spill] sm:$0xff] %v8434_v0  ;;  %v8459_v0 = vld [vmem:[%s12415_s12 + $0xc40] sm:$0xff] }
 0x237   :  { %12982 = vst [vmem:[#allocation576_spill] sm:$0xff] %v8439_v32  ;;  %v8464_v32 = vld [vmem:[%s12415_s12 + $0xc48] sm:$0xff] }
 0x238   :  { %12983 = vst [vmem:[#allocation577_spill] sm:$0xff] %v8444_v1  ;;  %v8469_v1 = vld [vmem:[%s12415_s12 + $0xc50] sm:$0xff] }
 0x239   :  { %12984 = vst [vmem:[#allocation578_spill] sm:$0xff] %v8449_v10  ;;  %v8474_v10 = vld [vmem:[%s12415_s12 + $0xc58] sm:$0xff] }
 0x23a   :  { %12985 = vst [vmem:[#allocation579_spill] sm:$0xff] %v8454_v2  ;;  %v8479_v2 = vld [vmem:[%s12415_s12 + $0xc60] sm:$0xff] }
 0x23b   :  { %12986 = vst [vmem:[#allocation580_spill] sm:$0xff] %v8459_v0  ;;  %v8484_v0 = vld [vmem:[%s12415_s12 + $0xc68] sm:$0xff] }
 0x23c   :  { %12987 = vst [vmem:[#allocation581_spill] sm:$0xff] %v8464_v32  ;;  %v8489_v32 = vld [vmem:[%s12415_s12 + $0xc70] sm:$0xff] }
 0x23d   :  { %12988 = vst [vmem:[#allocation582_spill] sm:$0xff] %v8469_v1  ;;  %v8494_v1 = vld [vmem:[%s12415_s12 + $0xc78] sm:$0xff] }
 0x23e   :  { %12989 = vst [vmem:[#allocation583_spill] sm:$0xff] %v8474_v10  ;;  %v8499_v10 = vld [vmem:[%s12415_s12 + $0xc80] sm:$0xff] }
 0x23f   :  { %12990 = vst [vmem:[#allocation584_spill] sm:$0xff] %v8479_v2  ;;  %v8504_v2 = vld [vmem:[%s12415_s12 + $0xc88] sm:$0xff] }
 0x240   :  { %12991 = vst [vmem:[#allocation585_spill] sm:$0xff] %v8484_v0  ;;  %v8509_v0 = vld [vmem:[%s12415_s12 + $0xc90] sm:$0xff] }
 0x241   :  { %12992 = vst [vmem:[#allocation586_spill] sm:$0xff] %v8489_v32  ;;  %v8514_v32 = vld [vmem:[%s12415_s12 + $0xc98] sm:$0xff] }
 0x242   :  { %12993 = vst [vmem:[#allocation587_spill] sm:$0xff] %v8494_v1  ;;  %v8519_v1 = vld [vmem:[%s12415_s12 + $0xca0] sm:$0xff] }
 0x243   :  { %12994 = vst [vmem:[#allocation588_spill] sm:$0xff] %v8499_v10  ;;  %v8524_v10 = vld [vmem:[%s12415_s12 + $0xca8] sm:$0xff] }
 0x244   :  { %12995 = vst [vmem:[#allocation589_spill] sm:$0xff] %v8504_v2  ;;  %v8529_v2 = vld [vmem:[%s12415_s12 + $0xcb0] sm:$0xff] }
 0x245   :  { %12996 = vst [vmem:[#allocation590_spill] sm:$0xff] %v8509_v0  ;;  %v8534_v0 = vld [vmem:[%s12415_s12 + $0xcb8] sm:$0xff] }
 0x246   :  { %12997 = vst [vmem:[#allocation591_spill] sm:$0xff] %v8514_v32  ;;  %v8539_v32 = vld [vmem:[%s12415_s12 + $0xcc0] sm:$0xff] }
 0x247   :  { %12998 = vst [vmem:[#allocation592_spill] sm:$0xff] %v8519_v1  ;;  %v8544_v1 = vld [vmem:[%s12415_s12 + $0xcc8] sm:$0xff] }
 0x248   :  { %12999 = vst [vmem:[#allocation593_spill] sm:$0xff] %v8524_v10  ;;  %v8549_v10 = vld [vmem:[%s12415_s12 + $0xcd0] sm:$0xff] }
 0x249   :  { %13000 = vst [vmem:[#allocation594_spill] sm:$0xff] %v8529_v2  ;;  %v8554_v2 = vld [vmem:[%s12415_s12 + $0xcd8] sm:$0xff] }
 0x24a   :  { %13001 = vst [vmem:[#allocation595_spill] sm:$0xff] %v8534_v0  ;;  %v8559_v0 = vld [vmem:[%s12415_s12 + $0xce0] sm:$0xff] }
 0x24b   :  { %13002 = vst [vmem:[#allocation596_spill] sm:$0xff] %v8539_v32  ;;  %v8564_v32 = vld [vmem:[%s12415_s12 + $0xce8] sm:$0xff] }
 0x24c   :  { %13003 = vst [vmem:[#allocation597_spill] sm:$0xff] %v8544_v1  ;;  %v8569_v1 = vld [vmem:[%s12415_s12 + $0xcf0] sm:$0xff] }
 0x24d   :  { %13004 = vst [vmem:[#allocation598_spill] sm:$0xff] %v8549_v10  ;;  %v8574_v10 = vld [vmem:[%s12415_s12 + $0xcf8] sm:$0xff] }
 0x24e   :  { %13005 = vst [vmem:[#allocation599_spill] sm:$0xff] %v8554_v2  ;;  %v8579_v2 = vld [vmem:[%s12415_s12 + $0xd00] sm:$0xff] }
 0x24f   :  { %13006 = vst [vmem:[#allocation600_spill] sm:$0xff] %v8559_v0  ;;  %v8584_v0 = vld [vmem:[%s12415_s12 + $0xd08] sm:$0xff] }
 0x250   :  { %13007 = vst [vmem:[#allocation601_spill] sm:$0xff] %v8564_v32  ;;  %v8589_v32 = vld [vmem:[%s12415_s12 + $0xd10] sm:$0xff] }
 0x251   :  { %13008 = vst [vmem:[#allocation602_spill] sm:$0xff] %v8569_v1  ;;  %v8594_v1 = vld [vmem:[%s12415_s12 + $0xd18] sm:$0xff] }
 0x252   :  { %13009 = vst [vmem:[#allocation603_spill] sm:$0xff] %v8574_v10  ;;  %v8599_v10 = vld [vmem:[%s12415_s12 + $0xd20] sm:$0xff] }
 0x253   :  { %13010 = vst [vmem:[#allocation604_spill] sm:$0xff] %v8579_v2  ;;  %v8604_v2 = vld [vmem:[%s12415_s12 + $0xd28] sm:$0xff] }
 0x254   :  { %13011 = vst [vmem:[#allocation605_spill] sm:$0xff] %v8584_v0  ;;  %v8609_v0 = vld [vmem:[%s12415_s12 + $0xd30] sm:$0xff] }
 0x255   :  { %13012 = vst [vmem:[#allocation606_spill] sm:$0xff] %v8589_v32  ;;  %v8614_v32 = vld [vmem:[%s12415_s12 + $0xd38] sm:$0xff] }
 0x256   :  { %13013 = vst [vmem:[#allocation607_spill] sm:$0xff] %v8594_v1  ;;  %v8619_v1 = vld [vmem:[%s12415_s12 + $0xd40] sm:$0xff] }
 0x257   :  { %13014 = vst [vmem:[#allocation608_spill] sm:$0xff] %v8599_v10  ;;  %v8624_v10 = vld [vmem:[%s12415_s12 + $0xd48] sm:$0xff] }
 0x258   :  { %13015 = vst [vmem:[#allocation609_spill] sm:$0xff] %v8604_v2  ;;  %v8629_v2 = vld [vmem:[%s12415_s12 + $0xd50] sm:$0xff] }
 0x259   :  { %13016 = vst [vmem:[#allocation610_spill] sm:$0xff] %v8609_v0  ;;  %v8634_v0 = vld [vmem:[%s12415_s12 + $0xd58] sm:$0xff] }
 0x25a   :  { %13017 = vst [vmem:[#allocation611_spill] sm:$0xff] %v8614_v32  ;;  %v8639_v32 = vld [vmem:[%s12415_s12 + $0xd60] sm:$0xff] }
 0x25b   :  { %13018 = vst [vmem:[#allocation612_spill] sm:$0xff] %v8619_v1  ;;  %v8644_v1 = vld [vmem:[%s12415_s12 + $0xd68] sm:$0xff] }
 0x25c   :  { %13019 = vst [vmem:[#allocation613_spill] sm:$0xff] %v8624_v10  ;;  %v8649_v10 = vld [vmem:[%s12415_s12 + $0xd70] sm:$0xff] }
 0x25d   :  { %13020 = vst [vmem:[#allocation614_spill] sm:$0xff] %v8629_v2  ;;  %v8654_v2 = vld [vmem:[%s12415_s12 + $0xd78] sm:$0xff] }
 0x25e   :  { %13021 = vst [vmem:[#allocation615_spill] sm:$0xff] %v8634_v0  ;;  %v8659_v0 = vld [vmem:[%s12415_s12 + $0xd80] sm:$0xff] }
 0x25f   :  { %13022 = vst [vmem:[#allocation616_spill] sm:$0xff] %v8639_v32  ;;  %v8664_v32 = vld [vmem:[%s12415_s12 + $0xd88] sm:$0xff] }
 0x260   :  { %13023 = vst [vmem:[#allocation617_spill] sm:$0xff] %v8644_v1  ;;  %v8669_v1 = vld [vmem:[%s12415_s12 + $0xd90] sm:$0xff] }
 0x261   :  { %13024 = vst [vmem:[#allocation618_spill] sm:$0xff] %v8649_v10  ;;  %v8674_v10 = vld [vmem:[%s12415_s12 + $0xd98] sm:$0xff] }
 0x262   :  { %13025 = vst [vmem:[#allocation619_spill] sm:$0xff] %v8654_v2  ;;  %v8679_v2 = vld [vmem:[%s12415_s12 + $0xda0] sm:$0xff] }
 0x263   :  { %13026 = vst [vmem:[#allocation620_spill] sm:$0xff] %v8659_v0  ;;  %v8684_v0 = vld [vmem:[%s12415_s12 + $0xda8] sm:$0xff] }
 0x264   :  { %13027 = vst [vmem:[#allocation621_spill] sm:$0xff] %v8664_v32  ;;  %v8689_v32 = vld [vmem:[%s12415_s12 + $0xdb0] sm:$0xff] }
 0x265   :  { %13028 = vst [vmem:[#allocation622_spill] sm:$0xff] %v8669_v1  ;;  %v8694_v1 = vld [vmem:[%s12415_s12 + $0xdb8] sm:$0xff] }
 0x266   :  { %13029 = vst [vmem:[#allocation623_spill] sm:$0xff] %v8674_v10  ;;  %v8699_v10 = vld [vmem:[%s12415_s12 + $0xdc0] sm:$0xff] }
 0x267   :  { %13030 = vst [vmem:[#allocation624_spill] sm:$0xff] %v8679_v2  ;;  %v8704_v2 = vld [vmem:[%s12415_s12 + $0xdc8] sm:$0xff] }
 0x268   :  { %13031 = vst [vmem:[#allocation625_spill] sm:$0xff] %v8684_v0  ;;  %v8709_v0 = vld [vmem:[%s12415_s12 + $0xdd0] sm:$0xff] }
 0x269   :  { %13032 = vst [vmem:[#allocation626_spill] sm:$0xff] %v8689_v32  ;;  %v8714_v32 = vld [vmem:[%s12415_s12 + $0xdd8] sm:$0xff] }
 0x26a   :  { %13033 = vst [vmem:[#allocation627_spill] sm:$0xff] %v8694_v1  ;;  %v8719_v1 = vld [vmem:[%s12415_s12 + $0xde0] sm:$0xff] }
 0x26b   :  { %13034 = vst [vmem:[#allocation628_spill] sm:$0xff] %v8699_v10  ;;  %v8724_v10 = vld [vmem:[%s12415_s12 + $0xde8] sm:$0xff] }
 0x26c   :  { %13035 = vst [vmem:[#allocation629_spill] sm:$0xff] %v8704_v2  ;;  %v8729_v2 = vld [vmem:[%s12415_s12 + $0xdf0] sm:$0xff] }
 0x26d   :  { %13036 = vst [vmem:[#allocation630_spill] sm:$0xff] %v8709_v0  ;;  %v8734_v0 = vld [vmem:[%s12415_s12 + $0xdf8] sm:$0xff] }
 0x26e   :  { %13037 = vst [vmem:[#allocation631_spill] sm:$0xff] %v8714_v32  ;;  %v8739_v32 = vld [vmem:[%s12415_s12 + $0xe00] sm:$0xff] }
 0x26f   :  { %13038 = vst [vmem:[#allocation632_spill] sm:$0xff] %v8719_v1  ;;  %v8744_v1 = vld [vmem:[%s12415_s12 + $0xe08] sm:$0xff] }
 0x270   :  { %13039 = vst [vmem:[#allocation633_spill] sm:$0xff] %v8724_v10  ;;  %v8749_v10 = vld [vmem:[%s12415_s12 + $0xe10] sm:$0xff] }
 0x271   :  { %13040 = vst [vmem:[#allocation634_spill] sm:$0xff] %v8729_v2  ;;  %v8754_v2 = vld [vmem:[%s12415_s12 + $0xe18] sm:$0xff] }
 0x272   :  { %13041 = vst [vmem:[#allocation635_spill] sm:$0xff] %v8734_v0  ;;  %v8759_v0 = vld [vmem:[%s12415_s12 + $0xe20] sm:$0xff] }
 0x273   :  { %13042 = vst [vmem:[#allocation636_spill] sm:$0xff] %v8739_v32  ;;  %v8764_v32 = vld [vmem:[%s12415_s12 + $0xe28] sm:$0xff] }
 0x274   :  { %13043 = vst [vmem:[#allocation637_spill] sm:$0xff] %v8744_v1  ;;  %v8769_v1 = vld [vmem:[%s12415_s12 + $0xe30] sm:$0xff] }
 0x275   :  { %13044 = vst [vmem:[#allocation638_spill] sm:$0xff] %v8749_v10  ;;  %v8774_v10 = vld [vmem:[%s12415_s12 + $0xe38] sm:$0xff] }
 0x276   :  { %13045 = vst [vmem:[#allocation639_spill] sm:$0xff] %v8754_v2  ;;  %v8779_v2 = vld [vmem:[%s12415_s12 + $0xe40] sm:$0xff] }
 0x277   :  { %13046 = vst [vmem:[#allocation640_spill] sm:$0xff] %v8759_v0  ;;  %v8784_v0 = vld [vmem:[%s12415_s12 + $0xe48] sm:$0xff] }
 0x278   :  { %13047 = vst [vmem:[#allocation641_spill] sm:$0xff] %v8764_v32  ;;  %v8789_v32 = vld [vmem:[%s12415_s12 + $0xe50] sm:$0xff] }
 0x279   :  { %13048 = vst [vmem:[#allocation642_spill] sm:$0xff] %v8769_v1  ;;  %v8794_v1 = vld [vmem:[%s12415_s12 + $0xe58] sm:$0xff] }
 0x27a   :  { %13049 = vst [vmem:[#allocation643_spill] sm:$0xff] %v8774_v10  ;;  %v8799_v10 = vld [vmem:[%s12415_s12 + $0xe60] sm:$0xff] }
 0x27b   :  { %13050 = vst [vmem:[#allocation644_spill] sm:$0xff] %v8779_v2  ;;  %v8804_v2 = vld [vmem:[%s12415_s12 + $0xe68] sm:$0xff] }
 0x27c   :  { %13051 = vst [vmem:[#allocation645_spill] sm:$0xff] %v8784_v0  ;;  %v8809_v0 = vld [vmem:[%s12415_s12 + $0xe70] sm:$0xff] }
 0x27d   :  { %13052 = vst [vmem:[#allocation646_spill] sm:$0xff] %v8789_v32  ;;  %v8814_v32 = vld [vmem:[%s12415_s12 + $0xe78] sm:$0xff] }
 0x27e   :  { %13053 = vst [vmem:[#allocation647_spill] sm:$0xff] %v8794_v1  ;;  %v8819_v1 = vld [vmem:[%s12415_s12 + $0xe80] sm:$0xff] }
 0x27f   :  { %13054 = vst [vmem:[#allocation648_spill] sm:$0xff] %v8799_v10  ;;  %v8824_v10 = vld [vmem:[%s12415_s12 + $0xe88] sm:$0xff] }
 0x280   :  { %13055 = vst [vmem:[#allocation649_spill] sm:$0xff] %v8804_v2  ;;  %v8829_v2 = vld [vmem:[%s12415_s12 + $0xe90] sm:$0xff] }
 0x281   :  { %13056 = vst [vmem:[#allocation650_spill] sm:$0xff] %v8809_v0  ;;  %v8834_v0 = vld [vmem:[%s12415_s12 + $0xe98] sm:$0xff] }
 0x282   :  { %13057 = vst [vmem:[#allocation651_spill] sm:$0xff] %v8814_v32  ;;  %v8839_v32 = vld [vmem:[%s12415_s12 + $0xea0] sm:$0xff] }
 0x283   :  { %13058 = vst [vmem:[#allocation652_spill] sm:$0xff] %v8819_v1  ;;  %v8844_v1 = vld [vmem:[%s12415_s12 + $0xea8] sm:$0xff] }
 0x284   :  { %13059 = vst [vmem:[#allocation653_spill] sm:$0xff] %v8824_v10  ;;  %v8849_v10 = vld [vmem:[%s12415_s12 + $0xeb0] sm:$0xff] }
 0x285   :  { %13060 = vst [vmem:[#allocation654_spill] sm:$0xff] %v8829_v2  ;;  %v8854_v2 = vld [vmem:[%s12415_s12 + $0xeb8] sm:$0xff] }
 0x286   :  { %13061 = vst [vmem:[#allocation655_spill] sm:$0xff] %v8834_v0  ;;  %v8859_v0 = vld [vmem:[%s12415_s12 + $0xec0] sm:$0xff] }
 0x287   :  { %13062 = vst [vmem:[#allocation656_spill] sm:$0xff] %v8839_v32  ;;  %v8864_v32 = vld [vmem:[%s12415_s12 + $0xec8] sm:$0xff] }
 0x288   :  { %13063 = vst [vmem:[#allocation657_spill] sm:$0xff] %v8844_v1  ;;  %v8869_v1 = vld [vmem:[%s12415_s12 + $0xed0] sm:$0xff] }
 0x289   :  { %13064 = vst [vmem:[#allocation658_spill] sm:$0xff] %v8849_v10  ;;  %v8874_v10 = vld [vmem:[%s12415_s12 + $0xed8] sm:$0xff] }
 0x28a   :  { %13065 = vst [vmem:[#allocation659_spill] sm:$0xff] %v8854_v2  ;;  %v8879_v2 = vld [vmem:[%s12415_s12 + $0xee0] sm:$0xff] }
 0x28b   :  { %13066 = vst [vmem:[#allocation660_spill] sm:$0xff] %v8859_v0  ;;  %v8884_v0 = vld [vmem:[%s12415_s12 + $0xee8] sm:$0xff] }
 0x28c   :  { %13067 = vst [vmem:[#allocation661_spill] sm:$0xff] %v8864_v32  ;;  %v8889_v32 = vld [vmem:[%s12415_s12 + $0xef0] sm:$0xff] }
 0x28d   :  { %13068 = vst [vmem:[#allocation662_spill] sm:$0xff] %v8869_v1  ;;  %v8894_v1 = vld [vmem:[%s12415_s12 + $0xef8] sm:$0xff] }
 0x28e   :  { %13069 = vst [vmem:[#allocation663_spill] sm:$0xff] %v8874_v10  ;;  %v8899_v10 = vld [vmem:[%s12415_s12 + $0xf00] sm:$0xff] }
 0x28f   :  { %13070 = vst [vmem:[#allocation664_spill] sm:$0xff] %v8879_v2  ;;  %v8904_v2 = vld [vmem:[%s12415_s12 + $0xf08] sm:$0xff] }
 0x290   :  { %13071 = vst [vmem:[#allocation665_spill] sm:$0xff] %v8884_v0  ;;  %v8909_v0 = vld [vmem:[%s12415_s12 + $0xf10] sm:$0xff] }
 0x291   :  { %13072 = vst [vmem:[#allocation666_spill] sm:$0xff] %v8889_v32  ;;  %v8914_v32 = vld [vmem:[%s12415_s12 + $0xf18] sm:$0xff] }
 0x292   :  { %13073 = vst [vmem:[#allocation667_spill] sm:$0xff] %v8894_v1  ;;  %v8919_v1 = vld [vmem:[%s12415_s12 + $0xf20] sm:$0xff] }
 0x293   :  { %13074 = vst [vmem:[#allocation668_spill] sm:$0xff] %v8899_v10  ;;  %v8924_v10 = vld [vmem:[%s12415_s12 + $0xf28] sm:$0xff] }
 0x294   :  { %13075 = vst [vmem:[#allocation669_spill] sm:$0xff] %v8904_v2  ;;  %v8929_v2 = vld [vmem:[%s12415_s12 + $0xf30] sm:$0xff] }
 0x295   :  { %13076 = vst [vmem:[#allocation670_spill] sm:$0xff] %v8909_v0  ;;  %v8934_v0 = vld [vmem:[%s12415_s12 + $0xf38] sm:$0xff] }
 0x296   :  { %13077 = vst [vmem:[#allocation671_spill] sm:$0xff] %v8914_v32  ;;  %v8939_v32 = vld [vmem:[%s12415_s12 + $0xf40] sm:$0xff] }
 0x297   :  { %13078 = vst [vmem:[#allocation672_spill] sm:$0xff] %v8919_v1  ;;  %v8944_v1 = vld [vmem:[%s12415_s12 + $0xf48] sm:$0xff] }
 0x298   :  { %13079 = vst [vmem:[#allocation673_spill] sm:$0xff] %v8924_v10  ;;  %v8949_v10 = vld [vmem:[%s12415_s12 + $0xf50] sm:$0xff] }
 0x299   :  { %13080 = vst [vmem:[#allocation674_spill] sm:$0xff] %v8929_v2  ;;  %v8954_v2 = vld [vmem:[%s12415_s12 + $0xf58] sm:$0xff] }
 0x29a   :  { %13081 = vst [vmem:[#allocation675_spill] sm:$0xff] %v8934_v0  ;;  %v8959_v0 = vld [vmem:[%s12415_s12 + $0xf60] sm:$0xff] }
 0x29b   :  { %13082 = vst [vmem:[#allocation676_spill] sm:$0xff] %v8939_v32  ;;  %v8964_v32 = vld [vmem:[%s12415_s12 + $0xf68] sm:$0xff] }
 0x29c   :  { %13083 = vst [vmem:[#allocation677_spill] sm:$0xff] %v8944_v1  ;;  %v8969_v1 = vld [vmem:[%s12415_s12 + $0xf70] sm:$0xff] }
 0x29d   :  { %13084 = vst [vmem:[#allocation678_spill] sm:$0xff] %v8949_v10  ;;  %v8974_v10 = vld [vmem:[%s12415_s12 + $0xf78] sm:$0xff] }
 0x29e   :  { %13085 = vst [vmem:[#allocation679_spill] sm:$0xff] %v8954_v2  ;;  %v8979_v2 = vld [vmem:[%s12415_s12 + $0xf80] sm:$0xff] }
 0x29f   :  { %13086 = vst [vmem:[#allocation680_spill] sm:$0xff] %v8959_v0  ;;  %v8984_v0 = vld [vmem:[%s12415_s12 + $0xf88] sm:$0xff] }
 0x2a0   :  { %13087 = vst [vmem:[#allocation681_spill] sm:$0xff] %v8964_v32  ;;  %v8989_v32 = vld [vmem:[%s12415_s12 + $0xf90] sm:$0xff] }
 0x2a1   :  { %13088 = vst [vmem:[#allocation682_spill] sm:$0xff] %v8969_v1  ;;  %v8994_v1 = vld [vmem:[%s12415_s12 + $0xf98] sm:$0xff] }
 0x2a2   :  { %13089 = vst [vmem:[#allocation683_spill] sm:$0xff] %v8974_v10  ;;  %v8999_v10 = vld [vmem:[%s12415_s12 + $0xfa0] sm:$0xff] }
 0x2a3   :  { %13090 = vst [vmem:[#allocation684_spill] sm:$0xff] %v8979_v2  ;;  %v9004_v2 = vld [vmem:[%s12415_s12 + $0xfa8] sm:$0xff] }
 0x2a4   :  { %13091 = vst [vmem:[#allocation685_spill] sm:$0xff] %v8984_v0  ;;  %v9009_v0 = vld [vmem:[%s12415_s12 + $0xfb0] sm:$0xff] }
 0x2a5   :  { %13092 = vst [vmem:[#allocation686_spill] sm:$0xff] %v8989_v32  ;;  %v9014_v32 = vld [vmem:[%s12415_s12 + $0xfb8] sm:$0xff] }
 0x2a6   :  { %13093 = vst [vmem:[#allocation687_spill] sm:$0xff] %v8994_v1  ;;  %v9019_v1 = vld [vmem:[%s12415_s12 + $0xfc0] sm:$0xff] }
 0x2a7   :  { %13094 = vst [vmem:[#allocation688_spill] sm:$0xff] %v8999_v10  ;;  %v9024_v10 = vld [vmem:[%s12415_s12 + $0xfc8] sm:$0xff] }
 0x2a8   :  { %13095 = vst [vmem:[#allocation689_spill] sm:$0xff] %v9004_v2  ;;  %v9029_v2 = vld [vmem:[%s12415_s12 + $0xfd0] sm:$0xff] }
 0x2a9   :  { %13096 = vst [vmem:[#allocation690_spill] sm:$0xff] %v9009_v0  ;;  %v9034_v0 = vld [vmem:[%s12415_s12 + $0xfd8] sm:$0xff] }
 0x2aa   :  { %13097 = vst [vmem:[#allocation691_spill] sm:$0xff] %v9014_v32  ;;  %v9039_v32 = vld [vmem:[%s12415_s12 + $0xfe0] sm:$0xff] }
 0x2ab   :  { %13098 = vst [vmem:[#allocation692_spill] sm:$0xff] %v9019_v1  ;;  %v9044_v1 = vld [vmem:[%s12415_s12 + $0xfe8] sm:$0xff] }
 0x2ac   :  { %13099 = vst [vmem:[#allocation693_spill] sm:$0xff] %v9024_v10  ;;  %v9049_v10 = vld [vmem:[%s12415_s12 + $0xff0] sm:$0xff] }
 0x2ad   :  { %13100 = vst [vmem:[#allocation694_spill] sm:$0xff] %v9029_v2  ;;  %v9054_v2 = vld [vmem:[%s12415_s12 + $0xff8] sm:$0xff] }
 0x2ae   :  { %13101 = vst [vmem:[#allocation695_spill] sm:$0xff] %v9034_v0  ;;  %v9059_v0 = vld [vmem:[%s12415_s12 + $0x1000] sm:$0xff] }
 0x2af   :  { %13102 = vst [vmem:[#allocation696_spill] sm:$0xff] %v9039_v32  ;;  %v9064_v32 = vld [vmem:[%s12415_s12 + $0x1008] sm:$0xff] }
 0x2b0   :  { %13103 = vst [vmem:[#allocation697_spill] sm:$0xff] %v9044_v1  ;;  %v9069_v1 = vld [vmem:[%s12415_s12 + $0x1010] sm:$0xff] }
 0x2b1   :  { %13104 = vst [vmem:[#allocation698_spill] sm:$0xff] %v9049_v10  ;;  %v9074_v10 = vld [vmem:[%s12415_s12 + $0x1018] sm:$0xff] }
 0x2b2   :  { %13105 = vst [vmem:[#allocation699_spill] sm:$0xff] %v9054_v2  ;;  %v9079_v2 = vld [vmem:[%s12415_s12 + $0x1020] sm:$0xff] }
 0x2b3   :  { %13106 = vst [vmem:[#allocation700_spill] sm:$0xff] %v9059_v0  ;;  %v9084_v0 = vld [vmem:[%s12415_s12 + $0x1028] sm:$0xff] }
 0x2b4   :  { %13107 = vst [vmem:[#allocation701_spill] sm:$0xff] %v9064_v32  ;;  %v9089_v32 = vld [vmem:[%s12415_s12 + $0x1030] sm:$0xff] }
 0x2b5   :  { %13108 = vst [vmem:[#allocation702_spill] sm:$0xff] %v9069_v1  ;;  %v9094_v1 = vld [vmem:[%s12415_s12 + $0x1038] sm:$0xff] }
 0x2b6   :  { %13109 = vst [vmem:[#allocation703_spill] sm:$0xff] %v9074_v10  ;;  %v9099_v10 = vld [vmem:[%s12415_s12 + $0x1040] sm:$0xff] }
 0x2b7   :  { %13110 = vst [vmem:[#allocation704_spill] sm:$0xff] %v9079_v2  ;;  %v9104_v2 = vld [vmem:[%s12415_s12 + $0x1048] sm:$0xff] }
 0x2b8   :  { %13111 = vst [vmem:[#allocation705_spill] sm:$0xff] %v9084_v0  ;;  %v9109_v0 = vld [vmem:[%s12415_s12 + $0x1050] sm:$0xff] }
 0x2b9   :  { %13112 = vst [vmem:[#allocation706_spill] sm:$0xff] %v9089_v32  ;;  %v9114_v32 = vld [vmem:[%s12415_s12 + $0x1058] sm:$0xff] }
 0x2ba   :  { %13113 = vst [vmem:[#allocation707_spill] sm:$0xff] %v9094_v1  ;;  %v9119_v1 = vld [vmem:[%s12415_s12 + $0x1060] sm:$0xff] }
 0x2bb   :  { %13114 = vst [vmem:[#allocation708_spill] sm:$0xff] %v9099_v10  ;;  %v9124_v10 = vld [vmem:[%s12415_s12 + $0x1068] sm:$0xff] }
 0x2bc   :  { %13115 = vst [vmem:[#allocation709_spill] sm:$0xff] %v9104_v2  ;;  %v9129_v2 = vld [vmem:[%s12415_s12 + $0x1070] sm:$0xff] }
 0x2bd   :  { %13116 = vst [vmem:[#allocation710_spill] sm:$0xff] %v9109_v0  ;;  %v9134_v0 = vld [vmem:[%s12415_s12 + $0x1078] sm:$0xff] }
 0x2be   :  { %13117 = vst [vmem:[#allocation711_spill] sm:$0xff] %v9114_v32  ;;  %v9139_v32 = vld [vmem:[%s12415_s12 + $0x1080] sm:$0xff] }
 0x2bf   :  { %13118 = vst [vmem:[#allocation712_spill] sm:$0xff] %v9119_v1  ;;  %v9144_v1 = vld [vmem:[%s12415_s12 + $0x1088] sm:$0xff] }
 0x2c0   :  { %13119 = vst [vmem:[#allocation713_spill] sm:$0xff] %v9124_v10  ;;  %v9149_v10 = vld [vmem:[%s12415_s12 + $0x1090] sm:$0xff] }
 0x2c1   :  { %13120 = vst [vmem:[#allocation714_spill] sm:$0xff] %v9129_v2  ;;  %v9154_v2 = vld [vmem:[%s12415_s12 + $0x1098] sm:$0xff] }
 0x2c2   :  { %13121 = vst [vmem:[#allocation715_spill] sm:$0xff] %v9134_v0  ;;  %v9159_v0 = vld [vmem:[%s12415_s12 + $0x10a0] sm:$0xff] }
 0x2c3   :  { %13122 = vst [vmem:[#allocation716_spill] sm:$0xff] %v9139_v32  ;;  %v9164_v32 = vld [vmem:[%s12415_s12 + $0x10a8] sm:$0xff] }
 0x2c4   :  { %13123 = vst [vmem:[#allocation717_spill] sm:$0xff] %v9144_v1  ;;  %v9169_v1 = vld [vmem:[%s12415_s12 + $0x10b0] sm:$0xff] }
 0x2c5   :  { %13124 = vst [vmem:[#allocation718_spill] sm:$0xff] %v9149_v10  ;;  %v9174_v10 = vld [vmem:[%s12415_s12 + $0x10b8] sm:$0xff] }
 0x2c6   :  { %13125 = vst [vmem:[#allocation719_spill] sm:$0xff] %v9154_v2  ;;  %v9179_v2 = vld [vmem:[%s12415_s12 + $0x10c0] sm:$0xff] }
 0x2c7   :  { %13126 = vst [vmem:[#allocation720_spill] sm:$0xff] %v9159_v0  ;;  %v9184_v0 = vld [vmem:[%s12415_s12 + $0x10c8] sm:$0xff] }
 0x2c8   :  { %13127 = vst [vmem:[#allocation721_spill] sm:$0xff] %v9164_v32  ;;  %v9189_v32 = vld [vmem:[%s12415_s12 + $0x10d0] sm:$0xff] }
 0x2c9   :  { %13128 = vst [vmem:[#allocation722_spill] sm:$0xff] %v9169_v1  ;;  %v9194_v1 = vld [vmem:[%s12415_s12 + $0x10d8] sm:$0xff] }
 0x2ca   :  { %13129 = vst [vmem:[#allocation723_spill] sm:$0xff] %v9174_v10  ;;  %v9199_v10 = vld [vmem:[%s12415_s12 + $0x10e0] sm:$0xff] }
 0x2cb   :  { %13130 = vst [vmem:[#allocation724_spill] sm:$0xff] %v9179_v2  ;;  %v9204_v2 = vld [vmem:[%s12415_s12 + $0x10e8] sm:$0xff] }
 0x2cc   :  { %13131 = vst [vmem:[#allocation725_spill] sm:$0xff] %v9184_v0  ;;  %v9209_v0 = vld [vmem:[%s12415_s12 + $0x10f0] sm:$0xff] }
 0x2cd   :  { %13132 = vst [vmem:[#allocation726_spill] sm:$0xff] %v9189_v32  ;;  %v9214_v32 = vld [vmem:[%s12415_s12 + $0x10f8] sm:$0xff] }
 0x2ce   :  { %13133 = vst [vmem:[#allocation727_spill] sm:$0xff] %v9194_v1  ;;  %v9219_v1 = vld [vmem:[%s12415_s12 + $0x1100] sm:$0xff] }
 0x2cf   :  { %13134 = vst [vmem:[#allocation728_spill] sm:$0xff] %v9199_v10  ;;  %v9224_v10 = vld [vmem:[%s12415_s12 + $0x1108] sm:$0xff] }
 0x2d0   :  { %13135 = vst [vmem:[#allocation729_spill] sm:$0xff] %v9204_v2  ;;  %v9229_v2 = vld [vmem:[%s12415_s12 + $0x1110] sm:$0xff] }
 0x2d1   :  { %13136 = vst [vmem:[#allocation730_spill] sm:$0xff] %v9209_v0  ;;  %v9234_v0 = vld [vmem:[%s12415_s12 + $0x1118] sm:$0xff] }
 0x2d2   :  { %13137 = vst [vmem:[#allocation731_spill] sm:$0xff] %v9214_v32  ;;  %v9239_v32 = vld [vmem:[%s12415_s12 + $0x1120] sm:$0xff] }
 0x2d3   :  { %13138 = vst [vmem:[#allocation732_spill] sm:$0xff] %v9219_v1  ;;  %v9244_v1 = vld [vmem:[%s12415_s12 + $0x1128] sm:$0xff] }
 0x2d4   :  { %13139 = vst [vmem:[#allocation733_spill] sm:$0xff] %v9224_v10  ;;  %v9249_v10 = vld [vmem:[%s12415_s12 + $0x1130] sm:$0xff] }
 0x2d5   :  { %13140 = vst [vmem:[#allocation734_spill] sm:$0xff] %v9229_v2  ;;  %v9254_v2 = vld [vmem:[%s12415_s12 + $0x1138] sm:$0xff] }
 0x2d6   :  { %13141 = vst [vmem:[#allocation735_spill] sm:$0xff] %v9234_v0  ;;  %v9259_v0 = vld [vmem:[%s12415_s12 + $0x1140] sm:$0xff] }
 0x2d7   :  { %13142 = vst [vmem:[#allocation736_spill] sm:$0xff] %v9239_v32  ;;  %v9264_v32 = vld [vmem:[%s12415_s12 + $0x1148] sm:$0xff] }
 0x2d8   :  { %13143 = vst [vmem:[#allocation737_spill] sm:$0xff] %v9244_v1  ;;  %v9269_v1 = vld [vmem:[%s12415_s12 + $0x1150] sm:$0xff] }
 0x2d9   :  { %13144 = vst [vmem:[#allocation738_spill] sm:$0xff] %v9249_v10  ;;  %v9274_v10 = vld [vmem:[%s12415_s12 + $0x1158] sm:$0xff] }
 0x2da   :  { %13145 = vst [vmem:[#allocation739_spill] sm:$0xff] %v9254_v2  ;;  %v9279_v2 = vld [vmem:[%s12415_s12 + $0x1160] sm:$0xff] }
 0x2db   :  { %13146 = vst [vmem:[#allocation740_spill] sm:$0xff] %v9259_v0  ;;  %v9284_v0 = vld [vmem:[%s12415_s12 + $0x1168] sm:$0xff] }
 0x2dc   :  { %13147 = vst [vmem:[#allocation741_spill] sm:$0xff] %v9264_v32  ;;  %v9289_v32 = vld [vmem:[%s12415_s12 + $0x1170] sm:$0xff] }
 0x2dd   :  { %13148 = vst [vmem:[#allocation742_spill] sm:$0xff] %v9269_v1  ;;  %v9294_v1 = vld [vmem:[%s12415_s12 + $0x1178] sm:$0xff] }
 0x2de   :  { %13149 = vst [vmem:[#allocation743_spill] sm:$0xff] %v9274_v10  ;;  %v9299_v10 = vld [vmem:[%s12415_s12 + $0x1180] sm:$0xff] }
 0x2df   :  { %13150 = vst [vmem:[#allocation744_spill] sm:$0xff] %v9279_v2  ;;  %v9304_v2 = vld [vmem:[%s12415_s12 + $0x1188] sm:$0xff] }
 0x2e0   :  { %13151 = vst [vmem:[#allocation745_spill] sm:$0xff] %v9284_v0  ;;  %v9309_v0 = vld [vmem:[%s12415_s12 + $0x1190] sm:$0xff] }
 0x2e1   :  { %13152 = vst [vmem:[#allocation746_spill] sm:$0xff] %v9289_v32  ;;  %v9314_v32 = vld [vmem:[%s12415_s12 + $0x1198] sm:$0xff] }
 0x2e2   :  { %13153 = vst [vmem:[#allocation747_spill] sm:$0xff] %v9294_v1  ;;  %v9319_v1 = vld [vmem:[%s12415_s12 + $0x11a0] sm:$0xff] }
 0x2e3   :  { %13154 = vst [vmem:[#allocation748_spill] sm:$0xff] %v9299_v10  ;;  %v9324_v10 = vld [vmem:[%s12415_s12 + $0x11a8] sm:$0xff] }
 0x2e4   :  { %13155 = vst [vmem:[#allocation749_spill] sm:$0xff] %v9304_v2  ;;  %v9329_v2 = vld [vmem:[%s12415_s12 + $0x11b0] sm:$0xff] }
 0x2e5   :  { %13156 = vst [vmem:[#allocation750_spill] sm:$0xff] %v9309_v0  ;;  %v9334_v0 = vld [vmem:[%s12415_s12 + $0x11b8] sm:$0xff] }
 0x2e6   :  { %13157 = vst [vmem:[#allocation751_spill] sm:$0xff] %v9314_v32  ;;  %v9339_v32 = vld [vmem:[%s12415_s12 + $0x11c0] sm:$0xff] }
 0x2e7   :  { %13158 = vst [vmem:[#allocation752_spill] sm:$0xff] %v9319_v1  ;;  %v9344_v1 = vld [vmem:[%s12415_s12 + $0x11c8] sm:$0xff] }
 0x2e8   :  { %13159 = vst [vmem:[#allocation753_spill] sm:$0xff] %v9324_v10  ;;  %v9349_v10 = vld [vmem:[%s12415_s12 + $0x11d0] sm:$0xff] }
 0x2e9   :  { %13160 = vst [vmem:[#allocation754_spill] sm:$0xff] %v9329_v2  ;;  %v9354_v2 = vld [vmem:[%s12415_s12 + $0x11d8] sm:$0xff] }
 0x2ea   :  { %13161 = vst [vmem:[#allocation755_spill] sm:$0xff] %v9334_v0  ;;  %v9359_v0 = vld [vmem:[%s12415_s12 + $0x11e0] sm:$0xff] }
 0x2eb   :  { %13162 = vst [vmem:[#allocation756_spill] sm:$0xff] %v9339_v32  ;;  %v9364_v32 = vld [vmem:[%s12415_s12 + $0x11e8] sm:$0xff] }
 0x2ec   :  { %13163 = vst [vmem:[#allocation757_spill] sm:$0xff] %v9344_v1  ;;  %v9369_v1 = vld [vmem:[%s12415_s12 + $0x11f0] sm:$0xff] }
 0x2ed   :  { %13164 = vst [vmem:[#allocation758_spill] sm:$0xff] %v9349_v10  ;;  %v9374_v10 = vld [vmem:[%s12415_s12 + $0x11f8] sm:$0xff] }
 0x2ee   :  { %13165 = vst [vmem:[#allocation759_spill] sm:$0xff] %v9354_v2  ;;  %v9379_v2 = vld [vmem:[%s12415_s12 + $0x1200] sm:$0xff] }
 0x2ef   :  { %13166 = vst [vmem:[#allocation760_spill] sm:$0xff] %v9359_v0  ;;  %v9384_v0 = vld [vmem:[%s12415_s12 + $0x1208] sm:$0xff] }
 0x2f0   :  { %13167 = vst [vmem:[#allocation761_spill] sm:$0xff] %v9364_v32  ;;  %v9389_v32 = vld [vmem:[%s12415_s12 + $0x1210] sm:$0xff] }
 0x2f1   :  { %13168 = vst [vmem:[#allocation762_spill] sm:$0xff] %v9369_v1  ;;  %v9394_v1 = vld [vmem:[%s12415_s12 + $0x1218] sm:$0xff] }
 0x2f2   :  { %13169 = vst [vmem:[#allocation763_spill] sm:$0xff] %v9374_v10  ;;  %v9399_v10 = vld [vmem:[%s12415_s12 + $0x1220] sm:$0xff] }
 0x2f3   :  { %13170 = vst [vmem:[#allocation764_spill] sm:$0xff] %v9379_v2  ;;  %v9404_v2 = vld [vmem:[%s12415_s12 + $0x1228] sm:$0xff] }
 0x2f4   :  { %13171 = vst [vmem:[#allocation765_spill] sm:$0xff] %v9384_v0  ;;  %v9409_v0 = vld [vmem:[%s12415_s12 + $0x1230] sm:$0xff] }
 0x2f5   :  { %13172 = vst [vmem:[#allocation766_spill] sm:$0xff] %v9389_v32  ;;  %v9414_v32 = vld [vmem:[%s12415_s12 + $0x1238] sm:$0xff] }
 0x2f6   :  { %13173 = vst [vmem:[#allocation767_spill] sm:$0xff] %v9394_v1  ;;  %v9419_v1 = vld [vmem:[%s12415_s12 + $0x1240] sm:$0xff] }
 0x2f7   :  { %13174 = vst [vmem:[#allocation768_spill] sm:$0xff] %v9399_v10  ;;  %v9424_v10 = vld [vmem:[%s12415_s12 + $0x1248] sm:$0xff] }
 0x2f8   :  { %13175 = vst [vmem:[#allocation769_spill] sm:$0xff] %v9404_v2  ;;  %v9429_v2 = vld [vmem:[%s12415_s12 + $0x1250] sm:$0xff] }
 0x2f9   :  { %13176 = vst [vmem:[#allocation770_spill] sm:$0xff] %v9409_v0  ;;  %v9434_v0 = vld [vmem:[%s12415_s12 + $0x1258] sm:$0xff] }
 0x2fa   :  { %13177 = vst [vmem:[#allocation771_spill] sm:$0xff] %v9414_v32  ;;  %v9439_v32 = vld [vmem:[%s12415_s12 + $0x1260] sm:$0xff] }
 0x2fb   :  { %13178 = vst [vmem:[#allocation772_spill] sm:$0xff] %v9419_v1  ;;  %v9444_v1 = vld [vmem:[%s12415_s12 + $0x1268] sm:$0xff] }
 0x2fc   :  { %13179 = vst [vmem:[#allocation773_spill] sm:$0xff] %v9424_v10  ;;  %v9449_v10 = vld [vmem:[%s12415_s12 + $0x1270] sm:$0xff] }
 0x2fd   :  { %13180 = vst [vmem:[#allocation774_spill] sm:$0xff] %v9429_v2  ;;  %v9454_v2 = vld [vmem:[%s12415_s12 + $0x1278] sm:$0xff] }
 0x2fe   :  { %13181 = vst [vmem:[#allocation775_spill] sm:$0xff] %v9434_v0  ;;  %v9459_v0 = vld [vmem:[%s12415_s12 + $0x1280] sm:$0xff] }
 0x2ff   :  { %13182 = vst [vmem:[#allocation776_spill] sm:$0xff] %v9439_v32  ;;  %v9464_v32 = vld [vmem:[%s12415_s12 + $0x1288] sm:$0xff] }
 0x300   :  { %13183 = vst [vmem:[#allocation777_spill] sm:$0xff] %v9444_v1  ;;  %v9469_v1 = vld [vmem:[%s12415_s12 + $0x1290] sm:$0xff] }
 0x301   :  { %13184 = vst [vmem:[#allocation778_spill] sm:$0xff] %v9449_v10  ;;  %v9474_v10 = vld [vmem:[%s12415_s12 + $0x1298] sm:$0xff] }
 0x302   :  { %13185 = vst [vmem:[#allocation779_spill] sm:$0xff] %v9454_v2  ;;  %v9479_v2 = vld [vmem:[%s12415_s12 + $0x12a0] sm:$0xff] }
 0x303   :  { %13186 = vst [vmem:[#allocation780_spill] sm:$0xff] %v9459_v0  ;;  %v9484_v0 = vld [vmem:[%s12415_s12 + $0x12a8] sm:$0xff] }
 0x304   :  { %13187 = vst [vmem:[#allocation781_spill] sm:$0xff] %v9464_v32  ;;  %v9489_v32 = vld [vmem:[%s12415_s12 + $0x12b0] sm:$0xff] }
 0x305   :  { %13188 = vst [vmem:[#allocation782_spill] sm:$0xff] %v9469_v1  ;;  %v9494_v1 = vld [vmem:[%s12415_s12 + $0x12b8] sm:$0xff] }
 0x306   :  { %13189 = vst [vmem:[#allocation783_spill] sm:$0xff] %v9474_v10  ;;  %v9499_v10 = vld [vmem:[%s12415_s12 + $0x12c0] sm:$0xff] }
 0x307   :  { %13190 = vst [vmem:[#allocation784_spill] sm:$0xff] %v9479_v2  ;;  %v9504_v2 = vld [vmem:[%s12415_s12 + $0x12c8] sm:$0xff] }
 0x308   :  { %13191 = vst [vmem:[#allocation785_spill] sm:$0xff] %v9484_v0  ;;  %v9509_v0 = vld [vmem:[%s12415_s12 + $0x12d0] sm:$0xff] }
 0x309   :  { %13192 = vst [vmem:[#allocation786_spill] sm:$0xff] %v9489_v32  ;;  %v9514_v32 = vld [vmem:[%s12415_s12 + $0x12d8] sm:$0xff] }
 0x30a   :  { %13193 = vst [vmem:[#allocation787_spill] sm:$0xff] %v9494_v1  ;;  %v9519_v1 = vld [vmem:[%s12415_s12 + $0x12e0] sm:$0xff] }
 0x30b   :  { %13194 = vst [vmem:[#allocation788_spill] sm:$0xff] %v9499_v10  ;;  %v9524_v10 = vld [vmem:[%s12415_s12 + $0x12e8] sm:$0xff] }
 0x30c   :  { %13195 = vst [vmem:[#allocation789_spill] sm:$0xff] %v9504_v2  ;;  %v9529_v2 = vld [vmem:[%s12415_s12 + $0x12f0] sm:$0xff] }
 0x30d   :  { %13196 = vst [vmem:[#allocation790_spill] sm:$0xff] %v9509_v0  ;;  %v9534_v0 = vld [vmem:[%s12415_s12 + $0x12f8] sm:$0xff] }
 0x30e   :  { %13197 = vst [vmem:[#allocation791_spill] sm:$0xff] %v9514_v32  ;;  %v9539_v32 = vld [vmem:[%s12415_s12 + $0x1300] sm:$0xff] }
 0x30f   :  { %13198 = vst [vmem:[#allocation792_spill] sm:$0xff] %v9519_v1  ;;  %v9544_v1 = vld [vmem:[%s12415_s12 + $0x1308] sm:$0xff] }
 0x310   :  { %13199 = vst [vmem:[#allocation793_spill] sm:$0xff] %v9524_v10  ;;  %v9549_v10 = vld [vmem:[%s12415_s12 + $0x1310] sm:$0xff] }
 0x311   :  { %13200 = vst [vmem:[#allocation794_spill] sm:$0xff] %v9529_v2  ;;  %v9554_v2 = vld [vmem:[%s12415_s12 + $0x1318] sm:$0xff] }
 0x312   :  { %13201 = vst [vmem:[#allocation795_spill] sm:$0xff] %v9534_v0  ;;  %v9559_v0 = vld [vmem:[%s12415_s12 + $0x1320] sm:$0xff] }
 0x313   :  { %13202 = vst [vmem:[#allocation796_spill] sm:$0xff] %v9539_v32  ;;  %v9564_v32 = vld [vmem:[%s12415_s12 + $0x1328] sm:$0xff] }
 0x314   :  { %13203 = vst [vmem:[#allocation797_spill] sm:$0xff] %v9544_v1  ;;  %v9569_v1 = vld [vmem:[%s12415_s12 + $0x1330] sm:$0xff] }
 0x315   :  { %13204 = vst [vmem:[#allocation798_spill] sm:$0xff] %v9549_v10  ;;  %v9574_v10 = vld [vmem:[%s12415_s12 + $0x1338] sm:$0xff] }
 0x316   :  { %13205 = vst [vmem:[#allocation799_spill] sm:$0xff] %v9554_v2  ;;  %v9579_v2 = vld [vmem:[%s12415_s12 + $0x1340] sm:$0xff] }
 0x317   :  { %13206 = vst [vmem:[#allocation800_spill] sm:$0xff] %v9559_v0  ;;  %v9584_v0 = vld [vmem:[%s12415_s12 + $0x1348] sm:$0xff] }
 0x318   :  { %13207 = vst [vmem:[#allocation801_spill] sm:$0xff] %v9564_v32  ;;  %v9589_v32 = vld [vmem:[%s12415_s12 + $0x1350] sm:$0xff] }
 0x319   :  { %13208 = vst [vmem:[#allocation802_spill] sm:$0xff] %v9569_v1  ;;  %v9594_v1 = vld [vmem:[%s12415_s12 + $0x1358] sm:$0xff] }
 0x31a   :  { %13209 = vst [vmem:[#allocation803_spill] sm:$0xff] %v9574_v10  ;;  %v9599_v10 = vld [vmem:[%s12415_s12 + $0x1360] sm:$0xff] }
 0x31b   :  { %13210 = vst [vmem:[#allocation804_spill] sm:$0xff] %v9579_v2  ;;  %v9604_v2 = vld [vmem:[%s12415_s12 + $0x1368] sm:$0xff] }
 0x31c   :  { %13211 = vst [vmem:[#allocation805_spill] sm:$0xff] %v9584_v0  ;;  %v9609_v0 = vld [vmem:[%s12415_s12 + $0x1370] sm:$0xff] }
 0x31d   :  { %13212 = vst [vmem:[#allocation806_spill] sm:$0xff] %v9589_v32  ;;  %v9614_v32 = vld [vmem:[%s12415_s12 + $0x1378] sm:$0xff] }
 0x31e   :  { %13213 = vst [vmem:[#allocation807_spill] sm:$0xff] %v9594_v1  ;;  %v9619_v1 = vld [vmem:[%s12415_s12 + $0x1380] sm:$0xff] }
 0x31f   :  { %13214 = vst [vmem:[#allocation808_spill] sm:$0xff] %v9599_v10  ;;  %v9624_v10 = vld [vmem:[%s12415_s12 + $0x1388] sm:$0xff] }
 0x320   :  { %13215 = vst [vmem:[#allocation809_spill] sm:$0xff] %v9604_v2  ;;  %v9629_v2 = vld [vmem:[%s12415_s12 + $0x1390] sm:$0xff] }
 0x321   :  { %13216 = vst [vmem:[#allocation810_spill] sm:$0xff] %v9609_v0  ;;  %v9634_v0 = vld [vmem:[%s12415_s12 + $0x1398] sm:$0xff] }
 0x322   :  { %13217 = vst [vmem:[#allocation811_spill] sm:$0xff] %v9614_v32  ;;  %v9639_v32 = vld [vmem:[%s12415_s12 + $0x13a0] sm:$0xff] }
 0x323   :  { %13218 = vst [vmem:[#allocation812_spill] sm:$0xff] %v9619_v1  ;;  %v9644_v1 = vld [vmem:[%s12415_s12 + $0x13a8] sm:$0xff] }
 0x324   :  { %13219 = vst [vmem:[#allocation813_spill] sm:$0xff] %v9624_v10  ;;  %v9649_v10 = vld [vmem:[%s12415_s12 + $0x13b0] sm:$0xff] }
 0x325   :  { %13220 = vst [vmem:[#allocation814_spill] sm:$0xff] %v9629_v2  ;;  %v9654_v2 = vld [vmem:[%s12415_s12 + $0x13b8] sm:$0xff] }
 0x326   :  { %13221 = vst [vmem:[#allocation815_spill] sm:$0xff] %v9634_v0  ;;  %v9659_v0 = vld [vmem:[%s12415_s12 + $0x13c0] sm:$0xff] }
 0x327   :  { %13222 = vst [vmem:[#allocation816_spill] sm:$0xff] %v9639_v32  ;;  %v9664_v32 = vld [vmem:[%s12415_s12 + $0x13c8] sm:$0xff] }
 0x328   :  { %13223 = vst [vmem:[#allocation817_spill] sm:$0xff] %v9644_v1  ;;  %v9669_v1 = vld [vmem:[%s12415_s12 + $0x13d0] sm:$0xff] }
 0x329   :  { %13224 = vst [vmem:[#allocation818_spill] sm:$0xff] %v9649_v10  ;;  %v9674_v10 = vld [vmem:[%s12415_s12 + $0x13d8] sm:$0xff] }
 0x32a   :  { %13225 = vst [vmem:[#allocation819_spill] sm:$0xff] %v9654_v2  ;;  %v9679_v2 = vld [vmem:[%s12415_s12 + $0x13e0] sm:$0xff] }
 0x32b   :  { %13226 = vst [vmem:[#allocation820_spill] sm:$0xff] %v9659_v0  ;;  %v9684_v0 = vld [vmem:[%s12415_s12 + $0x13e8] sm:$0xff] }
 0x32c   :  { %13227 = vst [vmem:[#allocation821_spill] sm:$0xff] %v9664_v32  ;;  %v9689_v32 = vld [vmem:[%s12415_s12 + $0x13f0] sm:$0xff] }
 0x32d   :  { %13228 = vst [vmem:[#allocation822_spill] sm:$0xff] %v9669_v1  ;;  %v9694_v1 = vld [vmem:[%s12415_s12 + $0x13f8] sm:$0xff] }
 0x32e   :  { %13229 = vst [vmem:[#allocation823_spill] sm:$0xff] %v9674_v10  ;;  %v9699_v10 = vld [vmem:[%s12415_s12 + $0x1400] sm:$0xff] }
 0x32f   :  { %13230 = vst [vmem:[#allocation824_spill] sm:$0xff] %v9679_v2  ;;  %v9704_v2 = vld [vmem:[%s12415_s12 + $0x1408] sm:$0xff] }
 0x330   :  { %13231 = vst [vmem:[#allocation825_spill] sm:$0xff] %v9684_v0  ;;  %v9709_v0 = vld [vmem:[%s12415_s12 + $0x1410] sm:$0xff] }
 0x331   :  { %13232 = vst [vmem:[#allocation826_spill] sm:$0xff] %v9689_v32  ;;  %v9714_v32 = vld [vmem:[%s12415_s12 + $0x1418] sm:$0xff] }
 0x332   :  { %13233 = vst [vmem:[#allocation827_spill] sm:$0xff] %v9694_v1  ;;  %v9719_v1 = vld [vmem:[%s12415_s12 + $0x1420] sm:$0xff] }
 0x333   :  { %13234 = vst [vmem:[#allocation828_spill] sm:$0xff] %v9699_v10  ;;  %v9724_v10 = vld [vmem:[%s12415_s12 + $0x1428] sm:$0xff] }
 0x334   :  { %13235 = vst [vmem:[#allocation829_spill] sm:$0xff] %v9704_v2  ;;  %v9729_v2 = vld [vmem:[%s12415_s12 + $0x1430] sm:$0xff] }
 0x335   :  { %13236 = vst [vmem:[#allocation830_spill] sm:$0xff] %v9709_v0  ;;  %v9734_v0 = vld [vmem:[%s12415_s12 + $0x1438] sm:$0xff] }
 0x336   :  { %13237 = vst [vmem:[#allocation831_spill] sm:$0xff] %v9714_v32  ;;  %v9739_v32 = vld [vmem:[%s12415_s12 + $0x1440] sm:$0xff] }
 0x337   :  { %13238 = vst [vmem:[#allocation832_spill] sm:$0xff] %v9719_v1  ;;  %v9744_v1 = vld [vmem:[%s12415_s12 + $0x1448] sm:$0xff] }
 0x338   :  { %13239 = vst [vmem:[#allocation833_spill] sm:$0xff] %v9724_v10  ;;  %v9749_v10 = vld [vmem:[%s12415_s12 + $0x1450] sm:$0xff] }
 0x339   :  { %13240 = vst [vmem:[#allocation834_spill] sm:$0xff] %v9729_v2  ;;  %v9754_v2 = vld [vmem:[%s12415_s12 + $0x1458] sm:$0xff] }
 0x33a   :  { %13241 = vst [vmem:[#allocation835_spill] sm:$0xff] %v9734_v0  ;;  %v9759_v0 = vld [vmem:[%s12415_s12 + $0x1460] sm:$0xff] }
 0x33b   :  { %13242 = vst [vmem:[#allocation836_spill] sm:$0xff] %v9739_v32  ;;  %v9764_v32 = vld [vmem:[%s12415_s12 + $0x1468] sm:$0xff] }
 0x33c   :  { %13243 = vst [vmem:[#allocation837_spill] sm:$0xff] %v9744_v1  ;;  %v9769_v1 = vld [vmem:[%s12415_s12 + $0x1470] sm:$0xff] }
 0x33d   :  { %13244 = vst [vmem:[#allocation838_spill] sm:$0xff] %v9749_v10  ;;  %v9774_v10 = vld [vmem:[%s12415_s12 + $0x1478] sm:$0xff] }
 0x33e   :  { %13245 = vst [vmem:[#allocation839_spill] sm:$0xff] %v9754_v2  ;;  %v9779_v2 = vld [vmem:[%s12415_s12 + $0x1480] sm:$0xff] }
 0x33f   :  { %13246 = vst [vmem:[#allocation840_spill] sm:$0xff] %v9759_v0  ;;  %v9784_v0 = vld [vmem:[%s12415_s12 + $0x1488] sm:$0xff] }
 0x340   :  { %13247 = vst [vmem:[#allocation841_spill] sm:$0xff] %v9764_v32  ;;  %v9789_v32 = vld [vmem:[%s12415_s12 + $0x1490] sm:$0xff] }
 0x341   :  { %13248 = vst [vmem:[#allocation842_spill] sm:$0xff] %v9769_v1  ;;  %v9794_v1 = vld [vmem:[%s12415_s12 + $0x1498] sm:$0xff] }
 0x342   :  { %13249 = vst [vmem:[#allocation843_spill] sm:$0xff] %v9774_v10  ;;  %v9799_v10 = vld [vmem:[%s12415_s12 + $0x14a0] sm:$0xff] }
 0x343   :  { %13250 = vst [vmem:[#allocation844_spill] sm:$0xff] %v9779_v2  ;;  %v9804_v2 = vld [vmem:[%s12415_s12 + $0x14a8] sm:$0xff] }
 0x344   :  { %13251 = vst [vmem:[#allocation845_spill] sm:$0xff] %v9784_v0  ;;  %v9809_v0 = vld [vmem:[%s12415_s12 + $0x14b0] sm:$0xff] }
 0x345   :  { %13252 = vst [vmem:[#allocation846_spill] sm:$0xff] %v9789_v32  ;;  %v9814_v32 = vld [vmem:[%s12415_s12 + $0x14b8] sm:$0xff] }
 0x346   :  { %13253 = vst [vmem:[#allocation847_spill] sm:$0xff] %v9794_v1  ;;  %v9819_v1 = vld [vmem:[%s12415_s12 + $0x14c0] sm:$0xff] }
 0x347   :  { %13254 = vst [vmem:[#allocation848_spill] sm:$0xff] %v9799_v10  ;;  %v9824_v10 = vld [vmem:[%s12415_s12 + $0x14c8] sm:$0xff] }
 0x348   :  { %13255 = vst [vmem:[#allocation849_spill] sm:$0xff] %v9804_v2  ;;  %v9829_v2 = vld [vmem:[%s12415_s12 + $0x14d0] sm:$0xff] }
 0x349   :  { %13256 = vst [vmem:[#allocation850_spill] sm:$0xff] %v9809_v0  ;;  %v9834_v0 = vld [vmem:[%s12415_s12 + $0x14d8] sm:$0xff] }
 0x34a   :  { %13257 = vst [vmem:[#allocation851_spill] sm:$0xff] %v9814_v32  ;;  %v9839_v32 = vld [vmem:[%s12415_s12 + $0x14e0] sm:$0xff] }
 0x34b   :  { %13258 = vst [vmem:[#allocation852_spill] sm:$0xff] %v9819_v1  ;;  %v9844_v1 = vld [vmem:[%s12415_s12 + $0x14e8] sm:$0xff] }
 0x34c   :  { %13259 = vst [vmem:[#allocation853_spill] sm:$0xff] %v9824_v10  ;;  %v9849_v10 = vld [vmem:[%s12415_s12 + $0x14f0] sm:$0xff] }
 0x34d   :  { %13260 = vst [vmem:[#allocation854_spill] sm:$0xff] %v9829_v2  ;;  %v9854_v2 = vld [vmem:[%s12415_s12 + $0x14f8] sm:$0xff] }
 0x34e   :  { %13261 = vst [vmem:[#allocation855_spill] sm:$0xff] %v9834_v0  ;;  %v9859_v0 = vld [vmem:[%s12415_s12 + $0x1500] sm:$0xff] }
 0x34f   :  { %13262 = vst [vmem:[#allocation856_spill] sm:$0xff] %v9839_v32  ;;  %v9864_v32 = vld [vmem:[%s12415_s12 + $0x1508] sm:$0xff] }
 0x350   :  { %13263 = vst [vmem:[#allocation857_spill] sm:$0xff] %v9844_v1  ;;  %v9869_v1 = vld [vmem:[%s12415_s12 + $0x1510] sm:$0xff] }
 0x351   :  { %13264 = vst [vmem:[#allocation858_spill] sm:$0xff] %v9849_v10  ;;  %v9874_v10 = vld [vmem:[%s12415_s12 + $0x1518] sm:$0xff] }
 0x352   :  { %13265 = vst [vmem:[#allocation859_spill] sm:$0xff] %v9854_v2  ;;  %v9879_v2 = vld [vmem:[%s12415_s12 + $0x1520] sm:$0xff] }
 0x353   :  { %13266 = vst [vmem:[#allocation860_spill] sm:$0xff] %v9859_v0  ;;  %v9884_v0 = vld [vmem:[%s12415_s12 + $0x1528] sm:$0xff] }
 0x354   :  { %13267 = vst [vmem:[#allocation861_spill] sm:$0xff] %v9864_v32  ;;  %v9889_v32 = vld [vmem:[%s12415_s12 + $0x1530] sm:$0xff] }
 0x355   :  { %13268 = vst [vmem:[#allocation862_spill] sm:$0xff] %v9869_v1  ;;  %v9894_v1 = vld [vmem:[%s12415_s12 + $0x1538] sm:$0xff] }
 0x356   :  { %13269 = vst [vmem:[#allocation863_spill] sm:$0xff] %v9874_v10  ;;  %v9899_v10 = vld [vmem:[%s12415_s12 + $0x1540] sm:$0xff] }
 0x357   :  { %13270 = vst [vmem:[#allocation864_spill] sm:$0xff] %v9879_v2  ;;  %v9904_v2 = vld [vmem:[%s12415_s12 + $0x1548] sm:$0xff] }
 0x358   :  { %13271 = vst [vmem:[#allocation865_spill] sm:$0xff] %v9884_v0  ;;  %v9909_v0 = vld [vmem:[%s12415_s12 + $0x1550] sm:$0xff] }
 0x359   :  { %13272 = vst [vmem:[#allocation866_spill] sm:$0xff] %v9889_v32  ;;  %v9914_v32 = vld [vmem:[%s12415_s12 + $0x1558] sm:$0xff] }
 0x35a   :  { %13273 = vst [vmem:[#allocation867_spill] sm:$0xff] %v9894_v1  ;;  %v9919_v1 = vld [vmem:[%s12415_s12 + $0x1560] sm:$0xff] }
 0x35b   :  { %13274 = vst [vmem:[#allocation868_spill] sm:$0xff] %v9899_v10  ;;  %v9924_v10 = vld [vmem:[%s12415_s12 + $0x1568] sm:$0xff] }
 0x35c   :  { %13275 = vst [vmem:[#allocation869_spill] sm:$0xff] %v9904_v2  ;;  %v9929_v2 = vld [vmem:[%s12415_s12 + $0x1570] sm:$0xff] }
 0x35d   :  { %13276 = vst [vmem:[#allocation870_spill] sm:$0xff] %v9909_v0  ;;  %v9934_v0 = vld [vmem:[%s12415_s12 + $0x1578] sm:$0xff] }
 0x35e   :  { %13277 = vst [vmem:[#allocation871_spill] sm:$0xff] %v9914_v32  ;;  %v9939_v32 = vld [vmem:[%s12415_s12 + $0x1580] sm:$0xff] }
 0x35f   :  { %13278 = vst [vmem:[#allocation872_spill] sm:$0xff] %v9919_v1  ;;  %v9944_v1 = vld [vmem:[%s12415_s12 + $0x1588] sm:$0xff] }
 0x360   :  { %13279 = vst [vmem:[#allocation873_spill] sm:$0xff] %v9924_v10  ;;  %v9949_v10 = vld [vmem:[%s12415_s12 + $0x1590] sm:$0xff] }
 0x361   :  { %13280 = vst [vmem:[#allocation874_spill] sm:$0xff] %v9929_v2  ;;  %v9954_v2 = vld [vmem:[%s12415_s12 + $0x1598] sm:$0xff] }
 0x362   :  { %13281 = vst [vmem:[#allocation875_spill] sm:$0xff] %v9934_v0  ;;  %v9959_v0 = vld [vmem:[%s12415_s12 + $0x15a0] sm:$0xff] }
 0x363   :  { %13282 = vst [vmem:[#allocation876_spill] sm:$0xff] %v9939_v32  ;;  %v9964_v32 = vld [vmem:[%s12415_s12 + $0x15a8] sm:$0xff] }
 0x364   :  { %13283 = vst [vmem:[#allocation877_spill] sm:$0xff] %v9944_v1  ;;  %v9969_v1 = vld [vmem:[%s12415_s12 + $0x15b0] sm:$0xff] }
 0x365   :  { %13284 = vst [vmem:[#allocation878_spill] sm:$0xff] %v9949_v10  ;;  %v9974_v10 = vld [vmem:[%s12415_s12 + $0x15b8] sm:$0xff] }
 0x366   :  { %13285 = vst [vmem:[#allocation879_spill] sm:$0xff] %v9954_v2  ;;  %v9979_v2 = vld [vmem:[%s12415_s12 + $0x15c0] sm:$0xff] }
 0x367   :  { %13286 = vst [vmem:[#allocation880_spill] sm:$0xff] %v9959_v0  ;;  %v9984_v0 = vld [vmem:[%s12415_s12 + $0x15c8] sm:$0xff] }
 0x368   :  { %13287 = vst [vmem:[#allocation881_spill] sm:$0xff] %v9964_v32  ;;  %v9989_v32 = vld [vmem:[%s12415_s12 + $0x15d0] sm:$0xff] }
 0x369   :  { %13288 = vst [vmem:[#allocation882_spill] sm:$0xff] %v9969_v1  ;;  %v9994_v1 = vld [vmem:[%s12415_s12 + $0x15d8] sm:$0xff] }
 0x36a   :  { %13289 = vst [vmem:[#allocation883_spill] sm:$0xff] %v9974_v10  ;;  %v9999_v10 = vld [vmem:[%s12415_s12 + $0x15e0] sm:$0xff] }
 0x36b   :  { %13290 = vst [vmem:[#allocation884_spill] sm:$0xff] %v9979_v2  ;;  %v10004_v2 = vld [vmem:[%s12415_s12 + $0x15e8] sm:$0xff] }
 0x36c   :  { %13291 = vst [vmem:[#allocation885_spill] sm:$0xff] %v9984_v0  ;;  %v10009_v0 = vld [vmem:[%s12415_s12 + $0x15f0] sm:$0xff] }
 0x36d   :  { %13292 = vst [vmem:[#allocation886_spill] sm:$0xff] %v9989_v32  ;;  %v10014_v32 = vld [vmem:[%s12415_s12 + $0x15f8] sm:$0xff] }
 0x36e   :  { %13293 = vst [vmem:[#allocation887_spill] sm:$0xff] %v9994_v1  ;;  %v10019_v1 = vld [vmem:[%s12415_s12 + $0x1600] sm:$0xff] }
 0x36f   :  { %13294 = vst [vmem:[#allocation888_spill] sm:$0xff] %v9999_v10  ;;  %v10024_v10 = vld [vmem:[%s12415_s12 + $0x1608] sm:$0xff] }
 0x370   :  { %13295 = vst [vmem:[#allocation889_spill] sm:$0xff] %v10004_v2  ;;  %v10029_v2 = vld [vmem:[%s12415_s12 + $0x1610] sm:$0xff] }
 0x371   :  { %13296 = vst [vmem:[#allocation890_spill] sm:$0xff] %v10009_v0  ;;  %v10034_v0 = vld [vmem:[%s12415_s12 + $0x1618] sm:$0xff] }
 0x372   :  { %13297 = vst [vmem:[#allocation891_spill] sm:$0xff] %v10014_v32  ;;  %v10039_v32 = vld [vmem:[%s12415_s12 + $0x1620] sm:$0xff] }
 0x373   :  { %13298 = vst [vmem:[#allocation892_spill] sm:$0xff] %v10019_v1  ;;  %v10044_v1 = vld [vmem:[%s12415_s12 + $0x1628] sm:$0xff] }
 0x374   :  { %13299 = vst [vmem:[#allocation893_spill] sm:$0xff] %v10024_v10  ;;  %v10049_v10 = vld [vmem:[%s12415_s12 + $0x1630] sm:$0xff] }
 0x375   :  { %13300 = vst [vmem:[#allocation894_spill] sm:$0xff] %v10029_v2  ;;  %v10054_v2 = vld [vmem:[%s12415_s12 + $0x1638] sm:$0xff] }
 0x376   :  { %13301 = vst [vmem:[#allocation895_spill] sm:$0xff] %v10034_v0  ;;  %v10059_v0 = vld [vmem:[%s12415_s12 + $0x1640] sm:$0xff] }
 0x377   :  { %13302 = vst [vmem:[#allocation896_spill] sm:$0xff] %v10039_v32  ;;  %v10064_v32 = vld [vmem:[%s12415_s12 + $0x1648] sm:$0xff] }
 0x378   :  { %13303 = vst [vmem:[#allocation897_spill] sm:$0xff] %v10044_v1  ;;  %v10069_v1 = vld [vmem:[%s12415_s12 + $0x1650] sm:$0xff] }
 0x379   :  { %13304 = vst [vmem:[#allocation898_spill] sm:$0xff] %v10049_v10  ;;  %v10074_v10 = vld [vmem:[%s12415_s12 + $0x1658] sm:$0xff] }
 0x37a   :  { %13305 = vst [vmem:[#allocation899_spill] sm:$0xff] %v10054_v2  ;;  %v10079_v2 = vld [vmem:[%s12415_s12 + $0x1660] sm:$0xff] }
 0x37b   :  { %13306 = vst [vmem:[#allocation900_spill] sm:$0xff] %v10059_v0  ;;  %v10084_v0 = vld [vmem:[%s12415_s12 + $0x1668] sm:$0xff] }
 0x37c   :  { %13307 = vst [vmem:[#allocation901_spill] sm:$0xff] %v10064_v32  ;;  %v10089_v32 = vld [vmem:[%s12415_s12 + $0x1670] sm:$0xff] }
 0x37d   :  { %13308 = vst [vmem:[#allocation902_spill] sm:$0xff] %v10069_v1  ;;  %v10094_v1 = vld [vmem:[%s12415_s12 + $0x1678] sm:$0xff] }
 0x37e   :  { %13309 = vst [vmem:[#allocation903_spill] sm:$0xff] %v10074_v10  ;;  %v10099_v10 = vld [vmem:[%s12415_s12 + $0x1680] sm:$0xff] }
 0x37f   :  { %13310 = vst [vmem:[#allocation904_spill] sm:$0xff] %v10079_v2  ;;  %v10104_v2 = vld [vmem:[%s12415_s12 + $0x1688] sm:$0xff] }
 0x380   :  { %13311 = vst [vmem:[#allocation905_spill] sm:$0xff] %v10084_v0  ;;  %v10109_v0 = vld [vmem:[%s12415_s12 + $0x1690] sm:$0xff] }
 0x381   :  { %13312 = vst [vmem:[#allocation906_spill] sm:$0xff] %v10089_v32  ;;  %v10114_v32 = vld [vmem:[%s12415_s12 + $0x1698] sm:$0xff] }
 0x382   :  { %13313 = vst [vmem:[#allocation907_spill] sm:$0xff] %v10094_v1  ;;  %v10119_v1 = vld [vmem:[%s12415_s12 + $0x16a0] sm:$0xff] }
 0x383   :  { %13314 = vst [vmem:[#allocation908_spill] sm:$0xff] %v10099_v10  ;;  %v10124_v10 = vld [vmem:[%s12415_s12 + $0x16a8] sm:$0xff] }
 0x384   :  { %13315 = vst [vmem:[#allocation909_spill] sm:$0xff] %v10104_v2  ;;  %v10129_v2 = vld [vmem:[%s12415_s12 + $0x16b0] sm:$0xff] }
 0x385   :  { %13316 = vst [vmem:[#allocation910_spill] sm:$0xff] %v10109_v0  ;;  %v10134_v0 = vld [vmem:[%s12415_s12 + $0x16b8] sm:$0xff] }
 0x386   :  { %13317 = vst [vmem:[#allocation911_spill] sm:$0xff] %v10114_v32  ;;  %v10139_v32 = vld [vmem:[%s12415_s12 + $0x16c0] sm:$0xff] }
 0x387   :  { %13318 = vst [vmem:[#allocation912_spill] sm:$0xff] %v10119_v1  ;;  %v10144_v1 = vld [vmem:[%s12415_s12 + $0x16c8] sm:$0xff] }
 0x388   :  { %13319 = vst [vmem:[#allocation913_spill] sm:$0xff] %v10124_v10  ;;  %v10149_v10 = vld [vmem:[%s12415_s12 + $0x16d0] sm:$0xff] }
 0x389   :  { %13320 = vst [vmem:[#allocation914_spill] sm:$0xff] %v10129_v2  ;;  %v10154_v2 = vld [vmem:[%s12415_s12 + $0x16d8] sm:$0xff] }
 0x38a   :  { %13321 = vst [vmem:[#allocation915_spill] sm:$0xff] %v10134_v0  ;;  %v10159_v0 = vld [vmem:[%s12415_s12 + $0x16e0] sm:$0xff] }
 0x38b   :  { %13322 = vst [vmem:[#allocation916_spill] sm:$0xff] %v10139_v32  ;;  %v10164_v32 = vld [vmem:[%s12415_s12 + $0x16e8] sm:$0xff] }
 0x38c   :  { %13323 = vst [vmem:[#allocation917_spill] sm:$0xff] %v10144_v1  ;;  %v10169_v1 = vld [vmem:[%s12415_s12 + $0x16f0] sm:$0xff] }
 0x38d   :  { %13324 = vst [vmem:[#allocation918_spill] sm:$0xff] %v10149_v10  ;;  %v10174_v10 = vld [vmem:[%s12415_s12 + $0x16f8] sm:$0xff] }
 0x38e   :  { %13325 = vst [vmem:[#allocation919_spill] sm:$0xff] %v10154_v2  ;;  %v10179_v2 = vld [vmem:[%s12415_s12 + $0x1700] sm:$0xff] }
 0x38f   :  { %13326 = vst [vmem:[#allocation920_spill] sm:$0xff] %v10159_v0  ;;  %v10184_v0 = vld [vmem:[%s12415_s12 + $0x1708] sm:$0xff] }
 0x390   :  { %13327 = vst [vmem:[#allocation921_spill] sm:$0xff] %v10164_v32  ;;  %v10189_v32 = vld [vmem:[%s12415_s12 + $0x1710] sm:$0xff] }
 0x391   :  { %13328 = vst [vmem:[#allocation922_spill] sm:$0xff] %v10169_v1  ;;  %v10194_v1 = vld [vmem:[%s12415_s12 + $0x1718] sm:$0xff] }
 0x392   :  { %13329 = vst [vmem:[#allocation923_spill] sm:$0xff] %v10174_v10  ;;  %v10199_v10 = vld [vmem:[%s12415_s12 + $0x1720] sm:$0xff] }
 0x393   :  { %13330 = vst [vmem:[#allocation924_spill] sm:$0xff] %v10179_v2  ;;  %v10204_v2 = vld [vmem:[%s12415_s12 + $0x1728] sm:$0xff] }
 0x394   :  { %13331 = vst [vmem:[#allocation925_spill] sm:$0xff] %v10184_v0  ;;  %v10209_v0 = vld [vmem:[%s12415_s12 + $0x1730] sm:$0xff] }
 0x395   :  { %13332 = vst [vmem:[#allocation926_spill] sm:$0xff] %v10189_v32  ;;  %v10214_v32 = vld [vmem:[%s12415_s12 + $0x1738] sm:$0xff] }
 0x396   :  { %13333 = vst [vmem:[#allocation927_spill] sm:$0xff] %v10194_v1  ;;  %v10219_v1 = vld [vmem:[%s12415_s12 + $0x1740] sm:$0xff] }
 0x397   :  { %13334 = vst [vmem:[#allocation928_spill] sm:$0xff] %v10199_v10  ;;  %v10224_v10 = vld [vmem:[%s12415_s12 + $0x1748] sm:$0xff] }
 0x398   :  { %13335 = vst [vmem:[#allocation929_spill] sm:$0xff] %v10204_v2  ;;  %v10229_v2 = vld [vmem:[%s12415_s12 + $0x1750] sm:$0xff] }
 0x399   :  { %13336 = vst [vmem:[#allocation930_spill] sm:$0xff] %v10209_v0  ;;  %v10234_v0 = vld [vmem:[%s12415_s12 + $0x1758] sm:$0xff] }
 0x39a   :  { %13337 = vst [vmem:[#allocation931_spill] sm:$0xff] %v10214_v32  ;;  %v10239_v32 = vld [vmem:[%s12415_s12 + $0x1760] sm:$0xff] }
 0x39b   :  { %13338 = vst [vmem:[#allocation932_spill] sm:$0xff] %v10219_v1  ;;  %v10244_v1 = vld [vmem:[%s12415_s12 + $0x1768] sm:$0xff] }
 0x39c   :  { %13339 = vst [vmem:[#allocation933_spill] sm:$0xff] %v10224_v10  ;;  %v10249_v10 = vld [vmem:[%s12415_s12 + $0x1770] sm:$0xff] }
 0x39d   :  { %13340 = vst [vmem:[#allocation934_spill] sm:$0xff] %v10229_v2  ;;  %v10254_v2 = vld [vmem:[%s12415_s12 + $0x1778] sm:$0xff] }
 0x39e   :  { %13341 = vst [vmem:[#allocation935_spill] sm:$0xff] %v10234_v0  ;;  %v10259_v0 = vld [vmem:[%s12415_s12 + $0x1780] sm:$0xff] }
 0x39f   :  { %13342 = vst [vmem:[#allocation936_spill] sm:$0xff] %v10239_v32  ;;  %v10264_v32 = vld [vmem:[%s12415_s12 + $0x1788] sm:$0xff] }
 0x3a0   :  { %13343 = vst [vmem:[#allocation937_spill] sm:$0xff] %v10244_v1  ;;  %v10269_v1 = vld [vmem:[%s12415_s12 + $0x1790] sm:$0xff] }
 0x3a1   :  { %13344 = vst [vmem:[#allocation938_spill] sm:$0xff] %v10249_v10  ;;  %v10274_v10 = vld [vmem:[%s12415_s12 + $0x1798] sm:$0xff] }
 0x3a2   :  { %13345 = vst [vmem:[#allocation939_spill] sm:$0xff] %v10254_v2  ;;  %v2068_v2 = vld [vmem:[%s12404_s1 + $0xf8] sm:$0xff] }
 0x3a3   :  { %13346 = vst [vmem:[#allocation940_spill] sm:$0xff] %v10259_v0 }
 0x3a4   :  { %13347 = vst [vmem:[#allocation941_spill] sm:$0xff] %v10264_v32 }
 0x3a5   :  { %13348 = vst [vmem:[#allocation942_spill] sm:$0xff] %v10269_v1 }
 0x3a6   :  { %13349 = vst [vmem:[#allocation943_spill] sm:$0xff] %v10274_v10 }
 0x3a7   :  { %2035 = vsyncadd [#allocation4 + $0x1], 96768  ;;  %v2067_v0 = vld [vmem:[%s12404_s1 + $0xf0] sm:$0xff]  ;;  %2136 = vmatpush.msra.mxu2 %v2068_v2  ;;  %v2066_v1 = vld [vmem:[%s12404_s1 + $0xe8] sm:$0xff]  ;;  %vm2089_vm0 = vcmask 1045504   ;;  %vm2286_vm1 = vcmask 1041408  }
 0x3a8   :  { %2096 = vmatpush.msra.mxu0 %v2067_v0  ;;  %v2065_v32 = vld [vmem:[%s12404_s1 + $0xe0] sm:$0xff]  ;;  %v2064_v10 = vld [vmem:[%s12404_s1 + $0xd8] sm:$0xff]  ;;  %v2063_v8 = vld [vmem:[%s12404_s1 + $0xd0] sm:$0xff]  ;;  %vm2086_vm2 = vcmask 179200   ;;  %vm2282_vm3 = vcmask 998400   ;;  %vm2505_vm4 = vcmask 1043456  }
 0x3a9   :  { %2137 = vmatpush.msra.mxu2 %v2066_v1  ;;  %v2062_v0 = vld [vmem:[%s12404_s1 + $0xc8] sm:$0xff]  ;;  %v2061_v2 = vld [vmem:[%s12404_s1 + $0xc0] sm:$0xff]  ;;  %v2060_v47 = vld [vmem:[%s12404_s1 + $0xb8] sm:$0xff]  ;;  %vm2501_vm5 = vcmask 359424  }
 0x3aa   :  { %2097 = vmatpush.msra.mxu0 %v2065_v32  ;;  %v2059_v7 = vld [vmem:[%s12404_s1 + $0xb0] sm:$0xff]  ;;  %v2058_v1 = vld [vmem:[%s12404_s1 + $0xa8] sm:$0xff]  ;;  %v2057_v32 = vld [vmem:[%s12404_s1 + $0xa0] sm:$0xff] }
 0x3ab   :  { %2138 = vmatpush.msra.mxu2 %v2064_v10  ;;  %v2055_v10 = vld [vmem:[%s12404_s1 + $0x90] sm:$0xff]  ;;  %v2054_v9 = vld [vmem:[%s12404_s1 + $0x88] sm:$0xff]  ;;  %v2053_v15 = vld [vmem:[%s12404_s1 + $0x80] sm:$0xff] }
 0x3ac   :  { %2098 = vmatpush.msra.mxu0 %v2063_v8  ;;  %v2056_v8 = vld [vmem:[%s12404_s1 + $0x98] sm:$0xff]  ;;  %v2069_v17 = vld [vmem:[%s12404_s1 + $0x100] sm:$0xff] }
 0x3ad   :  { %2139 = vmatpush.msra.mxu2 %v2062_v0  ;;  %v2074_v0 = vld [vmem:[%s12404_s1 + $0x128] sm:$0x3f]  ;;  %v2041_v14 = vld [vmem:[%s12404_s1 + $0x20] sm:$0xff] }
 0x3ae   :  { %2099 = vmatpush.msra.mxu0 %v2061_v2  ;;  %v2073_v2 = vld [vmem:[%s12404_s1 + $0x120] sm:$0x3f]  ;;  %5246 = vmatpush.msk.msra.mxu3 %vm2089_vm0, %v2074_v0  ;;  %v2052_v0 = vld [vmem:[%s12404_s1 + $0x78] sm:$0xff] }
 0x3af   :  { %2140 = vmatpush.msra.mxu2 %v2060_v47  ;;  %v2036_v47 = vld [vmem:[%s12403_s0] sm:$0xf]  ;;  %5244 = vmatpush.msk.msra.mxu1 %vm2089_vm0, %v2073_v2  ;;  %v2051_v2 = vld [vmem:[%s12404_s1 + $0x70] sm:$0xff] }
 0x3b0   :  { %2100 = vmatpush.msra.mxu0 %v2059_v7  ;;  %v2072_v7 = vld [vmem:[%s12404_s1 + $0x118] sm:$0xff]  ;;  %2082 = vst [vmem:[#allocation1] ss:$4 sm:$0xff] %v2036_v47  ;;  %v2050_v47 = vld [vmem:[%s12404_s1 + $0x68] sm:$0xff] }
 0x3b1   :  { %2141 = vmatpush.msra.mxu2 %v2058_v1  ;;  %v2071_v1 = vld [vmem:[%s12404_s1 + $0x110] sm:$0xff]  ;;  %2170 = vmatpush.msra.mxu3 %v2072_v7  ;;  %v2049_v7 = vld [vmem:[%s12404_s1 + $0x60] sm:$0xff] }
 0x3b2   :  { %2101 = vmatpush.msra.mxu0 %v2057_v32  ;;  %v2070_v32 = vld [vmem:[%s12404_s1 + $0x108] sm:$0xff]  ;;  %2130 = vmatpush.msra.mxu1 %v2071_v1 }
 0x3b3   :  { %2142 = vmatpush.msra.mxu2 %v2056_v8  ;;  %v2223_v8 = vld [vmem:[%s12406_s3 + $0x168] sm:$0xff]  ;;  %2171 = vmatpush.msra.mxu3 %v2070_v32  ;;  %v2268_v32 = vld [vmem:[%s12406_s3 + $0x2d0] sm:$0xff] }
 0x3b4   :  { %2102 = vmatpush.msra.mxu0 %v2055_v10  ;;  %v2271_v10 = vld [vmem:[%s12406_s3 + $0x2e8] sm:$0x3]  ;;  %2131 = vmatpush.msra.mxu1 %v2069_v17  ;;  %v2220_v17 = vld [vmem:[%s12406_s3 + $0x150] sm:$0xff] }
 0x3b5   :  { %2143 = vmatpush.msra.mxu2 %v2054_v9  ;;  %v2048_v9 = vld [vmem:[%s12404_s1 + $0x58] sm:$0xff]  ;;  %5248 = vmatpush.msk.msrb.mxu3 %vm2286_vm1, %v2271_v10 }
 0x3b6   :  { %2103 = vmatpush.msra.mxu0 %v2053_v15  ;;  %v2047_v15 = vld [vmem:[%s12404_s1 + $0x50] sm:$0xff]  ;;  %2296 = vmatpush.msrb.mxu1 %v2223_v8  ;;  %v2217_v8 = vld [vmem:[%s12406_s3 + $0x138] sm:$0xff] }
 0x3b7   :  { %2144 = vmatpush.msra.mxu2 %v2052_v0  ;;  %v2084_v1 = vld.sshfl [vmem:[#allocation1 + $0x8] sm:$0xff pattern:$0x73625140]  ;;  %v2265_v10 = vld [vmem:[%s12406_s3 + $0x2b8] sm:$0xff]  ;;  %2317 = vmatpush.msrb.mxu3 %v2268_v32 }
 0x3b8   :  { %2104 = vmatpush.msra.mxu0 %v2051_v2  ;;  %v2046_v0 = vld [vmem:[%s12404_s1 + $0x48] sm:$0xff]  ;;  %v2045_v2 = vld [vmem:[%s12404_s1 + $0x40] sm:$0xff]  ;;  %5247 = vmatmul.msk.f32.vlgmr.msra.gmra.mxu3 %vm2086_vm2, %v2084_v1 }
 0x3b9   :  { %2145 = vmatpush.msra.mxu2 %v2050_v47  ;;  %5245 = vmatmul.msk.f32.vlgmr.msra.gmra.mxu1 %vm2086_vm2, %v2084_v1  ;;  %v2044_v47 = vld [vmem:[%s12404_s1 + $0x38] sm:$0xff]  ;;  %v2042_v1 = vld [vmem:[%s12404_s1 + $0x28] sm:$0xff] }
 0x3ba   :  { %2105 = vmatpush.msra.mxu0 %v2049_v7  ;;  %v2043_v7 = vld [vmem:[%s12404_s1 + $0x30] sm:$0xff]  ;;  %2297 = vmatpush.msrb.mxu1 %v2220_v17  ;;  %v2211_v17 = vld [vmem:[%s12406_s3 + $0x108] sm:$0xff] }
 0x3bb   :  { %2146 = vmatpush.msra.mxu2 %v2048_v9  ;;  %v2214_v9 = vld [vmem:[%s12406_s3 + $0x120] sm:$0xff]  ;;  %2318 = vmatpush.msrb.mxu3 %v2265_v10  ;;  %v2259_v32 = vld [vmem:[%s12406_s3 + $0x288] sm:$0xff]  ;;  %v2256_v10 = vld [vmem:[%s12406_s3 + $0x270] sm:$0xff] }
 0x3bc   :  { %2106 = vmatpush.msra.mxu0 %v2047_v15  ;;  %v2262_v15 = vld [vmem:[%s12406_s3 + $0x2a0] sm:$0xff]  ;;  %2298 = vmatpush.msrb.mxu1 %v2217_v8  ;;  %v2208_v8 = vld [vmem:[%s12406_s3 + $0xf0] sm:$0xff] }
 0x3bd   :  { %2147 = vmatpush.msra.mxu2 %v2046_v0  ;;  %v2040_v0 = vld [vmem:[%s12404_s1 + $0x18] sm:$0xff]  ;;  %2319 = vmatpush.msrb.mxu3 %v2262_v15 }
 0x3be   :  { %2107 = vmatpush.msra.mxu0 %v2045_v2  ;;  %v2039_v2 = vld [vmem:[%s12404_s1 + $0x10] sm:$0xff]  ;;  %2299 = vmatpush.msrb.mxu1 %v2214_v9  ;;  %v2205_v9 = vld [vmem:[%s12406_s3 + $0xd8] sm:$0xff] }
 0x3bf   :  { %2148 = vmatpush.msra.mxu2 %v2044_v47  ;;  %v2038_v47 = vld [vmem:[%s12404_s1 + $0x8] sm:$0xff]  ;;  %2320 = vmatpush.msrb.mxu3 %v2259_v32  ;;  %v2253_v15 = vld [vmem:[%s12406_s3 + $0x258] sm:$0xff]  ;;  %v2202_v32 = vld [vmem:[%s12406_s3 + $0xc0] sm:$0xff] }
 0x3c0   :  { %2108 = vmatpush.msra.mxu0 %v2043_v7  ;;  %v2037_v7 = vld [vmem:[%s12404_s1] sm:$0xff]  ;;  %2300 = vmatpush.msrb.mxu1 %v2211_v17  ;;  %v2224_v17 = vld [vmem:[%s12406_s3 + $0x170] sm:$0xff] }
 0x3c1   :  { %2149 = vmatpush.msra.mxu2 %v2042_v1  ;;  %2321 = vmatpush.msrb.mxu3 %v2256_v10  ;;  %v2272_v1 = vld [vmem:[%s12406_s3 + $0x2f0] sm:$0x3]  ;;  %v2199_v10 = vld [vmem:[%s12406_s3 + $0xa8] sm:$0xff] }
 0x3c2   :  { %2109 = vmatpush.msra.mxu0 %v2041_v14  ;;  %v2083_v14 = vld.sshfl [vmem:[#allocation1] sm:$0xff pattern:$0x73625140]  ;;  %2301 = vmatpush.msrb.mxu1 %v2208_v8  ;;  %v2221_v8 = vld [vmem:[%s12406_s3 + $0x158] sm:$0xff] }
 0x3c3   :  { %2150 = vmatpush.msra.mxu2 %v2040_v0  ;;  %v2250_v0 = vld [vmem:[%s12406_s3 + $0x240] sm:$0xff]  ;;  %2322 = vmatpush.msrb.mxu3 %v2253_v15  ;;  %v2244_v15 = vld [vmem:[%s12406_s3 + $0x210] sm:$0xff] }
 0x3c4   :  { %2110 = vmatpush.msra.mxu0 %v2039_v2  ;;  %2302 = vmatpush.msrb.mxu1 %v2205_v9  ;;  %v2269_v2 = vld [vmem:[%s12406_s3 + $0x2d8] sm:$0xff]  ;;  %v2196_v9 = vld [vmem:[%s12406_s3 + $0x90] sm:$0xff] }
 0x3c5   :  { %2151 = vmatpush.msra.mxu2 %v2038_v47  ;;  %v2247_v47 = vld [vmem:[%s12406_s3 + $0x228] sm:$0xff]  ;;  %2323 = vmatpush.msrb.mxu3 %v2250_v0  ;;  %v2241_v0 = vld [vmem:[%s12406_s3 + $0x1f8] sm:$0xff] }
 0x3c6   :  { %2111 = vmatpush.msra.mxu0 %v2037_v7  ;;  %2152 = vmatmul.f32.vlgmr.msra.gmra.mxu2 %v2083_v14  ;;  %v2266_v7 = vld [vmem:[%s12406_s3 + $0x2c0] sm:$0xff] }
 0x3c7   :  { %2112 = vmatmul.f32.vlgmr.msra.gmra.mxu0 %v2083_v14  ;;  %5250 = vmatpush.msk.msrb.mxu2 %vm2286_vm1, %v2272_v1  ;;  %v2218_v14 = vld [vmem:[%s12406_s3 + $0x140] sm:$0xff]  ;;  %v2263_v1 = vld [vmem:[%s12406_s3 + $0x2a8] sm:$0xff] }
 0x3c8   :  { %2336 = vmatpush.msrb.mxu0 %v2224_v17  ;;  %2303 = vmatpush.msrb.mxu1 %v2202_v32  ;;  %v2215_v17 = vld [vmem:[%s12406_s3 + $0x128] sm:$0xff]  ;;  %v2193_v32 = vld [vmem:[%s12406_s3 + $0x78] sm:$0xff] }
 0x3c9   :  { %2357 = vmatpush.msrb.mxu2 %v2269_v2  ;;  %2324 = vmatpush.msrb.mxu3 %v2247_v47  ;;  %v2260_v2 = vld [vmem:[%s12406_s3 + $0x290] sm:$0xff]  ;;  %v2238_v47 = vld [vmem:[%s12406_s3 + $0x1e0] sm:$0xff] }
 0x3ca   :  { %2337 = vmatpush.msrb.mxu0 %v2221_v8  ;;  %2304 = vmatpush.msrb.mxu1 %v2199_v10  ;;  %v2212_v8 = vld [vmem:[%s12406_s3 + $0x110] sm:$0xff]  ;;  %v2190_v10 = vld [vmem:[%s12406_s3 + $0x60] sm:$0xff] }
 0x3cb   :  { %2358 = vmatpush.msrb.mxu2 %v2266_v7  ;;  %2325 = vmatpush.msrb.mxu3 %v2244_v15  ;;  %v2257_v7 = vld [vmem:[%s12406_s3 + $0x278] sm:$0xff]  ;;  %v2235_v15 = vld [vmem:[%s12406_s3 + $0x1c8] sm:$0xff] }
 0x3cc   :  { %2338 = vmatpush.msrb.mxu0 %v2218_v14  ;;  %2305 = vmatpush.msrb.mxu1 %v2196_v9  ;;  %v2209_v14 = vld [vmem:[%s12406_s3 + $0xf8] sm:$0xff]  ;;  %v2187_v9 = vld [vmem:[%s12406_s3 + $0x48] sm:$0xff] }
 0x3cd   :  { %2359 = vmatpush.msrb.mxu2 %v2263_v1  ;;  %2326 = vmatpush.msrb.mxu3 %v2241_v0  ;;  %v2254_v1 = vld [vmem:[%s12406_s3 + $0x260] sm:$0xff]  ;;  %v2232_v0 = vld [vmem:[%s12406_s3 + $0x1b0] sm:$0xff] }
 0x3ce   :  { %2339 = vmatpush.msrb.mxu0 %v2215_v17  ;;  %2306 = vmatpush.msrb.mxu1 %v2193_v32  ;;  %v2206_v17 = vld [vmem:[%s12406_s3 + $0xe0] sm:$0xff]  ;;  %v2184_v32 = vld [vmem:[%s12406_s3 + $0x30] sm:$0xff] }
 0x3cf   :  { %2360 = vmatpush.msrb.mxu2 %v2260_v2  ;;  %2327 = vmatpush.msrb.mxu3 %v2238_v47  ;;  %v2251_v2 = vld [vmem:[%s12406_s3 + $0x248] sm:$0xff]  ;;  %v2229_v47 = vld [vmem:[%s12406_s3 + $0x198] sm:$0xff] }
 0x3d0   :  { %2340 = vmatpush.msrb.mxu0 %v2212_v8  ;;  %2307 = vmatpush.msrb.mxu1 %v2190_v10  ;;  %v2203_v8 = vld [vmem:[%s12406_s3 + $0xc8] sm:$0xff]  ;;  %v2181_v10 = vld [vmem:[%s12406_s3 + $0x18] sm:$0xff] }
 0x3d1   :  { %2361 = vmatpush.msrb.mxu2 %v2257_v7  ;;  %2328 = vmatpush.msrb.mxu3 %v2235_v15  ;;  %v2248_v7 = vld [vmem:[%s12406_s3 + $0x230] sm:$0xff]  ;;  %v2225_v15 = vld [vmem:[%s12406_s3 + $0x178] sm:$0xff] }
 0x3d2   :  { %2341 = vmatpush.msrb.mxu0 %v2209_v14  ;;  %2308 = vmatpush.msrb.mxu1 %v2187_v9  ;;  %v2178_v14 = vld [vmem:[%s12406_s3] sm:$0xff] }
 0x3d3   :  { %2362 = vmatpush.msrb.mxu2 %v2254_v1  ;;  %2329 = vmatpush.msrb.mxu3 %v2232_v0  ;;  %v2226_v9 = vld [vmem:[%s12406_s3 + $0x180] sm:$0xff]  ;;  %v2273_v1 = vld [vmem:[%s12406_s3 + $0x2f8] sm:$0x3] }
 0x3d4   :  { %2342 = vmatpush.msrb.mxu0 %v2206_v17  ;;  %2309 = vmatpush.msrb.mxu1 %v2184_v32  ;;  %v2245_v17 = vld [vmem:[%s12406_s3 + $0x218] sm:$0xff]  ;;  %v2222_v32 = vld [vmem:[%s12406_s3 + $0x160] sm:$0xff] }
 0x3d5   :  { %2363 = vmatpush.msrb.mxu2 %v2251_v2  ;;  %2330 = vmatpush.msrb.mxu3 %v2229_v47  ;;  %v2270_v0 = vld [vmem:[%s12406_s3 + $0x2e0] sm:$0xff]  ;;  %v2219_v2 = vld [vmem:[%s12406_s3 + $0x148] sm:$0xff]  ;;  %v2264_v47 = vld [vmem:[%s12406_s3 + $0x2b0] sm:$0xff] }
 0x3d6   :  { %2343 = vmatpush.msrb.mxu0 %v2203_v8  ;;  %2310 = vmatpush.msrb.mxu1 %v2181_v10  ;;  %v2267_v8 = vld [vmem:[%s12406_s3 + $0x2c8] sm:$0xff]  ;;  %v2216_v10 = vld [vmem:[%s12406_s3 + $0x130] sm:$0xff] }
 0x3d7   :  { %2364 = vmatpush.msrb.mxu2 %v2248_v7  ;;  %2331 = vmatpush.msrb.mxu3 %v2226_v9  ;;  %v2213_v7 = vld [vmem:[%s12406_s3 + $0x118] sm:$0xff]  ;;  %v2210_v9 = vld [vmem:[%s12406_s3 + $0x100] sm:$0xff] }
 0x3d8   :  { %2311 = vmatpush.msrb.mxu1 %v2178_v14  ;;  %v2261_v14 = vld [vmem:[%s12406_s3 + $0x298] sm:$0xff] }
 0x3d9   :  { %5252 = vmatpush.msk.msra.mxu3 %vm2286_vm1, %v2273_v1  ;;  %2365 = vmatpush.msrb.mxu2 %v2245_v17  ;;  %v2207_v1 = vld [vmem:[%s12406_s3 + $0xe8] sm:$0xff]  ;;  %v2204_v17 = vld [vmem:[%s12406_s3 + $0xd0] sm:$0xff] }
 0x3da   :  { %2376 = vmatpush.msra.mxu1 %v2225_v15  ;;  %v2258_v15 = vld [vmem:[%s12406_s3 + $0x280] sm:$0xff] }
 0x3db   :  { %2397 = vmatpush.msra.mxu3 %v2270_v0  ;;  %v2242_v0 = vld [vmem:[%s12406_s3 + $0x200] sm:$0xff] }
 0x3dc   :  { %2377 = vmatpush.msra.mxu1 %v2222_v32  ;;  %v2200_v32 = vld [vmem:[%s12406_s3 + $0xb0] sm:$0xff]  ;;  %2366 = vmatpush.msrb.mxu2 %v2242_v0  ;;  %v2233_v0 = vld [vmem:[%s12406_s3 + $0x1b8] sm:$0xff] }
 0x3dd   :  { %2398 = vmatpush.msra.mxu3 %v2267_v8  ;;  %2344 = vmatpush.msrb.mxu0 %v2200_v32  ;;  %v2255_v8 = vld [vmem:[%s12406_s3 + $0x268] sm:$0xff] }
 0x3de   :  { %2378 = vmatpush.msra.mxu1 %v2219_v2  ;;  %v2201_v2 = vld [vmem:[%s12406_s3 + $0xb8] sm:$0xff]  ;;  %v2191_v32 = vld [vmem:[%s12406_s3 + $0x68] sm:$0xff] }
 0x3df   :  { %2399 = vmatpush.msra.mxu3 %v2264_v47  ;;  %v2239_v47 = vld [vmem:[%s12406_s3 + $0x1e8] sm:$0xff] }
 0x3e0   :  { %2379 = vmatpush.msra.mxu1 %v2216_v10  ;;  %v2197_v10 = vld [vmem:[%s12406_s3 + $0x98] sm:$0xff]  ;;  %2367 = vmatpush.msrb.mxu2 %v2239_v47  ;;  %v2230_v47 = vld [vmem:[%s12406_s3 + $0x1a0] sm:$0xff] }
 0x3e1   :  { %2400 = vmatpush.msra.mxu3 %v2261_v14  ;;  %2345 = vmatpush.msrb.mxu0 %v2197_v10  ;;  %v2252_v14 = vld [vmem:[%s12406_s3 + $0x250] sm:$0xff] }
 0x3e2   :  { %2380 = vmatpush.msra.mxu1 %v2213_v7  ;;  %v2198_v7 = vld [vmem:[%s12406_s3 + $0xa0] sm:$0xff]  ;;  %v2188_v10 = vld [vmem:[%s12406_s3 + $0x50] sm:$0xff] }
 0x3e3   :  { %2401 = vmatpush.msra.mxu3 %v2258_v15  ;;  %v2236_v15 = vld [vmem:[%s12406_s3 + $0x1d0] sm:$0xff] }
 0x3e4   :  { %2381 = vmatpush.msra.mxu1 %v2210_v9  ;;  %v2194_v9 = vld [vmem:[%s12406_s3 + $0x80] sm:$0xff]  ;;  %2368 = vmatpush.msrb.mxu2 %v2236_v15  ;;  %v2227_v15 = vld [vmem:[%s12406_s3 + $0x188] sm:$0xff] }
 0x3e5   :  { %2402 = vmatpush.msra.mxu3 %v2255_v8  ;;  %2346 = vmatpush.msrb.mxu0 %v2194_v9  ;;  %v2246_v8 = vld [vmem:[%s12406_s3 + $0x220] sm:$0xff]  ;;  %v2185_v9 = vld [vmem:[%s12406_s3 + $0x38] sm:$0xff] }
 0x3e6   :  { %2382 = vmatpush.msra.mxu1 %v2207_v1  ;;  %v2195_v1 = vld [vmem:[%s12406_s3 + $0x88] sm:$0xff]  ;;  %2369 = vmatpush.msrb.mxu2 %v2233_v0 }
 0x3e7   :  { %2403 = vmatpush.msra.mxu3 %v2252_v14  ;;  %2347 = vmatpush.msrb.mxu0 %v2191_v32  ;;  %v2243_v14 = vld [vmem:[%s12406_s3 + $0x208] sm:$0xff]  ;;  %v2182_v32 = vld [vmem:[%s12406_s3 + $0x20] sm:$0xff] }
 0x3e8   :  { %2383 = vmatpush.msra.mxu1 %v2204_v17  ;;  %v2249_v17 = vld [vmem:[%s12406_s3 + $0x238] sm:$0xff]  ;;  %2370 = vmatpush.msrb.mxu2 %v2230_v47  ;;  %v2183_v0 = vld [vmem:[%s12406_s3 + $0x28] sm:$0xff]  ;;  %v2234_v47 = vld [vmem:[%s12406_s3 + $0x1c0] sm:$0xff] }
 0x3e9   :  { %2404 = vmatpush.msra.mxu3 %v2249_v17  ;;  %2348 = vmatpush.msrb.mxu0 %v2188_v10  ;;  %v2240_v17 = vld [vmem:[%s12406_s3 + $0x1f0] sm:$0xff] }
 0x3ea   :  { %2384 = vmatpush.msra.mxu1 %v2201_v2  ;;  %v2192_v2 = vld [vmem:[%s12406_s3 + $0x70] sm:$0xff]  ;;  %2371 = vmatpush.msrb.mxu2 %v2227_v15  ;;  %v2447_v15 = vld [vmem:[%s12408_s5 + $0xe0] sm:$0xff] }
 0x3eb   :  { %2405 = vmatpush.msra.mxu3 %v2246_v8  ;;  %2349 = vmatpush.msrb.mxu0 %v2185_v9  ;;  %v2179_v8 = vld [vmem:[%s12406_s3 + $0x8] sm:$0xff]  ;;  %v2180_v10 = vld [vmem:[%s12406_s3 + $0x10] sm:$0xff] }
 0x3ec   :  { %2385 = vmatpush.msra.mxu1 %v2198_v7  ;;  %v2189_v7 = vld [vmem:[%s12406_s3 + $0x58] sm:$0xff]  ;;  %v2449_v9 = vld [vmem:[%s12408_s5 + $0xf0] sm:$0xff] }
 0x3ed   :  { %2406 = vmatpush.msra.mxu3 %v2243_v14  ;;  %2350 = vmatpush.msrb.mxu0 %v2182_v32  ;;  %v2228_v14 = vld [vmem:[%s12406_s3 + $0x190] sm:$0xff]  ;;  %v2479_v32 = vld [vmem:[%s12408_s5 + $0x1e0] sm:$0xff] }
 0x3ee   :  { %2386 = vmatpush.msra.mxu1 %v2195_v1  ;;  %v2186_v1 = vld [vmem:[%s12406_s3 + $0x40] sm:$0xff] }
 0x3ef   :  { %2407 = vmatpush.msra.mxu3 %v2240_v17  ;;  %2351 = vmatpush.msrb.mxu0 %v2179_v8  ;;  %v2445_v17 = vld [vmem:[%s12408_s5 + $0xd0] sm:$0xff]  ;;  %v2075_v8 = vld [vmem:[%s12405_s2] sm:$0x3] }
 0x3f0   :  { %2387 = vmatpush.msra.mxu1 %v2192_v2  ;;  %v2237_v2 = vld [vmem:[%s12406_s3 + $0x1d8] sm:$0xff] }
 0x3f1   :  { %2408 = vmatpush.msra.mxu3 %v2237_v2  ;;  %2512 = vmatpush.msra.mxu0 %v2449_v9  ;;  %v2477_v2 = vld [vmem:[%s12408_s5 + $0x1d0] sm:$0xff]  ;;  %v2439_v9 = vld [vmem:[%s12408_s5 + $0xa0] sm:$0xff] }
 0x3f2   :  { %2388 = vmatpush.msra.mxu1 %v2189_v7  ;;  %v2231_v7 = vld [vmem:[%s12406_s3 + $0x1a8] sm:$0xff] }
 0x3f3   :  { %2409 = vmatpush.msra.mxu3 %v2234_v47  ;;  %2513 = vmatpush.msra.mxu0 %v2447_v15  ;;  %v2441_v47 = vld [vmem:[%s12408_s5 + $0xb0] sm:$0xff]  ;;  %v2471_v15 = vld [vmem:[%s12408_s5 + $0x1a0] sm:$0xff] }
 0x3f4   :  { %2389 = vmatpush.msra.mxu1 %v2186_v1  ;;  %v2481_v1 = vld [vmem:[%s12408_s5 + $0x1f0] sm:$0xff] }
 0x3f5   :  { %2410 = vmatpush.msra.mxu3 %v2231_v7  ;;  %2532 = vmatpush.msra.mxu2 %v2481_v1  ;;  %v2473_v7 = vld [vmem:[%s12408_s5 + $0x1b0] sm:$0xff] }
 0x3f6   :  { %2390 = vmatpush.msra.mxu1 %v2183_v0  ;;  %v2443_v0 = vld [vmem:[%s12408_s5 + $0xc0] sm:$0xff]  ;;  %2514 = vmatpush.msra.mxu0 %v2445_v17  ;;  %v2437_v1 = vld [vmem:[%s12408_s5 + $0x90] sm:$0xff] }
 0x3f7   :  { %2411 = vmatpush.msra.mxu3 %v2228_v14  ;;  %2533 = vmatpush.msra.mxu2 %v2479_v32  ;;  %v2077_v14 = vperm.slane %v2075_v8, 0 }
 0x3f8   :  { %2391 = vmatpush.msra.mxu1 %v2180_v10  ;;  %v2475_v10 = vld [vmem:[%s12408_s5 + $0x1c0] sm:$0xff]  ;;  %2515 = vmatpush.msra.mxu0 %v2443_v0  ;;  %v2469_v0 = vld [vmem:[%s12408_s5 + $0x190] sm:$0xff] }
 0x3f9   :  { %2534 = vmatpush.msra.mxu2 %v2477_v2 }
 0x3fa   :  { %2516 = vmatpush.msra.mxu0 %v2441_v47  ;;  %v2467_v47 = vld [vmem:[%s12408_s5 + $0x180] sm:$0xff] }
 0x3fb   :  { %2535 = vmatpush.msra.mxu2 %v2475_v10  ;;  %v2435_v10 = vld [vmem:[%s12408_s5 + $0x80] sm:$0xff] }
 0x3fc   :  { %2517 = vmatpush.msra.mxu0 %v2439_v9  ;;  %v2433_v9 = vld [vmem:[%s12408_s5 + $0x70] sm:$0xff] }
 0x3fd   :  { %2536 = vmatpush.msra.mxu2 %v2473_v7  ;;  %v2078_v7 = vperm.slane %v2075_v8, 1 }
 0x3fe   :  { %2518 = vmatpush.msra.mxu0 %v2437_v1 }
 0x3ff   :  { %2537 = vmatpush.msra.mxu2 %v2471_v15  ;;  %v2431_v15 = vld [vmem:[%s12408_s5 + $0x60] sm:$0xff] }
 0x400   :  { %2519 = vmatpush.msra.mxu0 %v2435_v10 }
 0x401   :  { %2538 = vmatpush.msra.mxu2 %v2469_v0 }
 0x402   :  { %2520 = vmatpush.msra.mxu0 %v2433_v9  ;;  %v2448_v9 = vld [vmem:[%s12408_s5 + $0xe8] sm:$0xff] }
 0x403   :  { %2539 = vmatpush.msra.mxu2 %v2467_v47  ;;  %v2450_v47 = vld [vmem:[%s12408_s5 + $0xf8] sm:$0xff] }
 0x404   :  { %2521 = vmatpush.msra.mxu0 %v2431_v15  ;;  %v2446_v15 = vld [vmem:[%s12408_s5 + $0xd8] sm:$0xff] }
 0x436   :  { %v2133_v32 = vpop.f32.mrf.mxu1 }
 0x444   :  { %v2113_v17 = vpop.f32.mrf.mxu0 }
 0x445   :  { %v2114_v2 = vadd.f32 %v2113_v17, %v2077_v14  ;;  %v2482_v14 = vld [vmem:[%s12408_s5 + $0x1f8] sm:$0xff]  ;;  %v2173_v17 = vpop.f32.mrf.mxu3 }
 0x447   :  { %v2134_v31 = vadd.f32 %v2133_v32, %v2114_v2  ;;  %v2480_v32 = vld [vmem:[%s12408_s5 + $0x1e8] sm:$0xff]  ;;  %v2478_v2 = vld [vmem:[%s12408_s5 + $0x1d8] sm:$0xff] }
 0x449   :  { %v2176_v22 = vmax.f32 %v2134_v31, 0.0  ;;  %v2153_v1 = vpop.f32.mrf.mxu2  ;;  %v2429_v31 = vld [vmem:[%s12408_s5 + $0x50] sm:$0xff] }
 0x44a   :  { %v2154_v8 = vadd.f32 %v2153_v1, %v2078_v7  ;;  %2522 = vmatpush.msra.mxu0 %v2429_v31  ;;  %v2476_v7 = vld [vmem:[%s12408_s5 + $0x1c8] sm:$0xff] }
 0x44b   :  { %2312 = vmatmul.f32.vlgmr.msrb.gmra.mxu1 %v2176_v22  ;;  %2352 = vmatmul.f32.vlgmr.msrb.gmra.mxu0 %v2176_v22  ;;  %v2472_v1 = vld [vmem:[%s12408_s5 + $0x1a8] sm:$0xff] }
 0x44c   :  { %2592 = vmatpush.msrb.mxu1 %v2482_v14  ;;  %v2174_v0 = vadd.f32 %v2173_v17, %v2154_v8  ;;  %v2474_v14 = vld [vmem:[%s12408_s5 + $0x1b8] sm:$0xff]  ;;  %v2444_v17 = vld [vmem:[%s12408_s5 + $0xc8] sm:$0xff] }
 0x44d   :  { %v2470_v8 = vld [vmem:[%s12408_s5 + $0x198] sm:$0xff]  ;;  %v2440_v31 = vld [vmem:[%s12408_s5 + $0xa8] sm:$0xff] }
 0x44e   :  { %2593 = vmatpush.msrb.mxu1 %v2480_v32  ;;  %v2177_v10 = vmax.f32 %v2174_v0, 0.0  ;;  %v2468_v32 = vld [vmem:[%s12408_s5 + $0x188] sm:$0xff]  ;;  %v2438_v0 = vld [vmem:[%s12408_s5 + $0x98] sm:$0xff] }
 0x450   :  { %2594 = vmatpush.msrb.mxu1 %v2478_v2  ;;  %5249 = vmatmul.msk.f32.vlgmr.msrb.gmra.mxu3 %vm2282_vm3, %v2177_v10  ;;  %v2436_v2 = vld [vmem:[%s12408_s5 + $0x88] sm:$0xff] }
 0x451   :  { %5251 = vmatmul.msk.f32.vlgmr.msrb.gmra.mxu2 %vm2282_vm3, %v2177_v10  ;;  %2572 = vmatpush.msrb.mxu3 %v2450_v47  ;;  %v2465_v47 = vld [vmem:[%s12408_s5 + $0x170] sm:$0xff] }
 0x452   :  { %2595 = vmatpush.msrb.mxu1 %v2476_v7  ;;  %v2434_v7 = vld [vmem:[%s12408_s5 + $0x78] sm:$0xff]  ;;  %2540 = vmatpush.msra.mxu2 %v2465_v47  ;;  %v2460_v47 = vld [vmem:[%s12408_s5 + $0x148] sm:$0xff] }
 0x453   :  { %2392 = vmatmul.f32.vlgmr.msra.gmra.mxu1 %v2176_v22  ;;  %2573 = vmatpush.msrb.mxu3 %v2448_v9  ;;  %v2442_v22 = vld [vmem:[%s12408_s5 + $0xb8] sm:$0xff] }
 0x454   :  { %2596 = vmatpush.msrb.mxu1 %v2474_v14  ;;  %v2466_v9 = vld [vmem:[%s12408_s5 + $0x178] sm:$0xff]  ;;  %v2425_v14 = vld [vmem:[%s12408_s5 + $0x30] sm:$0xff] }
 0x455   :  { %2574 = vmatpush.msrb.mxu3 %v2446_v15  ;;  %v2463_v15 = vld [vmem:[%s12408_s5 + $0x160] sm:$0xff] }
 0x456   :  { %2597 = vmatpush.msrb.mxu1 %v2472_v1  ;;  %v2432_v1 = vld [vmem:[%s12408_s5 + $0x68] sm:$0xff]  ;;  %2541 = vmatpush.msra.mxu2 %v2463_v15  ;;  %v2458_v15 = vld [vmem:[%s12408_s5 + $0x138] sm:$0xff] }
 0x457   :  { %2575 = vmatpush.msrb.mxu3 %v2444_v17  ;;  %v2464_v17 = vld [vmem:[%s12408_s5 + $0x168] sm:$0xff] }
 0x458   :  { %2598 = vmatpush.msrb.mxu1 %v2470_v8  ;;  %5253 = vmatmul.msk.f32.vlgmr.msra.gmra.mxu3 %vm2282_vm3, %v2177_v10  ;;  %v2427_v10 = vld [vmem:[%s12408_s5 + $0x40] sm:$0xff] }
 0x459   :  { %2576 = vmatpush.msrb.mxu3 %v2442_v22  ;;  %2523 = vmatpush.msra.mxu0 %v2427_v10  ;;  %v2423_v8 = vld [vmem:[%s12408_s5 + $0x20] sm:$0xff]  ;;  %v2461_v22 = vld [vmem:[%s12408_s5 + $0x150] sm:$0xff]  ;;  %v2428_v10 = vld [vmem:[%s12408_s5 + $0x48] sm:$0xff] }
 0x45a   :  { %2599 = vmatpush.msrb.mxu1 %v2468_v32  ;;  %v2430_v32 = vld [vmem:[%s12408_s5 + $0x58] sm:$0xff]  ;;  %2542 = vmatpush.msra.mxu2 %v2461_v22  ;;  %v2456_v22 = vld [vmem:[%s12408_s5 + $0x128] sm:$0xff] }
 0x45b   :  { %2577 = vmatpush.msrb.mxu3 %v2440_v31  ;;  %2524 = vmatpush.msra.mxu0 %v2425_v14  ;;  %v2462_v31 = vld [vmem:[%s12408_s5 + $0x158] sm:$0xff] }
 0x45c   :  { %2600 = vmatpush.msrb.mxu1 %v2466_v9  ;;  %v2457_v9 = vld [vmem:[%s12408_s5 + $0x130] sm:$0xff]  ;;  %v2426_v14 = vld [vmem:[%s12408_s5 + $0x38] sm:$0xff] }
 0x45d   :  { %2578 = vmatpush.msrb.mxu3 %v2438_v0  ;;  %v2421_v0 = vld [vmem:[%s12408_s5 + $0x10] sm:$0xff]  ;;  %2525 = vmatpush.msra.mxu0 %v2423_v8  ;;  %v2424_v8 = vld [vmem:[%s12408_s5 + $0x28] sm:$0xff] }
 0x45e   :  { %2601 = vmatpush.msrb.mxu1 %v2464_v17  ;;  %v2455_v17 = vld [vmem:[%s12408_s5 + $0x120] sm:$0xff] }
 0x45f   :  { %2579 = vmatpush.msrb.mxu3 %v2436_v2  ;;  %v2459_v2 = vld [vmem:[%s12408_s5 + $0x140] sm:$0xff]  ;;  %2526 = vmatpush.msra.mxu0 %v2421_v0  ;;  %v2422_v0 = vld [vmem:[%s12408_s5 + $0x18] sm:$0xff] }
 0x460   :  { %2602 = vmatpush.msrb.mxu1 %v2462_v31  ;;  %2543 = vmatpush.msra.mxu2 %v2459_v2  ;;  %v2453_v31 = vld [vmem:[%s12408_s5 + $0x110] sm:$0xff]  ;;  %v2454_v2 = vld [vmem:[%s12408_s5 + $0x118] sm:$0xff] }
 0x461   :  { %2580 = vmatpush.msrb.mxu3 %v2434_v7  ;;  %v2419_v7 = vld [vmem:[%s12408_s5] sm:$0xff] }
 0x462   :  { %2603 = vmatpush.msrb.mxu1 %v2460_v47  ;;  %2527 = vmatpush.msra.mxu0 %v2419_v7  ;;  %v2451_v47 = vld [vmem:[%s12408_s5 + $0x100] sm:$0xff]  ;;  %v2420_v7 = vld [vmem:[%s12408_s5 + $0x8] sm:$0xff] }
 0x463   :  { %2581 = vmatpush.msrb.mxu3 %v2432_v1  ;;  %2544 = vmatpush.msra.mxu2 %v2457_v9  ;;  %v2493_v1 = vld [vmem:[%s12408_s5 + $0x250] sm:$0xf]  ;;  %v2452_v9 = vld [vmem:[%s12408_s5 + $0x108] sm:$0xff] }
 0x464   :  { %2604 = vmatpush.msrb.mxu1 %v2458_v15  ;;  %5254 = vmatpush.msk.msrb.mxu0 %vm2505_vm4, %v2493_v1  ;;  %v2485_v15 = vld [vmem:[%s12408_s5 + $0x210] sm:$0xff]  ;;  %v2483_v1 = vld [vmem:[%s12408_s5 + $0x200] sm:$0xff] }
 0x465   :  { %2582 = vmatpush.msrb.mxu3 %v2430_v32  ;;  %2545 = vmatpush.msra.mxu2 %v2455_v17  ;;  %v2491_v32 = vld [vmem:[%s12408_s5 + $0x240] sm:$0xff] }
 0x466   :  { %2605 = vmatpush.msrb.mxu1 %v2456_v22  ;;  %2563 = vmatpush.msrb.mxu0 %v2491_v32  ;;  %v2274_v17 = vld [vmem:[%s12407_s4] sm:$0x7] }
 0x467   :  { %2583 = vmatpush.msrb.mxu3 %v2428_v10  ;;  %2546 = vmatpush.msra.mxu2 %v2453_v31  ;;  %v2489_v10 = vld [vmem:[%s12408_s5 + $0x230] sm:$0xff]  ;;  %v2277_v22 = vperm.slane %v2274_v17, 1 }
 0x468   :  { %2606 = vmatpush.msrb.mxu1 %v2454_v2  ;;  %2564 = vmatpush.msrb.mxu0 %v2489_v10 }
 0x469   :  { %2584 = vmatpush.msrb.mxu3 %v2426_v14  ;;  %2547 = vmatpush.msra.mxu2 %v2451_v47  ;;  %v2487_v14 = vld [vmem:[%s12408_s5 + $0x220] sm:$0xff] }
 0x46a   :  { %2607 = vmatpush.msrb.mxu1 %v2452_v9  ;;  %2565 = vmatpush.msrb.mxu0 %v2487_v14  ;;  %v2278_v14 = vperm.slane %v2274_v17, 2 }
 0x46b   :  { %2585 = vmatpush.msrb.mxu3 %v2424_v8  ;;  %v2276_v8 = vperm.slane %v2274_v17, 0  ;;  %v2490_v17 = vld [vmem:[%s12408_s5 + $0x238] sm:$0xff]  ;;  %2876 = vmatpush.msrb.mxu2 %v5904_v3 }
 0x46c   :  { %2566 = vmatpush.msrb.mxu0 %v2485_v15 }
 0x46d   :  { %2586 = vmatpush.msrb.mxu3 %v2422_v0 }
 0x46e   :  { %2567 = vmatpush.msrb.mxu0 %v2483_v1  ;;  %v2494_v1 = vld [vmem:[%s12408_s5 + $0x258] sm:$0xf] }
 0x46f   :  { %2587 = vmatpush.msrb.mxu3 %v2420_v7 }
 0x471   :  { %2896 = vmatpush.msra.mxu3 %v6464_v41 }
 0x4c8   :  { %v2313_v32 = vpop.f32.mrf.mxu1  ;;  %v2353_v31 = vpop.f32.mrf.mxu0 }
 0x4c9   :  { %v2314_v0 = vadd.f32 %v2313_v32, %v2276_v8  ;;  %v2354_v2 = vadd.f32 %v2353_v31, %v2277_v22  ;;  %v2492_v8 = vld [vmem:[%s12408_s5 + $0x248] sm:$0xff] }
 0x4d0   :  { %v2393_v21 = vpop.f32.mrf.mxu1 }
 0x4d1   :  { %v2394_v22 = vadd.f32 %v2393_v21, %v2278_v14  ;;  %v2486_v21 = vld [vmem:[%s12408_s5 + $0x218] sm:$0xff] }
 0x4d3   :  { %v2333_v10 = vpop.f32.mrf.mxu3 }
 0x4d4   :  { %v2373_v47 = vpop.f32.mrf.mxu2  ;;  %v2334_v7 = vadd.f32 %v2333_v10, %v2314_v0  ;;  %v2495_v10 = vld [vmem:[%s12409_s6] sm:$0x3] }
 0x4d5   :  { %v2374_v9 = vadd.f32 %v2373_v47, %v2354_v2  ;;  %v2484_v2 = vld [vmem:[%s12408_s5 + $0x208] sm:$0xff] }
 0x4d6   :  { %v2416_v15 = vmax.f32 %v2334_v7, 0.0  ;;  %v2497_v7 = vperm.slane %v2495_v10, 0 }
 0x4d7   :  { %v2417_v16 = vmax.f32 %v2374_v9, 0.0 }
 0x4d8   :  { %2528 = vmatmul.f32.vlgmr.msra.gmra.mxu0 %v2416_v15  ;;  %2588 = vmatmul.f32.vlgmr.msrb.gmra.mxu3 %v2416_v15 }
 0x4d9   :  { %2548 = vmatmul.f32.vlgmr.msra.gmra.mxu2 %v2417_v16  ;;  %2608 = vmatmul.f32.vlgmr.msrb.gmra.mxu1 %v2417_v16  ;;  %v2488_v16 = vld [vmem:[%s12408_s5 + $0x228] sm:$0xff] }
 0x4da   :  { %5256 = vmatpush.msk.msra.mxu0 %vm2505_vm4, %v2494_v1  ;;  %v2498_v1 = vperm.slane %v2495_v10, 1 }
 0x4db   :  { %v2413_v32 = vpop.f32.mrf.mxu3 }
 0x4dc   :  { %v2414_v31 = vadd.f32 %v2413_v32, %v2394_v22  ;;  %2623 = vmatpush.msra.mxu0 %v2492_v8 }
 0x4de   :  { %v2418_v0 = vmax.f32 %v2414_v31, 0.0  ;;  %2624 = vmatpush.msra.mxu0 %v2490_v17 }
 0x4e0   :  { %5255 = vmatmul.msk.f32.vlgmr.msrb.gmra.mxu0 %vm2501_vm5, %v2418_v0 }
 0x4e1   :  { %2625 = vmatpush.msra.mxu0 %v2488_v16 }
 0x4e3   :  { %2626 = vmatpush.msra.mxu0 %v2486_v21 }
 0x4e5   :  { %2627 = vmatpush.msra.mxu0 %v2484_v2 }
 0x4e8   :  { %5257 = vmatmul.msk.f32.vlgmr.msra.gmra.mxu0 %vm2501_vm5, %v2418_v0 }
 0x555   :  { %v2529_v47 = vpop.f32.mrf.mxu0 }
 0x556   :  { %v2530_v9 = vadd.f32 %v2529_v47, %v2497_v7  ;;  %v2609_v31 = vpop.f32.mrf.mxu1 }
 0x55b   :  { %v2589_v8 = vpop.f32.mrf.mxu3 }
 0x55c   :  { %v2549_v14 = vpop.f32.mrf.mxu2  ;;  %v2590_v17 = vadd.f32 %v2589_v8, %v2498_v1 }
 0x55d   :  { %v2550_v15 = vadd.f32 %v2549_v14, %v2530_v9  ;;  %v2569_v22 = vpop.f32.mrf.mxu0 }
 0x55e   :  { %v2610_v16 = vadd.f32 %v2609_v31, %v2590_v17 }
 0x55f   :  { %v10926_v32 = vadd.f32 %v2569_v22, %v2550_v15 }
 0x565   :  { %v2629_v21 = vpop.f32.mrf.mxu0 }
 0x566   :  { %v10928_v2 = vadd.f32 %v2629_v21, %v2610_v16 }
 0x567   :  { %5294 = dma.done.wait [#allocation4], 28672 }
 0x568   :  { %5295 = vsyncadd [#allocation4], 4294938624  ;;  %2916 = vmatpush.msrb.mxu0 %v5909_v34  ;;  %2936 = vmatpush.msra.mxu1 %v6469_v24  ;;  %v13350_v3 = vld [vmem:[#allocation33_spill] sm:$0xff]  ;;  %v13361_v24 = vld [vmem:[#allocation108_spill] sm:$0xff]  ;;  %vm3275_vm6 = vcmask 785408   ;;  %vm3419_vm7 = vcmask 74752  }
 0x569   :  { %2877 = vmatpush.msrb.mxu2 %v5869_v60  ;;  %2897 = vmatpush.msra.mxu3 %v6429_v46  ;;  %v13369_v34 = vld [vmem:[#allocation178_spill] sm:$0xff]  ;;  %v13376_v41 = vld [vmem:[#allocation80_spill] sm:$0xff]  ;;  %v13381_v46 = vld [vmem:[#allocation163_spill] sm:$0xff] }
 0x56a   :  { %2917 = vmatpush.msrb.mxu0 %v5874_v27  ;;  %2937 = vmatpush.msra.mxu1 %v6434_v19  ;;  %v13358_v19 = vld [vmem:[#allocation19_spill] sm:$0xff]  ;;  %v13394_v60 = vld [vmem:[#allocation66_spill] sm:$0xff]  ;;  %v13398_v0 = vld [vmem:[#allocation61_spill] sm:$0xff] }
 0x56b   :  { %2878 = vmatpush.msrb.mxu2 %v5834_v39  ;;  %2898 = vmatpush.msra.mxu3 %v6394_v25  ;;  %v13362_v25 = vld [vmem:[#allocation12_spill] sm:$0xff]  ;;  %v13364_v27 = vld [vmem:[#allocation95_spill] sm:$0xff]  ;;  %v13399_v10 = vld [vmem:[#allocation50_spill] sm:$0xff] }
 0x56c   :  { %2918 = vmatpush.msrb.mxu0 %v5839_v12  ;;  %2938 = vmatpush.msra.mxu1 %v6399_v53  ;;  %v13355_v12 = vld [vmem:[#allocation114_spill] sm:$0xff]  ;;  %v13374_v39 = vld [vmem:[#allocation91_spill] sm:$0xff]  ;;  %v13387_v53 = vld [vmem:[#allocation164_spill] sm:$0xff] }
 0x56d   :  { %2879 = vmatpush.msrb.mxu2 %v5799_v18  ;;  %2899 = vmatpush.msra.mxu3 %v6359_v4  ;;  %v13351_v4 = vld [vmem:[#allocation121_spill] sm:$0xff]  ;;  %v13357_v18 = vld [vmem:[#allocation115_spill] sm:$0xff]  ;;  %v13400_v47 = vld [vmem:[#allocation138_spill] sm:$0xff] }
 0x56e   :  { %2919 = vmatpush.msrb.mxu0 %v5804_v54  ;;  %2939 = vmatpush.msra.mxu1 %v6364_v11  ;;  %v13354_v11 = vld [vmem:[#allocation26_spill] sm:$0xff]  ;;  %v13388_v54 = vld [vmem:[#allocation65_spill] sm:$0xff]  ;;  %v13401_v7 = vld [vmem:[#allocation56_spill] sm:$0xff] }
 0x56f   :  { %2880 = vmatpush.msrb.mxu2 %v5764_v26  ;;  %2900 = vmatpush.msra.mxu3 %v6324_v62  ;;  %v13363_v26 = vld [vmem:[#allocation100_spill] sm:$0xff]  ;;  %v13396_v62 = vld [vmem:[#allocation55_spill] sm:$0xff]  ;;  %v13402_v9 = vld [vmem:[#allocation149_spill] sm:$0xff] }
 0x570   :  { %2920 = vmatpush.msrb.mxu0 %v5769_v33  ;;  %2940 = vmatpush.msra.mxu1 %v6329_v61  ;;  %v13368_v33 = vld [vmem:[#allocation90_spill] sm:$0xff]  ;;  %v13403_v14 = vld [vmem:[#allocation45_spill] sm:$0xff]  ;;  %v13405_v1 = vld [vmem:[#allocation51_spill] sm:$0xff] }
 0x571   :  { %2881 = vmatpush.msrb.mxu2 %v5729_v48  ;;  %2901 = vmatpush.msra.mxu3 %v6289_v13  ;;  %v13356_v13 = vld [vmem:[#allocation27_spill] sm:$0xff]  ;;  %v13382_v48 = vld [vmem:[#allocation81_spill] sm:$0xff]  ;;  %v13395_v61 = vld [vmem:[#allocation154_spill] sm:$0xff] }
 0x572   :  { %2921 = vmatpush.msrb.mxu0 %v5734_v55  ;;  %2941 = vmatpush.msra.mxu1 %v6294_v40  ;;  %v13375_v40 = vld [vmem:[#allocation179_spill] sm:$0xff]  ;;  %v13389_v55 = vld [vmem:[#allocation153_spill] sm:$0xff]  ;;  %v13406_v8 = vld [vmem:[#allocation40_spill] sm:$0xff] }
 0x573   :  { %2882 = vmatpush.msrb.mxu2 %v5694_v63  ;;  %2902 = vmatpush.msra.mxu3 %v6254_v58  ;;  %v13392_v58 = vld [vmem:[#allocation60_spill] sm:$0xff]  ;;  %v13397_v63 = vld [vmem:[#allocation143_spill] sm:$0xff]  ;;  %v13404_v15 = vld [vmem:[#allocation133_spill] sm:$0xff] }
 0x574   :  { %2922 = vmatpush.msrb.mxu0 %v5699_v6  ;;  %2942 = vmatpush.msra.mxu1 %v6259_v5  ;;  %v13352_v5 = vld [vmem:[#allocation34_spill] sm:$0xff]  ;;  %v13407_v22 = vld [vmem:[#allocation128_spill] sm:$0xff]  ;;  %v13410_v16 = vld [vmem:[#allocation35_spill] sm:$0xff] }
 0x575   :  { %2883 = vmatpush.msrb.mxu2 %v5659_v56  ;;  %2903 = vmatpush.msra.mxu3 %v6219_v51  ;;  %v13353_v6 = vld [vmem:[#allocation122_spill] sm:$0xff]  ;;  %v13390_v56 = vld [vmem:[#allocation71_spill] sm:$0xff]  ;;  %v13408_v17 = vld [vmem:[#allocation144_spill] sm:$0xff] }
 0x576   :  { %2923 = vmatpush.msrb.mxu0 %v5664_v57  ;;  %2943 = vmatpush.msra.mxu1 %v6224_v20  ;;  %v13359_v20 = vld [vmem:[#allocation107_spill] sm:$0xff]  ;;  %v13385_v51 = vld [vmem:[#allocation158_spill] sm:$0xff] }
 0x577   :  { %2884 = vmatpush.msrb.mxu2 %v5624_v49  ;;  %2904 = vmatpush.msra.mxu3 %v6184_v44  ;;  %v13379_v44 = vld [vmem:[#allocation174_spill] sm:$0xff]  ;;  %v13383_v49 = vld [vmem:[#allocation169_spill] sm:$0xff]  ;;  %v13391_v57 = vld [vmem:[#allocation159_spill] sm:$0xff] }
 0x578   :  { %2924 = vmatpush.msrb.mxu0 %v5629_v50  ;;  %2944 = vmatpush.msra.mxu1 %v6189_v59  ;;  %v13384_v50 = vld [vmem:[#allocation70_spill] sm:$0xff]  ;;  %v13393_v59 = vld [vmem:[#allocation148_spill] sm:$0xff]  ;;  %v13411_v21 = vld [vmem:[#allocation123_spill] sm:$0xff] }
 0x579   :  { %2885 = vmatpush.msrb.mxu2 %v5589_v42  ;;  %2905 = vmatpush.msra.mxu3 %v6149_v37  ;;  %v13372_v37 = vld [vmem:[#allocation85_spill] sm:$0xff]  ;;  %v13377_v42 = vld [vmem:[#allocation168_spill] sm:$0xff]  ;;  %v13409_v31 = vld [vmem:[#allocation46_spill] sm:$0xff] }
 0x57a   :  { %2925 = vmatpush.msrb.mxu0 %v5594_v43  ;;  %2945 = vmatpush.msra.mxu1 %v6154_v52  ;;  %v13378_v43 = vld [vmem:[#allocation86_spill] sm:$0xff]  ;;  %v13386_v52 = vld [vmem:[#allocation76_spill] sm:$0xff] }
 0x57b   :  { %2886 = vmatpush.msrb.mxu2 %v5554_v35  ;;  %2906 = vmatpush.msra.mxu3 %v6114_v30  ;;  %v13367_v30 = vld [vmem:[#allocation101_spill] sm:$0xff]  ;;  %v13370_v35 = vld [vmem:[#allocation96_spill] sm:$0xff] }
 0x57c   :  { %2926 = vmatpush.msrb.mxu0 %v5559_v36  ;;  %2946 = vmatpush.msra.mxu1 %v6119_v45  ;;  %v13371_v36 = vld [vmem:[#allocation184_spill] sm:$0xff]  ;;  %v13380_v45 = vld [vmem:[#allocation75_spill] sm:$0xff] }
 0x57d   :  { %2887 = vmatpush.msrb.mxu2 %v5519_v28  ;;  %2907 = vmatpush.msra.mxu3 %v6079_v23  ;;  %v13360_v23 = vld [vmem:[#allocation20_spill] sm:$0xff]  ;;  %v13365_v28 = vld [vmem:[#allocation183_spill] sm:$0xff] }
 0x57e   :  { %2927 = vmatpush.msrb.mxu0 %v5524_v29  ;;  %2947 = vmatpush.msra.mxu1 %v6084_v38  ;;  %v13366_v29 = vld [vmem:[#allocation13_spill] sm:$0xff] }
 0x57f   :  { %2888 = vmatpush.msrb.mxu2 %v13350_v3  ;;  %2908 = vmatpush.msra.mxu3 %v13351_v4  ;;  %v13373_v38 = vld [vmem:[#allocation173_spill] sm:$0xff]  ;;  %v13412_v3 = vld [vmem:[#allocation139_spill] sm:$0xff] }
 0x580   :  { %2928 = vmatpush.msrb.mxu0 %v13352_v5  ;;  %2948 = vmatpush.msra.mxu1 %v13353_v6  ;;  %v13413_v4 = vld [vmem:[#allocation41_spill] sm:$0xff]  ;;  %v13414_v5 = vld [vmem:[#allocation28_spill] sm:$0xff] }
 0x581   :  { %2889 = vmatpush.msrb.mxu2 %v13354_v11  ;;  %2909 = vmatpush.msra.mxu3 %v13355_v12  ;;  %v13415_v6 = vld [vmem:[#allocation116_spill] sm:$0xff]  ;;  %v13416_v11 = vld [vmem:[#allocation134_spill] sm:$0xff]  ;;  %v13417_v12 = vld [vmem:[#allocation21_spill] sm:$0xff] }
 0x582   :  { %2929 = vmatpush.msrb.mxu0 %v13356_v13  ;;  %2949 = vmatpush.msra.mxu1 %v13357_v18  ;;  %v13418_v13 = vld [vmem:[#allocation109_spill] sm:$0xff]  ;;  %v13419_v18 = vld [vmem:[#allocation36_spill] sm:$0xff] }
 0x583   :  { %2890 = vmatpush.msrb.mxu2 %v13358_v19  ;;  %2910 = vmatpush.msra.mxu3 %v13359_v20  ;;  %v13420_v19 = vld [vmem:[#allocation129_spill] sm:$0xff]  ;;  %v13421_v20 = vld [vmem:[#allocation14_spill] sm:$0xff] }
 0x584   :  { %2930 = vmatpush.msrb.mxu0 %v13360_v23  ;;  %2950 = vmatpush.msra.mxu1 %v13361_v24  ;;  %v13422_v23 = vld [vmem:[#allocation102_spill] sm:$0xff]  ;;  %v13423_v24 = vld [vmem:[#allocation97_spill] sm:$0xff] }
 0x585   :  { %2891 = vmatpush.msrb.mxu2 %v13362_v25  ;;  %2911 = vmatpush.msra.mxu3 %v13363_v26  ;;  %v13424_v25 = vld [vmem:[#allocation185_spill] sm:$0xff] }
 0x586   :  { %2931 = vmatpush.msrb.mxu0 %v13366_v29  ;;  %2951 = vmatpush.msra.mxu1 %v13367_v30  ;;  %v13425_v26 = vld [vmem:[#allocation29_spill] sm:$0xff]  ;;  %v13428_v29 = vld [vmem:[#allocation180_spill] sm:$0xff]  ;;  %v13429_v30 = vld [vmem:[#allocation22_spill] sm:$0xff] }
 0x587   :  { %2956 = vmatpush.msra.mxu2 %v13364_v27  ;;  %2976 = vmatpush.msrb.mxu3 %v13365_v28  ;;  %v13426_v27 = vld [vmem:[#allocation92_spill] sm:$0xff] }
 0x588   :  { %2996 = vmatpush.msra.mxu0 %v13370_v35  ;;  %3016 = vmatpush.msrb.mxu1 %v13371_v36  ;;  %v13427_v28 = vld [vmem:[#allocation124_spill] sm:$0xff]  ;;  %v13432_v35 = vld [vmem:[#allocation175_spill] sm:$0xff] }
 0x589   :  { %2957 = vmatpush.msra.mxu2 %v13368_v33  ;;  %2977 = vmatpush.msrb.mxu3 %v13369_v34  ;;  %v13430_v33 = vld [vmem:[#allocation87_spill] sm:$0xff]  ;;  %v13431_v34 = vld [vmem:[#allocation117_spill] sm:$0xff] }
 0x58a   :  { %2997 = vmatpush.msra.mxu0 %v13374_v39  ;;  %3017 = vmatpush.msrb.mxu1 %v13375_v40  ;;  %v13433_v36 = vld [vmem:[#allocation15_spill] sm:$0xff]  ;;  %v13436_v39 = vld [vmem:[#allocation170_spill] sm:$0xff]  ;;  %v13437_v40 = vld [vmem:[#allocation77_spill] sm:$0xff] }
 0x58b   :  { %2958 = vmatpush.msra.mxu2 %v13372_v37  ;;  %2978 = vmatpush.msrb.mxu3 %v13373_v38  ;;  %v13434_v37 = vld [vmem:[#allocation82_spill] sm:$0xff] }
 0x58c   :  { %2998 = vmatpush.msra.mxu0 %v13378_v43  ;;  %3018 = vmatpush.msrb.mxu1 %v13379_v44  ;;  %v13435_v38 = vld [vmem:[#allocation110_spill] sm:$0xff]  ;;  %v13440_v43 = vld [vmem:[#allocation165_spill] sm:$0xff]  ;;  %v13441_v44 = vld [vmem:[#allocation72_spill] sm:$0xff] }
 0x58d   :  { %2959 = vmatpush.msra.mxu2 %v13376_v41  ;;  %2979 = vmatpush.msrb.mxu3 %v13377_v42  ;;  %v13438_v41 = vld [vmem:[#allocation98_spill] sm:$0xff]  ;;  %v13439_v42 = vld [vmem:[#allocation103_spill] sm:$0xff] }
 0x58e   :  { %2999 = vmatpush.msra.mxu0 %v13382_v48  ;;  %3019 = vmatpush.msrb.mxu1 %v13383_v49  ;;  %v13444_v48 = vld [vmem:[#allocation67_spill] sm:$0xff]  ;;  %v13445_v49 = vld [vmem:[#allocation160_spill] sm:$0xff] }
 0x58f   :  { %2960 = vmatpush.msra.mxu2 %v13380_v45  ;;  %2980 = vmatpush.msrb.mxu3 %v13381_v46  ;;  %v13442_v45 = vld [vmem:[#allocation93_spill] sm:$0xff]  ;;  %v13443_v46 = vld [vmem:[#allocation186_spill] sm:$0xff] }
 0x590   :  { %3000 = vmatpush.msra.mxu0 %v13386_v52  ;;  %3020 = vmatpush.msrb.mxu1 %v13387_v53  ;;  %v13448_v52 = vld [vmem:[#allocation62_spill] sm:$0xff]  ;;  %v13449_v53 = vld [vmem:[#allocation155_spill] sm:$0xff] }
 0x591   :  { %2961 = vmatpush.msra.mxu2 %v13384_v50  ;;  %2981 = vmatpush.msrb.mxu3 %v13385_v51  ;;  %v13446_v50 = vld [vmem:[#allocation88_spill] sm:$0xff]  ;;  %v13447_v51 = vld [vmem:[#allocation181_spill] sm:$0xff] }
 0x592   :  { %3001 = vmatpush.msra.mxu0 %v13390_v56  ;;  %3021 = vmatpush.msrb.mxu1 %v13391_v57  ;;  %v13452_v56 = vld [vmem:[#allocation57_spill] sm:$0xff]  ;;  %v13453_v57 = vld [vmem:[#allocation150_spill] sm:$0xff] }
 0x593   :  { %2962 = vmatpush.msra.mxu2 %v13388_v54  ;;  %2982 = vmatpush.msrb.mxu3 %v13389_v55  ;;  %v13450_v54 = vld [vmem:[#allocation83_spill] sm:$0xff]  ;;  %v13451_v55 = vld [vmem:[#allocation176_spill] sm:$0xff] }
 0x594   :  { %3002 = vmatpush.msra.mxu0 %v13394_v60  ;;  %3022 = vmatpush.msrb.mxu1 %v13395_v61  ;;  %v13456_v60 = vld [vmem:[#allocation52_spill] sm:$0xff]  ;;  %v13457_v61 = vld [vmem:[#allocation145_spill] sm:$0xff] }
 0x595   :  { %2963 = vmatpush.msra.mxu2 %v13392_v58  ;;  %2983 = vmatpush.msrb.mxu3 %v13393_v59  ;;  %v13454_v58 = vld [vmem:[#allocation78_spill] sm:$0xff]  ;;  %v13455_v59 = vld [vmem:[#allocation171_spill] sm:$0xff] }
 0x596   :  { %3003 = vmatpush.msra.mxu0 %v13398_v0  ;;  %2892 = vmatmul.f32.vlgmr.msrb.gmra.mxu2 %v10926_v32  ;;  %v13460_v0 = vld [vmem:[#allocation47_spill] sm:$0xff] }
 0x597   :  { %2964 = vmatpush.msra.mxu2 %v13396_v62  ;;  %2984 = vmatpush.msrb.mxu3 %v13397_v63  ;;  %v13458_v62 = vld [vmem:[#allocation73_spill] sm:$0xff]  ;;  %v13459_v63 = vld [vmem:[#allocation166_spill] sm:$0xff] }
 0x598   :  { %3004 = vmatpush.msra.mxu0 %v13401_v7  ;;  %3023 = vmatpush.msrb.mxu1 %v13402_v9  ;;  %v13463_v7 = vld [vmem:[#allocation161_spill] sm:$0xff]  ;;  %v13464_v9 = vld [vmem:[#allocation42_spill] sm:$0xff] }
 0x599   :  { %2965 = vmatpush.msra.mxu2 %v13399_v10  ;;  %2985 = vmatpush.msrb.mxu3 %v13400_v47  ;;  %v13461_v10 = vld [vmem:[#allocation140_spill] sm:$0xff] }
 0x59a   :  { %2912 = vmatmul.f32.vlgmr.msra.gmra.mxu3 %v10928_v2  ;;  %3005 = vmatpush.msra.mxu0 %v13405_v1  ;;  %v13462_v47 = vld [vmem:[#allocation68_spill] sm:$0xff] }
 0x59b   :  { %2966 = vmatpush.msra.mxu2 %v13403_v14  ;;  %2986 = vmatpush.msrb.mxu3 %v13404_v15  ;;  %v13465_v14 = vld [vmem:[#allocation135_spill] sm:$0xff]  ;;  %v13467_v1 = vld [vmem:[#allocation156_spill] sm:$0xff] }
 0x59c   :  { %3024 = vmatpush.msrb.mxu1 %v13408_v17  ;;  %3006 = vmatpush.msra.mxu0 %v13409_v31  ;;  %v13466_v15 = vld [vmem:[#allocation63_spill] sm:$0xff]  ;;  %v13470_v17 = vld [vmem:[#allocation58_spill] sm:$0xff] }
 0x59d   :  { %2967 = vmatpush.msra.mxu2 %v13406_v8  ;;  %2987 = vmatpush.msrb.mxu3 %v13407_v22  ;;  %v13468_v8 = vld [vmem:[#allocation37_spill] sm:$0xff]  ;;  %v13469_v22 = vld [vmem:[#allocation130_spill] sm:$0xff]  ;;  %v13471_v31 = vld [vmem:[#allocation151_spill] sm:$0xff] }
 0x59e   :  { %3025 = vmatpush.msrb.mxu1 %v13412_v3  ;;  %3007 = vmatpush.msra.mxu0 %v13413_v4  ;;  %v13474_v3 = vld [vmem:[#allocation53_spill] sm:$0xff]  ;;  %v13475_v4 = vld [vmem:[#allocation146_spill] sm:$0xff] }
 0x59f   :  { %2968 = vmatpush.msra.mxu2 %v13410_v16  ;;  %2988 = vmatpush.msrb.mxu3 %v13411_v21  ;;  %v13472_v16 = vld [vmem:[#allocation30_spill] sm:$0xff]  ;;  %v13473_v21 = vld [vmem:[#allocation125_spill] sm:$0xff] }
 0x5a0   :  { %3026 = vmatpush.msrb.mxu1 %v13416_v11  ;;  %2932 = vmatmul.f32.vlgmr.msrb.gmra.mxu0 %v10926_v32  ;;  %v13478_v11 = vld [vmem:[#allocation48_spill] sm:$0xff] }
 0x5a1   :  { %2969 = vmatpush.msra.mxu2 %v13414_v5  ;;  %2989 = vmatpush.msrb.mxu3 %v13415_v6  ;;  %v13476_v5 = vld [vmem:[#allocation23_spill] sm:$0xff]  ;;  %v13477_v6 = vld [vmem:[#allocation118_spill] sm:$0xff] }
 0x5a2   :  { %3008 = vmatpush.msra.mxu0 %v13419_v18  ;;  %3027 = vmatpush.msrb.mxu1 %v13420_v19  ;;  %v13481_v18 = vld [vmem:[#allocation111_spill] sm:$0xff] }
 0x5a3   :  { %2970 = vmatpush.msra.mxu2 %v13417_v12  ;;  %2990 = vmatpush.msrb.mxu3 %v13418_v13  ;;  %v13479_v12 = vld [vmem:[#allocation141_spill] sm:$0xff]  ;;  %v13480_v13 = vld [vmem:[#allocation16_spill] sm:$0xff]  ;;  %v13482_v19 = vld [vmem:[#allocation43_spill] sm:$0xff] }
 0x5a4   :  { %2952 = vmatmul.f32.vlgmr.msra.gmra.mxu1 %v10928_v2  ;;  %3009 = vmatpush.msra.mxu0 %v13425_v26  ;;  %v13487_v26 = vld [vmem:[#allocation131_spill] sm:$0xff] }
 0x5a5   :  { %2971 = vmatpush.msra.mxu2 %v13421_v20  ;;  %2991 = vmatpush.msrb.mxu3 %v13422_v23  ;;  %v13483_v20 = vld [vmem:[#allocation136_spill] sm:$0xff] }
 0x5a6   :  { %2972 = vmatmul.f32.vlgmr.msra.gmra.mxu2 %v10926_v32  ;;  %2992 = vmatmul.f32.vlgmr.msrb.gmra.mxu3 %v10928_v2  ;;  %v13484_v23 = vld [vmem:[#allocation104_spill] sm:$0xff] }
 0x5a7   :  { %3036 = vmatpush.msrb.mxu2 %v13423_v24  ;;  %3056 = vmatpush.msra.mxu3 %v13424_v25  ;;  %v13485_v24 = vld [vmem:[#allocation99_spill] sm:$0xff]  ;;  %v13486_v25 = vld [vmem:[#allocation38_spill] sm:$0xff] }
 0x5a8   :  { %3028 = vmatpush.msrb.mxu1 %v13427_v28  ;;  %3010 = vmatpush.msra.mxu0 %v13429_v30  ;;  %v13489_v28 = vld [vmem:[#allocation187_spill] sm:$0xff]  ;;  %v13491_v30 = vld [vmem:[#allocation126_spill] sm:$0xff] }
 0x5a9   :  { %3037 = vmatpush.msrb.mxu2 %v13426_v27  ;;  %3057 = vmatpush.msra.mxu3 %v13428_v29  ;;  %v13488_v27 = vld [vmem:[#allocation94_spill] sm:$0xff]  ;;  %v13490_v29 = vld [vmem:[#allocation31_spill] sm:$0xff] }
 0x5aa   :  { %3029 = vmatpush.msrb.mxu1 %v13431_v34  ;;  %3011 = vmatpush.msra.mxu0 %v13433_v36  ;;  %v13493_v34 = vld [vmem:[#allocation182_spill] sm:$0xff]  ;;  %v13495_v36 = vld [vmem:[#allocation119_spill] sm:$0xff] }
 0x5ab   :  { %3038 = vmatpush.msrb.mxu2 %v13430_v33  ;;  %3058 = vmatpush.msra.mxu3 %v13432_v35  ;;  %v13492_v33 = vld [vmem:[#allocation89_spill] sm:$0xff]  ;;  %v13494_v35 = vld [vmem:[#allocation24_spill] sm:$0xff] }
 0x5ac   :  { %3030 = vmatpush.msrb.mxu1 %v13435_v38  ;;  %3012 = vmatmul.f32.vlgmr.msra.gmra.mxu0 %v10926_v32  ;;  %v13497_v38 = vld [vmem:[#allocation177_spill] sm:$0xff] }
 0x5ad   :  { %3039 = vmatpush.msrb.mxu2 %v13434_v37  ;;  %3059 = vmatpush.msra.mxu3 %v13436_v39  ;;  %v13496_v37 = vld [vmem:[#allocation84_spill] sm:$0xff]  ;;  %v13498_v39 = vld [vmem:[#allocation17_spill] sm:$0xff] }
 0x5ae   :  { %3076 = vmatpush.msrb.mxu0 %v13438_v41  ;;  %3031 = vmatpush.msrb.mxu1 %v13439_v42  ;;  %v13500_v41 = vld [vmem:[#allocation79_spill] sm:$0xff]  ;;  %v3178_v42 = vld [vmem:[%s12412_s9 + $0x78] sm:$0xff] }
 0x5af   :  { %3040 = vmatpush.msrb.mxu2 %v13437_v40  ;;  %3060 = vmatpush.msra.mxu3 %v13440_v43  ;;  %v13499_v40 = vld [vmem:[#allocation112_spill] sm:$0xff] }
 0x5b0   :  { %3032 = vmatmul.f32.vlgmr.msrb.gmra.mxu1 %v10928_v2  ;;  %3077 = vmatpush.msrb.mxu0 %v13442_v45  ;;  %v13501_v43 = vld [vmem:[#allocation172_spill] sm:$0xff]  ;;  %v3194_v45 = vld [vmem:[%s12412_s9 + $0xf8] sm:$0xff] }
 0x5b1   :  { %3041 = vmatpush.msrb.mxu2 %v13441_v44  ;;  %3096 = vmatpush.msra.mxu1 %v13443_v46  ;;  %v13502_v44 = vld [vmem:[#allocation105_spill] sm:$0xff]  ;;  %v13503_v46 = vld [vmem:[#allocation74_spill] sm:$0xff] }
 0x5b2   :  { %3061 = vmatpush.msra.mxu3 %v13445_v49  ;;  %3078 = vmatpush.msrb.mxu0 %v13446_v50  ;;  %v13504_v49 = vld [vmem:[#allocation167_spill] sm:$0xff]  ;;  %v3193_v50 = vld [vmem:[%s12412_s9 + $0xf0] sm:$0xff] }
 0x5b3   :  { %3042 = vmatpush.msrb.mxu2 %v13444_v48  ;;  %3097 = vmatpush.msra.mxu1 %v13447_v51  ;;  %v3177_v48 = vld [vmem:[%s12412_s9 + $0x70] sm:$0xff] }
 0x5b4   :  { %3062 = vmatpush.msra.mxu3 %v13449_v53  ;;  %3079 = vmatpush.msrb.mxu0 %v13450_v54  ;;  %v13505_v51 = vld [vmem:[#allocation69_spill] sm:$0xff]  ;;  %v13506_v53 = vld [vmem:[#allocation162_spill] sm:$0xff]  ;;  %v3192_v54 = vld [vmem:[%s12412_s9 + $0xe8] sm:$0xff] }
 0x5b5   :  { %3043 = vmatpush.msrb.mxu2 %v13448_v52  ;;  %3098 = vmatpush.msra.mxu1 %v13451_v55  ;;  %v3176_v52 = vld [vmem:[%s12412_s9 + $0x68] sm:$0xff] }
 0x5b6   :  { %3063 = vmatpush.msra.mxu3 %v13453_v57  ;;  %3080 = vmatpush.msrb.mxu0 %v13454_v58  ;;  %v13507_v55 = vld [vmem:[#allocation64_spill] sm:$0xff]  ;;  %v13508_v57 = vld [vmem:[#allocation157_spill] sm:$0xff]  ;;  %v3191_v58 = vld [vmem:[%s12412_s9 + $0xe0] sm:$0xff] }
 0x5b7   :  { %3044 = vmatpush.msrb.mxu2 %v13452_v56  ;;  %3099 = vmatpush.msra.mxu1 %v13455_v59  ;;  %v3175_v56 = vld [vmem:[%s12412_s9 + $0x60] sm:$0xff] }
 0x5b8   :  { %3064 = vmatpush.msra.mxu3 %v13457_v61  ;;  %3081 = vmatpush.msrb.mxu0 %v13458_v62  ;;  %v13509_v59 = vld [vmem:[#allocation59_spill] sm:$0xff]  ;;  %v13510_v61 = vld [vmem:[#allocation152_spill] sm:$0xff]  ;;  %v3190_v62 = vld [vmem:[%s12412_s9 + $0xd8] sm:$0xff] }
 0x5b9   :  { %3045 = vmatpush.msrb.mxu2 %v13456_v60  ;;  %3100 = vmatpush.msra.mxu1 %v13459_v63  ;;  %v3174_v60 = vld [vmem:[%s12412_s9 + $0x58] sm:$0xff] }
 0x5ba   :  { %3065 = vmatpush.msra.mxu3 %v13461_v10  ;;  %3082 = vmatpush.msrb.mxu0 %v13462_v47  ;;  %v13511_v63 = vld [vmem:[#allocation54_spill] sm:$0xff]  ;;  %v13512_v10 = vld [vmem:[#allocation147_spill] sm:$0xff]  ;;  %v3189_v47 = vld [vmem:[%s12412_s9 + $0xd0] sm:$0xff] }
 0x5bb   :  { %3046 = vmatpush.msrb.mxu2 %v13460_v0  ;;  %3101 = vmatpush.msra.mxu1 %v13463_v7  ;;  %v3173_v0 = vld [vmem:[%s12412_s9 + $0x50] sm:$0xff] }
 0x5bc   :  { %3066 = vmatpush.msra.mxu3 %v13465_v14  ;;  %3083 = vmatpush.msrb.mxu0 %v13466_v15  ;;  %v13513_v7 = vld [vmem:[#allocation49_spill] sm:$0xff]  ;;  %v13514_v14 = vld [vmem:[#allocation142_spill] sm:$0xff]  ;;  %v3188_v15 = vld [vmem:[%s12412_s9 + $0xc8] sm:$0xff] }
 0x5bd   :  { %3047 = vmatpush.msrb.mxu2 %v13464_v9  ;;  %3102 = vmatpush.msra.mxu1 %v13467_v1  ;;  %v3172_v9 = vld [vmem:[%s12412_s9 + $0x48] sm:$0xff] }
 0x5be   :  { %3067 = vmatpush.msra.mxu3 %v13469_v22  ;;  %3084 = vmatpush.msrb.mxu0 %v13470_v17  ;;  %v13515_v1 = vld [vmem:[#allocation44_spill] sm:$0xff]  ;;  %v13516_v22 = vld [vmem:[#allocation137_spill] sm:$0xff]  ;;  %v13517_v17 = vld [vmem:[#allocation39_spill] sm:$0xff] }
 0x5bf   :  { %3048 = vmatpush.msrb.mxu2 %v13468_v8  ;;  %3103 = vmatpush.msra.mxu1 %v13471_v31  ;;  %v3171_v8 = vld [vmem:[%s12412_s9 + $0x40] sm:$0xff]  ;;  %v13518_v31 = vld [vmem:[#allocation132_spill] sm:$0xff] }
 0x5c0   :  { %3068 = vmatpush.msra.mxu3 %v13473_v21  ;;  %3085 = vmatpush.msrb.mxu0 %v13474_v3  ;;  %v13520_v21 = vld [vmem:[#allocation127_spill] sm:$0xff]  ;;  %v13521_v3 = vld [vmem:[#allocation25_spill] sm:$0xff] }
 0x5c1   :  { %3049 = vmatpush.msrb.mxu2 %v13472_v16  ;;  %3104 = vmatpush.msra.mxu1 %v13475_v4  ;;  %v13519_v16 = vld [vmem:[#allocation32_spill] sm:$0xff] }
 0x5c2   :  { %3069 = vmatpush.msra.mxu3 %v13477_v6  ;;  %3086 = vmatpush.msrb.mxu0 %v13478_v11  ;;  %v13522_v4 = vld [vmem:[#allocation120_spill] sm:$0xff]  ;;  %v13523_v6 = vld [vmem:[#allocation18_spill] sm:$0xff]  ;;  %v13524_v11 = vld [vmem:[#allocation113_spill] sm:$0xff] }
 0x5c3   :  { %3050 = vmatpush.msrb.mxu2 %v13476_v5  ;;  %3105 = vmatpush.msra.mxu1 %v13479_v12  ;;  %v3210_v5 = vld [vmem:[%s12412_s9 + $0x178] sm:$0xff]  ;;  %v3209_v12 = vld [vmem:[%s12412_s9 + $0x170] sm:$0xff] }
 0x5c4   :  { %3070 = vmatpush.msra.mxu3 %v13481_v18  ;;  %3087 = vmatpush.msrb.mxu0 %v13482_v19  ;;  %v13525_v18 = vld [vmem:[#allocation106_spill] sm:$0xff]  ;;  %v3208_v19 = vld [vmem:[%s12412_s9 + $0x168] sm:$0xff] }
 0x5c5   :  { %3051 = vmatpush.msrb.mxu2 %v13480_v13  ;;  %3106 = vmatpush.msra.mxu1 %v13483_v20  ;;  %v3226_v13 = vld [vmem:[%s12412_s9 + $0x1f8] sm:$0xff]  ;;  %v3207_v20 = vld [vmem:[%s12412_s9 + $0x160] sm:$0xff] }
 0x5c6   :  { %3052 = vmatmul.f32.vlgmr.msrb.gmra.mxu2 %v10926_v32  ;;  %3071 = vmatpush.msra.mxu3 %v13484_v23  ;;  %v3224_v23 = vld [vmem:[%s12412_s9 + $0x1e8] sm:$0xff] }
 0x5c7   :  { %3116 = vmatpush.msra.mxu2 %v13485_v24  ;;  %3088 = vmatpush.msrb.mxu0 %v13486_v25  ;;  %v3223_v24 = vld [vmem:[%s12412_s9 + $0x1e0] sm:$0xff]  ;;  %v3205_v25 = vld [vmem:[%s12412_s9 + $0x150] sm:$0xff] }
 0x5c8   :  { %3107 = vmatpush.msra.mxu1 %v13487_v26  ;;  %3072 = vmatmul.f32.vlgmr.msra.gmra.mxu3 %v10928_v2  ;;  %v3222_v26 = vld [vmem:[%s12412_s9 + $0x1d8] sm:$0xff] }
 0x5c9   :  { %3117 = vmatpush.msra.mxu2 %v13488_v27  ;;  %3136 = vmatpush.msrb.mxu3 %v13489_v28  ;;  %v3204_v27 = vld [vmem:[%s12412_s9 + $0x148] sm:$0xff]  ;;  %v3221_v28 = vld [vmem:[%s12412_s9 + $0x1d0] sm:$0xff] }
 0x5ca   :  { %3089 = vmatpush.msrb.mxu0 %v13490_v29  ;;  %3108 = vmatpush.msra.mxu1 %v13491_v30  ;;  %v3203_v29 = vld [vmem:[%s12412_s9 + $0x140] sm:$0xff]  ;;  %v3220_v30 = vld [vmem:[%s12412_s9 + $0x1c8] sm:$0xff] }
 0x5cb   :  { %3118 = vmatpush.msra.mxu2 %v13492_v33  ;;  %3137 = vmatpush.msrb.mxu3 %v13493_v34  ;;  %v3170_v33 = vld [vmem:[%s12412_s9 + $0x38] sm:$0xff]  ;;  %v3187_v34 = vld [vmem:[%s12412_s9 + $0xc0] sm:$0xff] }
 0x5cc   :  { %3090 = vmatpush.msrb.mxu0 %v13494_v35  ;;  %3109 = vmatpush.msra.mxu1 %v13495_v36  ;;  %v3202_v35 = vld [vmem:[%s12412_s9 + $0x138] sm:$0xff]  ;;  %v3219_v36 = vld [vmem:[%s12412_s9 + $0x1c0] sm:$0xff] }
 0x5cd   :  { %3119 = vmatpush.msra.mxu2 %v13496_v37  ;;  %3138 = vmatpush.msrb.mxu3 %v13497_v38  ;;  %v3169_v37 = vld [vmem:[%s12412_s9 + $0x30] sm:$0xff]  ;;  %v3186_v38 = vld [vmem:[%s12412_s9 + $0xb8] sm:$0xff] }
 0x5ce   :  { %3091 = vmatpush.msrb.mxu0 %v13498_v39  ;;  %3110 = vmatpush.msra.mxu1 %v13499_v40  ;;  %v3201_v39 = vld [vmem:[%s12412_s9 + $0x130] sm:$0xff]  ;;  %v3218_v40 = vld [vmem:[%s12412_s9 + $0x1b8] sm:$0xff] }
 0x5cf   :  { %3092 = vmatmul.f32.vlgmr.msrb.gmra.mxu0 %v10926_v32  ;;  %3120 = vmatpush.msra.mxu2 %v13500_v41  ;;  %v3168_v41 = vld [vmem:[%s12412_s9 + $0x28] sm:$0xff] }
 0x5d0   :  { %3139 = vmatpush.msrb.mxu3 %v13501_v43  ;;  %3111 = vmatpush.msra.mxu1 %v13502_v44  ;;  %v3200_v43 = vld [vmem:[%s12412_s9 + $0x128] sm:$0xff]  ;;  %v3217_v44 = vld [vmem:[%s12412_s9 + $0x1b0] sm:$0xff] }
 0x5d1   :  { %3112 = vmatmul.f32.vlgmr.msra.gmra.mxu1 %v10928_v2  ;;  %3121 = vmatpush.msra.mxu2 %v13503_v46  ;;  %v3184_v46 = vld [vmem:[%s12412_s9 + $0xa8] sm:$0xff] }
 0x5d2   :  { %3140 = vmatpush.msrb.mxu3 %v13504_v49  ;;  %3279 = vmatpush.msra.mxu0 %v3178_v42  ;;  %v3185_v42 = vld [vmem:[%s12412_s9 + $0xb0] sm:$0xff]  ;;  %v3216_v49 = vld [vmem:[%s12412_s9 + $0x1a8] sm:$0xff] }
 0x5d3   :  { %3122 = vmatpush.msra.mxu2 %v13505_v51  ;;  %3299 = vmatpush.msrb.mxu1 %v3194_v45  ;;  %v3167_v45 = vld [vmem:[%s12412_s9 + $0x20] sm:$0xff] }
 0x5d4   :  { %3141 = vmatpush.msrb.mxu3 %v13506_v53  ;;  %3280 = vmatpush.msra.mxu0 %v3177_v48  ;;  %v3199_v48 = vld [vmem:[%s12412_s9 + $0x120] sm:$0xff] }
 0x5d5   :  { %3123 = vmatpush.msra.mxu2 %v13507_v55  ;;  %3300 = vmatpush.msrb.mxu1 %v3193_v50  ;;  %v3166_v50 = vld [vmem:[%s12412_s9 + $0x18] sm:$0xff]  ;;  %v3183_v51 = vld [vmem:[%s12412_s9 + $0xa0] sm:$0xff] }
 0x5d6   :  { %3142 = vmatpush.msrb.mxu3 %v13508_v57  ;;  %3281 = vmatpush.msra.mxu0 %v3176_v52  ;;  %v3198_v52 = vld [vmem:[%s12412_s9 + $0x118] sm:$0xff]  ;;  %v3215_v53 = vld [vmem:[%s12412_s9 + $0x1a0] sm:$0xff] }
 0x5d7   :  { %3124 = vmatpush.msra.mxu2 %v13509_v59  ;;  %3301 = vmatpush.msrb.mxu1 %v3192_v54  ;;  %v3165_v54 = vld [vmem:[%s12412_s9 + $0x10] sm:$0xff]  ;;  %v3182_v55 = vld [vmem:[%s12412_s9 + $0x98] sm:$0xff] }
 0x5d8   :  { %3143 = vmatpush.msrb.mxu3 %v13510_v61  ;;  %3282 = vmatpush.msra.mxu0 %v3175_v56  ;;  %v3197_v56 = vld [vmem:[%s12412_s9 + $0x110] sm:$0xff]  ;;  %v3214_v57 = vld [vmem:[%s12412_s9 + $0x198] sm:$0xff] }
 0x5d9   :  { %3125 = vmatpush.msra.mxu2 %v13511_v63  ;;  %3302 = vmatpush.msrb.mxu1 %v3191_v58  ;;  %v3164_v58 = vld [vmem:[%s12412_s9 + $0x8] sm:$0xff]  ;;  %v3181_v59 = vld [vmem:[%s12412_s9 + $0x90] sm:$0xff] }
 0x5da   :  { %3144 = vmatpush.msrb.mxu3 %v13512_v10  ;;  %3283 = vmatpush.msra.mxu0 %v3174_v60  ;;  %v3196_v60 = vld [vmem:[%s12412_s9 + $0x108] sm:$0xff]  ;;  %v3213_v61 = vld [vmem:[%s12412_s9 + $0x190] sm:$0xff] }
 0x5db   :  { %3126 = vmatpush.msra.mxu2 %v13513_v7  ;;  %3303 = vmatpush.msrb.mxu1 %v3190_v62  ;;  %v3163_v62 = vld [vmem:[%s12412_s9] sm:$0xff]  ;;  %v3180_v63 = vld [vmem:[%s12412_s9 + $0x88] sm:$0xff] }
 0x5dc   :  { %3145 = vmatpush.msrb.mxu3 %v13514_v14  ;;  %3284 = vmatpush.msra.mxu0 %v3173_v0  ;;  %v3195_v0 = vld [vmem:[%s12412_s9 + $0x100] sm:$0xff]  ;;  %v3212_v10 = vld [vmem:[%s12412_s9 + $0x188] sm:$0xff]  ;;  %v3241_v14 = vld [vmem:[%s12412_s9 + $0x270] sm:$0xff] }
 0x5dd   :  { %3127 = vmatpush.msra.mxu2 %v13515_v1  ;;  %3304 = vmatpush.msrb.mxu1 %v3189_v47  ;;  %v3242_v47 = vld [vmem:[%s12412_s9 + $0x278] sm:$0xff]  ;;  %v3179_v7 = vld [vmem:[%s12412_s9 + $0x80] sm:$0xff] }
 0x5de   :  { %3146 = vmatpush.msrb.mxu3 %v13516_v22  ;;  %3285 = vmatpush.msra.mxu0 %v3172_v9  ;;  %v3211_v9 = vld [vmem:[%s12412_s9 + $0x180] sm:$0xff]  ;;  %v3240_v22 = vld [vmem:[%s12412_s9 + $0x268] sm:$0xff] }
 0x5df   :  { %3128 = vmatpush.msra.mxu2 %v13517_v17  ;;  %3305 = vmatpush.msrb.mxu1 %v3188_v15  ;;  %v3258_v15 = vld [vmem:[%s12412_s9 + $0x2f8] sm:$0xff]  ;;  %v11372_v1 = vld [vmem:[%s12410_s7] sm:$0x7f]  ;;  %v3256_v17 = vld [vmem:[%s12412_s9 + $0x2e8] sm:$0xff] }
 0x5e0   :  { %3147 = vmatpush.msrb.mxu3 %v13518_v31  ;;  %3286 = vmatpush.msra.mxu0 %v3171_v8  ;;  %v3257_v8 = vld [vmem:[%s12412_s9 + $0x2f0] sm:$0xff]  ;;  %v2862_v31 = vperm.slane %v11372_v1, 0 }
 0x5e1   :  { %3129 = vmatpush.msra.mxu2 %v13519_v16  ;;  %3306 = vmatpush.msrb.mxu1 %v3187_v34  ;;  %v3239_v16 = vld [vmem:[%s12412_s9 + $0x260] sm:$0xff] }
 0x5e2   :  { %3148 = vmatpush.msrb.mxu3 %v13520_v21  ;;  %3287 = vmatpush.msra.mxu0 %v3170_v33  ;;  %v3255_v21 = vld [vmem:[%s12412_s9 + $0x2e0] sm:$0xff]  ;;  %v3233_v33 = vld [vmem:[%s12412_s9 + $0x230] sm:$0xff] }
 0x5e3   :  { %3130 = vmatpush.msra.mxu2 %v13521_v3  ;;  %3307 = vmatpush.msrb.mxu1 %v3186_v38  ;;  %v3238_v3 = vld [vmem:[%s12412_s9 + $0x258] sm:$0xff]  ;;  %v2865_v38 = vperm.slane %v11372_v1, 3 }
 0x5e4   :  { %3149 = vmatpush.msrb.mxu3 %v13522_v4  ;;  %3288 = vmatpush.msra.mxu0 %v3169_v37  ;;  %v3249_v37 = vld [vmem:[%s12412_s9 + $0x2b0] sm:$0xff] }
 0x5e5   :  { %3131 = vmatpush.msra.mxu2 %v13523_v6  ;;  %3308 = vmatpush.msrb.mxu1 %v3185_v42 }
 0x5e6   :  { %3150 = vmatpush.msrb.mxu3 %v13524_v11  ;;  %3132 = vmatmul.f32.vlgmr.msra.gmra.mxu2 %v10926_v32  ;;  %v3225_v32 = vld [vmem:[%s12412_s9 + $0x1f0] sm:$0xff]  ;;  %v2863_v11 = vperm.slane %v11372_v1, 1 }
 0x5e7   :  { %3319 = vmatpush.msrb.mxu2 %v3210_v5  ;;  %3289 = vmatpush.msra.mxu0 %v3168_v41  ;;  %v3254_v5 = vld [vmem:[%s12412_s9 + $0x2d8] sm:$0xff] }
 0x5e8   :  { %3151 = vmatpush.msrb.mxu3 %v13525_v18  ;;  %3309 = vmatpush.msrb.mxu1 %v3184_v46  ;;  %v3236_v18 = vld [vmem:[%s12412_s9 + $0x248] sm:$0xff]  ;;  %v3247_v46 = vld [vmem:[%s12412_s9 + $0x2a0] sm:$0xff] }
 0x5e9   :  { %3152 = vmatmul.f32.vlgmr.msrb.gmra.mxu3 %v10928_v2  ;;  %3320 = vmatpush.msrb.mxu2 %v3209_v12  ;;  %v3206_v2 = vld [vmem:[%s12412_s9 + $0x158] sm:$0xff]  ;;  %v3237_v12 = vld [vmem:[%s12412_s9 + $0x250] sm:$0xff] }
 0x5ea   :  { %3339 = vmatpush.msra.mxu3 %v3226_v13  ;;  %3290 = vmatpush.msra.mxu0 %v3167_v45  ;;  %v3253_v13 = vld [vmem:[%s12412_s9 + $0x2d0] sm:$0xff]  ;;  %v3230_v45 = vld [vmem:[%s12412_s9 + $0x218] sm:$0xff] }
 0x5eb   :  { %3321 = vmatpush.msrb.mxu2 %v3208_v19  ;;  %3310 = vmatpush.msrb.mxu1 %v3183_v51  ;;  %v3246_v51 = vld [vmem:[%s12412_s9 + $0x298] sm:$0xff] }
 0x5ec   :  { %3340 = vmatpush.msra.mxu3 %v3225_v32  ;;  %3291 = vmatpush.msra.mxu0 %v3166_v50  ;;  %v3229_v50 = vld [vmem:[%s12412_s9 + $0x210] sm:$0xff] }
 0x5ed   :  { %3322 = vmatpush.msrb.mxu2 %v3207_v20  ;;  %3311 = vmatpush.msrb.mxu1 %v3182_v55  ;;  %v3252_v20 = vld [vmem:[%s12412_s9 + $0x2c8] sm:$0xff] }
 0x5ee   :  { %3341 = vmatpush.msra.mxu3 %v3224_v23  ;;  %3292 = vmatpush.msra.mxu0 %v3165_v54  ;;  %v3228_v55 = vld [vmem:[%s12412_s9 + $0x208] sm:$0xff] }
 0x5ef   :  { %3323 = vmatpush.msrb.mxu2 %v3206_v2  ;;  %3312 = vmatpush.msrb.mxu1 %v3181_v59  ;;  %v3244_v59 = vld [vmem:[%s12412_s9 + $0x288] sm:$0xff] }
 0x5f0   :  { %3342 = vmatpush.msra.mxu3 %v3223_v24  ;;  %3293 = vmatpush.msra.mxu0 %v3164_v58  ;;  %v3235_v24 = vld [vmem:[%s12412_s9 + $0x240] sm:$0xff] }
 0x5f1   :  { %3324 = vmatpush.msrb.mxu2 %v3205_v25  ;;  %3313 = vmatpush.msrb.mxu1 %v3180_v63  ;;  %v3251_v25 = vld [vmem:[%s12412_s9 + $0x2c0] sm:$0xff]  ;;  %v3268_v63 = vld [vmem:[%s12412_s9 + $0x348] sm:$0xff] }
 0x5f2   :  { %3343 = vmatpush.msra.mxu3 %v3222_v26  ;;  %3294 = vmatpush.msra.mxu0 %v3163_v62  ;;  %v3227_v58 = vld [vmem:[%s12412_s9 + $0x200] sm:$0xff]  ;;  %v3269_v62 = vld [vmem:[%s12412_s9 + $0x350] sm:$0xff] }
 0x5f3   :  { %3325 = vmatpush.msrb.mxu2 %v3204_v27  ;;  %3314 = vmatpush.msrb.mxu1 %v3179_v7  ;;  %v3234_v27 = vld [vmem:[%s12412_s9 + $0x238] sm:$0xff]  ;;  %v3264_v7 = vld [vmem:[%s12412_s9 + $0x328] sm:$0xff] }
 0x5f4   :  { %3344 = vmatpush.msra.mxu3 %v3221_v28  ;;  %3359 = vmatpush.msrb.mxu0 %v3242_v47  ;;  %v3265_v47 = vld [vmem:[%s12412_s9 + $0x330] sm:$0xff] }
 0x5f5   :  { %3326 = vmatpush.msrb.mxu2 %v3203_v29  ;;  %3379 = vmatpush.msra.mxu1 %v3258_v15  ;;  %v3250_v29 = vld [vmem:[%s12412_s9 + $0x2b8] sm:$0xff] }
 0x5f6   :  { %3345 = vmatpush.msra.mxu3 %v3220_v30  ;;  %3360 = vmatpush.msrb.mxu0 %v3241_v14  ;;  %v2866_v14 = vperm.slane %v11372_v1, 4 }
 0x5f7   :  { %3327 = vmatpush.msrb.mxu2 %v3202_v35  ;;  %3380 = vmatpush.msra.mxu1 %v3257_v8  ;;  %v2864_v35 = vperm.slane %v11372_v1, 2  ;;  %v2867_v8 = vperm.slane %v11372_v1, 5 }
 0x5f8   :  { %3346 = vmatpush.msra.mxu3 %v3219_v36  ;;  %3361 = vmatpush.msrb.mxu0 %v3240_v22  ;;  %v3232_v36 = vld [vmem:[%s12412_s9 + $0x228] sm:$0xff]  ;;  %v3262_v22 = vld [vmem:[%s12412_s9 + $0x318] sm:$0xff] }
 0x5f9   :  { %3328 = vmatpush.msrb.mxu2 %v3201_v39  ;;  %3381 = vmatpush.msra.mxu1 %v3256_v17  ;;  %v3231_v39 = vld [vmem:[%s12412_s9 + $0x220] sm:$0xff] }
 0x5fa   :  { %3347 = vmatpush.msra.mxu3 %v3218_v40  ;;  %3362 = vmatpush.msrb.mxu0 %v3239_v16  ;;  %v3248_v40 = vld [vmem:[%s12412_s9 + $0x2a8] sm:$0xff]  ;;  %v3261_v16 = vld [vmem:[%s12412_s9 + $0x310] sm:$0xff] }
 0x5fb   :  { %3329 = vmatpush.msrb.mxu2 %v3200_v43  ;;  %3382 = vmatpush.msra.mxu1 %v3255_v21 }
 0x5fc   :  { %3348 = vmatpush.msra.mxu3 %v3217_v44  ;;  %3363 = vmatpush.msrb.mxu0 %v3238_v3 }
 0x5fd   :  { %3330 = vmatpush.msrb.mxu2 %v3199_v48  ;;  %3383 = vmatpush.msra.mxu1 %v3254_v5  ;;  %v3260_v5 = vld [vmem:[%s12412_s9 + $0x308] sm:$0xff] }
 0x5fe   :  { %3349 = vmatpush.msra.mxu3 %v3216_v49  ;;  %3364 = vmatpush.msrb.mxu0 %v3237_v12 }
 0x5ff   :  { %3331 = vmatpush.msrb.mxu2 %v3198_v52  ;;  %3384 = vmatpush.msra.mxu1 %v3253_v13  ;;  %v3259_v13 = vld [vmem:[%s12412_s9 + $0x300] sm:$0xff] }
 0x600   :  { %3350 = vmatpush.msra.mxu3 %v3215_v53  ;;  %3365 = vmatpush.msrb.mxu0 %v3236_v18 }
 0x601   :  { %3332 = vmatpush.msrb.mxu2 %v3197_v56  ;;  %3385 = vmatpush.msra.mxu1 %v3252_v20  ;;  %v3245_v56 = vld [vmem:[%s12412_s9 + $0x290] sm:$0xff] }
 0x602   :  { %3351 = vmatpush.msra.mxu3 %v3214_v57  ;;  %3366 = vmatpush.msrb.mxu0 %v3235_v24 }
 0x603   :  { %3333 = vmatpush.msrb.mxu2 %v3196_v60  ;;  %3386 = vmatpush.msra.mxu1 %v3251_v25  ;;  %v3243_v60 = vld [vmem:[%s12412_s9 + $0x280] sm:$0xff] }
 0x604   :  { %3352 = vmatpush.msra.mxu3 %v3213_v61  ;;  %3367 = vmatpush.msrb.mxu0 %v3234_v27  ;;  %v3270_v61 = vld [vmem:[%s12412_s9 + $0x358] sm:$0xff]  ;;  %v5269_v25 = vld [vmem:[%s12413_s10] ss:$0 sm:$0xff] }
 0x605   :  { %3334 = vmatpush.msrb.mxu2 %v3195_v0  ;;  %3387 = vmatpush.msra.mxu1 %v3250_v29  ;;  %v3267_v0 = vld [vmem:[%s12412_s9 + $0x340] sm:$0xff] }
 0x606   :  { %3353 = vmatpush.msra.mxu3 %v3212_v10  ;;  %3368 = vmatpush.msrb.mxu0 %v3233_v33  ;;  %v3266_v10 = vld [vmem:[%s12412_s9 + $0x338] sm:$0xff] }
 0x607   :  { %3388 = vmatpush.msra.mxu1 %v3249_v37  ;;  %3403 = vmatpush.msra.mxu2 %v3270_v61 }
 0x608   :  { %3354 = vmatpush.msra.mxu3 %v3211_v9  ;;  %3369 = vmatpush.msrb.mxu0 %v3232_v36  ;;  %v3263_v9 = vld [vmem:[%s12412_s9 + $0x320] sm:$0xff] }
 0x609   :  { %3389 = vmatpush.msra.mxu1 %v3248_v40  ;;  %3404 = vmatpush.msra.mxu2 %v3269_v62 }
 0x60a   :  { %3370 = vmatpush.msrb.mxu0 %v3231_v39 }
 0x60b   :  { %3390 = vmatpush.msra.mxu1 %v3247_v46  ;;  %3405 = vmatpush.msra.mxu2 %v3268_v63 }
 0x60c   :  { %3371 = vmatpush.msrb.mxu0 %v3230_v45 }
 0x60d   :  { %3391 = vmatpush.msra.mxu1 %v3246_v51  ;;  %3406 = vmatpush.msra.mxu2 %v3267_v0 }
 0x60e   :  { %3372 = vmatpush.msrb.mxu0 %v3229_v50 }
 0x60f   :  { %3392 = vmatpush.msra.mxu1 %v3245_v56  ;;  %3407 = vmatpush.msra.mxu2 %v3266_v10 }
 0x610   :  { %3373 = vmatpush.msrb.mxu0 %v3228_v55 }
 0x611   :  { %3393 = vmatpush.msra.mxu1 %v3244_v59  ;;  %3408 = vmatpush.msra.mxu2 %v3265_v47 }
 0x612   :  { %3374 = vmatpush.msrb.mxu0 %v3227_v58 }
 0x613   :  { %3394 = vmatpush.msra.mxu1 %v3243_v60  ;;  %3409 = vmatpush.msra.mxu2 %v3264_v7 }
 0x615   :  { %3410 = vmatpush.msra.mxu2 %v3263_v9 }
 0x617   :  { %3411 = vmatpush.msra.mxu2 %v3262_v22 }
 0x619   :  { %v2893_v4 = vpop.f32.mrf.mxu2  ;;  %3412 = vmatpush.msra.mxu2 %v3261_v16 }
 0x61a   :  { %v2894_v6 = vadd.f32 %v2893_v4, %v2862_v31 }
 0x61b   :  { %3413 = vmatpush.msra.mxu2 %v3260_v5 }
 0x61d   :  { %v2913_v19 = vpop.f32.mrf.mxu3  ;;  %v2933_v32 = vpop.f32.mrf.mxu0  ;;  %3414 = vmatpush.msra.mxu2 %v3259_v13 }
 0x61e   :  { %v2914_v23 = vadd.f32 %v2913_v19, %v2894_v6  ;;  %v2934_v2 = vadd.f32 %v2933_v32, %v2863_v11  ;;  %v2868_v19 = vperm.slane %v11372_v1, 6 }
 0x620   :  { %v11415_v26 = vmax.f32 %v2914_v23, 0.0 }
 0x621   :  { %v2953_v28 = vpop.f32.mrf.mxu1 }
 0x622   :  { %v2954_v30 = vadd.f32 %v2953_v28, %v2934_v2  ;;  %3295 = vmatmul.f32.vlgmr.msra.gmra.mxu0 %v11415_v26 }
 0x624   :  { %v11427_v34 = vmax.f32 %v2954_v30, 0.0 }
 0x626   :  { %3315 = vmatmul.f32.vlgmr.msrb.gmra.mxu1 %v11427_v34 }
 0x629   :  { %v2973_v41 = vpop.f32.mrf.mxu2  ;;  %v2993_v43 = vpop.f32.mrf.mxu3 }
 0x62a   :  { %v2974_v42 = vadd.f32 %v2973_v41, %v2864_v35  ;;  %v3013_v44 = vpop.f32.mrf.mxu0 }
 0x62b   :  { %v3014_v49 = vadd.f32 %v3013_v44, %v2865_v38  ;;  %v13527_v44 = vld [vmem:[#allocation405_spill] sm:$0xff] }
 0x62c   :  { %v2994_v48 = vadd.f32 %v2993_v43, %v2974_v42  ;;  %v13526_v43 = vld [vmem:[#allocation293_spill] sm:$0xff]  ;;  %4217 = vmatpush.msra.mxu0 %v13527_v44 }
 0x62d   :  { %v3033_v53 = vpop.f32.mrf.mxu1  ;;  %4197 = vmatpush.msrb.mxu3 %v13526_v43 }
 0x62e   :  { %v11456_v52 = vmax.f32 %v2994_v48, 0.0  ;;  %v3034_v54 = vadd.f32 %v3033_v53, %v3014_v49 }
 0x630   :  { %3335 = vmatmul.f32.vlgmr.msrb.gmra.mxu2 %v11456_v52  ;;  %v11465_v57 = vmax.f32 %v3034_v54, 0.0 }
 0x632   :  { %3355 = vmatmul.f32.vlgmr.msra.gmra.mxu3 %v11465_v57 }
 0x649   :  { %v3053_v15 = vpop.f32.mrf.mxu2 }
 0x64a   :  { %v3054_v17 = vadd.f32 %v3053_v15, %v2866_v14 }
 0x64b   :  { %v3073_v31 = vpop.f32.mrf.mxu3 }
 0x64c   :  { %v3074_v21 = vadd.f32 %v3073_v31, %v3054_v17  ;;  %v3093_v3 = vpop.f32.mrf.mxu0 }
 0x64d   :  { %v3094_v4 = vadd.f32 %v3093_v3, %v2867_v8 }
 0x64e   :  { %v11512_v6 = vmax.f32 %v3074_v21, 0.0  ;;  %v3113_v11 = vpop.f32.mrf.mxu1 }
 0x64f   :  { %v3114_v12 = vadd.f32 %v3113_v11, %v3094_v4 }
 0x650   :  { %3375 = vmatmul.f32.vlgmr.msrb.gmra.mxu0 %v11512_v6 }
 0x651   :  { %v11518_v18 = vmax.f32 %v3114_v12, 0.0 }
 0x653   :  { %3395 = vmatmul.f32.vlgmr.msra.gmra.mxu1 %v11518_v18 }
 0x669   :  { %v3133_v32 = vpop.f32.mrf.mxu2 }
 0x66a   :  { %v3134_v20 = vadd.f32 %v3133_v32, %v2868_v19 }
 0x66c   :  { %v3153_v23 = vpop.f32.mrf.mxu3 }
 0x66d   :  { %v3154_v2 = vadd.f32 %v3153_v23, %v3134_v20 }
 0x66f   :  { %v11522_v24 = vmax.f32 %v3154_v2, 0.0 }
 0x671   :  { %5258 = vmatmul.msk.f32.vlgmr.msra.gmra.mxu2 %vm3275_vm6, %v11522_v24 }
 0x69f   :  { %v3296_v27 = vpop.f32.mrf.mxu0 }
 0x6a0   :  { %v3297_v28 = vadd.f32 %v5269_v25, %v3296_v27 }
 0x6a3   :  { %v3316_v29 = vpop.f32.mrf.mxu1 }
 0x6a4   :  { %v3317_v33 = vadd.f32 %v3316_v29, %v3297_v28 }
 0x6b3   :  { %v3336_v30 = vpop.f32.mrf.mxu2 }
 0x6b4   :  { %v3337_v1 = vadd.f32 %v3336_v30, %v3317_v33 }
 0x6b5   :  { %v3356_v35 = vpop.f32.mrf.mxu3 }
 0x6b6   :  { %v3357_v37 = vadd.f32 %v3356_v35, %v3337_v1 }
 0x6cd   :  { %v3376_v36 = vpop.f32.mrf.mxu0 }
 0x6ce   :  { %v3377_v38 = vadd.f32 %v3376_v36, %v3357_v37 }
 0x6d0   :  { %v3396_v39 = vpop.f32.mrf.mxu1 }
 0x6d1   :  { %v3397_v40 = vadd.f32 %v3396_v39, %v3377_v38 }
 0x6f4   :  { %v3416_v41 = vpop.f32.mrf.mxu2 }
 0x6f5   :  { %v3417_v42 = vadd.f32 %v3416_v41, %v3397_v40 }
 0x6f7   :  { %3420 = vst.msk [vmem:[#allocation5] sm:$0x3] %vm3419_vm7, %v3417_v42 }
 0x6f8   :  { %5296 = dma.done.wait [#allocation4 + $0x1], 96768 }
 0x6f9   :  { %5297 = vsyncadd [#allocation4 + $0x1], 4294870528  ;;  %v13528_v45 = vld [vmem:[#allocation517_spill] sm:$0xff]  ;;  %v13530_v48 = vld [vmem:[#allocation286_spill] sm:$0xff]  ;;  %vm5190_vm8 = vcmask 1045508   ;;  %s5300_s22 = smov [#allocation5]  }
 0x6fa   :  { %4237 = vmatpush.msrb.mxu1 %v13528_v45  ;;  %v13529_v46 = vld [vmem:[#allocation629_spill] sm:$0xff]  ;;  %4198 = vmatpush.msrb.mxu3 %v13530_v48  ;;  %v13531_v49 = vld [vmem:[#allocation398_spill] sm:$0xff]  ;;  %v13534_v53 = vld [vmem:[#allocation279_spill] sm:$0xff]  ;;  %s5210_s23 = sshll.u32 %s5300_s22, 4  ;;  %s5212_s25 = sshll.u32 %s12417_s14, 4  ;;  %vm5198_vm9 = vcmask 1043458   ;;  %s5211_s23 = int_to_ptr.vmem [resolvable:$true] %s5210_s23  ;;  %s5213_s25 = int_to_ptr.hbm [resolvable:$true] %s5212_s25 }
 0x6fb   :  { %4257 = vmatpush.msrb.mxu2 %v13529_v46  ;;  %4218 = vmatpush.msra.mxu0 %v13531_v49  ;;  %v13532_v50 = vld [vmem:[#allocation510_spill] sm:$0xff]  ;;  %v13535_v54 = vld [vmem:[#allocation391_spill] sm:$0xff]  ;;  %v13538_v58 = vld [vmem:[#allocation272_spill] sm:$0xff]  ;;  %5215 = dma.vmem_to_hbm [thread:$0]  %s5211_s23, 32, %s5213_s25, [#allocation6]   ;;  %vm5200_vm11 = vcmask 128004  }
 0x6fc   :  { %4238 = vmatpush.msrb.mxu1 %v13532_v50  ;;  %v13533_v51 = vld [vmem:[#allocation622_spill] sm:$0xff]  ;;  %4199 = vmatpush.msrb.mxu3 %v13534_v53  ;;  %v13536_v55 = vld [vmem:[#allocation503_spill] sm:$0xff]  ;;  %v13539_v59 = vld [vmem:[#allocation384_spill] sm:$0xff] }
 0x6fd   :  { %4258 = vmatpush.msrb.mxu2 %v13533_v51  ;;  %4219 = vmatpush.msra.mxu0 %v13535_v54  ;;  %v13537_v56 = vld [vmem:[#allocation615_spill] sm:$0xff]  ;;  %v13540_v60 = vld [vmem:[#allocation496_spill] sm:$0xff]  ;;  %v13542_v62 = vld [vmem:[#allocation265_spill] sm:$0xff] }
 0x6fe   :  { %4239 = vmatpush.msrb.mxu1 %v13536_v55  ;;  %4200 = vmatpush.msrb.mxu3 %v13538_v58  ;;  %v13541_v61 = vld [vmem:[#allocation608_spill] sm:$0xff]  ;;  %v13543_v63 = vld [vmem:[#allocation377_spill] sm:$0xff]  ;;  %v13546_v47 = vld [vmem:[#allocation258_spill] sm:$0xff] }
 0x6ff   :  { %4259 = vmatpush.msrb.mxu2 %v13537_v56  ;;  %4220 = vmatpush.msra.mxu0 %v13539_v59  ;;  %v13544_v0 = vld [vmem:[#allocation489_spill] sm:$0xff]  ;;  %v13547_v7 = vld [vmem:[#allocation370_spill] sm:$0xff]  ;;  %v13550_v15 = vld [vmem:[#allocation251_spill] sm:$0xff] }
 0x700   :  { %4240 = vmatpush.msrb.mxu1 %v13540_v60  ;;  %4201 = vmatpush.msrb.mxu3 %v13542_v62  ;;  %v13545_v10 = vld [vmem:[#allocation601_spill] sm:$0xff]  ;;  %v13548_v9 = vld [vmem:[#allocation482_spill] sm:$0xff]  ;;  %v13551_v8 = vld [vmem:[#allocation363_spill] sm:$0xff] }
 0x701   :  { %4260 = vmatpush.msrb.mxu2 %v13541_v61  ;;  %4221 = vmatpush.msra.mxu0 %v13543_v63  ;;  %v13549_v14 = vld [vmem:[#allocation594_spill] sm:$0xff]  ;;  %v13552_v22 = vld [vmem:[#allocation475_spill] sm:$0xff]  ;;  %v13554_v31 = vld [vmem:[#allocation244_spill] sm:$0xff] }
 0x702   :  { %4241 = vmatpush.msrb.mxu1 %v13544_v0  ;;  %4202 = vmatpush.msrb.mxu3 %v13546_v47  ;;  %v13553_v17 = vld [vmem:[#allocation587_spill] sm:$0xff]  ;;  %v13555_v16 = vld [vmem:[#allocation356_spill] sm:$0xff]  ;;  %v13558_v4 = vld [vmem:[#allocation237_spill] sm:$0xff] }
 0x703   :  { %4261 = vmatpush.msrb.mxu2 %v13545_v10  ;;  %4222 = vmatpush.msra.mxu0 %v13547_v7  ;;  %v13556_v21 = vld [vmem:[#allocation468_spill] sm:$0xff]  ;;  %v13559_v5 = vld [vmem:[#allocation349_spill] sm:$0xff]  ;;  %v13562_v13 = vld [vmem:[#allocation230_spill] sm:$0xff] }
 0x704   :  { %4242 = vmatpush.msrb.mxu1 %v13548_v9  ;;  %4203 = vmatpush.msrb.mxu3 %v13550_v15  ;;  %v13557_v3 = vld [vmem:[#allocation580_spill] sm:$0xff]  ;;  %v13560_v11 = vld [vmem:[#allocation461_spill] sm:$0xff]  ;;  %v13563_v19 = vld [vmem:[#allocation342_spill] sm:$0xff] }
 0x705   :  { %4262 = vmatpush.msrb.mxu2 %v13549_v14  ;;  %4223 = vmatpush.msra.mxu0 %v13551_v8  ;;  %v13561_v12 = vld [vmem:[#allocation573_spill] sm:$0xff]  ;;  %v13564_v32 = vld [vmem:[#allocation454_spill] sm:$0xff]  ;;  %v13566_v23 = vld [vmem:[#allocation223_spill] sm:$0xff] }
 0x706   :  { %4243 = vmatpush.msrb.mxu1 %v13552_v22  ;;  %4204 = vmatpush.msrb.mxu3 %v13554_v31  ;;  %v13565_v20 = vld [vmem:[#allocation566_spill] sm:$0xff]  ;;  %v13567_v2 = vld [vmem:[#allocation335_spill] sm:$0xff]  ;;  %v13570_v28 = vld [vmem:[#allocation216_spill] sm:$0xff] }
 0x707   :  { %4263 = vmatpush.msrb.mxu2 %v13553_v17  ;;  %4224 = vmatpush.msra.mxu0 %v13555_v16  ;;  %v13568_v25 = vld [vmem:[#allocation447_spill] sm:$0xff]  ;;  %v13571_v29 = vld [vmem:[#allocation328_spill] sm:$0xff]  ;;  %v13574_v1 = vld [vmem:[#allocation209_spill] sm:$0xff] }
 0x708   :  { %4244 = vmatpush.msrb.mxu1 %v13556_v21  ;;  %4205 = vmatpush.msrb.mxu3 %v13558_v4  ;;  %v13569_v27 = vld [vmem:[#allocation559_spill] sm:$0xff]  ;;  %v13572_v30 = vld [vmem:[#allocation440_spill] sm:$0xff]  ;;  %v13575_v35 = vld [vmem:[#allocation321_spill] sm:$0xff] }
 0x709   :  { %4264 = vmatpush.msrb.mxu2 %v13557_v3  ;;  %4225 = vmatpush.msra.mxu0 %v13559_v5  ;;  %v13573_v33 = vld [vmem:[#allocation552_spill] sm:$0xff]  ;;  %v13576_v36 = vld [vmem:[#allocation433_spill] sm:$0xff]  ;;  %v13578_v38 = vld [vmem:[#allocation202_spill] sm:$0xff] }
 0x70a   :  { %4245 = vmatpush.msrb.mxu1 %v13560_v11  ;;  %4206 = vmatpush.msrb.mxu3 %v13562_v13  ;;  %v13577_v37 = vld [vmem:[#allocation545_spill] sm:$0xff]  ;;  %v13579_v39 = vld [vmem:[#allocation314_spill] sm:$0xff]  ;;  %v13582_v42 = vld [vmem:[#allocation195_spill] sm:$0xff] }
 0x70b   :  { %4265 = vmatpush.msrb.mxu2 %v13561_v12  ;;  %4226 = vmatpush.msra.mxu0 %v13563_v19  ;;  %v13580_v40 = vld [vmem:[#allocation426_spill] sm:$0xff]  ;;  %v13583_v43 = vld [vmem:[#allocation307_spill] sm:$0xff]  ;;  %v13586_v46 = vld [vmem:[#allocation188_spill] sm:$0xff] }
 0x70c   :  { %4246 = vmatpush.msrb.mxu1 %v13564_v32  ;;  %4207 = vmatpush.msrb.mxu3 %v13566_v23  ;;  %v13581_v41 = vld [vmem:[#allocation538_spill] sm:$0xff]  ;;  %v13584_v44 = vld [vmem:[#allocation419_spill] sm:$0xff]  ;;  %v13587_v48 = vld [vmem:[#allocation300_spill] sm:$0xff] }
 0x70d   :  { %4266 = vmatpush.msrb.mxu2 %v13565_v20  ;;  %4227 = vmatpush.msra.mxu0 %v13567_v2  ;;  %v13585_v45 = vld [vmem:[#allocation531_spill] sm:$0xff]  ;;  %v13588_v49 = vld [vmem:[#allocation741_spill] sm:$0xff]  ;;  %v13590_v51 = vld [vmem:[#allocation412_spill] sm:$0xff] }
 0x70e   :  { %4247 = vmatpush.msrb.mxu1 %v13568_v25  ;;  %4208 = vmatpush.msrb.mxu3 %v13570_v28  ;;  %v13589_v50 = vld [vmem:[#allocation853_spill] sm:$0xff]  ;;  %v13591_v53 = vld [vmem:[#allocation524_spill] sm:$0xff]  ;;  %v13592_v54 = vld [vmem:[#allocation734_spill] sm:$0xff] }
 0x70f   :  { %4267 = vmatpush.msrb.mxu2 %v13569_v27  ;;  %4228 = vmatpush.msra.mxu0 %v13571_v29  ;;  %v13593_v55 = vld [vmem:[#allocation846_spill] sm:$0xff]  ;;  %v13594_v56 = vld [vmem:[#allocation937_spill] sm:$0xff]  ;;  %v13596_v59 = vld [vmem:[#allocation727_spill] sm:$0xff] }
 0x710   :  { %4248 = vmatpush.msrb.mxu1 %v13572_v30  ;;  %4209 = vmatpush.msrb.mxu3 %v13574_v1  ;;  %v13595_v58 = vld [vmem:[#allocation294_spill] sm:$0xff]  ;;  %v13597_v60 = vld [vmem:[#allocation839_spill] sm:$0xff]  ;;  %v13600_v63 = vld [vmem:[#allocation720_spill] sm:$0xff] }
 0x711   :  { %4268 = vmatpush.msrb.mxu2 %v13573_v33  ;;  %4229 = vmatpush.msra.mxu0 %v13575_v35  ;;  %v13598_v61 = vld [vmem:[#allocation930_spill] sm:$0xff]  ;;  %v13599_v62 = vld [vmem:[#allocation287_spill] sm:$0xff]  ;;  %v13601_v0 = vld [vmem:[#allocation832_spill] sm:$0xff] }
 0x712   :  { %4249 = vmatpush.msrb.mxu1 %v13576_v36  ;;  %4210 = vmatpush.msrb.mxu3 %v13578_v38  ;;  %v13602_v10 = vld [vmem:[#allocation923_spill] sm:$0xff]  ;;  %v13603_v47 = vld [vmem:[#allocation280_spill] sm:$0xff]  ;;  %v13604_v7 = vld [vmem:[#allocation713_spill] sm:$0xff] }
 0x713   :  { %4269 = vmatpush.msrb.mxu2 %v13577_v37  ;;  %4230 = vmatpush.msra.mxu0 %v13579_v39  ;;  %v13605_v9 = vld [vmem:[#allocation825_spill] sm:$0xff]  ;;  %v13606_v14 = vld [vmem:[#allocation916_spill] sm:$0xff]  ;;  %v13608_v8 = vld [vmem:[#allocation706_spill] sm:$0xff] }
 0x714   :  { %4250 = vmatpush.msrb.mxu1 %v13580_v40  ;;  %4211 = vmatpush.msrb.mxu3 %v13582_v42  ;;  %v13607_v15 = vld [vmem:[#allocation273_spill] sm:$0xff]  ;;  %v13609_v22 = vld [vmem:[#allocation818_spill] sm:$0xff]  ;;  %v13612_v16 = vld [vmem:[#allocation699_spill] sm:$0xff] }
 0x715   :  { %4270 = vmatpush.msrb.mxu2 %v13581_v41  ;;  %4231 = vmatpush.msra.mxu0 %v13583_v43  ;;  %v13610_v17 = vld [vmem:[#allocation909_spill] sm:$0xff]  ;;  %v13611_v31 = vld [vmem:[#allocation266_spill] sm:$0xff]  ;;  %v13613_v21 = vld [vmem:[#allocation811_spill] sm:$0xff] }
 0x716   :  { %4251 = vmatpush.msrb.mxu1 %v13584_v44  ;;  %4212 = vmatpush.msrb.mxu3 %v13586_v46  ;;  %v13614_v3 = vld [vmem:[#allocation902_spill] sm:$0xff]  ;;  %v13615_v4 = vld [vmem:[#allocation259_spill] sm:$0xff]  ;;  %v13616_v5 = vld [vmem:[#allocation692_spill] sm:$0xff] }
 0x717   :  { %4271 = vmatpush.msrb.mxu2 %v13585_v45  ;;  %4232 = vmatpush.msra.mxu0 %v13587_v48  ;;  %v13617_v11 = vld [vmem:[#allocation804_spill] sm:$0xff]  ;;  %v13618_v12 = vld [vmem:[#allocation895_spill] sm:$0xff]  ;;  %v13620_v19 = vld [vmem:[#allocation685_spill] sm:$0xff] }
 0x718   :  { %4277 = vmatpush.msra.mxu3 %v13588_v49  ;;  %4252 = vmatpush.msrb.mxu1 %v13590_v51  ;;  %v13619_v13 = vld [vmem:[#allocation252_spill] sm:$0xff]  ;;  %v13621_v32 = vld [vmem:[#allocation797_spill] sm:$0xff]  ;;  %v13623_v23 = vld [vmem:[#allocation678_spill] sm:$0xff] }
 0x719   :  { %4297 = vmatpush.msrb.mxu0 %v13589_v50  ;;  %4272 = vmatpush.msrb.mxu2 %v13591_v53  ;;  %v13622_v20 = vld [vmem:[#allocation888_spill] sm:$0xff]  ;;  %v13624_v2 = vld [vmem:[#allocation790_spill] sm:$0xff]  ;;  %v13625_v25 = vld [vmem:[#allocation881_spill] sm:$0xff] }
 0x71a   :  { %4278 = vmatpush.msra.mxu3 %v13592_v54  ;;  %4321 = vmatpush.msra.mxu1 %v13594_v56  ;;  %v13626_v27 = vld [vmem:[#allocation245_spill] sm:$0xff]  ;;  %v13627_v28 = vld [vmem:[#allocation671_spill] sm:$0xff]  ;;  %v13629_v30 = vld [vmem:[#allocation874_spill] sm:$0xff] }
 0x71b   :  { %4298 = vmatpush.msrb.mxu0 %v13593_v55  ;;  %4337 = vmatpush.msra.mxu2 %v13595_v58  ;;  %v13628_v29 = vld [vmem:[#allocation783_spill] sm:$0xff]  ;;  %v13630_v33 = vld [vmem:[#allocation238_spill] sm:$0xff]  ;;  %v13631_v1 = vld [vmem:[#allocation664_spill] sm:$0xff] }
 0x71c   :  { %4279 = vmatpush.msra.mxu3 %v13596_v59  ;;  %4322 = vmatpush.msra.mxu1 %v13598_v61  ;;  %v13632_v35 = vld [vmem:[#allocation776_spill] sm:$0xff]  ;;  %v13633_v36 = vld [vmem:[#allocation867_spill] sm:$0xff]  ;;  %v13635_v38 = vld [vmem:[#allocation657_spill] sm:$0xff] }
 0x71d   :  { %4299 = vmatpush.msrb.mxu0 %v13597_v60  ;;  %4338 = vmatpush.msra.mxu2 %v13599_v62  ;;  %v13634_v37 = vld [vmem:[#allocation231_spill] sm:$0xff]  ;;  %v13636_v39 = vld [vmem:[#allocation769_spill] sm:$0xff]  ;;  %v13637_v40 = vld [vmem:[#allocation860_spill] sm:$0xff] }
 0x71e   :  { %4280 = vmatpush.msra.mxu3 %v13600_v63  ;;  %4323 = vmatpush.msra.mxu1 %v13602_v10  ;;  %v13638_v41 = vld [vmem:[#allocation650_spill] sm:$0xff]  ;;  %v13640_v43 = vld [vmem:[#allocation224_spill] sm:$0xff]  ;;  %v13641_v44 = vld [vmem:[#allocation643_spill] sm:$0xff] }
 0x71f   :  { %4300 = vmatpush.msrb.mxu0 %v13601_v0  ;;  %4339 = vmatpush.msra.mxu2 %v13603_v47  ;;  %v13639_v42 = vld [vmem:[#allocation762_spill] sm:$0xff]  ;;  %v13642_v45 = vld [vmem:[#allocation755_spill] sm:$0xff]  ;;  %v13644_v48 = vld [vmem:[#allocation636_spill] sm:$0xff] }
 0x720   :  { %4281 = vmatpush.msra.mxu3 %v13604_v7  ;;  %4324 = vmatpush.msra.mxu1 %v13606_v14  ;;  %v13643_v46 = vld [vmem:[#allocation518_spill] sm:$0xff]  ;;  %v13645_v49 = vld [vmem:[#allocation748_spill] sm:$0xff]  ;;  %v13647_v51 = vld [vmem:[#allocation511_spill] sm:$0xff] }
 0x721   :  { %4301 = vmatpush.msrb.mxu0 %v13605_v9  ;;  %4340 = vmatpush.msra.mxu2 %v13607_v15  ;;  %v13646_v50 = vld [vmem:[#allocation406_spill] sm:$0xff]  ;;  %v13649_v54 = vld [vmem:[#allocation217_spill] sm:$0xff]  ;;  %v13650_v55 = vld [vmem:[#allocation399_spill] sm:$0xff] }
 0x722   :  { %4282 = vmatpush.msra.mxu3 %v13608_v8  ;;  %4325 = vmatpush.msra.mxu1 %v13610_v17  ;;  %v13648_v53 = vld [vmem:[#allocation630_spill] sm:$0xff]  ;;  %v13651_v56 = vld [vmem:[#allocation504_spill] sm:$0xff]  ;;  %v13652_v58 = vld [vmem:[#allocation623_spill] sm:$0xff] }
 0x723   :  { %4302 = vmatpush.msrb.mxu0 %v13609_v22  ;;  %4341 = vmatpush.msra.mxu2 %v13611_v31  ;;  %v13653_v59 = vld [vmem:[#allocation210_spill] sm:$0xff]  ;;  %v13654_v60 = vld [vmem:[#allocation392_spill] sm:$0xff]  ;;  %v13655_v61 = vld [vmem:[#allocation497_spill] sm:$0xff] }
 0x724   :  { %4283 = vmatpush.msra.mxu3 %v13612_v16  ;;  %4326 = vmatpush.msra.mxu1 %v13614_v3  ;;  %v13656_v62 = vld [vmem:[#allocation616_spill] sm:$0xff]  ;;  %v13657_v63 = vld [vmem:[#allocation203_spill] sm:$0xff]  ;;  %v13658_v0 = vld [vmem:[#allocation385_spill] sm:$0xff] }
 0x725   :  { %4303 = vmatpush.msrb.mxu0 %v13613_v21  ;;  %4342 = vmatpush.msra.mxu2 %v13615_v4  ;;  %v13659_v10 = vld [vmem:[#allocation490_spill] sm:$0xff]  ;;  %v13660_v47 = vld [vmem:[#allocation609_spill] sm:$0xff]  ;;  %v13661_v7 = vld [vmem:[#allocation196_spill] sm:$0xff] }
 0x726   :  { %4284 = vmatpush.msra.mxu3 %v13616_v5  ;;  %4327 = vmatpush.msra.mxu1 %v13618_v12  ;;  %v13662_v9 = vld [vmem:[#allocation378_spill] sm:$0xff]  ;;  %v13663_v14 = vld [vmem:[#allocation483_spill] sm:$0xff]  ;;  %v13665_v8 = vld [vmem:[#allocation189_spill] sm:$0xff] }
 0x727   :  { %4304 = vmatpush.msrb.mxu0 %v13617_v11  ;;  %4343 = vmatpush.msra.mxu2 %v13619_v13  ;;  %v13664_v15 = vld [vmem:[#allocation602_spill] sm:$0xff]  ;;  %v13666_v22 = vld [vmem:[#allocation371_spill] sm:$0xff]  ;;  %v13667_v17 = vld [vmem:[#allocation476_spill] sm:$0xff] }
 0x728   :  { %4285 = vmatpush.msra.mxu3 %v13620_v19  ;;  %4328 = vmatpush.msra.mxu1 %v13622_v20  ;;  %v13668_v31 = vld [vmem:[#allocation595_spill] sm:$0xff]  ;;  %v13669_v16 = vld [vmem:[#allocation742_spill] sm:$0xff]  ;;  %v13670_v21 = vld [vmem:[#allocation364_spill] sm:$0xff] }
 0x729   :  { %4305 = vmatpush.msrb.mxu0 %v13621_v32  ;;  %4213 = vmatmul.f32.vlgmr.msrb.gmra.mxu3 %v11415_v26  ;;  %v13671_v3 = vld [vmem:[#allocation469_spill] sm:$0xff]  ;;  %v13672_v4 = vld [vmem:[#allocation588_spill] sm:$0xff]  ;;  %v13673_v5 = vld [vmem:[#allocation735_spill] sm:$0xff] }
 0x72a   :  { %4286 = vmatpush.msra.mxu3 %v13623_v23  ;;  %4329 = vmatpush.msra.mxu1 %v13625_v25  ;;  %v13674_v11 = vld [vmem:[#allocation357_spill] sm:$0xff]  ;;  %v13675_v12 = vld [vmem:[#allocation462_spill] sm:$0xff]  ;;  %v13677_v19 = vld [vmem:[#allocation728_spill] sm:$0xff] }
 0x72b   :  { %4306 = vmatpush.msrb.mxu0 %v13624_v2  ;;  %4344 = vmatpush.msra.mxu2 %v13626_v27  ;;  %v13676_v13 = vld [vmem:[#allocation581_spill] sm:$0xff]  ;;  %v13678_v32 = vld [vmem:[#allocation350_spill] sm:$0xff]  ;;  %v13679_v20 = vld [vmem:[#allocation455_spill] sm:$0xff] }
 0x72c   :  { %4287 = vmatpush.msra.mxu3 %v13627_v28  ;;  %4330 = vmatpush.msra.mxu1 %v13629_v30  ;;  %v13680_v23 = vld [vmem:[#allocation574_spill] sm:$0xff]  ;;  %v13681_v2 = vld [vmem:[#allocation721_spill] sm:$0xff]  ;;  %v13682_v25 = vld [vmem:[#allocation343_spill] sm:$0xff] }
 0x72d   :  { %4307 = vmatpush.msrb.mxu0 %v13628_v29  ;;  %4345 = vmatpush.msra.mxu2 %v13630_v33  ;;  %v13683_v27 = vld [vmem:[#allocation448_spill] sm:$0xff]  ;;  %v13684_v28 = vld [vmem:[#allocation567_spill] sm:$0xff]  ;;  %v13685_v29 = vld [vmem:[#allocation714_spill] sm:$0xff] }
 0x72e   :  { %4288 = vmatpush.msra.mxu3 %v13631_v1  ;;  %4331 = vmatpush.msra.mxu1 %v13633_v36  ;;  %v13686_v30 = vld [vmem:[#allocation336_spill] sm:$0xff]  ;;  %v13687_v33 = vld [vmem:[#allocation441_spill] sm:$0xff]  ;;  %vm5199_vm10 = vmor %vm5198_vm9, %vm2286_vm1 }
 0x72f   :  { %4308 = vmatpush.msrb.mxu0 %v13632_v35  ;;  %4346 = vmatpush.msra.mxu2 %v13634_v37  ;;  %v13688_v1 = vld [vmem:[#allocation560_spill] sm:$0xff]  ;;  %v13689_v35 = vld [vmem:[#allocation707_spill] sm:$0xff]  ;;  %v13690_v36 = vld [vmem:[#allocation329_spill] sm:$0xff] }
 0x730   :  { %4289 = vmatpush.msra.mxu3 %v13635_v38  ;;  %4332 = vmatpush.msra.mxu1 %v13637_v40  ;;  %v13691_v37 = vld [vmem:[#allocation434_spill] sm:$0xff]  ;;  %v13692_v38 = vld [vmem:[#allocation553_spill] sm:$0xff]  ;;  %vm5201_vm12 = vmor %vm5200_vm11, %vm5199_vm10 }
 0x731   :  { %4309 = vmatpush.msrb.mxu0 %v13636_v39  ;;  %4273 = vmatmul.f32.vlgmr.msrb.gmra.mxu2 %v11465_v57  ;;  %v13693_v39 = vld [vmem:[#allocation700_spill] sm:$0xff]  ;;  %v13694_v40 = vld [vmem:[#allocation322_spill] sm:$0xff] }
 0x732   :  { %4290 = vmatpush.msra.mxu3 %v13638_v41  ;;  %4253 = vmatmul.f32.vlgmr.msrb.gmra.mxu1 %v11456_v52  ;;  %v13695_v41 = vld [vmem:[#allocation427_spill] sm:$0xff] }
 0x733   :  { %4310 = vmatpush.msrb.mxu0 %v13639_v42  ;;  %4347 = vmatpush.msra.mxu2 %v13640_v43  ;;  %v13696_v42 = vld [vmem:[#allocation546_spill] sm:$0xff]  ;;  %v13697_v43 = vld [vmem:[#allocation693_spill] sm:$0xff] }
 0x734   :  { %4291 = vmatpush.msra.mxu3 %v13641_v44  ;;  %4377 = vmatpush.msrb.mxu1 %v13643_v46  ;;  %v13698_v44 = vld [vmem:[#allocation315_spill] sm:$0xff] }
 0x735   :  { %4311 = vmatpush.msrb.mxu0 %v13642_v45  ;;  %4348 = vmatpush.msra.mxu2 %v13649_v54  ;;  %v13699_v45 = vld [vmem:[#allocation420_spill] sm:$0xff]  ;;  %v13700_v46 = vld [vmem:[#allocation539_spill] sm:$0xff]  ;;  %v13706_v54 = vld [vmem:[#allocation938_spill] sm:$0xff] }
 0x736   :  { %4233 = vmatmul.f32.vlgmr.msra.gmra.mxu0 %v11427_v34  ;;  %4292 = vmatpush.msra.mxu3 %v13644_v48  ;;  %v13701_v48 = vld [vmem:[#allocation686_spill] sm:$0xff] }
 0x737   :  { %4312 = vmatpush.msrb.mxu0 %v13645_v49  ;;  %4378 = vmatpush.msrb.mxu1 %v13647_v51  ;;  %v13702_v49 = vld [vmem:[#allocation308_spill] sm:$0xff] }
 0x738   :  { %4357 = vmatpush.msrb.mxu3 %v13646_v50  ;;  %4349 = vmatpush.msra.mxu2 %v13653_v59  ;;  %v13703_v50 = vld [vmem:[#allocation413_spill] sm:$0xff]  ;;  %v13704_v51 = vld [vmem:[#allocation532_spill] sm:$0xff]  ;;  %v13710_v59 = vld [vmem:[#allocation854_spill] sm:$0xff] }
 0x739   :  { %4397 = vmatpush.msra.mxu0 %v13648_v53  ;;  %4293 = vmatmul.f32.vlgmr.msra.gmra.mxu3 %v11512_v6  ;;  %v13705_v53 = vld [vmem:[#allocation679_spill] sm:$0xff] }
 0x73a   :  { %4358 = vmatpush.msrb.mxu3 %v13650_v55  ;;  %4379 = vmatpush.msrb.mxu1 %v13651_v56  ;;  %v13707_v55 = vld [vmem:[#allocation301_spill] sm:$0xff] }
 0x73b   :  { %4398 = vmatpush.msra.mxu0 %v13652_v58  ;;  %4350 = vmatpush.msra.mxu2 %v13657_v63  ;;  %v13708_v56 = vld [vmem:[#allocation525_spill] sm:$0xff]  ;;  %v13709_v58 = vld [vmem:[#allocation672_spill] sm:$0xff]  ;;  %v13714_v63 = vld [vmem:[#allocation847_spill] sm:$0xff] }
 0x73c   :  { %4359 = vmatpush.msrb.mxu3 %v13654_v60  ;;  %4380 = vmatpush.msrb.mxu1 %v13655_v61  ;;  %v13711_v60 = vld [vmem:[#allocation931_spill] sm:$0xff] }
 0x73d   :  { %4399 = vmatpush.msra.mxu0 %v13656_v62  ;;  %4351 = vmatpush.msra.mxu2 %v13661_v7  ;;  %v13712_v61 = vld [vmem:[#allocation295_spill] sm:$0xff]  ;;  %v13713_v62 = vld [vmem:[#allocation665_spill] sm:$0xff]  ;;  %v13718_v7 = vld [vmem:[#allocation840_spill] sm:$0xff] }
 0x73e   :  { %4360 = vmatpush.msrb.mxu3 %v13658_v0  ;;  %4381 = vmatpush.msrb.mxu1 %v13659_v10  ;;  %v13715_v0 = vld [vmem:[#allocation924_spill] sm:$0xff] }
 0x73f   :  { %4400 = vmatpush.msra.mxu0 %v13660_v47  ;;  %4352 = vmatpush.msra.mxu2 %v13665_v8  ;;  %v13716_v10 = vld [vmem:[#allocation288_spill] sm:$0xff]  ;;  %v13717_v47 = vld [vmem:[#allocation658_spill] sm:$0xff]  ;;  %v13722_v8 = vld [vmem:[#allocation833_spill] sm:$0xff] }
 0x740   :  { %4361 = vmatpush.msrb.mxu3 %v13662_v9  ;;  %4382 = vmatpush.msrb.mxu1 %v13663_v14  ;;  %v13719_v9 = vld [vmem:[#allocation917_spill] sm:$0xff] }
 0x741   :  { %4401 = vmatpush.msra.mxu0 %v13664_v15  ;;  %4417 = vmatpush.msrb.mxu2 %v13669_v16  ;;  %v13720_v14 = vld [vmem:[#allocation281_spill] sm:$0xff]  ;;  %v13721_v15 = vld [vmem:[#allocation651_spill] sm:$0xff]  ;;  %v13726_v16 = vld [vmem:[#allocation826_spill] sm:$0xff] }
 0x742   :  { %4313 = vmatmul.f32.vlgmr.msrb.gmra.mxu0 %v11518_v18  ;;  %4362 = vmatpush.msrb.mxu3 %v13666_v22  ;;  %v13723_v22 = vld [vmem:[#allocation910_spill] sm:$0xff] }
 0x743   :  { %4383 = vmatpush.msrb.mxu1 %v13667_v17  ;;  %4402 = vmatpush.msra.mxu0 %v13668_v31  ;;  %v13724_v17 = vld [vmem:[#allocation274_spill] sm:$0xff]  ;;  %v13725_v31 = vld [vmem:[#allocation644_spill] sm:$0xff] }
 0x744   :  { %5259 = vmatmul.msk.f32.vlgmr.msra.gmra.mxu1 %vm3275_vm6, %v11522_v24  ;;  %4363 = vmatpush.msrb.mxu3 %v13670_v21  ;;  %v13727_v21 = vld [vmem:[#allocation903_spill] sm:$0xff] }
 0x745   :  { %4384 = vmatpush.msrb.mxu1 %v13671_v3  ;;  %4403 = vmatpush.msra.mxu0 %v13672_v4  ;;  %v13728_v3 = vld [vmem:[#allocation267_spill] sm:$0xff]  ;;  %v13729_v4 = vld [vmem:[#allocation637_spill] sm:$0xff] }
 0x746   :  { %4418 = vmatpush.msrb.mxu2 %v13673_v5  ;;  %4364 = vmatpush.msrb.mxu3 %v13674_v11  ;;  %v13730_v5 = vld [vmem:[#allocation819_spill] sm:$0xff]  ;;  %v13731_v11 = vld [vmem:[#allocation896_spill] sm:$0xff] }
 0x747   :  { %4385 = vmatpush.msrb.mxu1 %v13675_v12  ;;  %4404 = vmatpush.msra.mxu0 %v13676_v13  ;;  %v13732_v12 = vld [vmem:[#allocation260_spill] sm:$0xff]  ;;  %v13733_v13 = vld [vmem:[#allocation407_spill] sm:$0xff] }
 0x748   :  { %4419 = vmatpush.msrb.mxu2 %v13677_v19  ;;  %4365 = vmatpush.msrb.mxu3 %v13678_v32  ;;  %v13734_v19 = vld [vmem:[#allocation889_spill] sm:$0xff]  ;;  %v13735_v32 = vld [vmem:[#allocation812_spill] sm:$0xff] }
 0x749   :  { %4386 = vmatpush.msrb.mxu1 %v13679_v20  ;;  %4405 = vmatpush.msra.mxu0 %v13680_v23  ;;  %v13736_v20 = vld [vmem:[#allocation253_spill] sm:$0xff]  ;;  %v13737_v23 = vld [vmem:[#allocation400_spill] sm:$0xff] }
 0x74a   :  { %4420 = vmatpush.msrb.mxu2 %v13681_v2  ;;  %4366 = vmatpush.msrb.mxu3 %v13682_v25  ;;  %v13738_v2 = vld [vmem:[#allocation882_spill] sm:$0xff]  ;;  %v13739_v25 = vld [vmem:[#allocation805_spill] sm:$0xff] }
 0x74b   :  { %4387 = vmatpush.msrb.mxu1 %v13683_v27  ;;  %4406 = vmatpush.msra.mxu0 %v13684_v28  ;;  %v13740_v27 = vld [vmem:[#allocation246_spill] sm:$0xff]  ;;  %v13741_v28 = vld [vmem:[#allocation393_spill] sm:$0xff] }
 0x74c   :  { %4421 = vmatpush.msrb.mxu2 %v13685_v29  ;;  %4367 = vmatpush.msrb.mxu3 %v13686_v30  ;;  %v13742_v29 = vld [vmem:[#allocation875_spill] sm:$0xff]  ;;  %v13743_v30 = vld [vmem:[#allocation798_spill] sm:$0xff] }
 0x74d   :  { %4388 = vmatpush.msrb.mxu1 %v13687_v33  ;;  %4407 = vmatpush.msra.mxu0 %v13688_v1  ;;  %v13744_v33 = vld [vmem:[#allocation239_spill] sm:$0xff]  ;;  %v13745_v1 = vld [vmem:[#allocation386_spill] sm:$0xff] }
 0x74e   :  { %4422 = vmatpush.msrb.mxu2 %v13689_v35  ;;  %4368 = vmatpush.msrb.mxu3 %v13690_v36  ;;  %v13746_v35 = vld [vmem:[#allocation868_spill] sm:$0xff]  ;;  %v13747_v36 = vld [vmem:[#allocation791_spill] sm:$0xff] }
 0x74f   :  { %4389 = vmatpush.msrb.mxu1 %v13691_v37  ;;  %4408 = vmatpush.msra.mxu0 %v13692_v38  ;;  %v13748_v37 = vld [vmem:[#allocation232_spill] sm:$0xff]  ;;  %v13749_v38 = vld [vmem:[#allocation379_spill] sm:$0xff] }
 0x750   :  { %4423 = vmatpush.msrb.mxu2 %v13693_v39  ;;  %4369 = vmatpush.msrb.mxu3 %v13694_v40  ;;  %v13750_v39 = vld [vmem:[#allocation784_spill] sm:$0xff]  ;;  %v13751_v40 = vld [vmem:[#allocation861_spill] sm:$0xff] }
 0x751   :  { %4390 = vmatpush.msrb.mxu1 %v13695_v41  ;;  %4409 = vmatpush.msra.mxu0 %v13696_v42  ;;  %v13752_v41 = vld [vmem:[#allocation225_spill] sm:$0xff]  ;;  %v13753_v42 = vld [vmem:[#allocation372_spill] sm:$0xff] }
 0x752   :  { %4424 = vmatpush.msrb.mxu2 %v13697_v43  ;;  %4370 = vmatpush.msrb.mxu3 %v13698_v44  ;;  %v13754_v43 = vld [vmem:[#allocation519_spill] sm:$0xff]  ;;  %v13755_v44 = vld [vmem:[#allocation777_spill] sm:$0xff] }
 0x753   :  { %4391 = vmatpush.msrb.mxu1 %v13699_v45  ;;  %4410 = vmatpush.msra.mxu0 %v13700_v46  ;;  %v13756_v45 = vld [vmem:[#allocation218_spill] sm:$0xff]  ;;  %v13757_v46 = vld [vmem:[#allocation365_spill] sm:$0xff] }
 0x754   :  { %4425 = vmatpush.msrb.mxu2 %v13701_v48  ;;  %4371 = vmatpush.msrb.mxu3 %v13702_v49  ;;  %v13758_v48 = vld [vmem:[#allocation512_spill] sm:$0xff]  ;;  %v13759_v49 = vld [vmem:[#allocation770_spill] sm:$0xff] }
 0x755   :  { %4392 = vmatpush.msrb.mxu1 %v13703_v50  ;;  %4411 = vmatpush.msra.mxu0 %v13704_v51  ;;  %v13760_v50 = vld [vmem:[#allocation211_spill] sm:$0xff]  ;;  %v13761_v51 = vld [vmem:[#allocation358_spill] sm:$0xff] }
 0x756   :  { %4426 = vmatpush.msrb.mxu2 %v13705_v53  ;;  %4372 = vmatpush.msrb.mxu3 %v13707_v55  ;;  %v13762_v53 = vld [vmem:[#allocation505_spill] sm:$0xff]  ;;  %v13764_v55 = vld [vmem:[#allocation204_spill] sm:$0xff] }
 0x757   :  { %4461 = vmatpush.msra.mxu1 %v13706_v54  ;;  %4412 = vmatpush.msra.mxu0 %v13708_v56  ;;  %v13763_v54 = vld [vmem:[#allocation763_spill] sm:$0xff] }
 0x758   :  { %4427 = vmatpush.msrb.mxu2 %v13709_v58  ;;  %4437 = vmatpush.msra.mxu3 %v13710_v59  ;;  %v13765_v56 = vld [vmem:[#allocation351_spill] sm:$0xff]  ;;  %v13766_v58 = vld [vmem:[#allocation498_spill] sm:$0xff]  ;;  %v13767_v59 = vld [vmem:[#allocation756_spill] sm:$0xff] }
 0x759   :  { %4462 = vmatpush.msra.mxu1 %v13711_v60  ;;  %4477 = vmatpush.msrb.mxu0 %v13712_v61  ;;  %v13768_v60 = vld [vmem:[#allocation197_spill] sm:$0xff]  ;;  %v13769_v61 = vld [vmem:[#allocation344_spill] sm:$0xff] }
 0x75a   :  { %4428 = vmatpush.msrb.mxu2 %v13713_v62  ;;  %4438 = vmatpush.msra.mxu3 %v13714_v63  ;;  %v13770_v62 = vld [vmem:[#allocation491_spill] sm:$0xff]  ;;  %v13771_v63 = vld [vmem:[#allocation749_spill] sm:$0xff] }
 0x75b   :  { %4463 = vmatpush.msra.mxu1 %v13715_v0  ;;  %4478 = vmatpush.msrb.mxu0 %v13716_v10  ;;  %v13772_v0 = vld [vmem:[#allocation190_spill] sm:$0xff]  ;;  %v13773_v10 = vld [vmem:[#allocation337_spill] sm:$0xff] }
 0x75c   :  { %4429 = vmatpush.msrb.mxu2 %v13717_v47  ;;  %4439 = vmatpush.msra.mxu3 %v13718_v7  ;;  %v13774_v47 = vld [vmem:[#allocation484_spill] sm:$0xff]  ;;  %v13775_v7 = vld [vmem:[#allocation631_spill] sm:$0xff] }
 0x75d   :  { %4464 = vmatpush.msra.mxu1 %v13719_v9  ;;  %4479 = vmatpush.msrb.mxu0 %v13720_v14  ;;  %v13776_v9 = vld [vmem:[#allocation743_spill] sm:$0xff]  ;;  %v13777_v14 = vld [vmem:[#allocation330_spill] sm:$0xff] }
 0x75e   :  { %4430 = vmatpush.msrb.mxu2 %v13721_v15  ;;  %4440 = vmatpush.msra.mxu3 %v13722_v8  ;;  %v13778_v15 = vld [vmem:[#allocation477_spill] sm:$0xff]  ;;  %v13779_v8 = vld [vmem:[#allocation624_spill] sm:$0xff] }
 0x75f   :  { %4465 = vmatpush.msra.mxu1 %v13723_v22  ;;  %4480 = vmatpush.msrb.mxu0 %v13724_v17  ;;  %v13780_v22 = vld [vmem:[#allocation736_spill] sm:$0xff]  ;;  %v13781_v17 = vld [vmem:[#allocation323_spill] sm:$0xff] }
 0x760   :  { %4431 = vmatpush.msrb.mxu2 %v13725_v31  ;;  %4441 = vmatpush.msra.mxu3 %v13726_v16  ;;  %v13782_v31 = vld [vmem:[#allocation470_spill] sm:$0xff]  ;;  %v13783_v16 = vld [vmem:[#allocation617_spill] sm:$0xff] }
 0x761   :  { %4466 = vmatpush.msra.mxu1 %v13727_v21  ;;  %4481 = vmatpush.msrb.mxu0 %v13728_v3  ;;  %v13784_v21 = vld [vmem:[#allocation729_spill] sm:$0xff]  ;;  %v13785_v3 = vld [vmem:[#allocation316_spill] sm:$0xff] }
 0x762   :  { %4432 = vmatpush.msrb.mxu2 %v13729_v4  ;;  %4442 = vmatpush.msra.mxu3 %v13730_v5  ;;  %v13786_v4 = vld [vmem:[#allocation463_spill] sm:$0xff]  ;;  %v13787_v5 = vld [vmem:[#allocation610_spill] sm:$0xff] }
 0x763   :  { %4353 = vmatmul.f32.vlgmr.msra.gmra.mxu2 %v11415_v26  ;;  %4467 = vmatpush.msra.mxu1 %v13731_v11  ;;  %v13788_v11 = vld [vmem:[#allocation722_spill] sm:$0xff] }
 0x764   :  { %4482 = vmatpush.msrb.mxu0 %v13732_v12  ;;  %4497 = vmatpush.msra.mxu2 %v13733_v13  ;;  %v13789_v12 = vld [vmem:[#allocation309_spill] sm:$0xff]  ;;  %v13790_v13 = vld [vmem:[#allocation456_spill] sm:$0xff] }
 0x765   :  { %4373 = vmatmul.f32.vlgmr.msrb.gmra.mxu3 %v11427_v34  ;;  %4468 = vmatpush.msra.mxu1 %v13734_v19  ;;  %v13791_v19 = vld [vmem:[#allocation603_spill] sm:$0xff] }
 0x766   :  { %4443 = vmatpush.msra.mxu3 %v13735_v32  ;;  %4483 = vmatpush.msrb.mxu0 %v13736_v20  ;;  %v13792_v32 = vld [vmem:[#allocation715_spill] sm:$0xff]  ;;  %v13793_v20 = vld [vmem:[#allocation302_spill] sm:$0xff] }
 0x767   :  { %4498 = vmatpush.msra.mxu2 %v13737_v23  ;;  %4469 = vmatpush.msra.mxu1 %v13738_v2  ;;  %v13794_v23 = vld [vmem:[#allocation449_spill] sm:$0xff]  ;;  %v13795_v2 = vld [vmem:[#allocation596_spill] sm:$0xff] }
 0x768   :  { %4444 = vmatpush.msra.mxu3 %v13739_v25  ;;  %4484 = vmatpush.msrb.mxu0 %v13740_v27  ;;  %v13796_v25 = vld [vmem:[#allocation708_spill] sm:$0xff]  ;;  %v13797_v27 = vld [vmem:[#allocation855_spill] sm:$0xff] }
 0x769   :  { %4499 = vmatpush.msra.mxu2 %v13741_v28  ;;  %4470 = vmatpush.msra.mxu1 %v13742_v29  ;;  %v13798_v28 = vld [vmem:[#allocation442_spill] sm:$0xff]  ;;  %v13799_v29 = vld [vmem:[#allocation589_spill] sm:$0xff] }
 0x76a   :  { %4445 = vmatpush.msra.mxu3 %v13743_v30  ;;  %4485 = vmatpush.msrb.mxu0 %v13744_v33  ;;  %v13800_v30 = vld [vmem:[#allocation701_spill] sm:$0xff]  ;;  %v13801_v33 = vld [vmem:[#allocation848_spill] sm:$0xff] }
 0x76b   :  { %4500 = vmatpush.msra.mxu2 %v13745_v1  ;;  %4471 = vmatpush.msra.mxu1 %v13746_v35  ;;  %v13802_v1 = vld [vmem:[#allocation435_spill] sm:$0xff]  ;;  %v13803_v35 = vld [vmem:[#allocation582_spill] sm:$0xff] }
 0x76c   :  { %4433 = vmatmul.f32.vlgmr.msrb.gmra.mxu2 %v11512_v6  ;;  %4446 = vmatpush.msra.mxu3 %v13747_v36  ;;  %v13804_v36 = vld [vmem:[#allocation694_spill] sm:$0xff] }
 0x76d   :  { %4486 = vmatpush.msrb.mxu0 %v13748_v37  ;;  %4501 = vmatpush.msra.mxu2 %v13749_v38  ;;  %v13805_v37 = vld [vmem:[#allocation841_spill] sm:$0xff]  ;;  %v13806_v38 = vld [vmem:[#allocation428_spill] sm:$0xff] }
 0x76e   :  { %4393 = vmatmul.f32.vlgmr.msrb.gmra.mxu1 %v11456_v52  ;;  %4447 = vmatpush.msra.mxu3 %v13750_v39  ;;  %v13807_v39 = vld [vmem:[#allocation575_spill] sm:$0xff] }
 0x76f   :  { %4472 = vmatpush.msra.mxu1 %v13751_v40  ;;  %4487 = vmatpush.msrb.mxu0 %v13752_v41  ;;  %v13808_v40 = vld [vmem:[#allocation687_spill] sm:$0xff]  ;;  %v13809_v41 = vld [vmem:[#allocation834_spill] sm:$0xff] }
 0x770   :  { %4502 = vmatpush.msra.mxu2 %v13753_v42  ;;  %4413 = vmatmul.f32.vlgmr.msra.gmra.mxu0 %v11465_v57  ;;  %v13810_v42 = vld [vmem:[#allocation421_spill] sm:$0xff] }
 0x771   :  { %4517 = vmatpush.msrb.mxu1 %v13754_v43  ;;  %4448 = vmatpush.msra.mxu3 %v13755_v44  ;;  %v13811_v43 = vld [vmem:[#allocation568_spill] sm:$0xff] }
 0x772   :  { %4488 = vmatpush.msrb.mxu0 %v13756_v45  ;;  %4503 = vmatpush.msra.mxu2 %v13757_v46  ;;  %v13812_v44 = vld [vmem:[#allocation680_spill] sm:$0xff]  ;;  %v13813_v45 = vld [vmem:[#allocation827_spill] sm:$0xff]  ;;  %v13814_v46 = vld [vmem:[#allocation414_spill] sm:$0xff] }
 0x773   :  { %4518 = vmatpush.msrb.mxu1 %v13758_v48  ;;  %4449 = vmatpush.msra.mxu3 %v13759_v49  ;;  %v13815_v48 = vld [vmem:[#allocation561_spill] sm:$0xff] }
 0x774   :  { %4489 = vmatpush.msrb.mxu0 %v13760_v50  ;;  %4504 = vmatpush.msra.mxu2 %v13761_v51  ;;  %v13816_v49 = vld [vmem:[#allocation673_spill] sm:$0xff]  ;;  %v13817_v50 = vld [vmem:[#allocation820_spill] sm:$0xff]  ;;  %v13818_v51 = vld [vmem:[#allocation939_spill] sm:$0xff] }
 0x775   :  { %4519 = vmatpush.msrb.mxu1 %v13762_v53  ;;  %4450 = vmatpush.msra.mxu3 %v13763_v54  ;;  %v13819_v53 = vld [vmem:[#allocation554_spill] sm:$0xff] }
 0x776   :  { %4490 = vmatpush.msrb.mxu0 %v13764_v55  ;;  %4505 = vmatpush.msra.mxu2 %v13765_v56  ;;  %v13820_v54 = vld [vmem:[#allocation666_spill] sm:$0xff]  ;;  %v13821_v55 = vld [vmem:[#allocation813_spill] sm:$0xff]  ;;  %v13822_v56 = vld [vmem:[#allocation932_spill] sm:$0xff] }
 0x777   :  { %4520 = vmatpush.msrb.mxu1 %v13766_v58  ;;  %4451 = vmatpush.msra.mxu3 %v13767_v59  ;;  %v13823_v58 = vld [vmem:[#allocation547_spill] sm:$0xff] }
 0x778   :  { %4491 = vmatpush.msrb.mxu0 %v13768_v60  ;;  %4506 = vmatpush.msra.mxu2 %v13769_v61  ;;  %v13824_v59 = vld [vmem:[#allocation659_spill] sm:$0xff]  ;;  %v13825_v60 = vld [vmem:[#allocation806_spill] sm:$0xff]  ;;  %v13826_v61 = vld [vmem:[#allocation925_spill] sm:$0xff] }
 0x779   :  { %4521 = vmatpush.msrb.mxu1 %v13770_v62  ;;  %4452 = vmatpush.msra.mxu3 %v13771_v63  ;;  %v13827_v62 = vld [vmem:[#allocation540_spill] sm:$0xff] }
 0x77a   :  { %4492 = vmatpush.msrb.mxu0 %v13772_v0  ;;  %4507 = vmatpush.msra.mxu2 %v13773_v10  ;;  %v13828_v63 = vld [vmem:[#allocation652_spill] sm:$0xff]  ;;  %v13829_v0 = vld [vmem:[#allocation799_spill] sm:$0xff]  ;;  %v13830_v10 = vld [vmem:[#allocation918_spill] sm:$0xff] }
 0x77b   :  { %4453 = vmatmul.f32.vlgmr.msra.gmra.mxu3 %v11518_v18  ;;  %4522 = vmatpush.msrb.mxu1 %v13774_v47  ;;  %v13831_v47 = vld [vmem:[#allocation533_spill] sm:$0xff] }
 0x77c   :  { %4537 = vmatpush.msrb.mxu3 %v13775_v7  ;;  %4557 = vmatpush.msra.mxu0 %v13776_v9  ;;  %v13832_v7 = vld [vmem:[#allocation645_spill] sm:$0xff]  ;;  %v13833_v9 = vld [vmem:[#allocation792_spill] sm:$0xff] }
 0x77d   :  { %4508 = vmatpush.msra.mxu2 %v13777_v14  ;;  %4523 = vmatpush.msrb.mxu1 %v13778_v15  ;;  %v13834_v14 = vld [vmem:[#allocation911_spill] sm:$0xff]  ;;  %v13835_v15 = vld [vmem:[#allocation526_spill] sm:$0xff] }
 0x77e   :  { %4538 = vmatpush.msrb.mxu3 %v13779_v8  ;;  %4558 = vmatpush.msra.mxu0 %v13780_v22  ;;  %v13836_v8 = vld [vmem:[#allocation638_spill] sm:$0xff]  ;;  %v13837_v22 = vld [vmem:[#allocation785_spill] sm:$0xff] }
 0x77f   :  { %4509 = vmatpush.msra.mxu2 %v13781_v17  ;;  %4524 = vmatpush.msrb.mxu1 %v13782_v31  ;;  %v13838_v17 = vld [vmem:[#allocation904_spill] sm:$0xff] }
 0x780   :  { %4539 = vmatpush.msrb.mxu3 %v13783_v16  ;;  %4559 = vmatpush.msra.mxu0 %v13784_v21  ;;  %v13839_v31 = vld [vmem:[#allocation296_spill] sm:$0xff]  ;;  %v13841_v21 = vld [vmem:[#allocation778_spill] sm:$0xff] }
 0x781   :  { %4510 = vmatpush.msra.mxu2 %v13785_v3  ;;  %4525 = vmatpush.msrb.mxu1 %v13786_v4  ;;  %v13840_v16 = vld [vmem:[#allocation408_spill] sm:$0xff]  ;;  %v13842_v3 = vld [vmem:[#allocation897_spill] sm:$0xff] }
 0x782   :  { %4540 = vmatpush.msrb.mxu3 %v13787_v5  ;;  %4560 = vmatpush.msra.mxu0 %v13788_v11  ;;  %v13843_v4 = vld [vmem:[#allocation289_spill] sm:$0xff]  ;;  %v13845_v11 = vld [vmem:[#allocation771_spill] sm:$0xff] }
 0x783   :  { %4511 = vmatpush.msra.mxu2 %v13789_v12  ;;  %5260 = vmatmul.msk.f32.vlgmr.msra.gmra.mxu1 %vm3275_vm6, %v11522_v24  ;;  %v13844_v5 = vld [vmem:[#allocation401_spill] sm:$0xff]  ;;  %v13846_v12 = vld [vmem:[#allocation890_spill] sm:$0xff] }
 0x784   :  { %4526 = vmatpush.msrb.mxu1 %v13790_v13  ;;  %4541 = vmatpush.msrb.mxu3 %v13791_v19  ;;  %v13847_v13 = vld [vmem:[#allocation282_spill] sm:$0xff] }
 0x785   :  { %4561 = vmatpush.msra.mxu0 %v13792_v32  ;;  %4512 = vmatpush.msra.mxu2 %v13793_v20  ;;  %v13848_v19 = vld [vmem:[#allocation394_spill] sm:$0xff]  ;;  %v13849_v32 = vld [vmem:[#allocation764_spill] sm:$0xff]  ;;  %v13850_v20 = vld [vmem:[#allocation883_spill] sm:$0xff] }
 0x786   :  { %4527 = vmatpush.msrb.mxu1 %v13794_v23  ;;  %4542 = vmatpush.msrb.mxu3 %v13795_v2  ;;  %v13851_v23 = vld [vmem:[#allocation275_spill] sm:$0xff] }
 0x787   :  { %4562 = vmatpush.msra.mxu0 %v13796_v25  ;;  %4577 = vmatpush.msrb.mxu2 %v13797_v27  ;;  %v13852_v2 = vld [vmem:[#allocation387_spill] sm:$0xff]  ;;  %v13853_v25 = vld [vmem:[#allocation757_spill] sm:$0xff]  ;;  %v13854_v27 = vld [vmem:[#allocation876_spill] sm:$0xff] }
 0x788   :  { %4528 = vmatpush.msrb.mxu1 %v13798_v28  ;;  %4543 = vmatpush.msrb.mxu3 %v13799_v29  ;;  %v13855_v28 = vld [vmem:[#allocation268_spill] sm:$0xff] }
 0x789   :  { %4563 = vmatpush.msra.mxu0 %v13800_v30  ;;  %4578 = vmatpush.msrb.mxu2 %v13801_v33  ;;  %v13856_v29 = vld [vmem:[#allocation380_spill] sm:$0xff]  ;;  %v13857_v30 = vld [vmem:[#allocation750_spill] sm:$0xff]  ;;  %v13858_v33 = vld [vmem:[#allocation869_spill] sm:$0xff] }
 0x78a   :  { %4529 = vmatpush.msrb.mxu1 %v13802_v1  ;;  %4544 = vmatpush.msrb.mxu3 %v13803_v35  ;;  %v13859_v1 = vld [vmem:[#allocation261_spill] sm:$0xff] }
 0x78b   :  { %4564 = vmatpush.msra.mxu0 %v13804_v36  ;;  %4579 = vmatpush.msrb.mxu2 %v13805_v37  ;;  %v13860_v35 = vld [vmem:[#allocation373_spill] sm:$0xff]  ;;  %v13861_v36 = vld [vmem:[#allocation520_spill] sm:$0xff]  ;;  %v13862_v37 = vld [vmem:[#allocation862_spill] sm:$0xff] }
 0x78c   :  { %4530 = vmatpush.msrb.mxu1 %v13806_v38  ;;  %4545 = vmatpush.msrb.mxu3 %v13807_v39  ;;  %v13863_v38 = vld [vmem:[#allocation254_spill] sm:$0xff] }
 0x78d   :  { %4565 = vmatpush.msra.mxu0 %v13808_v40  ;;  %4580 = vmatpush.msrb.mxu2 %v13809_v41  ;;  %v13864_v39 = vld [vmem:[#allocation366_spill] sm:$0xff]  ;;  %v13865_v40 = vld [vmem:[#allocation513_spill] sm:$0xff]  ;;  %v13866_v41 = vld [vmem:[#allocation632_spill] sm:$0xff] }
 0x78e   :  { %4531 = vmatpush.msrb.mxu1 %v13810_v42  ;;  %4546 = vmatpush.msrb.mxu3 %v13811_v43  ;;  %v13867_v42 = vld [vmem:[#allocation247_spill] sm:$0xff] }
 0x78f   :  { %4566 = vmatpush.msra.mxu0 %v13812_v44  ;;  %4581 = vmatpush.msrb.mxu2 %v13813_v45  ;;  %v13868_v43 = vld [vmem:[#allocation359_spill] sm:$0xff]  ;;  %v13869_v44 = vld [vmem:[#allocation506_spill] sm:$0xff]  ;;  %v13870_v45 = vld [vmem:[#allocation625_spill] sm:$0xff] }
 0x790   :  { %4532 = vmatpush.msrb.mxu1 %v13814_v46  ;;  %4547 = vmatpush.msrb.mxu3 %v13815_v48  ;;  %v13871_v46 = vld [vmem:[#allocation240_spill] sm:$0xff] }
 0x791   :  { %4567 = vmatpush.msra.mxu0 %v13816_v49  ;;  %4582 = vmatpush.msrb.mxu2 %v13817_v50  ;;  %v13872_v48 = vld [vmem:[#allocation352_spill] sm:$0xff]  ;;  %v13873_v49 = vld [vmem:[#allocation499_spill] sm:$0xff]  ;;  %v13874_v50 = vld [vmem:[#allocation618_spill] sm:$0xff] }
 0x792   :  { %4601 = vmatpush.msra.mxu1 %v13818_v51  ;;  %4548 = vmatpush.msrb.mxu3 %v13819_v53  ;;  %v13875_v51 = vld [vmem:[#allocation233_spill] sm:$0xff] }
 0x793   :  { %4568 = vmatpush.msra.mxu0 %v13820_v54  ;;  %4583 = vmatpush.msrb.mxu2 %v13821_v55  ;;  %v13876_v53 = vld [vmem:[#allocation345_spill] sm:$0xff]  ;;  %v13877_v54 = vld [vmem:[#allocation492_spill] sm:$0xff]  ;;  %v13878_v55 = vld [vmem:[#allocation611_spill] sm:$0xff] }
 0x794   :  { %4602 = vmatpush.msra.mxu1 %v13822_v56  ;;  %4549 = vmatpush.msrb.mxu3 %v13823_v58  ;;  %v13879_v56 = vld [vmem:[#allocation226_spill] sm:$0xff] }
 0x795   :  { %4569 = vmatpush.msra.mxu0 %v13824_v59  ;;  %4584 = vmatpush.msrb.mxu2 %v13825_v60  ;;  %v13880_v58 = vld [vmem:[#allocation338_spill] sm:$0xff]  ;;  %v13881_v59 = vld [vmem:[#allocation485_spill] sm:$0xff]  ;;  %v13882_v60 = vld [vmem:[#allocation604_spill] sm:$0xff] }
 0x796   :  { %4603 = vmatpush.msra.mxu1 %v13826_v61  ;;  %4550 = vmatpush.msrb.mxu3 %v13827_v62  ;;  %v13883_v61 = vld [vmem:[#allocation219_spill] sm:$0xff] }
 0x797   :  { %4570 = vmatpush.msra.mxu0 %v13828_v63  ;;  %4585 = vmatpush.msrb.mxu2 %v13829_v0  ;;  %v13884_v62 = vld [vmem:[#allocation331_spill] sm:$0xff]  ;;  %v13885_v63 = vld [vmem:[#allocation478_spill] sm:$0xff]  ;;  %v13886_v0 = vld [vmem:[#allocation597_spill] sm:$0xff] }
 0x798   :  { %4604 = vmatpush.msra.mxu1 %v13830_v10  ;;  %4551 = vmatpush.msrb.mxu3 %v13831_v47  ;;  %v13887_v10 = vld [vmem:[#allocation212_spill] sm:$0xff] }
 0x799   :  { %4571 = vmatpush.msra.mxu0 %v13832_v7  ;;  %4586 = vmatpush.msrb.mxu2 %v13833_v9  ;;  %v13888_v47 = vld [vmem:[#allocation324_spill] sm:$0xff]  ;;  %v13889_v7 = vld [vmem:[#allocation471_spill] sm:$0xff]  ;;  %v13890_v9 = vld [vmem:[#allocation590_spill] sm:$0xff] }
 0x79a   :  { %4605 = vmatpush.msra.mxu1 %v13834_v14  ;;  %4552 = vmatpush.msrb.mxu3 %v13835_v15  ;;  %v13891_v14 = vld [vmem:[#allocation205_spill] sm:$0xff] }
 0x79b   :  { %4572 = vmatpush.msra.mxu0 %v13836_v8  ;;  %4587 = vmatpush.msrb.mxu2 %v13837_v22  ;;  %v13892_v15 = vld [vmem:[#allocation317_spill] sm:$0xff]  ;;  %v13893_v8 = vld [vmem:[#allocation464_spill] sm:$0xff]  ;;  %v13894_v22 = vld [vmem:[#allocation583_spill] sm:$0xff] }
 0x79c   :  { %4493 = vmatmul.f32.vlgmr.msrb.gmra.mxu0 %v11415_v26  ;;  %4606 = vmatpush.msra.mxu1 %v13838_v17  ;;  %v13895_v17 = vld [vmem:[#allocation198_spill] sm:$0xff] }
 0x79d   :  { %4617 = vmatpush.msra.mxu3 %v13839_v31  ;;  %4637 = vmatpush.msrb.mxu0 %v13840_v16  ;;  %v13896_v31 = vld [vmem:[#allocation310_spill] sm:$0xff]  ;;  %v13897_v16 = vld [vmem:[#allocation457_spill] sm:$0xff] }
 0x79e   :  { %4588 = vmatpush.msrb.mxu2 %v13841_v21  ;;  %4607 = vmatpush.msra.mxu1 %v13842_v3  ;;  %v13898_v21 = vld [vmem:[#allocation576_spill] sm:$0xff]  ;;  %v13899_v3 = vld [vmem:[#allocation191_spill] sm:$0xff] }
 0x79f   :  { %4618 = vmatpush.msra.mxu3 %v13843_v4  ;;  %4638 = vmatpush.msrb.mxu0 %v13844_v5  ;;  %v13900_v4 = vld [vmem:[#allocation303_spill] sm:$0xff]  ;;  %v13901_v5 = vld [vmem:[#allocation450_spill] sm:$0xff] }
 0x7a0   :  { %4589 = vmatpush.msrb.mxu2 %v13845_v11  ;;  %4608 = vmatpush.msra.mxu1 %v13846_v12  ;;  %v13902_v11 = vld [vmem:[#allocation569_spill] sm:$0xff]  ;;  %v13903_v12 = vld [vmem:[#allocation744_spill] sm:$0xff] }
 0x7a1   :  { %4619 = vmatpush.msra.mxu3 %v13847_v13  ;;  %4639 = vmatpush.msrb.mxu0 %v13848_v19  ;;  %v13904_v13 = vld [vmem:[#allocation856_spill] sm:$0xff]  ;;  %v13905_v19 = vld [vmem:[#allocation443_spill] sm:$0xff] }
 0x7a2   :  { %4590 = vmatpush.msrb.mxu2 %v13849_v32  ;;  %4609 = vmatpush.msra.mxu1 %v13850_v20  ;;  %v13906_v32 = vld [vmem:[#allocation562_spill] sm:$0xff]  ;;  %v13907_v20 = vld [vmem:[#allocation737_spill] sm:$0xff] }
 0x7a3   :  { %4620 = vmatpush.msra.mxu3 %v13851_v23  ;;  %4640 = vmatpush.msrb.mxu0 %v13852_v2  ;;  %v13908_v23 = vld [vmem:[#allocation849_spill] sm:$0xff]  ;;  %v13909_v2 = vld [vmem:[#allocation436_spill] sm:$0xff] }
 0x7a4   :  { %4591 = vmatpush.msrb.mxu2 %v13853_v25  ;;  %4610 = vmatpush.msra.mxu1 %v13854_v27  ;;  %v13910_v25 = vld [vmem:[#allocation555_spill] sm:$0xff]  ;;  %v13911_v27 = vld [vmem:[#allocation730_spill] sm:$0xff] }
 0x7a5   :  { %4621 = vmatpush.msra.mxu3 %v13855_v28  ;;  %4641 = vmatpush.msrb.mxu0 %v13856_v29  ;;  %v13912_v28 = vld [vmem:[#allocation842_spill] sm:$0xff]  ;;  %v13913_v29 = vld [vmem:[#allocation429_spill] sm:$0xff] }
 0x7a6   :  { %4592 = vmatpush.msrb.mxu2 %v13857_v30  ;;  %4611 = vmatpush.msra.mxu1 %v13858_v33  ;;  %v13914_v30 = vld [vmem:[#allocation548_spill] sm:$0xff]  ;;  %v13915_v33 = vld [vmem:[#allocation723_spill] sm:$0xff] }
 0x7a7   :  { %4513 = vmatmul.f32.vlgmr.msra.gmra.mxu2 %v11427_v34  ;;  %4622 = vmatpush.msra.mxu3 %v13859_v1  ;;  %v13916_v1 = vld [vmem:[#allocation835_spill] sm:$0xff] }
 0x7a8   :  { %4642 = vmatpush.msrb.mxu0 %v13860_v35  ;;  %4657 = vmatpush.msra.mxu2 %v13861_v36  ;;  %v13917_v35 = vld [vmem:[#allocation422_spill] sm:$0xff]  ;;  %v13918_v36 = vld [vmem:[#allocation541_spill] sm:$0xff] }
 0x7a9   :  { %4612 = vmatpush.msra.mxu1 %v13862_v37  ;;  %4623 = vmatpush.msra.mxu3 %v13863_v38  ;;  %v13919_v37 = vld [vmem:[#allocation716_spill] sm:$0xff] }
 0x7aa   :  { %4643 = vmatpush.msrb.mxu0 %v13864_v39  ;;  %4658 = vmatpush.msra.mxu2 %v13865_v40  ;;  %v13920_v38 = vld [vmem:[#allocation828_spill] sm:$0xff]  ;;  %v13921_v39 = vld [vmem:[#allocation415_spill] sm:$0xff]  ;;  %v13922_v40 = vld [vmem:[#allocation534_spill] sm:$0xff] }
 0x7ab   :  { %4533 = vmatmul.f32.vlgmr.msrb.gmra.mxu1 %v11456_v52  ;;  %4553 = vmatmul.f32.vlgmr.msrb.gmra.mxu3 %v11465_v57 }
 0x7ac   :  { %4677 = vmatpush.msrb.mxu1 %v13866_v41  ;;  %4624 = vmatpush.msra.mxu3 %v13867_v42  ;;  %v13923_v41 = vld [vmem:[#allocation709_spill] sm:$0xff] }
 0x7ad   :  { %4644 = vmatpush.msrb.mxu0 %v13868_v43  ;;  %4659 = vmatpush.msra.mxu2 %v13869_v44  ;;  %v13924_v42 = vld [vmem:[#allocation821_spill] sm:$0xff]  ;;  %v13925_v43 = vld [vmem:[#allocation940_spill] sm:$0xff]  ;;  %v13926_v44 = vld [vmem:[#allocation527_spill] sm:$0xff] }
 0x7ae   :  { %4678 = vmatpush.msrb.mxu1 %v13870_v45  ;;  %4625 = vmatpush.msra.mxu3 %v13871_v46  ;;  %v13927_v45 = vld [vmem:[#allocation702_spill] sm:$0xff] }
 0x7af   :  { %4645 = vmatpush.msrb.mxu0 %v13872_v48  ;;  %4660 = vmatpush.msra.mxu2 %v13873_v49  ;;  %v13928_v46 = vld [vmem:[#allocation814_spill] sm:$0xff]  ;;  %v13929_v48 = vld [vmem:[#allocation933_spill] sm:$0xff] }
 0x7b0   :  { %4679 = vmatpush.msrb.mxu1 %v13874_v50  ;;  %4593 = vmatmul.f32.vlgmr.msrb.gmra.mxu2 %v11518_v18  ;;  %v13930_v49 = vld [vmem:[#allocation297_spill] sm:$0xff]  ;;  %v13931_v50 = vld [vmem:[#allocation695_spill] sm:$0xff] }
 0x7b1   :  { %4626 = vmatpush.msra.mxu3 %v13875_v51  ;;  %4646 = vmatpush.msrb.mxu0 %v13876_v53  ;;  %v13932_v51 = vld [vmem:[#allocation807_spill] sm:$0xff]  ;;  %v13933_v53 = vld [vmem:[#allocation926_spill] sm:$0xff] }
 0x7b2   :  { %4661 = vmatpush.msra.mxu2 %v13877_v54  ;;  %4680 = vmatpush.msrb.mxu1 %v13878_v55  ;;  %v13934_v54 = vld [vmem:[#allocation290_spill] sm:$0xff]  ;;  %v13935_v55 = vld [vmem:[#allocation688_spill] sm:$0xff] }
 0x7b3   :  { %4627 = vmatpush.msra.mxu3 %v13879_v56  ;;  %4647 = vmatpush.msrb.mxu0 %v13880_v58  ;;  %v13936_v56 = vld [vmem:[#allocation800_spill] sm:$0xff]  ;;  %v13937_v58 = vld [vmem:[#allocation919_spill] sm:$0xff] }
 0x7b4   :  { %4662 = vmatpush.msra.mxu2 %v13881_v59  ;;  %4681 = vmatpush.msrb.mxu1 %v13882_v60  ;;  %v13938_v59 = vld [vmem:[#allocation283_spill] sm:$0xff]  ;;  %v13939_v60 = vld [vmem:[#allocation681_spill] sm:$0xff] }
 0x7b5   :  { %4573 = vmatmul.f32.vlgmr.msra.gmra.mxu0 %v11512_v6  ;;  %4628 = vmatpush.msra.mxu3 %v13883_v61  ;;  %v13940_v61 = vld [vmem:[#allocation793_spill] sm:$0xff] }
 0x7b6   :  { %4648 = vmatpush.msrb.mxu0 %v13884_v62  ;;  %4663 = vmatpush.msra.mxu2 %v13885_v63  ;;  %v13941_v62 = vld [vmem:[#allocation912_spill] sm:$0xff] }
 0x7b7   :  { %4682 = vmatpush.msrb.mxu1 %v13886_v0  ;;  %4629 = vmatpush.msra.mxu3 %v13887_v10  ;;  %v13942_v63 = vld [vmem:[#allocation276_spill] sm:$0xff]  ;;  %v13943_v0 = vld [vmem:[#allocation674_spill] sm:$0xff] }
 0x7b8   :  { %4649 = vmatpush.msrb.mxu0 %v13888_v47  ;;  %4664 = vmatpush.msra.mxu2 %v13889_v7  ;;  %v13944_v10 = vld [vmem:[#allocation786_spill] sm:$0xff]  ;;  %v13945_v47 = vld [vmem:[#allocation905_spill] sm:$0xff] }
 0x7b9   :  { %4683 = vmatpush.msrb.mxu1 %v13890_v9  ;;  %4630 = vmatpush.msra.mxu3 %v13891_v14  ;;  %v13946_v7 = vld [vmem:[#allocation269_spill] sm:$0xff]  ;;  %v13947_v9 = vld [vmem:[#allocation667_spill] sm:$0xff] }
 0x7ba   :  { %5261 = vmatmul.msk.f32.vlgmr.msra.gmra.mxu1 %vm3275_vm6, %v11522_v24  ;;  %4650 = vmatpush.msrb.mxu0 %v13892_v15  ;;  %v13948_v14 = vld [vmem:[#allocation779_spill] sm:$0xff]  ;;  %v13949_v15 = vld [vmem:[#allocation898_spill] sm:$0xff] }
 0x7bb   :  { %4665 = vmatpush.msra.mxu2 %v13893_v8  ;;  %4684 = vmatpush.msrb.mxu1 %v13894_v22  ;;  %v13950_v8 = vld [vmem:[#allocation262_spill] sm:$0xff]  ;;  %v13951_v22 = vld [vmem:[#allocation660_spill] sm:$0xff] }
 0x7bc   :  { %4631 = vmatpush.msra.mxu3 %v13895_v17  ;;  %4651 = vmatpush.msrb.mxu0 %v13896_v31  ;;  %v13952_v17 = vld [vmem:[#allocation772_spill] sm:$0xff]  ;;  %v13953_v31 = vld [vmem:[#allocation891_spill] sm:$0xff] }
 0x7bd   :  { %4666 = vmatpush.msra.mxu2 %v13897_v16  ;;  %4685 = vmatpush.msrb.mxu1 %v13898_v21  ;;  %v13954_v16 = vld [vmem:[#allocation255_spill] sm:$0xff]  ;;  %v13955_v21 = vld [vmem:[#allocation653_spill] sm:$0xff] }
 0x7be   :  { %4632 = vmatpush.msra.mxu3 %v13899_v3  ;;  %4652 = vmatpush.msrb.mxu0 %v13900_v4  ;;  %v13956_v3 = vld [vmem:[#allocation765_spill] sm:$0xff]  ;;  %v13957_v4 = vld [vmem:[#allocation884_spill] sm:$0xff] }
 0x7bf   :  { %4667 = vmatpush.msra.mxu2 %v13901_v5  ;;  %4686 = vmatpush.msrb.mxu1 %v13902_v11  ;;  %v13958_v5 = vld [vmem:[#allocation248_spill] sm:$0xff]  ;;  %v13959_v11 = vld [vmem:[#allocation646_spill] sm:$0xff] }
 0x7c0   :  { %4697 = vmatpush.msrb.mxu3 %v13903_v12  ;;  %4717 = vmatpush.msra.mxu0 %v13904_v13  ;;  %v13960_v12 = vld [vmem:[#allocation758_spill] sm:$0xff]  ;;  %v13961_v13 = vld [vmem:[#allocation877_spill] sm:$0xff] }
 0x7c1   :  { %4668 = vmatpush.msra.mxu2 %v13905_v19  ;;  %4687 = vmatpush.msrb.mxu1 %v13906_v32  ;;  %v13962_v19 = vld [vmem:[#allocation241_spill] sm:$0xff]  ;;  %v13963_v32 = vld [vmem:[#allocation639_spill] sm:$0xff] }
 0x7c2   :  { %4698 = vmatpush.msrb.mxu3 %v13907_v20  ;;  %4718 = vmatpush.msra.mxu0 %v13908_v23  ;;  %v13964_v20 = vld [vmem:[#allocation751_spill] sm:$0xff]  ;;  %v13965_v23 = vld [vmem:[#allocation870_spill] sm:$0xff] }
 0x7c3   :  { %4669 = vmatpush.msra.mxu2 %v13909_v2  ;;  %4688 = vmatpush.msrb.mxu1 %v13910_v25  ;;  %v13966_v2 = vld [vmem:[#allocation234_spill] sm:$0xff]  ;;  %v13967_v25 = vld [vmem:[#allocation409_spill] sm:$0xff] }
 0x7c4   :  { %4699 = vmatpush.msrb.mxu3 %v13911_v27  ;;  %4719 = vmatpush.msra.mxu0 %v13912_v28  ;;  %v13968_v27 = vld [vmem:[#allocation521_spill] sm:$0xff]  ;;  %v13969_v28 = vld [vmem:[#allocation863_spill] sm:$0xff] }
 0x7c5   :  { %4670 = vmatpush.msra.mxu2 %v13913_v29  ;;  %4689 = vmatpush.msrb.mxu1 %v13914_v30  ;;  %v13970_v29 = vld [vmem:[#allocation227_spill] sm:$0xff]  ;;  %v13971_v30 = vld [vmem:[#allocation402_spill] sm:$0xff] }
 0x7c6   :  { %4700 = vmatpush.msrb.mxu3 %v13915_v33  ;;  %4720 = vmatpush.msra.mxu0 %v13916_v1  ;;  %v13972_v33 = vld [vmem:[#allocation514_spill] sm:$0xff]  ;;  %v13973_v1 = vld [vmem:[#allocation633_spill] sm:$0xff] }
 0x7c7   :  { %4671 = vmatpush.msra.mxu2 %v13917_v35  ;;  %4690 = vmatpush.msrb.mxu1 %v13918_v36  ;;  %v13974_v35 = vld [vmem:[#allocation220_spill] sm:$0xff]  ;;  %v13975_v36 = vld [vmem:[#allocation395_spill] sm:$0xff] }
 0x7c8   :  { %4701 = vmatpush.msrb.mxu3 %v13919_v37  ;;  %4721 = vmatpush.msra.mxu0 %v13920_v38  ;;  %v13976_v37 = vld [vmem:[#allocation507_spill] sm:$0xff]  ;;  %v13977_v38 = vld [vmem:[#allocation626_spill] sm:$0xff] }
 0x7c9   :  { %4672 = vmatpush.msra.mxu2 %v13921_v39  ;;  %4691 = vmatpush.msrb.mxu1 %v13922_v40  ;;  %v13978_v39 = vld [vmem:[#allocation213_spill] sm:$0xff]  ;;  %v13979_v40 = vld [vmem:[#allocation388_spill] sm:$0xff] }
 0x7ca   :  { %4702 = vmatpush.msrb.mxu3 %v13923_v41  ;;  %4722 = vmatpush.msra.mxu0 %v13924_v42  ;;  %v13980_v41 = vld [vmem:[#allocation500_spill] sm:$0xff]  ;;  %v13981_v42 = vld [vmem:[#allocation619_spill] sm:$0xff] }
 0x7cb   :  { %4741 = vmatpush.msrb.mxu2 %v13925_v43  ;;  %4692 = vmatpush.msrb.mxu1 %v13926_v44  ;;  %v13982_v43 = vld [vmem:[#allocation206_spill] sm:$0xff]  ;;  %v13983_v44 = vld [vmem:[#allocation381_spill] sm:$0xff] }
 0x7cc   :  { %4703 = vmatpush.msrb.mxu3 %v13927_v45  ;;  %4723 = vmatpush.msra.mxu0 %v13928_v46  ;;  %v13984_v45 = vld [vmem:[#allocation493_spill] sm:$0xff]  ;;  %v13985_v46 = vld [vmem:[#allocation612_spill] sm:$0xff] }
 0x7cd   :  { %4742 = vmatpush.msrb.mxu2 %v13929_v48  ;;  %4757 = vmatpush.msra.mxu1 %v13930_v49  ;;  %v13986_v48 = vld [vmem:[#allocation199_spill] sm:$0xff]  ;;  %v13987_v49 = vld [vmem:[#allocation374_spill] sm:$0xff] }
 0x7ce   :  { %4704 = vmatpush.msrb.mxu3 %v13931_v50  ;;  %4724 = vmatpush.msra.mxu0 %v13932_v51  ;;  %v13988_v50 = vld [vmem:[#allocation486_spill] sm:$0xff]  ;;  %v13989_v51 = vld [vmem:[#allocation605_spill] sm:$0xff] }
 0x7cf   :  { %4743 = vmatpush.msrb.mxu2 %v13933_v53  ;;  %4758 = vmatpush.msra.mxu1 %v13934_v54  ;;  %v13990_v53 = vld [vmem:[#allocation192_spill] sm:$0xff]  ;;  %v13991_v54 = vld [vmem:[#allocation367_spill] sm:$0xff] }
 0x7d0   :  { %4705 = vmatpush.msrb.mxu3 %v13935_v55  ;;  %4725 = vmatpush.msra.mxu0 %v13936_v56  ;;  %v13992_v55 = vld [vmem:[#allocation479_spill] sm:$0xff]  ;;  %v13993_v56 = vld [vmem:[#allocation598_spill] sm:$0xff] }
 0x7d1   :  { %4744 = vmatpush.msrb.mxu2 %v13937_v58  ;;  %4759 = vmatpush.msra.mxu1 %v13938_v59  ;;  %v13994_v58 = vld [vmem:[#allocation745_spill] sm:$0xff]  ;;  %v13995_v59 = vld [vmem:[#allocation360_spill] sm:$0xff] }
 0x7d2   :  { %4706 = vmatpush.msrb.mxu3 %v13939_v60  ;;  %4726 = vmatpush.msra.mxu0 %v13940_v61  ;;  %v13996_v60 = vld [vmem:[#allocation472_spill] sm:$0xff]  ;;  %v13997_v61 = vld [vmem:[#allocation591_spill] sm:$0xff] }
 0x7d3   :  { %4745 = vmatpush.msrb.mxu2 %v13941_v62  ;;  %4760 = vmatpush.msra.mxu1 %v13942_v63  ;;  %v13998_v62 = vld [vmem:[#allocation738_spill] sm:$0xff]  ;;  %v13999_v63 = vld [vmem:[#allocation353_spill] sm:$0xff] }
 0x7d4   :  { %4707 = vmatpush.msrb.mxu3 %v13943_v0  ;;  %4727 = vmatpush.msra.mxu0 %v13944_v10  ;;  %v14000_v0 = vld [vmem:[#allocation465_spill] sm:$0xff]  ;;  %v14001_v10 = vld [vmem:[#allocation584_spill] sm:$0xff] }
 0x7d5   :  { %4746 = vmatpush.msrb.mxu2 %v13945_v47  ;;  %4761 = vmatpush.msra.mxu1 %v13946_v7  ;;  %v14002_v47 = vld [vmem:[#allocation731_spill] sm:$0xff]  ;;  %v14003_v7 = vld [vmem:[#allocation346_spill] sm:$0xff] }
 0x7d6   :  { %4708 = vmatpush.msrb.mxu3 %v13947_v9  ;;  %4728 = vmatpush.msra.mxu0 %v13948_v14  ;;  %v14004_v9 = vld [vmem:[#allocation458_spill] sm:$0xff]  ;;  %v14005_v14 = vld [vmem:[#allocation577_spill] sm:$0xff] }
 0x7d7   :  { %4747 = vmatpush.msrb.mxu2 %v13949_v15  ;;  %4633 = vmatmul.f32.vlgmr.msra.gmra.mxu3 %v11415_v26  ;;  %v14006_v15 = vld [vmem:[#allocation724_spill] sm:$0xff] }
 0x7d8   :  { %4762 = vmatpush.msra.mxu1 %v13950_v8  ;;  %4709 = vmatpush.msrb.mxu3 %v13951_v22  ;;  %v14007_v8 = vld [vmem:[#allocation339_spill] sm:$0xff] }
 0x7d9   :  { %4729 = vmatpush.msra.mxu0 %v13952_v17  ;;  %4748 = vmatpush.msrb.mxu2 %v13953_v31  ;;  %v14008_v22 = vld [vmem:[#allocation451_spill] sm:$0xff]  ;;  %v14009_v17 = vld [vmem:[#allocation570_spill] sm:$0xff]  ;;  %v14010_v31 = vld [vmem:[#allocation717_spill] sm:$0xff] }
 0x7da   :  { %4763 = vmatpush.msra.mxu1 %v13954_v16  ;;  %4710 = vmatpush.msrb.mxu3 %v13955_v21  ;;  %v14011_v16 = vld [vmem:[#allocation332_spill] sm:$0xff] }
 0x7db   :  { %4730 = vmatpush.msra.mxu0 %v13956_v3  ;;  %4749 = vmatpush.msrb.mxu2 %v13957_v4  ;;  %v14012_v21 = vld [vmem:[#allocation444_spill] sm:$0xff]  ;;  %v14013_v3 = vld [vmem:[#allocation563_spill] sm:$0xff]  ;;  %v14014_v4 = vld [vmem:[#allocation710_spill] sm:$0xff] }
 0x7dc   :  { %4673 = vmatmul.f32.vlgmr.msra.gmra.mxu2 %v11456_v52  ;;  %4764 = vmatpush.msra.mxu1 %v13958_v5  ;;  %v14015_v5 = vld [vmem:[#allocation325_spill] sm:$0xff] }
 0x7dd   :  { %4711 = vmatpush.msrb.mxu3 %v13959_v11  ;;  %4731 = vmatpush.msra.mxu0 %v13960_v12  ;;  %v14016_v11 = vld [vmem:[#allocation437_spill] sm:$0xff]  ;;  %v14017_v12 = vld [vmem:[#allocation556_spill] sm:$0xff] }
 0x7de   :  { %4750 = vmatpush.msrb.mxu2 %v13961_v13  ;;  %4765 = vmatpush.msra.mxu1 %v13962_v19  ;;  %v14018_v13 = vld [vmem:[#allocation703_spill] sm:$0xff]  ;;  %v14019_v19 = vld [vmem:[#allocation318_spill] sm:$0xff] }
 0x7df   :  { %4712 = vmatpush.msrb.mxu3 %v13963_v32  ;;  %4732 = vmatpush.msra.mxu0 %v13964_v20  ;;  %v14020_v32 = vld [vmem:[#allocation430_spill] sm:$0xff]  ;;  %v14021_v20 = vld [vmem:[#allocation549_spill] sm:$0xff] }
 0x7e0   :  { %4751 = vmatpush.msrb.mxu2 %v13965_v23  ;;  %4653 = vmatmul.f32.vlgmr.msrb.gmra.mxu0 %v11427_v34  ;;  %v14022_v23 = vld [vmem:[#allocation696_spill] sm:$0xff] }
 0x7e1   :  { %4713 = vmatmul.f32.vlgmr.msrb.gmra.mxu3 %v11512_v6  ;;  %4766 = vmatpush.msra.mxu1 %v13966_v2  ;;  %v14023_v2 = vld [vmem:[#allocation311_spill] sm:$0xff] }
 0x7e2   :  { %4777 = vmatpush.msra.mxu3 %v13967_v25  ;;  %4797 = vmatpush.msrb.mxu0 %v13968_v27  ;;  %v14024_v25 = vld [vmem:[#allocation423_spill] sm:$0xff]  ;;  %v14025_v27 = vld [vmem:[#allocation542_spill] sm:$0xff] }
 0x7e3   :  { %4752 = vmatpush.msrb.mxu2 %v13969_v28  ;;  %4767 = vmatpush.msra.mxu1 %v13970_v29  ;;  %v14026_v28 = vld [vmem:[#allocation689_spill] sm:$0xff]  ;;  %v14027_v29 = vld [vmem:[#allocation304_spill] sm:$0xff] }
 0x7e4   :  { %4778 = vmatpush.msra.mxu3 %v13971_v30  ;;  %4798 = vmatpush.msrb.mxu0 %v13972_v33  ;;  %v14028_v30 = vld [vmem:[#allocation416_spill] sm:$0xff]  ;;  %v14029_v33 = vld [vmem:[#allocation535_spill] sm:$0xff] }
 0x7e5   :  { %4817 = vmatpush.msra.mxu2 %v13973_v1  ;;  %4693 = vmatmul.f32.vlgmr.msrb.gmra.mxu1 %v11465_v57  ;;  %v14030_v1 = vld [vmem:[#allocation682_spill] sm:$0xff] }
 0x7e6   :  { %5262 = vmatmul.msk.f32.vlgmr.msrb.gmra.mxu2 %vm3275_vm6, %v11522_v24  ;;  %4768 = vmatpush.msra.mxu1 %v13974_v35  ;;  %v14031_v35 = vld [vmem:[#allocation857_spill] sm:$0xff] }
 0x7e7   :  { %4779 = vmatpush.msra.mxu3 %v13975_v36  ;;  %4799 = vmatpush.msrb.mxu0 %v13976_v37  ;;  %v14032_v36 = vld [vmem:[#allocation941_spill] sm:$0xff]  ;;  %v14033_v37 = vld [vmem:[#allocation528_spill] sm:$0xff] }
 0x7e8   :  { %4818 = vmatpush.msra.mxu2 %v13977_v38  ;;  %4769 = vmatpush.msra.mxu1 %v13978_v39  ;;  %v14034_v38 = vld [vmem:[#allocation675_spill] sm:$0xff]  ;;  %v14035_v39 = vld [vmem:[#allocation850_spill] sm:$0xff] }
 0x7e9   :  { %4780 = vmatpush.msra.mxu3 %v13979_v40  ;;  %4800 = vmatpush.msrb.mxu0 %v13980_v41  ;;  %v14036_v40 = vld [vmem:[#allocation934_spill] sm:$0xff] }
 0x7ea   :  { %4819 = vmatpush.msra.mxu2 %v13981_v42  ;;  %4733 = vmatmul.f32.vlgmr.msra.gmra.mxu0 %v11518_v18  ;;  %v14037_v41 = vld [vmem:[#allocation298_spill] sm:$0xff]  ;;  %v14038_v42 = vld [vmem:[#allocation668_spill] sm:$0xff] }
 0x7eb   :  { %4770 = vmatpush.msra.mxu1 %v13982_v43  ;;  %4781 = vmatpush.msra.mxu3 %v13983_v44  ;;  %v14039_v43 = vld [vmem:[#allocation843_spill] sm:$0xff] }
 0x7ec   :  { %4801 = vmatpush.msrb.mxu0 %v13984_v45  ;;  %4820 = vmatpush.msra.mxu2 %v13985_v46  ;;  %v14040_v44 = vld [vmem:[#allocation927_spill] sm:$0xff]  ;;  %v14042_v46 = vld [vmem:[#allocation661_spill] sm:$0xff] }
 0x7ed   :  { %4771 = vmatpush.msra.mxu1 %v13986_v48  ;;  %4782 = vmatpush.msra.mxu3 %v13987_v49  ;;  %v14041_v45 = vld [vmem:[#allocation291_spill] sm:$0xff]  ;;  %v14043_v48 = vld [vmem:[#allocation836_spill] sm:$0xff] }
 0x7ee   :  { %4802 = vmatpush.msrb.mxu0 %v13988_v50  ;;  %4821 = vmatpush.msra.mxu2 %v13989_v51  ;;  %v14044_v49 = vld [vmem:[#allocation920_spill] sm:$0xff]  ;;  %v14046_v51 = vld [vmem:[#allocation654_spill] sm:$0xff] }
 0x7ef   :  { %4772 = vmatpush.msra.mxu1 %v13990_v53  ;;  %4783 = vmatpush.msra.mxu3 %v13991_v54  ;;  %v14045_v50 = vld [vmem:[#allocation284_spill] sm:$0xff]  ;;  %v14047_v53 = vld [vmem:[#allocation829_spill] sm:$0xff] }
 0x7f0   :  { %4803 = vmatpush.msrb.mxu0 %v13992_v55  ;;  %4822 = vmatpush.msra.mxu2 %v13993_v56  ;;  %v14048_v54 = vld [vmem:[#allocation913_spill] sm:$0xff]  ;;  %v14050_v56 = vld [vmem:[#allocation647_spill] sm:$0xff] }
 0x7f1   :  { %4837 = vmatpush.msrb.mxu1 %v13994_v58  ;;  %4784 = vmatpush.msra.mxu3 %v13995_v59  ;;  %v14049_v55 = vld [vmem:[#allocation277_spill] sm:$0xff]  ;;  %v14051_v58 = vld [vmem:[#allocation822_spill] sm:$0xff] }
 0x7f2   :  { %4804 = vmatpush.msrb.mxu0 %v13996_v60  ;;  %4823 = vmatpush.msra.mxu2 %v13997_v61  ;;  %v14052_v59 = vld [vmem:[#allocation906_spill] sm:$0xff]  ;;  %v14054_v61 = vld [vmem:[#allocation640_spill] sm:$0xff] }
 0x7f3   :  { %4838 = vmatpush.msrb.mxu1 %v13998_v62  ;;  %4785 = vmatpush.msra.mxu3 %v13999_v63  ;;  %v14053_v60 = vld [vmem:[#allocation270_spill] sm:$0xff]  ;;  %v14055_v62 = vld [vmem:[#allocation815_spill] sm:$0xff] }
 0x7f4   :  { %4805 = vmatpush.msrb.mxu0 %v14000_v0  ;;  %4824 = vmatpush.msra.mxu2 %v14001_v10  ;;  %v14056_v63 = vld [vmem:[#allocation899_spill] sm:$0xff]  ;;  %v14058_v10 = vld [vmem:[#allocation410_spill] sm:$0xff] }
 0x7f5   :  { %4839 = vmatpush.msrb.mxu1 %v14002_v47  ;;  %4786 = vmatpush.msra.mxu3 %v14003_v7  ;;  %v14057_v0 = vld [vmem:[#allocation263_spill] sm:$0xff]  ;;  %v14059_v47 = vld [vmem:[#allocation808_spill] sm:$0xff] }
 0x7f6   :  { %4806 = vmatpush.msrb.mxu0 %v14004_v9  ;;  %4825 = vmatpush.msra.mxu2 %v14005_v14  ;;  %v14060_v7 = vld [vmem:[#allocation892_spill] sm:$0xff]  ;;  %v14062_v14 = vld [vmem:[#allocation403_spill] sm:$0xff] }
 0x7f7   :  { %4840 = vmatpush.msrb.mxu1 %v14006_v15  ;;  %4787 = vmatpush.msra.mxu3 %v14007_v8  ;;  %v14061_v9 = vld [vmem:[#allocation256_spill] sm:$0xff]  ;;  %v14063_v15 = vld [vmem:[#allocation801_spill] sm:$0xff] }
 0x7f8   :  { %4807 = vmatpush.msrb.mxu0 %v14008_v22  ;;  %4826 = vmatpush.msra.mxu2 %v14009_v17  ;;  %v14064_v8 = vld [vmem:[#allocation885_spill] sm:$0xff]  ;;  %v14066_v17 = vld [vmem:[#allocation396_spill] sm:$0xff] }
 0x7f9   :  { %4841 = vmatpush.msrb.mxu1 %v14010_v31  ;;  %4788 = vmatpush.msra.mxu3 %v14011_v16  ;;  %v14065_v22 = vld [vmem:[#allocation249_spill] sm:$0xff]  ;;  %v14067_v31 = vld [vmem:[#allocation794_spill] sm:$0xff] }
 0x7fa   :  { %4808 = vmatpush.msrb.mxu0 %v14012_v21  ;;  %4827 = vmatpush.msra.mxu2 %v14013_v3  ;;  %v14068_v16 = vld [vmem:[#allocation878_spill] sm:$0xff]  ;;  %v14070_v3 = vld [vmem:[#allocation389_spill] sm:$0xff] }
 0x7fb   :  { %4842 = vmatpush.msrb.mxu1 %v14014_v4  ;;  %4789 = vmatpush.msra.mxu3 %v14015_v5  ;;  %v14069_v21 = vld [vmem:[#allocation242_spill] sm:$0xff]  ;;  %v14071_v4 = vld [vmem:[#allocation787_spill] sm:$0xff] }
 0x7fc   :  { %4809 = vmatpush.msrb.mxu0 %v14016_v11  ;;  %4828 = vmatpush.msra.mxu2 %v14017_v12  ;;  %v14072_v5 = vld [vmem:[#allocation871_spill] sm:$0xff]  ;;  %v14074_v12 = vld [vmem:[#allocation382_spill] sm:$0xff] }
 0x7fd   :  { %4843 = vmatpush.msrb.mxu1 %v14018_v13  ;;  %4790 = vmatpush.msra.mxu3 %v14019_v19  ;;  %v14073_v11 = vld [vmem:[#allocation235_spill] sm:$0xff]  ;;  %v14075_v13 = vld [vmem:[#allocation780_spill] sm:$0xff] }
 0x7fe   :  { %4810 = vmatpush.msrb.mxu0 %v14020_v32  ;;  %4829 = vmatpush.msra.mxu2 %v14021_v20  ;;  %v14076_v19 = vld [vmem:[#allocation864_spill] sm:$0xff]  ;;  %v14078_v20 = vld [vmem:[#allocation375_spill] sm:$0xff] }
 0x7ff   :  { %4844 = vmatpush.msrb.mxu1 %v14022_v23  ;;  %4791 = vmatpush.msra.mxu3 %v14023_v2  ;;  %v14077_v32 = vld [vmem:[#allocation228_spill] sm:$0xff]  ;;  %v14079_v23 = vld [vmem:[#allocation522_spill] sm:$0xff]  ;;  %v14080_v2 = vld [vmem:[#allocation773_spill] sm:$0xff] }
 0x800   :  { %4811 = vmatpush.msrb.mxu0 %v14024_v25  ;;  %4830 = vmatpush.msra.mxu2 %v14025_v27  ;;  %v14081_v25 = vld [vmem:[#allocation221_spill] sm:$0xff]  ;;  %v14082_v27 = vld [vmem:[#allocation368_spill] sm:$0xff] }
 0x801   :  { %4845 = vmatpush.msrb.mxu1 %v14026_v28  ;;  %4792 = vmatpush.msra.mxu3 %v14027_v29  ;;  %v14083_v28 = vld [vmem:[#allocation515_spill] sm:$0xff]  ;;  %v14084_v29 = vld [vmem:[#allocation766_spill] sm:$0xff] }
 0x802   :  { %4812 = vmatpush.msrb.mxu0 %v14028_v30  ;;  %4831 = vmatpush.msra.mxu2 %v14029_v33  ;;  %v14085_v30 = vld [vmem:[#allocation214_spill] sm:$0xff]  ;;  %v14086_v33 = vld [vmem:[#allocation361_spill] sm:$0xff] }
 0x803   :  { %4846 = vmatpush.msrb.mxu1 %v14030_v1  ;;  %4857 = vmatpush.msrb.mxu3 %v14031_v35  ;;  %v14087_v1 = vld [vmem:[#allocation508_spill] sm:$0xff]  ;;  %v14088_v35 = vld [vmem:[#allocation759_spill] sm:$0xff] }
 0x804   :  { %4881 = vmatpush.msra.mxu0 %v14032_v36  ;;  %4832 = vmatpush.msra.mxu2 %v14033_v37  ;;  %v14089_v36 = vld [vmem:[#allocation207_spill] sm:$0xff]  ;;  %v14090_v37 = vld [vmem:[#allocation354_spill] sm:$0xff] }
 0x805   :  { %4847 = vmatpush.msrb.mxu1 %v14034_v38  ;;  %4858 = vmatpush.msrb.mxu3 %v14035_v39  ;;  %v14091_v38 = vld [vmem:[#allocation501_spill] sm:$0xff]  ;;  %v14092_v39 = vld [vmem:[#allocation752_spill] sm:$0xff] }
 0x806   :  { %4882 = vmatpush.msra.mxu0 %v14036_v40  ;;  %4897 = vmatpush.msrb.mxu2 %v14037_v41  ;;  %v14093_v40 = vld [vmem:[#allocation200_spill] sm:$0xff]  ;;  %v14094_v41 = vld [vmem:[#allocation347_spill] sm:$0xff] }
 0x807   :  { %4848 = vmatpush.msrb.mxu1 %v14038_v42  ;;  %4859 = vmatpush.msrb.mxu3 %v14039_v43  ;;  %v14095_v42 = vld [vmem:[#allocation494_spill] sm:$0xff] }
 0x808   :  { %4883 = vmatpush.msra.mxu0 %v14040_v44  ;;  %4898 = vmatpush.msrb.mxu2 %v14041_v45  ;;  %v14096_v43 = vld [vmem:[#allocation634_spill] sm:$0xff]  ;;  %v14097_v44 = vld [vmem:[#allocation193_spill] sm:$0xff]  ;;  %v14098_v45 = vld [vmem:[#allocation340_spill] sm:$0xff] }
 0x809   :  { %4849 = vmatpush.msrb.mxu1 %v14042_v46  ;;  %4860 = vmatpush.msrb.mxu3 %v14043_v48  ;;  %v14099_v46 = vld [vmem:[#allocation487_spill] sm:$0xff] }
 0x80a   :  { %4884 = vmatpush.msra.mxu0 %v14044_v49  ;;  %4899 = vmatpush.msrb.mxu2 %v14045_v50  ;;  %v14100_v48 = vld [vmem:[#allocation627_spill] sm:$0xff]  ;;  %v14101_v49 = vld [vmem:[#allocation746_spill] sm:$0xff]  ;;  %v14102_v50 = vld [vmem:[#allocation333_spill] sm:$0xff] }
 0x80b   :  { %4850 = vmatpush.msrb.mxu1 %v14046_v51  ;;  %4861 = vmatpush.msrb.mxu3 %v14047_v53  ;;  %v14103_v51 = vld [vmem:[#allocation480_spill] sm:$0xff] }
 0x80c   :  { %4885 = vmatpush.msra.mxu0 %v14048_v54  ;;  %4900 = vmatpush.msrb.mxu2 %v14049_v55  ;;  %v14104_v53 = vld [vmem:[#allocation620_spill] sm:$0xff]  ;;  %v14105_v54 = vld [vmem:[#allocation739_spill] sm:$0xff]  ;;  %v14106_v55 = vld [vmem:[#allocation326_spill] sm:$0xff] }
 0x80d   :  { %4851 = vmatpush.msrb.mxu1 %v14050_v56  ;;  %4862 = vmatpush.msrb.mxu3 %v14051_v58  ;;  %v14107_v56 = vld [vmem:[#allocation473_spill] sm:$0xff] }
 0x80e   :  { %4886 = vmatpush.msra.mxu0 %v14052_v59  ;;  %4901 = vmatpush.msrb.mxu2 %v14053_v60  ;;  %v14108_v58 = vld [vmem:[#allocation613_spill] sm:$0xff]  ;;  %v14109_v59 = vld [vmem:[#allocation732_spill] sm:$0xff]  ;;  %v12151_v60 = vpop.f32.mrf.mxu1 }
 0x80f   :  { %4852 = vmatpush.msrb.mxu1 %v14054_v61  ;;  %4863 = vmatpush.msrb.mxu3 %v14055_v62  ;;  %v14110_v61 = vld [vmem:[#allocation319_spill] sm:$0xff]  ;;  %v14111_v62 = vld [vmem:[#allocation466_spill] sm:$0xff] }
 0x810   :  { %4887 = vmatpush.msra.mxu0 %v14056_v63  ;;  %4902 = vmatpush.msrb.mxu2 %v14057_v0  ;;  %v14112_v63 = vld [vmem:[#allocation606_spill] sm:$0xff]  ;;  %v12158_v0 = vpop.f32.mrf.mxu3 }
 0x811   :  { %4773 = vmatmul.f32.vlgmr.msra.gmra.mxu1 %v11415_v26  ;;  %4793 = vmatmul.f32.vlgmr.msra.gmra.mxu3 %v11427_v34 }
 0x812   :  { %4917 = vmatpush.msra.mxu1 %v14058_v10  ;;  %4864 = vmatpush.msrb.mxu3 %v14059_v47  ;;  %v14113_v10 = vld [vmem:[#allocation725_spill] sm:$0xff]  ;;  %v14114_v47 = vld [vmem:[#allocation312_spill] sm:$0xff] }
 0x813   :  { %4888 = vmatpush.msra.mxu0 %v14060_v7  ;;  %4903 = vmatpush.msrb.mxu2 %v14061_v9  ;;  %v12162_v7 = vpop.f32.mrf.mxu0  ;;  %v14115_v9 = vld [vmem:[#allocation459_spill] sm:$0xff] }
 0x814   :  { %4918 = vmatpush.msra.mxu1 %v14062_v14  ;;  %4865 = vmatpush.msrb.mxu3 %v14063_v15  ;;  %v14116_v14 = vld [vmem:[#allocation599_spill] sm:$0xff]  ;;  %v14117_v15 = vld [vmem:[#allocation718_spill] sm:$0xff] }
 0x815   :  { %4889 = vmatpush.msra.mxu0 %v14064_v8  ;;  %4904 = vmatpush.msrb.mxu2 %v14065_v22  ;;  %v14118_v8 = vld [vmem:[#allocation305_spill] sm:$0xff]  ;;  %v12168_v22 = vpop.f32.mrf.mxu2 }
 0x816   :  { %4919 = vmatpush.msra.mxu1 %v14066_v17  ;;  %4833 = vmatmul.f32.vlgmr.msra.gmra.mxu2 %v11465_v57  ;;  %v14119_v17 = vld [vmem:[#allocation452_spill] sm:$0xff] }
 0x817   :  { %4866 = vmatpush.msrb.mxu3 %v14067_v31  ;;  %4890 = vmatpush.msra.mxu0 %v14068_v16  ;;  %v14120_v31 = vld [vmem:[#allocation592_spill] sm:$0xff]  ;;  %v14121_v16 = vld [vmem:[#allocation711_spill] sm:$0xff] }
 0x818   :  { %4905 = vmatpush.msrb.mxu2 %v14069_v21  ;;  %4920 = vmatpush.msra.mxu1 %v14070_v3  ;;  %v14122_v21 = vld [vmem:[#allocation858_spill] sm:$0xff]  ;;  %v14123_v3 = vld [vmem:[#allocation445_spill] sm:$0xff] }
 0x819   :  { %4867 = vmatpush.msrb.mxu3 %v14071_v4  ;;  %4891 = vmatpush.msra.mxu0 %v14072_v5  ;;  %v14124_v4 = vld [vmem:[#allocation585_spill] sm:$0xff]  ;;  %v14125_v5 = vld [vmem:[#allocation704_spill] sm:$0xff] }
 0x81a   :  { %4906 = vmatpush.msrb.mxu2 %v14073_v11  ;;  %4921 = vmatpush.msra.mxu1 %v14074_v12  ;;  %v14126_v11 = vld [vmem:[#allocation851_spill] sm:$0xff]  ;;  %v14127_v12 = vld [vmem:[#allocation438_spill] sm:$0xff] }
 0x81b   :  { %4813 = vmatmul.f32.vlgmr.msrb.gmra.mxu0 %v11456_v52  ;;  %4868 = vmatpush.msrb.mxu3 %v14075_v13  ;;  %v14128_v13 = vld [vmem:[#allocation578_spill] sm:$0xff] }
 0x81c   :  { %4892 = vmatpush.msra.mxu0 %v14076_v19  ;;  %4907 = vmatpush.msrb.mxu2 %v14077_v32  ;;  %v12180_v19 = vpop.f32.mrf.mxu1  ;;  %v14129_v32 = vld [vmem:[#allocation697_spill] sm:$0xff] }
 0x81d   :  { %4922 = vmatpush.msra.mxu1 %v14078_v20  ;;  %4869 = vmatpush.msrb.mxu3 %v14080_v2  ;;  %v14130_v20 = vld [vmem:[#allocation844_spill] sm:$0xff]  ;;  %v14132_v2 = vld [vmem:[#allocation571_spill] sm:$0xff] }
 0x81e   :  { %4937 = vmatpush.msrb.mxu0 %v14079_v23  ;;  %4908 = vmatpush.msrb.mxu2 %v14081_v25  ;;  %v14131_v23 = vld [vmem:[#allocation431_spill] sm:$0xff]  ;;  %v12186_v25 = vpop.f32.mrf.mxu3 }
 0x81f   :  { %4923 = vmatpush.msra.mxu1 %v14082_v27  ;;  %4870 = vmatpush.msrb.mxu3 %v14084_v29  ;;  %v14133_v27 = vld [vmem:[#allocation690_spill] sm:$0xff]  ;;  %v12190_v29 = vpop.f32.mrf.mxu0 }
 0x820   :  { %4938 = vmatpush.msrb.mxu0 %v14083_v28  ;;  %4853 = vmatmul.f32.vlgmr.msrb.gmra.mxu1 %v11512_v6  ;;  %v14134_v28 = vld [vmem:[#allocation837_spill] sm:$0xff] }
 0x821   :  { %4909 = vmatpush.msrb.mxu2 %v14085_v30  ;;  %4924 = vmatpush.msra.mxu1 %v14086_v33  ;;  %v4354_v30 = vpop.f32.mrf.mxu2  ;;  %v14135_v33 = vld [vmem:[#allocation424_spill] sm:$0xff] }
 0x822   :  { %4939 = vmatpush.msrb.mxu0 %v14087_v1  ;;  %4871 = vmatpush.msrb.mxu3 %v14088_v35  ;;  %v14136_v1 = vld [vmem:[#allocation564_spill] sm:$0xff]  ;;  %v14137_v35 = vld [vmem:[#allocation683_spill] sm:$0xff] }
 0x823   :  { %4910 = vmatpush.msrb.mxu2 %v14089_v36  ;;  %4925 = vmatpush.msra.mxu1 %v14090_v37  ;;  %v14138_v36 = vld [vmem:[#allocation830_spill] sm:$0xff]  ;;  %v14139_v37 = vld [vmem:[#allocation417_spill] sm:$0xff] }
 0x824   :  { %4940 = vmatpush.msrb.mxu0 %v14091_v38  ;;  %4872 = vmatpush.msrb.mxu3 %v14092_v39  ;;  %v14140_v38 = vld [vmem:[#allocation557_spill] sm:$0xff]  ;;  %v14141_v39 = vld [vmem:[#allocation676_spill] sm:$0xff] }
 0x825   :  { %4911 = vmatpush.msrb.mxu2 %v14093_v40  ;;  %4873 = vmatmul.f32.vlgmr.msrb.gmra.mxu3 %v11518_v18  ;;  %v14142_v40 = vld [vmem:[#allocation823_spill] sm:$0xff] }
 0x826   :  { %4926 = vmatpush.msra.mxu1 %v14094_v41  ;;  %4941 = vmatpush.msrb.mxu0 %v14095_v42  ;;  %v14143_v41 = vld [vmem:[#allocation942_spill] sm:$0xff] }
 0x827   :  { %4957 = vmatpush.msra.mxu3 %v14096_v43  ;;  %4912 = vmatpush.msrb.mxu2 %v14097_v44  ;;  %v14144_v42 = vld [vmem:[#allocation550_spill] sm:$0xff]  ;;  %v12202_v43 = vpop.f32.mrf.mxu1  ;;  %v14145_v44 = vld [vmem:[#allocation669_spill] sm:$0xff] }
 0x828   :  { %4927 = vmatpush.msra.mxu1 %v14098_v45  ;;  %4942 = vmatpush.msrb.mxu0 %v14099_v46  ;;  %v14146_v45 = vld [vmem:[#allocation816_spill] sm:$0xff]  ;;  %v14147_v46 = vld [vmem:[#allocation935_spill] sm:$0xff] }
 0x829   :  { %4958 = vmatpush.msra.mxu3 %v14100_v48  ;;  %4977 = vmatpush.msra.mxu2 %v14101_v49  ;;  %v14148_v48 = vld [vmem:[#allocation543_spill] sm:$0xff]  ;;  %v4374_v49 = vpop.f32.mrf.mxu3 }
 0x82a   :  { %4928 = vmatpush.msra.mxu1 %v14102_v50  ;;  %4943 = vmatpush.msrb.mxu0 %v14103_v51  ;;  %v14149_v50 = vld [vmem:[#allocation662_spill] sm:$0xff]  ;;  %v14150_v51 = vld [vmem:[#allocation809_spill] sm:$0xff] }
 0x82b   :  { %4959 = vmatpush.msra.mxu3 %v14104_v53  ;;  %4978 = vmatpush.msra.mxu2 %v14105_v54  ;;  %v12210_v53 = vpop.f32.mrf.mxu0  ;;  %v14151_v54 = vld [vmem:[#allocation928_spill] sm:$0xff] }
 0x82c   :  { %4929 = vmatpush.msra.mxu1 %v14106_v55  ;;  %4944 = vmatpush.msrb.mxu0 %v14107_v56  ;;  %v14152_v55 = vld [vmem:[#allocation536_spill] sm:$0xff]  ;;  %v14153_v56 = vld [vmem:[#allocation655_spill] sm:$0xff] }
 0x82d   :  { %4960 = vmatpush.msra.mxu3 %v14108_v58  ;;  %4979 = vmatpush.msra.mxu2 %v14109_v59  ;;  %v12216_v58 = vpop.f32.mrf.mxu2  ;;  %v14154_v59 = vld [vmem:[#allocation802_spill] sm:$0xff] }
 0x82e   :  { %5263 = vmatmul.msk.f32.vlgmr.msra.gmra.mxu0 %vm3275_vm6, %v11522_v24  ;;  %4930 = vmatpush.msra.mxu1 %v14110_v61  ;;  %v14155_v61 = vld [vmem:[#allocation921_spill] sm:$0xff] }
 0x82f   :  { %4945 = vmatpush.msrb.mxu0 %v14111_v62  ;;  %4961 = vmatpush.msra.mxu3 %v14112_v63  ;;  %v14156_v62 = vld [vmem:[#allocation529_spill] sm:$0xff]  ;;  %v14157_v63 = vld [vmem:[#allocation648_spill] sm:$0xff] }
 0x830   :  { %4980 = vmatpush.msra.mxu2 %v14113_v10  ;;  %4931 = vmatpush.msra.mxu1 %v14114_v47  ;;  %v14158_v10 = vld [vmem:[#allocation795_spill] sm:$0xff]  ;;  %v14159_v47 = vld [vmem:[#allocation914_spill] sm:$0xff] }
 0x831   :  { %4946 = vmatpush.msrb.mxu0 %v14115_v9  ;;  %4962 = vmatpush.msra.mxu3 %v14116_v14  ;;  %v12224_v9 = vpop.f32.mrf.mxu1  ;;  %v14160_v14 = vld [vmem:[#allocation299_spill] sm:$0xff] }
 0x832   :  { %4981 = vmatpush.msra.mxu2 %v14117_v15  ;;  %4932 = vmatpush.msra.mxu1 %v14118_v8  ;;  %v14161_v15 = vld [vmem:[#allocation641_spill] sm:$0xff]  ;;  %v14162_v8 = vld [vmem:[#allocation788_spill] sm:$0xff] }
 0x833   :  { %4947 = vmatpush.msrb.mxu0 %v14119_v17  ;;  %4963 = vmatpush.msra.mxu3 %v14120_v31  ;;  %v14163_v17 = vld [vmem:[#allocation907_spill] sm:$0xff]  ;;  %v12230_v31 = vpop.f32.mrf.mxu3 }
 0x834   :  { %4982 = vmatpush.msra.mxu2 %v14121_v16  ;;  %4997 = vmatpush.msrb.mxu1 %v14122_v21  ;;  %v14164_v16 = vld [vmem:[#allocation292_spill] sm:$0xff]  ;;  %v14165_v21 = vld [vmem:[#allocation411_spill] sm:$0xff] }
 0x835   :  { %4948 = vmatpush.msrb.mxu0 %v14123_v3  ;;  %4964 = vmatpush.msra.mxu3 %v14124_v4  ;;  %v12237_v3 = vld [vmem:[%s12411_s8] sm:$0x7f]  ;;  %v4494_v4 = vpop.f32.mrf.mxu0 }
 0x836   :  { %4983 = vmatpush.msra.mxu2 %v14125_v5  ;;  %4998 = vmatpush.msrb.mxu1 %v14126_v11  ;;  %v14166_v5 = vld [vmem:[#allocation781_spill] sm:$0xff]  ;;  %v4184_v11 = vperm.slane %v12237_v3, 1 }
 0x837   :  { %4949 = vmatpush.msrb.mxu0 %v14127_v12  ;;  %4965 = vmatpush.msra.mxu3 %v14128_v13  ;;  %v4185_v12 = vperm.slane %v12237_v3, 2  ;;  %v14167_v13 = vld [vmem:[#allocation900_spill] sm:$0xff] }
 0x838   :  { %4984 = vmatpush.msra.mxu2 %v14129_v32  ;;  %4999 = vmatpush.msrb.mxu1 %v14130_v20  ;;  %v14168_v32 = vld [vmem:[#allocation285_spill] sm:$0xff]  ;;  %v4514_v20 = vpop.f32.mrf.mxu2 }
 0x839   :  { %4950 = vmatpush.msrb.mxu0 %v14131_v23  ;;  %4966 = vmatpush.msra.mxu3 %v14132_v2  ;;  %v14169_v23 = vld [vmem:[#allocation404_spill] sm:$0xff]  ;;  %v14170_v2 = vld [vmem:[#allocation774_spill] sm:$0xff] }
 0x83a   :  { %4985 = vmatpush.msra.mxu2 %v14133_v27  ;;  %5000 = vmatpush.msrb.mxu1 %v14134_v28  ;;  %v4183_v27 = vperm.slane %v12237_v3, 0  ;;  %v14171_v28 = vld [vmem:[#allocation893_spill] sm:$0xff] }
 0x83b   :  { %4951 = vmatpush.msrb.mxu0 %v14135_v33  ;;  %4967 = vmatpush.msra.mxu3 %v14136_v1  ;;  %v14172_v33 = vld [vmem:[#allocation278_spill] sm:$0xff]  ;;  %v4355_v1 = vadd.f32 %v4354_v30, %v4184_v11  ;;  %v14179_v30 = vld [vmem:[#allocation879_spill] sm:$0xff] }
 0x83c   :  { %4986 = vmatpush.msra.mxu2 %v14137_v35  ;;  %5001 = vmatpush.msrb.mxu1 %v14138_v36  ;;  %v4495_v35 = vadd.f32 %v4494_v4, %v4185_v12  ;;  %v4534_v36 = vpop.f32.mrf.mxu1  ;;  %v14193_v11 = vld [vmem:[#allocation635_spill] sm:$0xff] }
 0x83d   :  { %4952 = vmatpush.msrb.mxu0 %v14139_v37  ;;  %4968 = vmatpush.msra.mxu3 %v14140_v38  ;;  %v14173_v37 = vld [vmem:[#allocation397_spill] sm:$0xff]  ;;  %v14174_v38 = vld [vmem:[#allocation767_spill] sm:$0xff] }
 0x83e   :  { %4987 = vmatpush.msra.mxu2 %v14141_v39  ;;  %5002 = vmatpush.msrb.mxu1 %v14142_v40  ;;  %v14175_v39 = vld [vmem:[#allocation886_spill] sm:$0xff]  ;;  %v4554_v40 = vpop.f32.mrf.mxu3 }
 0x83f   :  { %5021 = vmatpush.msra.mxu0 %v14143_v41  ;;  %4969 = vmatpush.msra.mxu3 %v14144_v42  ;;  %v14176_v41 = vld [vmem:[#allocation271_spill] sm:$0xff]  ;;  %v14177_v42 = vld [vmem:[#allocation390_spill] sm:$0xff] }
 0x840   :  { %4988 = vmatpush.msra.mxu2 %v14145_v44  ;;  %5003 = vmatpush.msrb.mxu1 %v14146_v45  ;;  %v4215_v44 = vadd.f32 %v12158_v0, %v4183_v27  ;;  %v14178_v45 = vld [vmem:[#allocation760_spill] sm:$0xff] }
 0x841   :  { %5022 = vmatpush.msra.mxu0 %v14147_v46  ;;  %4970 = vmatpush.msra.mxu3 %v14148_v48  ;;  %v4375_v46 = vadd.f32 %v4374_v49, %v4355_v1  ;;  %v4515_v48 = vadd.f32 %v4514_v20, %v4495_v35  ;;  %v14186_v49 = vld [vmem:[#allocation865_spill] sm:$0xff]  ;;  %v14195_v20 = vld [vmem:[#allocation355_spill] sm:$0xff]  ;;  %v14197_v27 = vld [vmem:[#allocation628_spill] sm:$0xff] }
 0x842   :  { %4989 = vmatpush.msra.mxu2 %v14149_v50  ;;  %5004 = vmatpush.msrb.mxu1 %v14150_v51  ;;  %v14180_v50 = vld [vmem:[#allocation264_spill] sm:$0xff]  ;;  %v14181_v51 = vld [vmem:[#allocation383_spill] sm:$0xff]  ;;  %v4235_v0 = vadd.f32 %v12162_v7, %v4215_v44  ;;  %v14200_v35 = vld [vmem:[#allocation502_spill] sm:$0xff] }
 0x843   :  { %5023 = vmatpush.msra.mxu0 %v14151_v54  ;;  %4913 = vmatmul.f32.vlgmr.msrb.gmra.mxu2 %v11415_v26  ;;  %v4574_v54 = vpop.f32.mrf.mxu0  ;;  %v14205_v44 = vld [vmem:[#allocation614_spill] sm:$0xff] }
 0x844   :  { %4971 = vmatpush.msra.mxu3 %v14152_v55  ;;  %4990 = vmatpush.msra.mxu2 %v14153_v56  ;;  %v14182_v55 = vld [vmem:[#allocation753_spill] sm:$0xff]  ;;  %v14183_v56 = vld [vmem:[#allocation872_spill] sm:$0xff]  ;;  %v4614_v7 = vpop.f32.mrf.mxu1  ;;  %v4255_v4 = vadd.f32 %v12151_v60, %v4235_v0 }
 0x845   :  { %5005 = vmatpush.msrb.mxu1 %v14154_v59  ;;  %5024 = vmatpush.msra.mxu0 %v14155_v61  ;;  %v14184_v59 = vld [vmem:[#allocation257_spill] sm:$0xff]  ;;  %v14185_v61 = vld [vmem:[#allocation376_spill] sm:$0xff] }
 0x846   :  { %4972 = vmatpush.msra.mxu3 %v14156_v62  ;;  %4991 = vmatpush.msra.mxu2 %v14157_v63  ;;  %v4594_v62 = vpop.f32.mrf.mxu2  ;;  %v4186_v63 = vperm.slane %v12237_v3, 3  ;;  %v14199_v60 = vld [vmem:[#allocation348_spill] sm:$0xff]  ;;  %v4275_v1 = vadd.f32 %v12168_v22, %v4255_v4  ;;  %v14206_v22 = vld [vmem:[#allocation215_spill] sm:$0xff] }
 0x847   :  { %5006 = vmatpush.msrb.mxu1 %v14158_v10  ;;  %5025 = vmatpush.msra.mxu0 %v14159_v47  ;;  %v4395_v10 = vadd.f32 %v12202_v43, %v4375_v46  ;;  %v4535_v47 = vadd.f32 %v4534_v36, %v4515_v48  ;;  %v14201_v36 = vld [vmem:[#allocation621_spill] sm:$0xff]  ;;  %v14208_v48 = vld [vmem:[#allocation488_spill] sm:$0xff] }
 0x848   :  { %5037 = vmatpush.msrb.mxu3 %v14160_v14  ;;  %4992 = vmatpush.msra.mxu2 %v14161_v15  ;;  %v14187_v14 = vld [vmem:[#allocation250_spill] sm:$0xff]  ;;  %v14188_v15 = vld [vmem:[#allocation369_spill] sm:$0xff]  ;;  %v14213_v0 = vld [vmem:[#allocation600_spill] sm:$0xff] }
 0x849   :  { %5007 = vmatpush.msrb.mxu1 %v14162_v8  ;;  %5026 = vmatpush.msra.mxu0 %v14163_v17  ;;  %v14189_v8 = vld [vmem:[#allocation523_spill] sm:$0xff]  ;;  %v4415_v12 = vadd.f32 %v12210_v53, %v4395_v10  ;;  %v14215_v10 = vld [vmem:[#allocation320_spill] sm:$0xff] }
 0x84a   :  { %5038 = vmatpush.msrb.mxu3 %v14164_v16  ;;  %5057 = vmatpush.msrb.mxu2 %v14165_v21  ;;  %v14190_v17 = vld [vmem:[#allocation243_spill] sm:$0xff]  ;;  %v14191_v16 = vld [vmem:[#allocation362_spill] sm:$0xff] }
 0x84b   :  { %4973 = vmatmul.f32.vlgmr.msra.gmra.mxu3 %v11465_v57  ;;  %5008 = vmatpush.msrb.mxu1 %v14166_v5  ;;  %v14192_v5 = vld [vmem:[#allocation516_spill] sm:$0xff] }
 0x84c   :  { %5027 = vmatpush.msra.mxu0 %v14167_v13  ;;  %5039 = vmatpush.msrb.mxu3 %v14168_v32  ;;  %v4555_v13 = vadd.f32 %v4554_v40, %v4535_v47  ;;  %v14194_v32 = vld [vmem:[#allocation236_spill] sm:$0xff]  ;;  %v14203_v40 = vld [vmem:[#allocation341_spill] sm:$0xff]  ;;  %v14216_v47 = vld [vmem:[#allocation474_spill] sm:$0xff] }
 0x84d   :  { %5058 = vmatpush.msrb.mxu2 %v14169_v23  ;;  %4933 = vmatmul.f32.vlgmr.msra.gmra.mxu1 %v11427_v34  ;;  %v14196_v23 = vld [vmem:[#allocation509_spill] sm:$0xff] }
 0x84e   :  { %4993 = vmatmul.f32.vlgmr.msra.gmra.mxu2 %v11512_v6  ;;  %5009 = vmatpush.msrb.mxu1 %v14170_v2 }
 0x84f   :  { %5028 = vmatpush.msra.mxu0 %v14171_v28  ;;  %5040 = vmatpush.msrb.mxu3 %v14172_v33  ;;  %v14198_v28 = vld [vmem:[#allocation229_spill] sm:$0xff] }
 0x850   :  { %5059 = vmatpush.msrb.mxu2 %v14173_v37  ;;  %4953 = vmatmul.f32.vlgmr.msrb.gmra.mxu0 %v11456_v52  ;;  %v4435_v37 = vadd.f32 %v12216_v58, %v4415_v12  ;;  %v14223_v12 = vld [vmem:[#allocation586_spill] sm:$0xff] }
 0x851   :  { %5010 = vmatpush.msrb.mxu1 %v14174_v38  ;;  %5029 = vmatpush.msra.mxu0 %v14175_v39  ;;  %v4575_v38 = vadd.f32 %v4574_v54, %v4555_v13  ;;  %v14202_v39 = vld [vmem:[#allocation222_spill] sm:$0xff]  ;;  %v14224_v13 = vld [vmem:[#allocation740_spill] sm:$0xff] }
 0x852   :  { %5041 = vmatpush.msrb.mxu3 %v14176_v41  ;;  %5060 = vmatpush.msrb.mxu2 %v14177_v42  ;;  %v14204_v42 = vld [vmem:[#allocation495_spill] sm:$0xff] }
 0x853   :  { %5011 = vmatpush.msrb.mxu1 %v14178_v45  ;;  %5030 = vmatpush.msra.mxu0 %v14179_v30  ;;  %v4455_v45 = vadd.f32 %v12230_v31, %v4435_v37  ;;  %v14207_v30 = vld [vmem:[#allocation334_spill] sm:$0xff]  ;;  %v4595_v54 = vadd.f32 %v4594_v62, %v4575_v38  ;;  %v14217_v62 = vld [vmem:[#allocation593_spill] sm:$0xff]  ;;  %v14235_v38 = vld [vmem:[#allocation719_spill] sm:$0xff] }
 0x854   :  { %5042 = vmatpush.msrb.mxu3 %v14180_v50  ;;  %5061 = vmatpush.msrb.mxu2 %v14181_v51  ;;  %v14209_v50 = vld [vmem:[#allocation607_spill] sm:$0xff]  ;;  %v4295_v51 = vadd.f32 %v12186_v25, %v4275_v1  ;;  %v14234_v37 = vld [vmem:[#allocation446_spill] sm:$0xff] }
 0x855   :  { %5012 = vmatpush.msrb.mxu1 %v14182_v55  ;;  %5031 = vmatpush.msra.mxu0 %v14183_v56  ;;  %v14210_v55 = vld [vmem:[#allocation208_spill] sm:$0xff]  ;;  %v14211_v56 = vld [vmem:[#allocation327_spill] sm:$0xff] }
 0x856   :  { %5043 = vmatpush.msrb.mxu3 %v14184_v59  ;;  %5062 = vmatpush.msrb.mxu2 %v14185_v61  ;;  %v14212_v61 = vld [vmem:[#allocation481_spill] sm:$0xff] }
 0x857   :  { %5013 = vmatmul.f32.vlgmr.msrb.gmra.mxu1 %v11518_v18  ;;  %5032 = vmatpush.msra.mxu0 %v14186_v49  ;;  %v4475_v49 = vadd.f32 %v12224_v9, %v4455_v45  ;;  %v14221_v9 = vld [vmem:[#allocation467_spill] sm:$0xff]  ;;  %v14241_v45 = vld [vmem:[#allocation432_spill] sm:$0xff] }
 0x858   :  { %5044 = vmatpush.msrb.mxu3 %v14187_v14  ;;  %5063 = vmatpush.msrb.mxu2 %v14188_v15  ;;  %v4315_v14 = vadd.f32 %v12190_v29, %v4295_v51  ;;  %v4615_v15 = vadd.f32 %v4614_v7, %v4595_v54  ;;  %v14225_v29 = vld [vmem:[#allocation859_spill] sm:$0xff] }
 0x859   :  { %5264 = vmatmul.msk.f32.vlgmr.msra.gmra.mxu0 %vm3275_vm6, %v11522_v24  ;;  %5077 = vmatpush.msra.mxu1 %v14189_v8  ;;  %v14218_v8 = vld [vmem:[#allocation194_spill] sm:$0xff]  ;;  %v14249_v51 = vld [vmem:[#allocation551_spill] sm:$0xff] }
 0x85a   :  { %5045 = vmatpush.msrb.mxu3 %v14190_v17  ;;  %5064 = vmatpush.msrb.mxu2 %v14191_v16  ;;  %v4634_v21 = vpop.f32.mrf.mxu3  ;;  %v14219_v17 = vld [vmem:[#allocation313_spill] sm:$0xff]  ;;  %v4335_v7 = vadd.f32 %v12180_v19, %v4315_v14  ;;  %v14250_v54 = vld [vmem:[#allocation691_spill] sm:$0xff]  ;;  %v14264_v14 = vld [vmem:[#allocation922_spill] sm:$0xff] }
 0x85b   :  { %5078 = vmatpush.msra.mxu1 %v14192_v5  ;;  %v4635_v43 = vadd.f32 %v4634_v21, %v4186_v63  ;;  %5097 = vmatpush.msrb.mxu0 %v14193_v11  ;;  %v14214_v63 = vld [vmem:[#allocation201_spill] sm:$0xff]  ;;  %v14220_v21 = vld [vmem:[#allocation747_spill] sm:$0xff]  ;;  %v5184_v5 = vrot.slane %v4475_v49, 6 }
 0x85c   :  { %5046 = vmatpush.msrb.mxu3 %v14194_v32  ;;  %5065 = vmatpush.msrb.mxu2 %v14195_v20  ;;  %v5185_v32 = vrot.slane %v4615_v15, 4  ;;  %v14226_v20 = vld [vmem:[#allocation460_spill] sm:$0xff]  ;;  %v14233_v19 = vld [vmem:[#allocation845_spill] sm:$0xff]  ;;  %v14265_v15 = vld [vmem:[#allocation663_spill] sm:$0xff] }
 0x85d   :  { %5079 = vmatpush.msra.mxu1 %v14196_v23  ;;  %v4654_v2 = vpop.f32.mrf.mxu0  ;;  %5098 = vmatpush.msrb.mxu0 %v14197_v27  ;;  %v14228_v27 = vld [vmem:[#allocation733_spill] sm:$0xff] }
 0x85e   :  { %5047 = vmatpush.msrb.mxu3 %v14198_v28  ;;  %5066 = vmatpush.msrb.mxu2 %v14199_v60  ;;  %v4655_v33 = vadd.f32 %v4654_v2, %v4635_v43  ;;  %v14222_v43 = vld [vmem:[#allocation306_spill] sm:$0xff]  ;;  %v14227_v2 = vld [vmem:[#allocation579_spill] sm:$0xff]  ;;  %v14229_v28 = vld [vmem:[#allocation852_spill] sm:$0xff]  ;;  %v5189_v60 = vsel %vm2286_vm1, %v4335_v7, %v5184_v5 }
 0x85f   :  { %5080 = vmatpush.msra.mxu1 %v14200_v35  ;;  %v4674_v53 = vpop.f32.mrf.mxu2  ;;  %5099 = vmatpush.msrb.mxu0 %v14201_v36  ;;  %v14231_v35 = vld [vmem:[#allocation572_spill] sm:$0xff]  ;;  %v14258_v49 = vld [vmem:[#allocation677_spill] sm:$0xff] }
 0x860   :  { %5048 = vmatpush.msrb.mxu3 %v14202_v39  ;;  %5067 = vmatpush.msrb.mxu2 %v14203_v40  ;;  %v4675_v41 = vadd.f32 %v4674_v53, %v4655_v33  ;;  %v14230_v33 = vld [vmem:[#allocation453_spill] sm:$0xff]  ;;  %v14232_v53 = vld [vmem:[#allocation726_spill] sm:$0xff]  ;;  %v14237_v40 = vld [vmem:[#allocation439_spill] sm:$0xff] }
 0x861   :  { %5081 = vmatpush.msra.mxu1 %v14204_v42  ;;  %5100 = vmatpush.msrb.mxu0 %v14205_v44  ;;  %v14236_v39 = vld [vmem:[#allocation838_spill] sm:$0xff]  ;;  %v14239_v42 = vld [vmem:[#allocation712_spill] sm:$0xff]  ;;  %v14240_v44 = vld [vmem:[#allocation831_spill] sm:$0xff] }
 0x862   :  { %5049 = vmatpush.msrb.mxu3 %v14206_v22  ;;  %5068 = vmatpush.msrb.mxu2 %v14207_v30  ;;  %v4694_v46 = vpop.f32.mrf.mxu1  ;;  %v14242_v22 = vld [vmem:[#allocation705_spill] sm:$0xff]  ;;  %v14243_v30 = vld [vmem:[#allocation824_spill] sm:$0xff] }
 0x863   :  { %5082 = vmatpush.msra.mxu1 %v14208_v48  ;;  %v4695_v58 = vadd.f32 %v4694_v46, %v4675_v41  ;;  %5101 = vmatpush.msrb.mxu0 %v14209_v50  ;;  %v14238_v41 = vld [vmem:[#allocation565_spill] sm:$0xff]  ;;  %v14245_v46 = vld [vmem:[#allocation558_spill] sm:$0xff]  ;;  %v14272_v5 = vld [vmem:[#allocation768_spill] sm:$0xff] }
 0x864   :  { %5050 = vmatpush.msrb.mxu3 %v14210_v55  ;;  %5069 = vmatpush.msrb.mxu2 %v14211_v56  ;;  %v4714_v59 = vpop.f32.mrf.mxu3  ;;  %v14246_v48 = vld [vmem:[#allocation698_spill] sm:$0xff]  ;;  %v14253_v56 = vld [vmem:[#allocation544_spill] sm:$0xff] }
 0x865   :  { %5083 = vmatpush.msra.mxu1 %v14212_v61  ;;  %v4715_v31 = vadd.f32 %v4714_v59, %v4695_v58  ;;  %5102 = vmatpush.msrb.mxu0 %v14213_v0  ;;  %v14247_v58 = vld [vmem:[#allocation817_spill] sm:$0xff]  ;;  %v14248_v50 = vld [vmem:[#allocation418_spill] sm:$0xff]  ;;  %v14254_v59 = vld [vmem:[#allocation684_spill] sm:$0xff] }
 0x866   :  { %5051 = vmatpush.msrb.mxu3 %v14214_v63  ;;  %5070 = vmatpush.msrb.mxu2 %v14215_v10  ;;  %v14251_v55 = vld [vmem:[#allocation810_spill] sm:$0xff]  ;;  %v14255_v61 = vld [vmem:[#allocation803_spill] sm:$0xff]  ;;  %v14257_v0 = vld [vmem:[#allocation537_spill] sm:$0xff] }
 0x867   :  { %5084 = vmatpush.msra.mxu1 %v14216_v47  ;;  %v4734_v25 = vpop.f32.mrf.mxu0  ;;  %5103 = vmatpush.msrb.mxu0 %v14217_v62  ;;  %v14259_v63 = vld [vmem:[#allocation796_spill] sm:$0xff]  ;;  %v14260_v10 = vld [vmem:[#allocation929_spill] sm:$0xff]  ;;  %v14261_v47 = vld [vmem:[#allocation530_spill] sm:$0xff] }
 0x868   :  { %5052 = vmatpush.msrb.mxu3 %v14218_v8  ;;  %5071 = vmatpush.msrb.mxu2 %v14219_v17  ;;  %v4735_v16 = vadd.f32 %v4734_v25, %v4715_v31  ;;  %v14256_v31 = vld [vmem:[#allocation936_spill] sm:$0xff]  ;;  %v14262_v25 = vld [vmem:[#allocation670_spill] sm:$0xff]  ;;  %v14263_v62 = vld [vmem:[#allocation789_spill] sm:$0xff] }
 0x869   :  { %5085 = vmatpush.msra.mxu1 %v14221_v9  ;;  %v4754_v4 = vpop.f32.mrf.mxu2  ;;  %5104 = vmatpush.msrb.mxu0 %v14223_v12  ;;  %v14266_v8 = vld [vmem:[#allocation782_spill] sm:$0xff]  ;;  %v14267_v17 = vld [vmem:[#allocation915_spill] sm:$0xff]  ;;  %v14270_v9 = vld [vmem:[#allocation908_spill] sm:$0xff] }
 0x86a   :  { %5117 = vmatpush.msra.mxu3 %v14220_v21  ;;  %5072 = vmatpush.msrb.mxu2 %v14222_v43  ;;  %v4755_v11 = vadd.f32 %v4754_v4, %v4735_v16  ;;  %v14268_v16 = vld [vmem:[#allocation656_spill] sm:$0xff]  ;;  %v14269_v21 = vld [vmem:[#allocation775_spill] sm:$0xff]  ;;  %v14271_v4 = vld [vmem:[#allocation649_spill] sm:$0xff] }
 0x86b   :  { %5086 = vmatpush.msra.mxu1 %v14226_v20  ;;  %5105 = vmatpush.msrb.mxu0 %v14227_v2  ;;  %v14273_v43 = vld [vmem:[#allocation901_spill] sm:$0xff]  ;;  %v14276_v12 = vld [vmem:[#allocation894_spill] sm:$0xff]  ;;  %v14279_v7 = vld [vmem:[#allocation880_spill] sm:$0xff] }
 0x86c   :  { %5118 = vmatpush.msra.mxu3 %v14224_v13  ;;  %5137 = vmatpush.msra.mxu2 %v14225_v29  ;;  %v5186_v23 = vrot.slane %v4755_v11, 2  ;;  %v14274_v11 = vld [vmem:[#allocation642_spill] sm:$0xff]  ;;  %v14278_v29 = vld [vmem:[#allocation887_spill] sm:$0xff] }
 0x86d   :  { %5087 = vmatpush.msra.mxu1 %v14230_v33  ;;  %5106 = vmatpush.msrb.mxu0 %v14231_v35  ;;  %v14277_v13 = vld [vmem:[#allocation754_spill] sm:$0xff]  ;;  %v4188_v33 = vperm.slane %v12237_v3, 5 }
 0x86e   :  { %5119 = vmatpush.msra.mxu3 %v14228_v27  ;;  %5138 = vmatpush.msra.mxu2 %v14229_v28  ;;  %v5191_v1 = vsel %vm5190_vm8, %v5185_v32, %v5186_v23  ;;  %v14280_v32 = vld [vmem:[#allocation873_spill] sm:$0xff]  ;;  %v14281_v20 = vld [vmem:[#allocation866_spill] sm:$0xff] }
 0x86f   :  { %v5192_v36 = vsel %vm2505_vm4, %v5189_v60, %v5191_v1  ;;  %5088 = vmatpush.msra.mxu1 %v14234_v37  ;;  %5053 = vmatmul.f32.vlgmr.msrb.gmra.mxu3 %v11415_v26  ;;  %v14244_v26 = vld [vmem:[#allocation425_spill] sm:$0xff] }
 0x870   :  { %5120 = vmatpush.msra.mxu3 %v14232_v53  ;;  %5139 = vmatpush.msra.mxu2 %v14233_v19  ;;  %5197 = vst [vmem:[%s12416_s13] sm:$0xff] %v5192_v36  ;;  %v4187_v19 = vperm.slane %v12237_v3, 4 }
 0x871   :  { %5089 = vmatpush.msra.mxu1 %v14237_v40  ;;  %5107 = vmatpush.msrb.mxu0 %v14238_v41  ;;  %v4189_v40 = vperm.slane %v12237_v3, 6 }
 0x872   :  { %5121 = vmatpush.msra.mxu3 %v14235_v38  ;;  %5140 = vmatpush.msra.mxu2 %v14236_v39 }
 0x873   :  { %5090 = vmatpush.msra.mxu1 %v14241_v45  ;;  %5073 = vmatmul.f32.vlgmr.msrb.gmra.mxu2 %v11427_v34  ;;  %v14252_v34 = vld [vmem:[#allocation943_spill] sm:$0xff] }
 0x874   :  { %5122 = vmatpush.msra.mxu3 %v14239_v42  ;;  %5141 = vmatpush.msra.mxu2 %v14240_v44 }
 0x875   :  { %5091 = vmatpush.msra.mxu1 %v14244_v26  ;;  %5108 = vmatpush.msrb.mxu0 %v14245_v46 }
 0x876   :  { %5123 = vmatpush.msra.mxu3 %v14242_v22  ;;  %5142 = vmatpush.msra.mxu2 %v14243_v30 }
 0x877   :  { %5092 = vmatpush.msra.mxu1 %v14248_v50  ;;  %5109 = vmatpush.msrb.mxu0 %v14249_v51 }
 0x878   :  { %5124 = vmatpush.msra.mxu3 %v14246_v48  ;;  %5143 = vmatpush.msra.mxu2 %v14247_v58 }
 0x879   :  { %5161 = vmatpush.msrb.mxu1 %v14252_v34  ;;  %5110 = vmatpush.msrb.mxu0 %v14253_v56 }
 0x87a   :  { %5125 = vmatpush.msra.mxu3 %v14250_v54  ;;  %5144 = vmatpush.msra.mxu2 %v14251_v55 }
 0x87b   :  { %5162 = vmatpush.msrb.mxu1 %v14256_v31  ;;  %5111 = vmatpush.msrb.mxu0 %v14257_v0 }
 0x87c   :  { %5126 = vmatpush.msra.mxu3 %v14254_v59  ;;  %5145 = vmatpush.msra.mxu2 %v14255_v61 }
 0x87d   :  { %5163 = vmatpush.msrb.mxu1 %v14260_v10  ;;  %5112 = vmatpush.msrb.mxu0 %v14261_v47 }
 0x87e   :  { %5127 = vmatpush.msra.mxu3 %v14258_v49  ;;  %5146 = vmatpush.msra.mxu2 %v14259_v63 }
 0x87f   :  { %5164 = vmatpush.msrb.mxu1 %v14264_v14  ;;  %5113 = vmatmul.f32.vlgmr.msrb.gmra.mxu0 %v11465_v57  ;;  %v14275_v57 = vld [vmem:[#allocation761_spill] sm:$0xff] }
 0x880   :  { %5128 = vmatpush.msra.mxu3 %v14262_v25  ;;  %5147 = vmatpush.msra.mxu2 %v14263_v62 }
 0x881   :  { %5165 = vmatpush.msrb.mxu1 %v14267_v17 }
 0x882   :  { %5129 = vmatpush.msra.mxu3 %v14265_v15  ;;  %5148 = vmatpush.msra.mxu2 %v14266_v8 }
 0x883   :  { %5166 = vmatpush.msrb.mxu1 %v14270_v9 }
 0x884   :  { %5130 = vmatpush.msra.mxu3 %v14268_v16  ;;  %5149 = vmatpush.msra.mxu2 %v14269_v21 }
 0x885   :  { %5167 = vmatpush.msrb.mxu1 %v14273_v43 }
 0x886   :  { %5131 = vmatpush.msra.mxu3 %v14271_v4  ;;  %5150 = vmatpush.msra.mxu2 %v14272_v5 }
 0x887   :  { %5168 = vmatpush.msrb.mxu1 %v14276_v12 }
 0x888   :  { %5132 = vmatpush.msra.mxu3 %v14274_v11  ;;  %5151 = vmatpush.msra.mxu2 %v14275_v57 }
 0x889   :  { %5133 = vmatmul.f32.vlgmr.msra.gmra.mxu3 %v11512_v6  ;;  %5093 = vmatmul.f32.vlgmr.msra.gmra.mxu1 %v11456_v52 }
 0x88a   :  { %5152 = vmatpush.msra.mxu2 %v14277_v13  ;;  %5169 = vmatpush.msrb.mxu1 %v14278_v29 }
 0x88b   :  { %5153 = vmatmul.f32.vlgmr.msra.gmra.mxu2 %v11518_v18 }
 0x88c   :  { %5170 = vmatpush.msrb.mxu1 %v14279_v7 }
 0x88e   :  { %5171 = vmatpush.msrb.mxu1 %v14280_v32  ;;  %v4774_v52 = vpop.f32.mrf.mxu1 }
 0x88f   :  { %v4775_v38 = vadd.f32 %v4774_v52, %v4187_v19 }
 0x890   :  { %5172 = vmatpush.msrb.mxu1 %v14281_v20 }
 0x891   :  { %5265 = vmatmul.msk.f32.vlgmr.msrb.gmra.mxu1 %vm3275_vm6, %v11522_v24 }
 0x894   :  { %v4794_v6 = vpop.f32.mrf.mxu3 }
 0x895   :  { %v4795_v45 = vadd.f32 %v4794_v6, %v4775_v38 }
 0x898   :  { %v4814_v18 = vpop.f32.mrf.mxu0 }
 0x899   :  { %v4834_v23 = vpop.f32.mrf.mxu2  ;;  %v4815_v46 = vadd.f32 %v4814_v18, %v4795_v45 }
 0x89b   :  { %v4835_v54 = vadd.f32 %v4834_v23, %v4815_v46 }
 0x89d   :  { %v4854_v2 = vpop.f32.mrf.mxu1 }
 0x89e   :  { %v4855_v59 = vadd.f32 %v4854_v2, %v4835_v54 }
 0x8a8   :  { %v4874_v27 = vpop.f32.mrf.mxu3 }
 0x8a9   :  { %v4875_v0 = vadd.f32 %v4874_v27, %v4855_v59 }
 0x8ab   :  { %v4894_v28 = vpop.f32.mrf.mxu0 }
 0x8ac   :  { %v4895_v62 = vadd.f32 %v4894_v28, %v4875_v0 }
 0x8c6   :  { %v4914_v60 = vpop.f32.mrf.mxu2 }
 0x8c7   :  { %v4915_v24 = vadd.f32 %v4914_v60, %v4188_v33 }
 0x8ca   :  { %v4934_v1 = vpop.f32.mrf.mxu1 }
 0x8cb   :  { %v4935_v36 = vadd.f32 %v4934_v1, %v4915_v24 }
 0x8cd   :  { %v4954_v35 = vpop.f32.mrf.mxu0 }
 0x8ce   :  { %v4974_v53 = vpop.f32.mrf.mxu3  ;;  %v4955_v39 = vadd.f32 %v4954_v35, %v4935_v36 }
 0x8d0   :  { %v4975_v22 = vadd.f32 %v4974_v53, %v4955_v39 }
 0x8d1   :  { %v4994_v37 = vpop.f32.mrf.mxu2 }
 0x8d2   :  { %v4995_v48 = vadd.f32 %v4994_v37, %v4975_v22 }
 0x8d4   :  { %v5014_v42 = vpop.f32.mrf.mxu1 }
 0x8d5   :  { %v5015_v55 = vadd.f32 %v5014_v42, %v4995_v48 }
 0x8d6   :  { %v5034_v44 = vpop.f32.mrf.mxu0 }
 0x8d7   :  { %v5035_v61 = vadd.f32 %v5034_v44, %v5015_v55 }
 0x8d9   :  { %v5187_v47 = vrot.slane %v5035_v61, 6 }
 0x8db   :  { %v5193_v15 = vsel %vm2286_vm1, %v4895_v62, %v5187_v47 }
 0x8f2   :  { %v5054_v41 = vpop.f32.mrf.mxu3 }
 0x8f3   :  { %v5055_v30 = vadd.f32 %v5054_v41, %v4189_v40 }
 0x8f6   :  { %v5074_v26 = vpop.f32.mrf.mxu2 }
 0x8f7   :  { %v5075_v58 = vadd.f32 %v5074_v26, %v5055_v30 }
 0x8fc   :  { %v5114_v51 = vpop.f32.mrf.mxu0 }
 0x906   :  { %v5094_v50 = vpop.f32.mrf.mxu1 }
 0x907   :  { %v5095_v34 = vadd.f32 %v5094_v50, %v5075_v58 }
 0x909   :  { %v5115_v56 = vadd.f32 %v5114_v51, %v5095_v34 }
 0x90c   :  { %v5134_v31 = vpop.f32.mrf.mxu3 }
 0x90d   :  { %v5135_v3 = vadd.f32 %v5134_v31, %v5115_v56 }
 0x90e   :  { %v5154_v49 = vpop.f32.mrf.mxu2  ;;  %v5174_v10 = vpop.f32.mrf.mxu1 }
 0x90f   :  { %v5155_v63 = vadd.f32 %v5154_v49, %v5135_v3 }
 0x911   :  { %v5175_v25 = vadd.f32 %v5174_v10, %v5155_v63 }
 0x913   :  { %v5188_v14 = vrot.slane %v5175_v25, 4 }
 0x915   :  { %v5194_v8 = vsel %vm2505_vm4, %v5193_v15, %v5188_v14 }
 0x916   :  { %5202 = vst.msk [vmem:[%s12416_s13 + $0x8] sm:$0x3f] %vm5201_vm12, %v5194_v8 }
 0x917   :  { %5298 = dma.done.wait [#allocation6], 32  }
 0x918   :  { %5299 = vsyncadd [#allocation6], 4294967264 }
 0x919   :  { %5222 = vsyncpa [#allocation6], 1 }
 0x91a   :  { %5223 = vsyncmov [#allocation4] }
 0x91d   :  { %s5224_s27 = vpop.sfrf %5223 }
 0x91e   :  { %p5266_p0 = scmp.ne.s32.totalorder %s5224_s27, 0 }
 0x920   :  { %5228 = shalt.err (%p5266_p0)  }
 0x921   :  { %5230 = vsyncmov [#allocation4 + $0x1] }
 0x924   :  { %s5231_s2 = vpop.sfrf %5230 }
 0x925   :  { %p5267_p1 = scmp.ne.s32.totalorder %s5231_s2, 0 }
 0x927   :  { %5235 = shalt.err (%p5267_p1)  }

</bundles_post_ra>
